<compile_context>
chip_gen: v5e
topology: v5e:2x2
jax: 0.10.0
libtpu: 0.0.40
codegen_flags: <defaults>
</compile_context>

<pallas_src>
import functools

import jax
import jax.numpy as jnp
from jax.experimental import pallas as pl
from jax.experimental.pallas import tpu as pltpu


_VMEM_LIMIT = 48 * 1024 * 1024   # > 16/32 MiB defaults, < v7x's 64 MiB physical VMEM


# --------------------------------------------------------------------------- #
# Helpers
# --------------------------------------------------------------------------- #
def _round_up(x, m):
    return (x + m - 1) // m * m


def _pick_row_tile(total, target, mult):
    """Largest divisor of `total` that is a multiple of `mult` and <= target (else total)."""
    best = total
    for cand in range(mult, min(target, total) + 1, mult):
        if total % cand == 0:
            best = cand
    return best


def _pick_band(h, w, target_rows=512):
    """Rows-per-band `tr` (divides h, tr*w multiple of 8 or full) and #parallel groups."""
    cands = [tr for tr in range(1, h + 1)
             if h % tr == 0 and ((tr * w) % 8 == 0 or tr == h)]
    fit = [tr for tr in cands if tr * w <= target_rows]
    tr = max(fit) if fit else min(cands)
    n_bands = h // tr
    n_groups = 2 if (n_bands % 2 == 0 and n_bands >= 2) else 1
    return tr, n_groups


# --------------------------------------------------------------------------- #
# Pallas kernels
# --------------------------------------------------------------------------- #
def fused_bottleneck_kernel(x_ref, w1_ref, w2_ref, w3_ref,
                            s1_ref, b1_ref, s2_ref, b2_ref, s3_ref, b3_ref,
                            h3_ref, psum_ref, *, tr, H, W, bands_per_group):
    """conv1+bn1+relu -> conv2(3x3)+bn2+relu -> conv3+bn3 (+SE channel-sum) on one row band.

    x_ref : (1, H+2, W+2, Cin)  bf16  (whole spatially-padded image; constant block index)
    w1    : (Cin, Cw) bf16   w2: (9*Cw, Cw) bf16 (tap-major kh,kw)   w3: (Cw, Cout) bf16
    h3_ref: (1, tr*W, Cout) bf16     psum_ref: (1, 1, 1, Cout) f32 (accum over bands in group)
    """
    s = pl.program_id(1)
    j = pl.program_id(2)
    band = s * bands_per_group + j
    row0 = pl.multiple_of(band * tr, tr)        # top of this band in padded-image rows

    cin_p = w1_ref.shape[0]
    width_p = w1_ref.shape[1]

    # --- conv1 (1x1) + bn1 + relu on the (tr+2, W+2) halo'd band (h1 stays in VMEM) ---
    xb = x_ref[0, pl.ds(row0, tr + 2), :, :]                       # (tr+2, W+2, Cin) bf16
    h1 = jnp.dot(xb.reshape((tr + 2) * (W + 2), cin_p), w1_ref[...],
                 preferred_element_type=jnp.float32)
    h1 = jnp.maximum(h1 * s1_ref[...] + b1_ref[...], 0.0)
    h1 = h1.reshape(tr + 2, W + 2, width_p)

    # conv2's spatial zero padding must see exact zeros, not relu(bn1(0)): mask the halo.
    row = jax.lax.broadcasted_iota(jnp.int32, h1.shape, 0) + row0
    col = jax.lax.broadcasted_iota(jnp.int32, h1.shape, 1)
    interior = (row >= 1) & (row <= H) & (col >= 1) & (col <= W)
    h1 = jnp.where(interior, h1, 0.0).astype(jnp.bfloat16)

    # --- conv2 (3x3, s=1, p=1) + bn2 + relu: band-local im2col, ONE K = 9*Cw matmul ---
    taps = [h1[kh:kh + tr, kw:kw + W, :].reshape(tr * W, width_p)
            for kh in range(3) for kw in range(3)]
    patch = jnp.concatenate(taps, axis=-1)                         # (tr*W, 9*Cw) bf16
    h2 = jnp.dot(patch, w2_ref[...], preferred_element_type=jnp.float32)
    h2 = jnp.maximum(h2 * s2_ref[...] + b2_ref[...], 0.0).astype(jnp.bfloat16)

    # --- conv3 (1x1) + bn3 (no relu); SE channel-sum fused in the epilogue ------------
    h3 = jnp.dot(h2, w3_ref[...], preferred_element_type=jnp.float32)
    h3 = h3 * s3_ref[...] + b3_ref[...]                            # (tr*W, Cout) f32
    h3_ref[0] = h3.astype(jnp.bfloat16)

    @pl.when(j == 0)
    def _():
        psum_ref[...] = jnp.zeros_like(psum_ref)

    psum_ref[...] += jnp.sum(h3, axis=0, keepdims=True)[None, None]


def se_mlp_kernel(psum_ref, w1_ref, w2_ref, g_ref, *, inv_hw):
    """SE: sum partial psums -> mean -> fc1 + ReLU -> fc2 + sigmoid."""
    pooled = jnp.sum(psum_ref[...][:, :, 0, :], axis=1) * inv_hw   # (N, C) f32
    z = jnp.dot(pooled.astype(jnp.bfloat16), w1_ref[...],
                preferred_element_type=jnp.float32)
    z = jnp.maximum(z, 0.0)
    g = jnp.dot(z.astype(jnp.bfloat16), w2_ref[...],
                preferred_element_type=jnp.float32)
    g_ref[...] = jax.nn.sigmoid(g)[:, None, :]                     # (N, 1, C)


def se_excite_residual_kernel(y_ref, g_ref, id_ref, o_ref):
    """out = relu(h3 * gate + identity) on a (1, thw, C) tile; h3 is bf16, math in f32."""
    y = y_ref[...].astype(jnp.float32)
    o_ref[...] = jnp.maximum(y * g_ref[...] + id_ref[...], 0.0)


# --------------------------------------------------------------------------- #
# pallas_call wrappers
# --------------------------------------------------------------------------- #
def fused_bottleneck(x_halo, p, *, tr, n_groups, h, w):
    n = x_halo.shape[0]
    d = p["dims"]
    cin_p, width_p, cout_p = d["cin_p"], d["width_p"], d["cout_p"]
    hw = h * w
    n_bands = h // tr
    bpg = n_bands // n_groups

    return pl.pallas_call(
        functools.partial(fused_bottleneck_kernel, tr=tr, H=h, W=w,
                          bands_per_group=bpg),
        out_shape=(jax.ShapeDtypeStruct((n, hw, cout_p), jnp.bfloat16),
                   jax.ShapeDtypeStruct((n, n_groups, 1, cout_p), jnp.float32)),
        grid=(n, n_groups, bpg),
        in_specs=[
            # whole padded image per batch (constant block index -> DMA'd once per image)
            pl.BlockSpec((1, h + 2, w + 2, cin_p), lambda b, s, j: (b, 0, 0, 0)),
            pl.BlockSpec((cin_p, width_p), lambda b, s, j: (0, 0)),
            pl.BlockSpec((9 * width_p, width_p), lambda b, s, j: (0, 0)),
            pl.BlockSpec((width_p, cout_p), lambda b, s, j: (0, 0)),
            pl.BlockSpec((1, width_p), lambda b, s, j: (0, 0)),
            pl.BlockSpec((1, width_p), lambda b, s, j: (0, 0)),
            pl.BlockSpec((1, width_p), lambda b, s, j: (0, 0)),
            pl.BlockSpec((1, width_p), lambda b, s, j: (0, 0)),
            pl.BlockSpec((1, cout_p), lambda b, s, j: (0, 0)),
            pl.BlockSpec((1, cout_p), lambda b, s, j: (0, 0)),
        ],
        out_specs=(
            pl.BlockSpec((1, tr * w, cout_p), lambda b, s, j: (b, s * bpg + j, 0)),
            pl.BlockSpec((1, 1, 1, cout_p), lambda b, s, j: (b, s, 0, 0)),
        ),
        compiler_params=pltpu.CompilerParams(
            dimension_semantics=("parallel", "parallel", "arbitrary"),
            vmem_limit_bytes=_VMEM_LIMIT),
    )(x_halo, p["w1"], p["w2"], p["w3"],
      p["s1"], p["b1"], p["s2"], p["b2"], p["s3"], p["b3"])


def se_mlp(psum, w1, w2, *, inv_hw):
    n = psum.shape[0]
    cout = psum.shape[-1]
    return pl.pallas_call(
        functools.partial(se_mlp_kernel, inv_hw=float(inv_hw)),
        out_shape=jax.ShapeDtypeStruct((n, 1, cout), jnp.float32),
        in_specs=[pl.BlockSpec(memory_space=pltpu.MemorySpace.VMEM)] * 3,
        out_specs=pl.BlockSpec(memory_space=pltpu.MemorySpace.VMEM),
        compiler_params=pltpu.CompilerParams(vmem_limit_bytes=_VMEM_LIMIT),
    )(psum, w1, w2)


def se_excite_residual(y, gate, identity, thw):
    n, hw, c = y.shape
    return pl.pallas_call(
        se_excite_residual_kernel,
        out_shape=jax.ShapeDtypeStruct((n, hw, c), jnp.float32),
        grid=(n, hw // thw),
        in_specs=[
            pl.BlockSpec((1, thw, c), lambda i, j: (i, j, 0)),
            pl.BlockSpec((1, 1, c), lambda i, j: (i, 0, 0)),
            pl.BlockSpec((1, thw, c), lambda i, j: (i, j, 0)),
        ],
        out_specs=pl.BlockSpec((1, thw, c), lambda i, j: (i, j, 0)),
        compiler_params=pltpu.CompilerParams(
            dimension_semantics=("parallel", "parallel"),
            vmem_limit_bytes=_VMEM_LIMIT),
    )(y, gate, identity)


# --------------------------------------------------------------------------- #
# Forward pass (eval mode, bayesian=False => every F.dropout is an identity)
# --------------------------------------------------------------------------- #
def bottleneck_dropout_forward(x_nchw, p):
    d = p["dims"]
    n, cin, h, w = x_nchw.shape
    hw = h * w
    cin_p, cout_p = d["cin_p"], d["cout_p"]
    assert cin == d["cout"] and cin_p == cout_p, "downsample=None needs inplanes == planes*4"

    # NCHW -> NHWC, channel zero-pad to a lane-dense width (padded channels stay exactly 0).
    x_nhwc = jnp.transpose(x_nchw, (0, 2, 3, 1)).astype(jnp.float32)
    x_pad = jnp.pad(x_nhwc, ((0, 0), (0, 0), (0, 0), (0, cin_p - cin)))
    identity = x_pad.reshape(n, hw, cin_p)                          # f32 residual input
    # bf16 spatially-halo'd conv input (cast happens here; no separate f32->bf16 x copy,
    # and no h1 halo pad round trip since conv1..conv3 are fused in one kernel).
    x_halo = jnp.pad(x_pad, ((0, 0), (1, 1), (1, 1), (0, 0))).astype(jnp.bfloat16)

    # Fused main path: h1 / h2 never hit HBM; h3 (bf16) + per-group SE partial sums out.
    tr, n_groups = _pick_band(h, w)
    h3, psum = fused_bottleneck(x_halo, p, tr=tr, n_groups=n_groups, h=h, w=w)

    # SE MLP: sum partial psums -> mean -> fc1+relu -> fc2+sigmoid
    gate = se_mlp(psum, p["w_fc1"], p["w_fc2"], inv_hw=1.0 / hw)    # (n, 1, cout_p) f32

    # excite + residual add (downsample=None) + relu   [dropout: identity]
    thw = _pick_row_tile(hw, 512, 8)
    out = se_excite_residual(h3, gate, identity, thw)               # (n, hw, cout_p) f32

    # NCHW interface of the original module (NHWC would avoid this extra HBM pass).
    out = out.reshape(n, h, w, cout_p)[..., :d["cout"]]
    return jnp.transpose(out, (0, 3, 1, 2))


# --------------------------------------------------------------------------- #
# Pure-JAX reference (NCHW lax convs, same bf16 matmul-input policy) for verification
# --------------------------------------------------------------------------- #
def reference_forward(x, raw):
    def conv(xa, wa, pad):
        return jax.lax.conv_general_dilated(
            xa.astype(jnp.bfloat16), wa.astype(jnp.bfloat16),
            window_strides=(1, 1), padding=pad,
            dimension_numbers=("NCHW", "OIHW", "NCHW"),
            preferred_element_type=jnp.float32)

    def bn(xa, gamma, beta, mean, var, eps=1e-5):
        s = gamma / jnp.sqrt(var + eps)
        return xa * s[None, :, None, None] + (beta - mean * s)[None, :, None, None]

    out = jax.nn.relu(bn(conv(x, raw["conv1_w"], ((0, 0), (0, 0))), *raw["bn1"]))
    out = jax.nn.relu(bn(conv(out, raw["conv2_w"], ((1, 1), (1, 1))), *raw["bn2"]))
    out = bn(conv(out, raw["conv3_w"], ((0, 0), (0, 0))), *raw["bn3"])
    pooled = jnp.mean(out, axis=(2, 3))
    z = jax.nn.relu(jnp.dot(pooled.astype(jnp.bfloat16),
                            raw["fc1_w"].T.astype(jnp.bfloat16),
                            preferred_element_type=jnp.float32))
    gate = jax.nn.sigmoid(jnp.dot(z.astype(jnp.bfloat16),
                                  raw["fc2_w"].T.astype(jnp.bfloat16),
                                  preferred_element_type=jnp.float32))
    out = out * gate[:, :, None, None] + x
    return jax.nn.relu(out)


# --------------------------------------------------------------------------- #
# Deterministic parameter construction (raw PyTorch-style + kernel-friendly padded)
# --------------------------------------------------------------------------- #
def make_params(key, inplanes, planes, expansion=4, base_width=64, groups=1,
                se_reduction=16):
    width = int(planes * (base_width / 64.0)) * groups
    cout = planes * expansion
    hid = max(cout // se_reduction, 1)
    keys = jax.random.split(key, 8)

    def bn(k, c):
        k1, k2, k3, k4 = jax.random.split(k, 4)
        gamma = 1.0 + 0.1 * jax.random.normal(k1, (c,), jnp.float32)
        beta = 0.1 * jax.random.normal(k2, (c,), jnp.float32)
        mean = 0.1 * jax.random.normal(k3, (c,), jnp.float32)
        var = 0.5 + jnp.abs(jax.random.normal(k4, (c,), jnp.float32))
        return (gamma, beta, mean, var)

    raw = {
        "conv1_w": 0.1 * jax.random.normal(keys[0], (width, inplanes, 1, 1), jnp.float32),
        "conv2_w": 0.1 * jax.random.normal(keys[1], (width, width, 3, 3), jnp.float32),
        "conv3_w": 0.1 * jax.random.normal(keys[2], (cout, width, 1, 1), jnp.float32),
        "fc1_w": 0.1 * jax.random.normal(keys[3], (hid, cout), jnp.float32),
        "fc2_w": 0.1 * jax.random.normal(keys[4], (cout, hid), jnp.float32),
        "bn1": bn(keys[5], width),
        "bn2": bn(keys[6], width),
        "bn3": bn(keys[7], cout),
    }

    cin_p = _round_up(inplanes, 128)
    width_p = _round_up(width, 128)
    cout_p = _round_up(cout, 128)
    hid_p = _round_up(hid, 128)

    def pad2(a, r, c):
        return jnp.pad(a, ((0, r - a.shape[0]), (0, c - a.shape[1])))

    # Input-major, zero-padded, bf16 weights (padded channels contribute exact zeros).
    w1 = pad2(raw["conv1_w"][:, :, 0, 0].T, cin_p, width_p).astype(jnp.bfloat16)
    w2_t = jnp.transpose(raw["conv2_w"], (2, 3, 1, 0)).reshape(9, width, width)  # (kh*kw, ci, co)
    w2 = jnp.zeros((9, width_p, width_p), jnp.float32).at[:, :width, :width].set(w2_t)
    w2 = w2.reshape(9 * width_p, width_p).astype(jnp.bfloat16)       # flattened im2col weight
    w3 = pad2(raw["conv3_w"][:, :, 0, 0].T, width_p, cout_p).astype(jnp.bfloat16)
    w_fc1 = pad2(raw["fc1_w"].T, cout_p, hid_p).astype(jnp.bfloat16)
    w_fc2 = pad2(raw["fc2_w"].T, hid_p, cout_p).astype(jnp.bfloat16)

    def fold(bn_params, cp, eps=1e-5):
        gamma, beta, mean, var = bn_params
        scale = gamma / jnp.sqrt(var + eps)
        bias = beta - mean * scale
        s = jnp.zeros((1, cp), jnp.float32).at[0, :scale.shape[0]].set(scale)
        b = jnp.zeros((1, cp), jnp.float32).at[0, :bias.shape[0]].set(bias)
        return s, b

    s1, b1 = fold(raw["bn1"], width_p)
    s2, b2 = fold(raw["bn2"], width_p)
    s3, b3 = fold(raw["bn3"], cout_p)

    params = {
        "w1": w1, "w2": w2, "w3": w3, "w_fc1": w_fc1, "w_fc2": w_fc2,
        "s1": s1, "b1": b1, "s2": s2, "b2": b2, "s3": s3, "b3": b3,
        "dims": {"cin": inplanes, "width": width, "cout": cout, "hid": hid,
                 "cin_p": cin_p, "width_p": width_p, "cout_p": cout_p, "hid_p": hid_p},
    }
    return params, raw


# --------------------------------------------------------------------------- #
if __name__ == "__main__":
    key = jax.random.PRNGKey(0)
    k_x, k_p = jax.random.split(key)

    # Small but big enough spatially to exercise multi-band tiling, band groups and the
    # per-group SE partial-sum accumulation (tr=8 -> 8 bands, 2 parallel groups of 4).
    N, inplanes, H, W = 2, 32, 64, 64          # inplanes == planes * expansion
    planes = 8
    x = jax.random.normal(k_x, (N, inplanes, H, W), jnp.float32)

    params, raw = make_params(k_p, inplanes, planes)

    out = jax.block_until_ready(bottleneck_dropout_forward(x, params))
    ref = jax.block_until_ready(reference_forward(x, raw))

    assert out.shape == ref.shape == (N, planes * 4, H, W)
    # bf16 MXU inputs on both paths (+ bf16 h3 storage); 1e-2 tolerance covers the
    # occasional bf16 rounding flip.
    assert jnp.allclose(out, ref, rtol=1e-2, atol=1e-2), (
        float(jnp.max(jnp.abs(out - ref))))

    print("KERNEL_OK")
</pallas_src>

<mosaic_0001>
module attributes {stable_mosaic.version = 11 : i64} {
  func.func @fused_bottleneck_kernel(%arg0: i32, %arg1: i32, %arg2: i32, %arg3: memref<1x66x66x128xbf16, #tpu.memory_space<vmem>>, %arg4: memref<128x128xbf16, #tpu.memory_space<vmem>>, %arg5: memref<1152x128xbf16, #tpu.memory_space<vmem>>, %arg6: memref<128x128xbf16, #tpu.memory_space<vmem>>, %arg7: memref<1x128xf32, #tpu.memory_space<vmem>>, %arg8: memref<1x128xf32, #tpu.memory_space<vmem>>, %arg9: memref<1x128xf32, #tpu.memory_space<vmem>>, %arg10: memref<1x128xf32, #tpu.memory_space<vmem>>, %arg11: memref<1x128xf32, #tpu.memory_space<vmem>>, %arg12: memref<1x128xf32, #tpu.memory_space<vmem>>, %arg13: memref<1x512x128xbf16, #tpu.memory_space<vmem>>, %arg14: memref<1x1x1x128xf32, #tpu.memory_space<vmem>>) attributes {dimension_semantics = [#tpu.dimension_semantics<parallel>, #tpu.dimension_semantics<parallel>, #tpu.dimension_semantics<arbitrary>], iteration_bounds = array<i64: 2, 2, 4>, scalar_prefetch = 0 : i64, scratch_operands = 0 : i64, tpu.core_type = #tpu.core_type<tc>, window_params = [{transform_indices = @transform_0, window_bounds = array<i64: 1, 66, 66, 128>}, {pipeline_mode = #tpu.pipeline_mode<synchronous>, transform_indices = @transform_1, window_bounds = array<i64: 128, 128>}, {pipeline_mode = #tpu.pipeline_mode<synchronous>, transform_indices = @transform_2, window_bounds = array<i64: 1152, 128>}, {pipeline_mode = #tpu.pipeline_mode<synchronous>, transform_indices = @transform_3, window_bounds = array<i64: 128, 128>}, {pipeline_mode = #tpu.pipeline_mode<synchronous>, transform_indices = @transform_4, window_bounds = array<i64: 1, 128>}, {pipeline_mode = #tpu.pipeline_mode<synchronous>, transform_indices = @transform_5, window_bounds = array<i64: 1, 128>}, {pipeline_mode = #tpu.pipeline_mode<synchronous>, transform_indices = @transform_6, window_bounds = array<i64: 1, 128>}, {pipeline_mode = #tpu.pipeline_mode<synchronous>, transform_indices = @transform_7, window_bounds = array<i64: 1, 128>}, {pipeline_mode = #tpu.pipeline_mode<synchronous>, transform_indices = @transform_8, window_bounds = array<i64: 1, 128>}, {pipeline_mode = #tpu.pipeline_mode<synchronous>, transform_indices = @transform_9, window_bounds = array<i64: 1, 128>}, {transform_indices = @transform_10, window_bounds = array<i64: 1, 512, 128>}, {transform_indices = @transform_11, window_bounds = array<i64: 1, 1, 1, 128>}]} {
    %c4_i32 = arith.constant 4 : i32
    %0 = arith.muli %arg1, %c4_i32 : i32
    %1 = arith.addi %0, %arg2 : i32
    %c8_i32 = arith.constant 8 : i32
    %2 = arith.muli %1, %c8_i32 : i32
    %3 = tpu.assume_multiple %2, 8 : i32
    %c0 = arith.constant 0 : index
    %4 = arith.index_cast %3 : i32 to index
    %c0_0 = arith.constant 0 : index
    %c0_1 = arith.constant 0 : index
    %5 = vector.load %arg3[%c0, %4, %c0_0, %c0_1] : memref<1x66x66x128xbf16, #tpu.memory_space<vmem>>, vector<1x10x66x128xbf16>
    %6 = vector.shape_cast %5 : vector<1x10x66x128xbf16> to vector<10x66x128xbf16>
    %7 = vector.shape_cast %6 : vector<10x66x128xbf16> to vector<660x128xbf16>
    %c0_2 = arith.constant 0 : index
    %c0_3 = arith.constant 0 : index
    %8 = vector.load %arg4[%c0_2, %c0_3] : memref<128x128xbf16, #tpu.memory_space<vmem>>, vector<128x128xbf16>
    %cst = arith.constant dense<0.000000e+00> : vector<660x128xf32>
    %9 = tpu.matmul %7, %8, %cst {dimension_numbers = #tpu.dot_dimension_numbers<[1], [0], [0], [1], [0, 0, 1, 1], [], []>} : vector<660x128xbf16>, vector<128x128xbf16>, vector<660x128xf32> -> vector<660x128xf32>
    %c0_4 = arith.constant 0 : index
    %c0_5 = arith.constant 0 : index
    %10 = vector.load %arg7[%c0_4, %c0_5] : memref<1x128xf32, #tpu.memory_space<vmem>>, vector<1x128xf32>
    %11 = vector.broadcast %10 : vector<1x128xf32> to vector<660x128xf32>
    %12 = arith.mulf %9, %11 : vector<660x128xf32>
    %c0_6 = arith.constant 0 : index
    %c0_7 = arith.constant 0 : index
    %13 = vector.load %arg8[%c0_6, %c0_7] : memref<1x128xf32, #tpu.memory_space<vmem>>, vector<1x128xf32>
    %14 = vector.broadcast %13 : vector<1x128xf32> to vector<660x128xf32>
    %15 = arith.addf %12, %14 : vector<660x128xf32>
    %cst_8 = arith.constant 0.000000e+00 : f32
    %16 = vector.broadcast %cst_8 : f32 to vector<660x128xf32>
    %17 = arith.maximumf %15, %16 : vector<660x128xf32>
    %18 = vector.shape_cast %17 : vector<660x128xf32> to vector<10x66x128xf32>
    %19 = tpu.iota {dimensions = array<i32: 0>} : vector<10x66x128xi32>
    %20 = vector.broadcast %3 : i32 to vector<10x66x128xi32>
    %21 = arith.addi %19, %20 : vector<10x66x128xi32>
    %22 = tpu.iota {dimensions = array<i32: 1>} : vector<10x66x128xi32>
    %c1_i32 = arith.constant 1 : i32
    %23 = vector.broadcast %c1_i32 : i32 to vector<10x66x128xi32>
    %24 = arith.cmpi sge, %21, %23 : vector<10x66x128xi32>
    %c64_i32 = arith.constant 64 : i32
    %25 = vector.broadcast %c64_i32 : i32 to vector<10x66x128xi32>
    %26 = arith.cmpi sle, %21, %25 : vector<10x66x128xi32>
    %27 = arith.andi %24, %26 : vector<10x66x128xi1>
    %c1_i32_9 = arith.constant 1 : i32
    %28 = vector.broadcast %c1_i32_9 : i32 to vector<10x66x128xi32>
    %29 = arith.cmpi sge, %22, %28 : vector<10x66x128xi32>
    %30 = arith.andi %27, %29 : vector<10x66x128xi1>
    %c64_i32_10 = arith.constant 64 : i32
    %31 = vector.broadcast %c64_i32_10 : i32 to vector<10x66x128xi32>
    %32 = arith.cmpi sle, %22, %31 : vector<10x66x128xi32>
    %33 = arith.andi %30, %32 : vector<10x66x128xi1>
    %cst_11 = arith.constant 0.000000e+00 : f32
    %34 = vector.broadcast %cst_11 : f32 to vector<10x66x128xf32>
    %35 = arith.select %33, %18, %34 : vector<10x66x128xi1>, vector<10x66x128xf32>
    %36 = arith.truncf %35 : vector<10x66x128xf32> to vector<10x66x128xbf16>
    %37 = vector.extract_strided_slice %36 {offsets = [0, 0, 0], sizes = [8, 64, 128], strides = [1, 1, 1]} : vector<10x66x128xbf16> to vector<8x64x128xbf16>
    %38 = vector.shape_cast %37 : vector<8x64x128xbf16> to vector<512x128xbf16>
    %39 = vector.extract_strided_slice %36 {offsets = [0, 1, 0], sizes = [8, 64, 128], strides = [1, 1, 1]} : vector<10x66x128xbf16> to vector<8x64x128xbf16>
    %40 = vector.shape_cast %39 : vector<8x64x128xbf16> to vector<512x128xbf16>
    %41 = vector.extract_strided_slice %36 {offsets = [0, 2, 0], sizes = [8, 64, 128], strides = [1, 1, 1]} : vector<10x66x128xbf16> to vector<8x64x128xbf16>
    %42 = vector.shape_cast %41 : vector<8x64x128xbf16> to vector<512x128xbf16>
    %43 = vector.extract_strided_slice %36 {offsets = [1, 0, 0], sizes = [8, 64, 128], strides = [1, 1, 1]} : vector<10x66x128xbf16> to vector<8x64x128xbf16>
    %44 = vector.shape_cast %43 : vector<8x64x128xbf16> to vector<512x128xbf16>
    %45 = vector.extract_strided_slice %36 {offsets = [1, 1, 0], sizes = [8, 64, 128], strides = [1, 1, 1]} : vector<10x66x128xbf16> to vector<8x64x128xbf16>
    %46 = vector.shape_cast %45 : vector<8x64x128xbf16> to vector<512x128xbf16>
    %47 = vector.extract_strided_slice %36 {offsets = [1, 2, 0], sizes = [8, 64, 128], strides = [1, 1, 1]} : vector<10x66x128xbf16> to vector<8x64x128xbf16>
    %48 = vector.shape_cast %47 : vector<8x64x128xbf16> to vector<512x128xbf16>
    %49 = vector.extract_strided_slice %36 {offsets = [2, 0, 0], sizes = [8, 64, 128], strides = [1, 1, 1]} : vector<10x66x128xbf16> to vector<8x64x128xbf16>
    %50 = vector.shape_cast %49 : vector<8x64x128xbf16> to vector<512x128xbf16>
    %51 = vector.extract_strided_slice %36 {offsets = [2, 1, 0], sizes = [8, 64, 128], strides = [1, 1, 1]} : vector<10x66x128xbf16> to vector<8x64x128xbf16>
    %52 = vector.shape_cast %51 : vector<8x64x128xbf16> to vector<512x128xbf16>
    %53 = vector.extract_strided_slice %36 {offsets = [2, 2, 0], sizes = [8, 64, 128], strides = [1, 1, 1]} : vector<10x66x128xbf16> to vector<8x64x128xbf16>
    %54 = vector.shape_cast %53 : vector<8x64x128xbf16> to vector<512x128xbf16>
    %55 = tpu.concatenate %38, %40, %42, %44, %46, %48, %50, %52, %54 in 1 : vector<512x128xbf16>, vector<512x128xbf16>, vector<512x128xbf16>, vector<512x128xbf16>, vector<512x128xbf16>, vector<512x128xbf16>, vector<512x128xbf16>, vector<512x128xbf16>, vector<512x128xbf16> -> vector<512x1152xbf16>
    %c0_12 = arith.constant 0 : index
    %c0_13 = arith.constant 0 : index
    %56 = vector.load %arg5[%c0_12, %c0_13] : memref<1152x128xbf16, #tpu.memory_space<vmem>>, vector<1152x128xbf16>
    %cst_14 = arith.constant dense<0.000000e+00> : vector<512x128xf32>
    %57 = tpu.matmul %55, %56, %cst_14 {dimension_numbers = #tpu.dot_dimension_numbers<[1], [0], [0], [1], [0, 0, 1, 1], [], []>} : vector<512x1152xbf16>, vector<1152x128xbf16>, vector<512x128xf32> -> vector<512x128xf32>
    %c0_15 = arith.constant 0 : index
    %c0_16 = arith.constant 0 : index
    %58 = vector.load %arg9[%c0_15, %c0_16] : memref<1x128xf32, #tpu.memory_space<vmem>>, vector<1x128xf32>
    %59 = vector.broadcast %58 : vector<1x128xf32> to vector<512x128xf32>
    %60 = arith.mulf %57, %59 : vector<512x128xf32>
    %c0_17 = arith.constant 0 : index
    %c0_18 = arith.constant 0 : index
    %61 = vector.load %arg10[%c0_17, %c0_18] : memref<1x128xf32, #tpu.memory_space<vmem>>, vector<1x128xf32>
    %62 = vector.broadcast %61 : vector<1x128xf32> to vector<512x128xf32>
    %63 = arith.addf %60, %62 : vector<512x128xf32>
    %cst_19 = arith.constant 0.000000e+00 : f32
    %64 = vector.broadcast %cst_19 : f32 to vector<512x128xf32>
    %65 = arith.maximumf %63, %64 : vector<512x128xf32>
    %66 = arith.truncf %65 : vector<512x128xf32> to vector<512x128xbf16>
    %c0_20 = arith.constant 0 : index
    %c0_21 = arith.constant 0 : index
    %67 = vector.load %arg6[%c0_20, %c0_21] : memref<128x128xbf16, #tpu.memory_space<vmem>>, vector<128x128xbf16>
    %cst_22 = arith.constant dense<0.000000e+00> : vector<512x128xf32>
    %68 = tpu.matmul %66, %67, %cst_22 {dimension_numbers = #tpu.dot_dimension_numbers<[1], [0], [0], [1], [0, 0, 1, 1], [], []>} : vector<512x128xbf16>, vector<128x128xbf16>, vector<512x128xf32> -> vector<512x128xf32>
    %c0_23 = arith.constant 0 : index
    %c0_24 = arith.constant 0 : index
    %69 = vector.load %arg11[%c0_23, %c0_24] : memref<1x128xf32, #tpu.memory_space<vmem>>, vector<1x128xf32>
    %70 = vector.broadcast %69 : vector<1x128xf32> to vector<512x128xf32>
    %71 = arith.mulf %68, %70 : vector<512x128xf32>
    %c0_25 = arith.constant 0 : index
    %c0_26 = arith.constant 0 : index
    %72 = vector.load %arg12[%c0_25, %c0_26] : memref<1x128xf32, #tpu.memory_space<vmem>>, vector<1x128xf32>
    %73 = vector.broadcast %72 : vector<1x128xf32> to vector<512x128xf32>
    %74 = arith.addf %71, %73 : vector<512x128xf32>
    %75 = arith.truncf %74 : vector<512x128xf32> to vector<512x128xbf16>
    %c0_27 = arith.constant 0 : index
    %c0_28 = arith.constant 0 : index
    %c0_29 = arith.constant 0 : index
    %76 = vector.load %arg13[%c0_27, %c0_28, %c0_29] : memref<1x512x128xbf16, #tpu.memory_space<vmem>>, vector<1x512x128xbf16>
    %77 = vector.shape_cast %76 : vector<1x512x128xbf16> to vector<512x128xbf16>
    %78 = vector.shape_cast %75 : vector<512x128xbf16> to vector<1x512x128xbf16>
    tpu.vector_store %arg13[%c0_27, %c0_28, %c0_29], %78 {strides = array<i32>} : memref<1x512x128xbf16, #tpu.memory_space<vmem>>, vector<1x512x128xbf16>,
    %c0_i32 = arith.constant 0 : i32
    %79 = arith.cmpi eq, %arg2, %c0_i32 : i32
    %80 = arith.extui %79 : i1 to i32
    %c0_i32_30 = arith.constant 0 : i32
    %81 = arith.cmpi ne, %80, %c0_i32_30 : i32
    scf.if %81 {
      %cst_40 = arith.constant 0.000000e+00 : f32
      %88 = vector.broadcast %cst_40 : f32 to vector<1x1x1x128xf32>
      %c0_41 = arith.constant 0 : index
      %c0_42 = arith.constant 0 : index
      %c0_43 = arith.constant 0 : index
      %c0_44 = arith.constant 0 : index
      %89 = vector.load %arg14[%c0_41, %c0_42, %c0_43, %c0_44] : memref<1x1x1x128xf32, #tpu.memory_space<vmem>>, vector<1x1x1x128xf32>
      tpu.vector_store %arg14[%c0_41, %c0_42, %c0_43, %c0_44], %88 {strides = array<i32>} : memref<1x1x1x128xf32, #tpu.memory_space<vmem>>, vector<1x1x1x128xf32>,
    } else {
    }
    %c0_31 = arith.constant 0 : index
    %c0_32 = arith.constant 0 : index
    %c0_33 = arith.constant 0 : index
    %c0_34 = arith.constant 0 : index
    %82 = vector.load %arg14[%c0_31, %c0_32, %c0_33, %c0_34] : memref<1x1x1x128xf32, #tpu.memory_space<vmem>>, vector<1x1x1x128xf32>
    %cst_35 = arith.constant dense<0.000000e+00> : vector<128xf32>
    %83 = vector.multi_reduction <add>, %74, %cst_35 [0] : vector<512x128xf32> to vector<128xf32>
    %84 = vector.shape_cast %83 : vector<128xf32> to vector<1x128xf32>
    %85 = vector.shape_cast %84 : vector<1x128xf32> to vector<1x1x1x128xf32>
    %86 = arith.addf %82, %85 : vector<1x1x1x128xf32>
    %c0_36 = arith.constant 0 : index
    %c0_37 = arith.constant 0 : index
    %c0_38 = arith.constant 0 : index
    %c0_39 = arith.constant 0 : index
    %87 = vector.load %arg14[%c0_36, %c0_37, %c0_38, %c0_39] : memref<1x1x1x128xf32, #tpu.memory_space<vmem>>, vector<1x1x1x128xf32>
    tpu.vector_store %arg14[%c0_36, %c0_37, %c0_38, %c0_39], %86 {strides = array<i32>} : memref<1x1x1x128xf32, #tpu.memory_space<vmem>>, vector<1x1x1x128xf32>,
    return
  }
  func.func @transform_0(%arg0: i32, %arg1: i32, %arg2: i32) -> (i32, i32, i32, i32) {
    %c0_i32 = arith.constant 0 : i32
    %c0_i32_0 = arith.constant 0 : i32
    %c0_i32_1 = arith.constant 0 : i32
    %c0_i32_2 = arith.constant 0 : i32
    return %arg0, %c0_i32, %c0_i32_0, %c0_i32_1 : i32, i32, i32, i32
  }
  func.func @transform_1(%arg0: i32, %arg1: i32, %arg2: i32) -> (i32, i32) {
    %c0_i32 = arith.constant 0 : i32
    %c0_i32_0 = arith.constant 0 : i32
    %c0_i32_1 = arith.constant 0 : i32
    return %c0_i32, %c0_i32_0 : i32, i32
  }
  func.func @transform_2(%arg0: i32, %arg1: i32, %arg2: i32) -> (i32, i32) {
    %c0_i32 = arith.constant 0 : i32
    %c0_i32_0 = arith.constant 0 : i32
    %c0_i32_1 = arith.constant 0 : i32
    return %c0_i32, %c0_i32_0 : i32, i32
  }
  func.func @transform_3(%arg0: i32, %arg1: i32, %arg2: i32) -> (i32, i32) {
    %c0_i32 = arith.constant 0 : i32
    %c0_i32_0 = arith.constant 0 : i32
    %c0_i32_1 = arith.constant 0 : i32
    return %c0_i32, %c0_i32_0 : i32, i32
  }
  func.func @transform_4(%arg0: i32, %arg1: i32, %arg2: i32) -> (i32, i32) {
    %c0_i32 = arith.constant 0 : i32
    %c0_i32_0 = arith.constant 0 : i32
    %c0_i32_1 = arith.constant 0 : i32
    return %c0_i32, %c0_i32_0 : i32, i32
  }
  func.func @transform_5(%arg0: i32, %arg1: i32, %arg2: i32) -> (i32, i32) {
    %c0_i32 = arith.constant 0 : i32
    %c0_i32_0 = arith.constant 0 : i32
    %c0_i32_1 = arith.constant 0 : i32
    return %c0_i32, %c0_i32_0 : i32, i32
  }
  func.func @transform_6(%arg0: i32, %arg1: i32, %arg2: i32) -> (i32, i32) {
    %c0_i32 = arith.constant 0 : i32
    %c0_i32_0 = arith.constant 0 : i32
    %c0_i32_1 = arith.constant 0 : i32
    return %c0_i32, %c0_i32_0 : i32, i32
  }
  func.func @transform_7(%arg0: i32, %arg1: i32, %arg2: i32) -> (i32, i32) {
    %c0_i32 = arith.constant 0 : i32
    %c0_i32_0 = arith.constant 0 : i32
    %c0_i32_1 = arith.constant 0 : i32
    return %c0_i32, %c0_i32_0 : i32, i32
  }
  func.func @transform_8(%arg0: i32, %arg1: i32, %arg2: i32) -> (i32, i32) {
    %c0_i32 = arith.constant 0 : i32
    %c0_i32_0 = arith.constant 0 : i32
    %c0_i32_1 = arith.constant 0 : i32
    return %c0_i32, %c0_i32_0 : i32, i32
  }
  func.func @transform_9(%arg0: i32, %arg1: i32, %arg2: i32) -> (i32, i32) {
    %c0_i32 = arith.constant 0 : i32
    %c0_i32_0 = arith.constant 0 : i32
    %c0_i32_1 = arith.constant 0 : i32
    return %c0_i32, %c0_i32_0 : i32, i32
  }
  func.func @transform_10(%arg0: i32, %arg1: i32, %arg2: i32) -> (i32, i32, i32) {
    %c4_i32 = arith.constant 4 : i32
    %0 = arith.muli %arg1, %c4_i32 : i32
    %1 = arith.addi %0, %arg2 : i32
    %c0_i32 = arith.constant 0 : i32
    %c0_i32_0 = arith.constant 0 : i32
    return %arg0, %1, %c0_i32 : i32, i32, i32
  }
  func.func @transform_11(%arg0: i32, %arg1: i32, %arg2: i32) -> (i32, i32, i32, i32) {
    %c0_i32 = arith.constant 0 : i32
    %c0_i32_0 = arith.constant 0 : i32
    %c0_i32_1 = arith.constant 0 : i32
    return %arg0, %arg1, %c0_i32, %c0_i32_0 : i32, i32, i32, i32
  }
}

</mosaic_0001>

<bundles_post_ra>
// kernel: tpu_custom_call.1
= control target key start
LH: loop header
LB: loop body
LE: loop exit
PB: predicated region body
PF: predicated region fallthrough
CT: control target
= control target key end

     0   :  { %s15223_s0 = inlined_call_operand.vmem [shape: bf16[2,66,66,128], index: 0, kind: input, shape index: {}]   ;;  %s15224_s1 = inlined_call_operand.vmem [shape: bf16[128,128], index: 1, kind: input, shape index: {}]   ;;  %s15225_s2 = inlined_call_operand.vmem [shape: bf16[1152,128], index: 2, kind: input, shape index: {}]   ;;  %s15226_s3 = inlined_call_operand.vmem [shape: bf16[128,128], index: 3, kind: input, shape index: {}]   ;;  %s15227_s4 = inlined_call_operand.vmem [shape: f32[1,128], index: 4, kind: input, shape index: {}]   ;;  %s15228_s5 = inlined_call_operand.vmem [shape: f32[1,128], index: 5, kind: input, shape index: {}]   ;;  %s15229_s6 = inlined_call_operand.vmem [shape: f32[1,128], index: 6, kind: input, shape index: {}]   ;;  %s15230_s7 = inlined_call_operand.vmem [shape: f32[1,128], index: 7, kind: input, shape index: {}]   ;;  %s15231_s8 = inlined_call_operand.vmem [shape: f32[1,128], index: 8, kind: input, shape index: {}]   ;;  %s15232_s9 = inlined_call_operand.vmem [shape: f32[1,128], index: 9, kind: input, shape index: {}]   ;;  %s15233_s10 = inlined_call_operand.hbm [shape: bf16[2,4096,128], index: 10, kind: output, shape index: {0}]   ;;  %s15234_s11 = inlined_call_operand.hbm [shape: f32[2,2,1,128], index: 11, kind: output, shape index: {1}]  }
   0x1   :  { %15445 = sst [smem:[#allocation137_spill]] %s15223_s0 }
   0x2   :  { %15446 = sst [smem:[#allocation138_spill]] %s15224_s1 }
   0x3   :  { %15447 = sst [smem:[#allocation139_spill]] %s15225_s2 }
   0x4   :  { %15448 = sst [smem:[#allocation140_spill]] %s15226_s3 }
   0x5   :  { %15449 = sst [smem:[#allocation141_spill]] %s15227_s4 }
   0x6   :  { %15450 = sst [smem:[#allocation142_spill]] %s15228_s5 }
   0x7   :  { %15451 = sst [smem:[#allocation143_spill]] %s15229_s6 }
   0x8   :  { %15452 = sst [smem:[#allocation144_spill]] %s15230_s7 }
   0x9   :  { %15453 = sst [smem:[#allocation145_spill]] %s15231_s8 }
   0xa   :  { %15454 = sst [smem:[#allocation146_spill]] %s15232_s9 }
   0xb   :  { %15455 = sst [smem:[#allocation147_spill]] %s15233_s10 }
   0xc   :  { %15456 = sst [smem:[#allocation148_spill]] %s15234_s11 }
   0xd   :  { %17 = vsyncpa [#allocation3], 0 }
   0xe   :  { %19 = vsyncpa [#allocation3 + $0x1], 0 }
   0xf   :  { %20 = vsyncpa [#allocation5], 0 }
  0x10   :  { %22 = vsyncpa [#allocation5 + $0x1], 0  ;;  %s9963_s17 = smov 0   ;;  %s9965_s18 = smov 0  }
  0x11   :  { %s9967_s19 = smov 0   ;;  %s9969_s20 = smov 0  }
  0x12   :  { %s9971_s21 = smov 0   ;;  %s9973_s22 = smov 0  }
  0x13   :  { %s9975_s23 = smov 0   ;;  %s9977_s24 = smov 0  }
  0x14   :  { %s9979_s25 = smov 0   ;;  %s9981_s26 = smov 0  }
  0x15   :  { %s9983_s27 = smov 0   ;;  %s9985_s28 = smov 0  }
  0x16   :  { %s9987_s29 = smov 0  }
  0x17 LB: > { %15457 = sst [smem:[#allocation8_spill]] %s9862_s20  ;;  %s8896_s30 = sadd.s32 4294967295, %s9898_s29   ;;  %s9898_s29 = sphi %s9987_s29, %s28_s29   ;;  %s9894_s28 = sphi %s9985_s28, %s16094_s28   ;;  %s9890_s27 = sphi %s9983_s27, %s16086_s27   ;;  %s9886_s26 = sphi %s9981_s26, %s16085_s26   ;;  %s9882_s25 = sphi %s9979_s25, %s16084_s25   ;;  %s9878_s24 = sphi %s9977_s24, %s16083_s24   ;;  %s9874_s23 = sphi %s9975_s23, %s16082_s23   ;;  %s9870_s22 = sphi %s9973_s22, %s16093_s22   ;;  %s9866_s21 = sphi %s9971_s21, %s16092_s21   ;;  %s9862_s20 = sphi %s9969_s20, %s16081_s20   ;;  %s9858_s19 = sphi %s9967_s19, %s16091_s19   ;;  %s9854_s18 = sphi %s9965_s18, %s16090_s18   ;;  %s9850_s17 = sphi %s9963_s17, %s16089_s17  }
  0x18   : > { %15458 = sst [smem:[#allocation9_spill]] %s9866_s21  ;;  %s8897_s12 = sadd.s32 4294967294, %s9898_s29  }
  0x19   : > { %15459 = sst [smem:[#allocation10_spill]] %s9886_s26  ;;  %s40_s13 = sadd.s32 1, %s9886_s26 }
  0x1a   : > { %15460 = sst [smem:[#allocation11_spill]] %s9890_s27  ;;  %s43_s14 = sadd.s32 1, %s9890_s27 }
  0x1b   : > { %15461 = sst [smem:[#allocation12_spill]] %s9894_s28  ;;  %p41_p0 = scmp.ge.s32.totalorder %s40_s13, 4 }
  0x1c   : > { %s47_s15 = sadd.s32 1, %s9894_s28  ;;  %s8898_s16 = sshll.u32 %s9890_s27, 2 }
  0x1d   : > { %s275_s11 = sadd.s32 1, %s9870_s22  ;;  %s16096_s13 = smov (%p41_p0, %s40_s13), 0 }
  0x1e   : > { %15462 = sst [smem:[#allocation13_spill]] %s16096_s13  ;;  %s16098_s14 = smov (!%p41_p0, %s43_s14), %s9890_s27 }
  0x1f   : > { %s267_s10 = sadd.s32 %s9886_s26, %s8898_s16  ;;  %p285_p1 = scmp.ne.s32.totalorder %s9870_s22, %s9866_s21 }
  0x20   : > { %p45_p2 = scmp.ge.s32.totalorder %s16098_s14, 2  ;;  %p10041_p3 = scmp.eq.s32.totalorder %s8896_s30, 15 }
  0x21   : > { %p291_p4 = scmp.ne.s32.totalorder %s9866_s21, %s9862_s20  ;;  %p10047_p5 = scmp.eq.s32.totalorder %s8897_s12, 15 }
  0x22   : > { %s16100_s14 = smov (%p45_p2, %s16098_s14), 0  ;;  %s16102_s15 = smov (!%p45_p2, %s47_s15), %s9894_s28 }
  0x23   : > { %15465 = sst [smem:[#allocation14_spill]] %s16100_s14  ;;  %s8899_s16 = sshll.u32 %s16100_s14, 2 }
  0x24   : > { %p10057_p6 = por %p10041_p3, %p285_p1  ;;  %p49_p7 = scmp.ge.s32.totalorder %s16102_s15, 2 }
  0x25   : > { %s269_s12 = sadd.s32 %s8899_s16, %s16096_s13  ;;  %p10064_p8 = por %p10047_p5, %p291_p4 }
  0x26   : > { %s15466_s30 = scalar_select %p10057_p6, 1, 0 }
  0x27   : > { %s271_s26 = ssub.s32 %s267_s10, %s269_s12  ;;  %s16104_s15 = smov (%p49_p7, %s16102_s15), 0 }
  0x28   : > { %15467 = sst [smem:[#allocation15_spill]] %s15466_s30  ;;  %s299_s21 = ssub.s32 %s9890_s27, %s16100_s14 }
  0x29   : > { %15469 = sst [smem:[#allocation16_spill]] %s16104_s15  ;;  %s303_s7 = sadd.s32 1, %s9858_s19 }
  0x2a   : > { %s270_s6 = ssub.s32 %s9894_s28, %s16104_s15  ;;  %p313_p9 = scmp.ne.s32.totalorder %s9858_s19, %s9854_s18 }
  0x2b   : > { %s272_s30 = sor.u32 %s271_s26, %s270_s6  ;;  %s300_s3 = sor.u32 %s299_s21, %s270_s6 }
  0x2c   : > { %p273_p10 = scmp.eq.s32.totalorder %s272_s30, 0  ;;  %p301_p11 = scmp.eq.s32.totalorder %s300_s3, 0 }
  0x2d   : > { %p10079_p12 = por %p313_p9, %p10041_p3  ;;  %p319_p13 = scmp.ne.s32.totalorder %s9854_s18, %s9850_s17 }
  0x2e   : > { %s10086_s16 = scalar_select %p273_p10, %s9870_s22, %s275_s11  }
  0x2f   : > { %s10089_s12 = scalar_select %p301_p11, %s9858_s19, %s303_s7  }
  0x30   : > { %p10093_p0 = por %p319_p13, %p10047_p5  ;;  %p8902_p1 = scmp.ge.s32.totalorder %s9898_s29, 1 }
  0x31   : > { %p373_p2 = scmp.lt.s32.totalorder %s9898_s29, 17 }
  0x33   : > { %p374_p4 = pnand %p8902_p1, %p373_p2 }
  0x35   : > { %377 = sbr.rel (%p374_p4) target bundleno = 2692 (0xa84), region = 60 }
  0x3a   : > { %s15472_s1 = sld [smem:[#allocation138_spill]]  ;;  %p417_p3 = scmp.lt.s32.totalorder %s9882_s25, 1  ;;  %vm701_vm0 = vcmask 1040384   ;;  %vm705_vm1 = vcmask 1041409   ;;  %vm709_vm2 = vcmask 1042434   ;;  %vm713_vm3 = vcmask 1043459  }
  0x3b   : > { %s8905_s7 = sshll.u32 %s9878_s24, 2  ;;  %s15473_s0 = sld [smem:[#allocation137_spill]]  ;;  %vm4170_vm9 = vsmask.f32 3328  ;;  %vm4171_vm10 = vsmask.f32 7440 }
  0x3c   : > { %s418_s21 = scalar_select %p417_p3, %s9882_s25, 1  ;;  %vm10749_vm11 = vmor %vm4170_vm9, %vm4171_vm10  ;;  %vm4917_vm12 = vcmask 1042432   ;;  %vm4918_vm13 = vcmask 1046532  }
  0x3d   : > { %s10110_s26 = sadd.s32 %s9874_s23, %s8905_s7  ;;  %s15481_s4 = sld [smem:[#allocation141_spill]]  ;;  %vm10773_vm14 = vmor %vm4917_vm12, %vm4918_vm13 }
  0x3e   : > { %s9584_s30 = smul.u32 2376, %s418_s21  ;;  %s15482_s5 = sld [smem:[#allocation142_spill]] }
  0x3f   : > { %s9280_s15 = smul.u32 288, %s10110_s26  ;;  %s15498_s2 = sld [smem:[#allocation139_spill]] }
  0x40   : > { %v9288_v0 = vld [vmem:[%s15472_s1 + $0x38] sm:$0xff]  ;;  %v9287_v1 = vld [vmem:[%s15472_s1 + $0x30] sm:$0xff]  ;;  %v9286_v2 = vld [vmem:[%s15472_s1 + $0x28] sm:$0xff]  ;;  %s15766_s8 = sld [smem:[#allocation140_spill]]  ;;  %p9271_p5 = scmp.ne.s32.totalorder %s9874_s23, 0 }
  0x41   : > { %2420 = vmatpush.bf16.msra.mxu0 %v9288_v0  ;;  %s421_s28 = scalar_lea.vmem %s15473_s0, %s9584_s30  ;;  %v9285_v7 = vld [vmem:[%s15472_s1 + $0x20] sm:$0xff]  ;;  %v9284_v16 = vld [vmem:[%s15472_s1 + $0x18] sm:$0xff]  ;;  %v9283_v25 = vld [vmem:[%s15472_s1 + $0x10] sm:$0xff]  ;;  %s15959_s11 = sld [smem:[#allocation144_spill]] }
  0x42   : > { %s10119_s27 = scalar_lea.vmem %s421_s28, %s9280_s15  ;;  %v9282_v29 = vld [vmem:[%s15472_s1 + $0x8] sm:$0xff]  ;;  %v9281_v36 = vld [vmem:[%s15472_s1] sm:$0xff]  ;;  %s15956_s28 = sld [smem:[#allocation143_spill]] }
  0x43   : > { %v431_v3 = vld [vmem:[%s10119_s27] sm:$0xf]  ;;  %v432_v4 = vld [vmem:[%s10119_s27 + $0x4] sm:$0xf]  ;;  %v433_v22 = vld [vmem:[%s10119_s27 + $0x8] sm:$0xf] }
  0x44   : > { %v611_v5 = vrot.slane %v431_v3, 3  ;;  %v612_v6 = vrot.slane %v432_v4, 3  ;;  %v613_v24 = vrot.slane %v433_v22, 3  ;;  %v434_v26 = vld [vmem:[%s10119_s27 + $0xc] sm:$0xf]  ;;  %s15991_s21 = sld [smem:[#allocation9_spill]] }
  0x45   : > { %2421 = vmatpush.bf16.msra.mxu0 %v9287_v1  ;;  %v614_v27 = vrot.slane %v434_v26, 3  ;;  %v435_v44 = vld [vmem:[%s10119_s27 + $0x10] sm:$0xf]  ;;  %v436_v47 = vld [vmem:[%s10119_s27 + $0x14] sm:$0xf]  ;;  %s15995_s9 = sld [smem:[#allocation145_spill]] }
  0x46   : > { %v704_v8 = vsel %vm701_vm0, %v431_v3, %v611_v5  ;;  %v706_v9 = vsel %vm705_vm1, %v431_v3, %v611_v5  ;;  %v710_v10 = vsel %vm709_vm2, %v431_v3, %v611_v5  ;;  %v714_v11 = vsel %vm713_vm3, %v431_v3, %v611_v5  ;;  %v437_v63 = vld [vmem:[%s10119_s27 + $0x18] sm:$0xf] }
  0x47   : > { %v708_v12 = vrot.slane %v706_v9, 1  ;;  %v712_v13 = vrot.slane %v710_v10, 2  ;;  %v716_v14 = vrot.slane %v714_v11, 3  ;;  %v719_v15 = vsel %vm701_vm0, %v432_v4, %v612_v6  ;;  %1711 = vst [vmem:[#allocation1] ss:$9 sm:$0xff] %v704_v8 }
  0x48   : > { %v720_v17 = vsel %vm705_vm1, %v432_v4, %v612_v6  ;;  %v723_v18 = vsel %vm709_vm2, %v432_v4, %v612_v6  ;;  %v726_v19 = vsel %vm713_vm3, %v432_v4, %v612_v6  ;;  %1722 = vst [vmem:[#allocation1 + $0x4] ss:$9 sm:$0xff] %v719_v15  ;;  %v732_v28 = vsel %vm705_vm1, %v433_v22, %v613_v24  ;;  %s15957_s15 = smov %s15956_s28 }
  0x49   : > { %2422 = vmatpush.bf16.msra.mxu0 %v9286_v2  ;;  %v722_v20 = vrot.slane %v720_v17, 1  ;;  %v725_v21 = vrot.slane %v723_v18, 2  ;;  %1714 = vst [vmem:[#allocation1 + $0x1] ss:$9 sm:$0xff] %v708_v12  ;;  %v728_v23 = vrot.slane %v726_v19, 3  ;;  %v735_v30 = vsel %vm709_vm2, %v433_v22, %v613_v24 }
  0x4a   : > { %1717 = vst [vmem:[#allocation1 + $0x2] ss:$9 sm:$0xff] %v712_v13  ;;  %v738_v31 = vsel %vm713_vm3, %v433_v22, %v613_v24  ;;  %v731_v32 = vsel %vm701_vm0, %v433_v22, %v613_v24  ;;  %v734_v33 = vrot.slane %v732_v28, 1  ;;  %v737_v34 = vrot.slane %v735_v30, 2  ;;  %v438_v2 = vld [vmem:[%s10119_s27 + $0x1c] sm:$0xf] }
  0x4b   : > { %1720 = vst [vmem:[#allocation1 + $0x3] ss:$9 sm:$0xff] %v716_v14  ;;  %v744_v35 = vsel %vm705_vm1, %v434_v26, %v614_v27  ;;  %v740_v38 = vrot.slane %v738_v31, 3  ;;  %v747_v39 = vsel %vm709_vm2, %v434_v26, %v614_v27  ;;  %v750_v40 = vsel %vm713_vm3, %v434_v26, %v614_v27  ;;  %v440_v19 = vld [vmem:[%s10119_s27 + $0x24] sm:$0xf]  ;;  %s15440_s7 = sand.u32 1, %s15991_s21  }
  0x4c   : > { %1725 = vst [vmem:[#allocation1 + $0x5] ss:$9 sm:$0xff] %v722_v20  ;;  %v743_v41 = vsel %vm701_vm0, %v434_v26, %v614_v27  ;;  %v746_v42 = vrot.slane %v744_v35, 1  ;;  %v749_v43 = vrot.slane %v747_v39, 2  ;;  %v752_v45 = vrot.slane %v750_v40, 3  ;;  %s8903_s30 = sshll.u32 %s15440_s7, 8 }
  0x4d   : > { %2423 = vmatpush.bf16.msra.mxu0 %v9285_v7  ;;  %1728 = vst [vmem:[#allocation1 + $0x6] ss:$9 sm:$0xff] %v725_v21  ;;  %v615_v46 = vrot.slane %v435_v44, 3  ;;  %v616_v48 = vrot.slane %v436_v47, 3  ;;  %v617_v1 = vrot.slane %v437_v63, 3  ;;  %v618_v3 = vrot.slane %v438_v2, 3 }
  0x4e   : > { %1731 = vst [vmem:[#allocation1 + $0x7] ss:$9 sm:$0xff] %v728_v23  ;;  %v439_v20 = vld [vmem:[%s10119_s27 + $0x20] sm:$0x1]  ;;  %v620_v21 = vrot.slane %v440_v19, 3  ;;  %s14496_s21 = scalar_lea.vmem [#allocation2], %s8903_s30 }
  0x4f   : > { %v756_v49 = vsel %vm705_vm1, %v435_v44, %v615_v46  ;;  %v759_v50 = vsel %vm709_vm2, %v435_v44, %v615_v46  ;;  %v762_v51 = vsel %vm713_vm3, %v435_v44, %v615_v46  ;;  %v755_v52 = vsel %vm701_vm0, %v435_v44, %v615_v46  ;;  %v441_v22 = vld [vmem:[%s10119_s27 + $0x28] sm:$0xf]  ;;  %v442_v39 = vld [vmem:[%s10119_s27 + $0x2c] sm:$0xf] }
  0x50   : > { %v758_v53 = vrot.slane %v756_v49, 1  ;;  %v761_v54 = vrot.slane %v759_v50, 2  ;;  %v768_v55 = vsel %vm705_vm1, %v436_v47, %v616_v48  ;;  %v764_v57 = vrot.slane %v762_v51, 3 }
  0x51   : > { %2424 = vmatpush.bf16.msra.mxu0 %v9284_v16  ;;  %v771_v58 = vsel %vm709_vm2, %v436_v47, %v616_v48  ;;  %v774_v59 = vsel %vm713_vm3, %v436_v47, %v616_v48  ;;  %v767_v60 = vsel %vm701_vm0, %v436_v47, %v616_v48  ;;  %v770_v61 = vrot.slane %v768_v55, 1 }
  0x52   : > { %v773_v62 = vrot.slane %v771_v58, 2  ;;  %v776_v0 = vrot.slane %v774_v59, 3  ;;  %v780_v4 = vsel %vm705_vm1, %v437_v63, %v617_v1  ;;  %v783_v5 = vsel %vm709_vm2, %v437_v63, %v617_v1  ;;  %v444_v58 = vld [vmem:[%s10119_s27 + $0x34] sm:$0xf] }
  0x53   : > { %v786_v6 = vsel %vm713_vm3, %v437_v63, %v617_v1  ;;  %v779_v7 = vsel %vm701_vm0, %v437_v63, %v617_v1  ;;  %v782_v8 = vrot.slane %v780_v4, 1  ;;  %v785_v9 = vrot.slane %v783_v5, 2 }
  0x54   : > { %v792_v10 = vsel %vm705_vm1, %v438_v2, %v618_v3  ;;  %v788_v12 = vrot.slane %v786_v6, 3  ;;  %v795_v13 = vsel %vm709_vm2, %v438_v2, %v618_v3  ;;  %v798_v14 = vsel %vm713_vm3, %v438_v2, %v618_v3 }
  0x55   : > { %2425 = vmatpush.bf16.msra.mxu0 %v9283_v25  ;;  %v1732_v37 = vld [vmem:[#allocation1] sm:$0xff]  ;;  %v791_v15 = vsel %vm701_vm0, %v438_v2, %v618_v3  ;;  %v794_v16 = vrot.slane %v792_v10, 1  ;;  %v797_v17 = vrot.slane %v795_v13, 2  ;;  %v800_v18 = vrot.slane %v798_v14, 3  ;;  %v446_v13 = vld [vmem:[%s10119_s27 + $0x3c] sm:$0xf] }
  0x56   : > { %1733 = vst [vmem:[#allocation1] ss:$9 sm:$0xff] %v731_v32  ;;  %v619_v23 = vrot.slane %v439_v20, 3  ;;  %v621_v24 = vrot.slane %v441_v22, 3  ;;  %v807_v25 = vsel %vm705_vm1, %v440_v19, %v620_v21  ;;  %v810_v26 = vsel %vm709_vm2, %v440_v19, %v620_v21 }
  0x57   : > { %1735 = vst [vmem:[#allocation1 + $0x1] ss:$9 sm:$0xff] %v734_v33  ;;  %v813_v28 = vsel %vm713_vm3, %v440_v19, %v620_v21  ;;  %v809_v30 = vrot.slane %v807_v25, 1  ;;  %v812_v32 = vrot.slane %v810_v26, 2  ;;  %v622_v40 = vrot.slane %v442_v39, 3 }
  0x58   : > { %1737 = vst [vmem:[#allocation1 + $0x2] ss:$9 sm:$0xff] %v737_v34  ;;  %v803_v27 = vsel %vm701_vm0, %v439_v20, %v619_v23  ;;  %v819_v33 = vsel %vm705_vm1, %v441_v22, %v621_v24  ;;  %v815_v34 = vrot.slane %v813_v28, 3  ;;  %v822_v35 = vsel %vm709_vm2, %v441_v22, %v621_v24 }
  0x59   : > { %2426 = vmatpush.bf16.msra.mxu0 %v9282_v29  ;;  %1739 = vst [vmem:[#allocation1 + $0x3] ss:$9 sm:$0xff] %v740_v38  ;;  %v806_v29 = vsel %vm701_vm0, %v440_v19, %v620_v21  ;;  %v824_v38 = vrot.slane %v822_v35, 2  ;;  %v831_v44 = vsel %vm705_vm1, %v442_v39, %v622_v40  ;;  %v834_v46 = vsel %vm709_vm2, %v442_v39, %v622_v40  ;;  %v450_v35 = vld [vmem:[%s10119_s27 + $0x4c] sm:$0xf] }
  0x5a   : > { %1740 = vst [vmem:[#allocation1 + $0x4] ss:$9 sm:$0xff] %v743_v41  ;;  %v443_v41 = vld [vmem:[%s10119_s27 + $0x30] sm:$0xf]  ;;  %v837_v47 = vsel %vm713_vm3, %v442_v39, %v622_v40  ;;  %v830_v48 = vsel %vm701_vm0, %v442_v39, %v622_v40  ;;  %v833_v49 = vrot.slane %v831_v44, 1  ;;  %v836_v51 = vrot.slane %v834_v46, 2 }
  0x5b   : > { %1742 = vst [vmem:[#allocation1 + $0x5] ss:$9 sm:$0xff] %v746_v42  ;;  %v825_v42 = vsel %vm713_vm3, %v441_v22, %v621_v24  ;;  %v624_v59 = vrot.slane %v444_v58, 3  ;;  %v626_v14 = vrot.slane %v446_v13, 3 }
  0x5c   : > { %1744 = vst [vmem:[#allocation1 + $0x6] ss:$9 sm:$0xff] %v749_v43  ;;  %v623_v43 = vrot.slane %v443_v41, 3 }
  0x5d   : > { %2427 = vmatpush.bf16.msra.mxu0 %v9281_v36  ;;  %1746 = vst [vmem:[#allocation1 + $0x7] ss:$9 sm:$0xff] %v752_v45  ;;  %v818_v36 = vsel %vm701_vm0, %v441_v22, %v621_v24  ;;  %v827_v45 = vrot.slane %v825_v42, 3  ;;  %v855_v63 = vsel %vm705_vm1, %v444_v58, %v624_v59  ;;  %v858_v1 = vsel %vm709_vm2, %v444_v58, %v624_v59 }
  0x5e   : > { %v842_v55 = vsel %vm701_vm0, %v443_v41, %v623_v43  ;;  %v861_v2 = vsel %vm713_vm3, %v444_v58, %v624_v59  ;;  %v854_v3 = vsel %vm701_vm0, %v444_v58, %v624_v59  ;;  %v857_v4 = vrot.slane %v855_v63, 1 }
  0x5f   : > { %v860_v6 = vrot.slane %v858_v1, 2  ;;  %v882_v20 = vsel %vm709_vm2, %v446_v13, %v626_v14  ;;  %v885_v21 = vsel %vm713_vm3, %v446_v13, %v626_v14  ;;  %v878_v22 = vsel %vm701_vm0, %v446_v13, %v626_v14 }
  0x60   : > { %2428 = vmatmul.bf16.vlgmr.msra.gmra.mxu0 %v1732_v37  ;;  %v821_v37 = vrot.slane %v819_v33, 1  ;;  %v884_v25 = vrot.slane %v882_v20, 2  ;;  %v448_v33 = vld [vmem:[%s10119_s27 + $0x44] sm:$0x1] }
  0x64   : > { %v1747_v56 = vld [vmem:[#allocation1] sm:$0xff] }
  0x65   : > { %1748 = vst [vmem:[#allocation1] ss:$9 sm:$0xff] %v755_v52  ;;  %v843_v52 = vsel %vm705_vm1, %v443_v41, %v623_v43 }
  0x66   : > { %1750 = vst [vmem:[#allocation1 + $0x1] ss:$9 sm:$0xff] %v758_v53  ;;  %v839_v53 = vrot.slane %v837_v47, 3 }
  0x67   : > { %1752 = vst [vmem:[#allocation1 + $0x2] ss:$9 sm:$0xff] %v761_v54  ;;  %v846_v54 = vsel %vm709_vm2, %v443_v41, %v623_v43 }
  0x68   : > { %1754 = vst [vmem:[#allocation1 + $0x3] ss:$9 sm:$0xff] %v764_v57  ;;  %v848_v57 = vrot.slane %v846_v54, 2  ;;  %v452_v54 = vld [vmem:[%s10119_s27 + $0x54] sm:$0xf] }
  0x69   : > { %1755 = vst [vmem:[#allocation1 + $0x4] ss:$9 sm:$0xff] %v767_v60  ;;  %v445_v60 = vld [vmem:[%s10119_s27 + $0x38] sm:$0xf] }
  0x6a   : > { %1757 = vst [vmem:[#allocation1 + $0x5] ss:$9 sm:$0xff] %v770_v61  ;;  %v849_v61 = vsel %vm713_vm3, %v443_v41, %v623_v43 }
  0x6b   : > { %1759 = vst [vmem:[#allocation1 + $0x6] ss:$9 sm:$0xff] %v773_v62  ;;  %v625_v62 = vrot.slane %v445_v60, 3 }
  0x6c   : > { %1761 = vst [vmem:[#allocation1 + $0x7] ss:$9 sm:$0xff] %v776_v0  ;;  %v851_v0 = vrot.slane %v849_v61, 3 }
  0x6d   : > { %v866_v10 = vsel %vm701_vm0, %v445_v60, %v625_v62 }
  0x70   : > { %2433 = vmatmul.bf16.gmra.mxu0 %v1747_v56  ;;  %v845_v56 = vrot.slane %v843_v52, 1  ;;  %v451_v52 = vld [vmem:[%s10119_s27 + $0x50] sm:$0xf] }
  0x73   : > { %v1762_v11 = vld [vmem:[#allocation1] sm:$0xff] }
  0x74   : > { %1763 = vst [vmem:[#allocation1] ss:$9 sm:$0xff] %v779_v7  ;;  %v867_v7 = vsel %vm705_vm1, %v445_v60, %v625_v62 }
  0x75   : > { %1765 = vst [vmem:[#allocation1 + $0x1] ss:$9 sm:$0xff] %v782_v8  ;;  %v863_v8 = vrot.slane %v861_v2, 3 }
  0x76   : > { %1767 = vst [vmem:[#allocation1 + $0x2] ss:$9 sm:$0xff] %v785_v9  ;;  %v870_v9 = vsel %vm709_vm2, %v445_v60, %v625_v62 }
  0x77   : > { %1769 = vst [vmem:[#allocation1 + $0x3] ss:$9 sm:$0xff] %v788_v12  ;;  %v872_v12 = vrot.slane %v870_v9, 2  ;;  %v454_v9 = vld [vmem:[%s10119_s27 + $0x5c] sm:$0xf] }
  0x78   : > { %1770 = vst [vmem:[#allocation1 + $0x4] ss:$9 sm:$0xff] %v791_v15  ;;  %v447_v15 = vld [vmem:[%s10119_s27 + $0x40] sm:$0xf] }
  0x79   : > { %1772 = vst [vmem:[#allocation1 + $0x5] ss:$9 sm:$0xff] %v794_v16  ;;  %v873_v16 = vsel %vm713_vm3, %v445_v60, %v625_v62 }
  0x7a   : > { %1774 = vst [vmem:[#allocation1 + $0x6] ss:$9 sm:$0xff] %v797_v17  ;;  %v627_v17 = vrot.slane %v447_v15, 3  ;;  %v875_v19 = vrot.slane %v873_v16, 3 }
  0x7b   : > { %1776 = vst [vmem:[#allocation1 + $0x7] ss:$9 sm:$0xff] %v800_v18  ;;  %v879_v18 = vsel %vm705_vm1, %v446_v13, %v626_v14 }
  0x7c   : > { %v881_v23 = vrot.slane %v879_v18, 1  ;;  %v891_v26 = vsel %vm705_vm1, %v447_v15, %v627_v17  ;;  %v894_v28 = vsel %vm709_vm2, %v447_v15, %v627_v17 }
  0x80   : > { %2438 = vmatmul.bf16.gmra.mxu0 %v1762_v11  ;;  %v869_v11 = vrot.slane %v867_v7, 1  ;;  %v453_v7 = vld [vmem:[%s10119_s27 + $0x58] sm:$0xf] }
  0x82   : > { %v1777_v31 = vld [vmem:[#allocation1] sm:$0xff] }
  0x83   : > { %1778 = vst [vmem:[#allocation1] ss:$9 sm:$0xff] %v803_v27  ;;  %v887_v27 = vrot.slane %v885_v21, 3 }
  0x84   : > { %1779 = vst [vmem:[#allocation1 + $0x1] ss:$9 sm:$0xff] %v806_v29  ;;  %v890_v29 = vsel %vm701_vm0, %v447_v15, %v627_v17 }
  0x85   : > { %1781 = vst [vmem:[#allocation1 + $0x2] ss:$9 sm:$0xff] %v809_v30  ;;  %v893_v30 = vrot.slane %v891_v26, 1  ;;  %v455_v26 = vld [vmem:[%s10119_s27 + $0x60] sm:$0xf] }
  0x86   : > { %1783 = vst [vmem:[#allocation1 + $0x3] ss:$9 sm:$0xff] %v812_v32  ;;  %v449_v32 = vld [vmem:[%s10119_s27 + $0x48] sm:$0xf] }
  0x87   : > { %1785 = vst [vmem:[#allocation1 + $0x4] ss:$9 sm:$0xff] %v815_v34  ;;  %v629_v34 = vrot.slane %v449_v32, 3 }
  0x88   : > { %1786 = vst [vmem:[#allocation1 + $0x5] ss:$9 sm:$0xff] %v818_v36  ;;  %v897_v36 = vsel %vm713_vm3, %v447_v15, %v627_v17 }
  0x89   : > { %1788 = vst [vmem:[#allocation1 + $0x6] ss:$9 sm:$0xff] %v821_v37  ;;  %v628_v37 = vrot.slane %v448_v33, 3  ;;  %v899_v39 = vrot.slane %v897_v36, 3  ;;  %v906_v40 = vsel %vm705_vm1, %v449_v32, %v629_v34  ;;  %v909_v41 = vsel %vm709_vm2, %v449_v32, %v629_v34 }
  0x8a   : > { %1790 = vst [vmem:[#allocation1 + $0x7] ss:$9 sm:$0xff] %v824_v38  ;;  %v630_v38 = vrot.slane %v450_v35, 3  ;;  %v912_v43 = vsel %vm713_vm3, %v449_v32, %v629_v34  ;;  %v908_v46 = vrot.slane %v906_v40, 1  ;;  %v911_v47 = vrot.slane %v909_v41, 2 }
  0x8b   : > { %v902_v42 = vsel %vm701_vm0, %v448_v33, %v628_v37 }
  0x90   : > { %2443 = vmatmul.bf16.gmra.mxu0 %v1777_v31  ;;  %v896_v31 = vrot.slane %v894_v28, 2  ;;  %v456_v28 = vld [vmem:[%s10119_s27 + $0x64] sm:$0xf] }
  0x91   : > { %v1791_v50 = vld [vmem:[#allocation1] sm:$0xff] }
  0x92   : > { %1793 = vst [vmem:[#allocation1] ss:$9 sm:$0xff] %v827_v45  ;;  %v905_v45 = vsel %vm701_vm0, %v449_v32, %v629_v34 }
  0x93   : > { %1794 = vst [vmem:[#allocation1 + $0x1] ss:$9 sm:$0xff] %v830_v48  ;;  %v918_v48 = vsel %vm705_vm1, %v450_v35, %v630_v38 }
  0x94   : > { %1796 = vst [vmem:[#allocation1 + $0x2] ss:$9 sm:$0xff] %v833_v49  ;;  %v914_v49 = vrot.slane %v912_v43, 3 }
  0x95   : > { %1798 = vst [vmem:[#allocation1 + $0x3] ss:$9 sm:$0xff] %v836_v51  ;;  %v920_v51 = vrot.slane %v918_v48, 1 }
  0x96   : > { %1800 = vst [vmem:[#allocation1 + $0x4] ss:$9 sm:$0xff] %v839_v53  ;;  %v631_v53 = vrot.slane %v451_v52, 3 }
  0x97   : > { %1801 = vst [vmem:[#allocation1 + $0x5] ss:$9 sm:$0xff] %v842_v55  ;;  %v921_v55 = vsel %vm709_vm2, %v450_v35, %v630_v38 }
  0x98   : > { %1803 = vst [vmem:[#allocation1 + $0x6] ss:$9 sm:$0xff] %v845_v56  ;;  %v924_v56 = vsel %vm713_vm3, %v450_v35, %v630_v38  ;;  %v923_v58 = vrot.slane %v921_v55, 2  ;;  %v930_v59 = vsel %vm705_vm1, %v451_v52, %v631_v53  ;;  %v933_v61 = vsel %vm709_vm2, %v451_v52, %v631_v53 }
  0x99   : > { %1805 = vst [vmem:[#allocation1 + $0x7] ss:$9 sm:$0xff] %v848_v57  ;;  %v632_v57 = vrot.slane %v452_v54, 3  ;;  %v926_v60 = vrot.slane %v924_v56, 3  ;;  %v936_v62 = vsel %vm713_vm3, %v451_v52, %v631_v53  ;;  %v932_v1 = vrot.slane %v930_v59, 1 }
  0x9a   : > { %v935_v2 = vrot.slane %v933_v61, 2 }
  0xa0   : > { %2448 = vmatmul.bf16.gmra.mxu0 %v1791_v50  ;;  %v1806_v5 = vld [vmem:[#allocation1] sm:$0xff]  ;;  %v917_v50 = vsel %vm701_vm0, %v450_v35, %v630_v38 }
  0xa1   : > { %1808 = vst [vmem:[#allocation1] ss:$9 sm:$0xff] %v851_v0  ;;  %v929_v0 = vsel %vm701_vm0, %v451_v52, %v631_v53  ;;  %v459_v52 = vld [vmem:[%s10119_s27 + $0x70] sm:$0xf] }
  0xa2   : > { %1809 = vst [vmem:[#allocation1 + $0x1] ss:$9 sm:$0xff] %v854_v3  ;;  %v942_v3 = vsel %vm705_vm1, %v452_v54, %v632_v57  ;;  %v639_v59 = vrot.slane %v459_v52, 3 }
  0xa3   : > { %1811 = vst [vmem:[#allocation1 + $0x2] ss:$9 sm:$0xff] %v857_v4  ;;  %v938_v4 = vrot.slane %v936_v62, 3 }
  0xa4   : > { %1813 = vst [vmem:[#allocation1 + $0x3] ss:$9 sm:$0xff] %v860_v6  ;;  %v944_v6 = vrot.slane %v942_v3, 1  ;;  %v1017_v3 = vsel %vm705_vm1, %v459_v52, %v639_v59 }
  0xa5   : > { %1815 = vst [vmem:[#allocation1 + $0x4] ss:$9 sm:$0xff] %v863_v8  ;;  %v633_v8 = vrot.slane %v453_v7, 3 }
  0xa6   : > { %1816 = vst [vmem:[#allocation1 + $0x5] ss:$9 sm:$0xff] %v866_v10  ;;  %v945_v10 = vsel %vm709_vm2, %v452_v54, %v632_v57 }
  0xa7   : > { %1818 = vst [vmem:[#allocation1 + $0x6] ss:$9 sm:$0xff] %v869_v11  ;;  %v948_v11 = vsel %vm713_vm3, %v452_v54, %v632_v57  ;;  %v947_v13 = vrot.slane %v945_v10, 2  ;;  %v954_v14 = vsel %vm705_vm1, %v453_v7, %v633_v8  ;;  %v957_v17 = vsel %vm709_vm2, %v453_v7, %v633_v8 }
  0xa8   : > { %1820 = vst [vmem:[#allocation1 + $0x7] ss:$9 sm:$0xff] %v872_v12  ;;  %v634_v12 = vrot.slane %v454_v9, 3  ;;  %v950_v16 = vrot.slane %v948_v11, 3  ;;  %v960_v18 = vsel %vm713_vm3, %v453_v7, %v633_v8  ;;  %v956_v20 = vrot.slane %v954_v14, 1 }
  0xa9   : > { %v959_v21 = vrot.slane %v957_v17, 2 }
  0xaf   : > { %v1821_v24 = vld [vmem:[#allocation1] sm:$0xff] }
  0xb0   : > { %2453 = vmatmul.bf16.gmra.mxu0 %v1806_v5  ;;  %1823 = vst [vmem:[#allocation1] ss:$9 sm:$0xff] %v875_v19  ;;  %v941_v5 = vsel %vm701_vm0, %v452_v54, %v632_v57  ;;  %v953_v19 = vsel %vm701_vm0, %v453_v7, %v633_v8  ;;  %v461_v8 = vld [vmem:[%s10119_s27 + $0x78] sm:$0xf] }
  0xb1   : > { %1824 = vst [vmem:[#allocation1 + $0x1] ss:$9 sm:$0xff] %v878_v22  ;;  %v966_v22 = vsel %vm705_vm1, %v454_v9, %v634_v12 }
  0xb2   : > { %1826 = vst [vmem:[#allocation1 + $0x2] ss:$9 sm:$0xff] %v881_v23  ;;  %v962_v23 = vrot.slane %v960_v18, 3 }
  0xb3   : > { %1828 = vst [vmem:[#allocation1 + $0x3] ss:$9 sm:$0xff] %v884_v25  ;;  %v968_v25 = vrot.slane %v966_v22, 1 }
  0xb4   : > { %1830 = vst [vmem:[#allocation1 + $0x4] ss:$9 sm:$0xff] %v887_v27  ;;  %v635_v27 = vrot.slane %v455_v26, 3 }
  0xb5   : > { %1831 = vst [vmem:[#allocation1 + $0x5] ss:$9 sm:$0xff] %v890_v29  ;;  %v969_v29 = vsel %vm709_vm2, %v454_v9, %v634_v12 }
  0xb6   : > { %1833 = vst [vmem:[#allocation1 + $0x6] ss:$9 sm:$0xff] %v893_v30  ;;  %v972_v30 = vsel %vm713_vm3, %v454_v9, %v634_v12  ;;  %v971_v32 = vrot.slane %v969_v29, 2  ;;  %v978_v33 = vsel %vm705_vm1, %v455_v26, %v635_v27  ;;  %v981_v35 = vsel %vm709_vm2, %v455_v26, %v635_v27 }
  0xb7   : > { %1835 = vst [vmem:[#allocation1 + $0x7] ss:$9 sm:$0xff] %v896_v31  ;;  %v636_v31 = vrot.slane %v456_v28, 3  ;;  %v974_v34 = vrot.slane %v972_v30, 3  ;;  %v984_v36 = vsel %vm713_vm3, %v455_v26, %v635_v27  ;;  %v977_v37 = vsel %vm701_vm0, %v455_v26, %v635_v27 }
  0xb8   : > { %v980_v38 = vrot.slane %v978_v33, 1  ;;  %v983_v40 = vrot.slane %v981_v35, 2 }
  0xb9   : > { %v990_v41 = vsel %vm705_vm1, %v456_v28, %v636_v31  ;;  %v989_v43 = vsel %vm701_vm0, %v456_v28, %v636_v31  ;;  %v993_v48 = vsel %vm709_vm2, %v456_v28, %v636_v31 }
  0xbe   : > { %v1836_v44 = vld [vmem:[#allocation1] sm:$0xff] }
  0xbf   : > { %1838 = vst [vmem:[#allocation1] ss:$9 sm:$0xff] %v899_v39 }
  0xc0   : > { %2458 = vmatmul.bf16.gmra.mxu0 %v1821_v24  ;;  %1839 = vst [vmem:[#allocation1 + $0x1] ss:$9 sm:$0xff] %v902_v42  ;;  %v965_v24 = vsel %vm701_vm0, %v454_v9, %v634_v12  ;;  %v986_v42 = vrot.slane %v984_v36, 3 }
  0xc1   : > { %1840 = vst [vmem:[#allocation1 + $0x2] ss:$9 sm:$0xff] %v905_v45  ;;  %v458_v45 = vld [vmem:[%s10119_s27 + $0x6c] sm:$0xf] }
  0xc2   : > { %1842 = vst [vmem:[#allocation1 + $0x3] ss:$9 sm:$0xff] %v908_v46  ;;  %v457_v46 = vld [vmem:[%s10119_s27 + $0x68] sm:$0x1] }
  0xc3   : > { %1844 = vst [vmem:[#allocation1 + $0x4] ss:$9 sm:$0xff] %v911_v47  ;;  %v638_v47 = vrot.slane %v458_v45, 3 }
  0xc4   : > { %1846 = vst [vmem:[#allocation1 + $0x5] ss:$9 sm:$0xff] %v914_v49  ;;  %v996_v49 = vsel %vm713_vm3, %v456_v28, %v636_v31  ;;  %v463_v28 = vld [vmem:[%s10119_s27 + $0x80] sm:$0xf] }
  0xc5   : > { %1847 = vst [vmem:[#allocation1 + $0x6] ss:$9 sm:$0xff] %v917_v50  ;;  %v637_v50 = vrot.slane %v457_v46, 3  ;;  %v998_v53 = vrot.slane %v996_v49, 3  ;;  %v1005_v54 = vsel %vm705_vm1, %v458_v45, %v638_v47  ;;  %v1008_v55 = vsel %vm709_vm2, %v458_v45, %v638_v47 }
  0xc6   : > { %1849 = vst [vmem:[#allocation1 + $0x7] ss:$9 sm:$0xff] %v920_v51  ;;  %v995_v51 = vrot.slane %v993_v48, 2  ;;  %v1011_v57 = vsel %vm713_vm3, %v458_v45, %v638_v47  ;;  %v1007_v61 = vrot.slane %v1005_v54, 1  ;;  %v1010_v62 = vrot.slane %v1008_v55, 2 }
  0xc7   : > { %v1001_v56 = vsel %vm701_vm0, %v457_v46, %v637_v50  ;;  %v643_v35 = vrot.slane %v463_v28, 3 }
  0xcd   : > { %v1850_v63 = vld [vmem:[#allocation1] sm:$0xff] }
  0xce   : > { %1852 = vst [vmem:[#allocation1] ss:$9 sm:$0xff] %v923_v58 }
  0xcf   : > { %1854 = vst [vmem:[#allocation1 + $0x1] ss:$9 sm:$0xff] %v926_v60  ;;  %v1004_v60 = vsel %vm701_vm0, %v458_v45, %v638_v47  ;;  %v1071_v45 = vsel %vm713_vm3, %v463_v28, %v643_v35  ;;  %v465_v47 = vld [vmem:[%s10119_s27 + $0x88] sm:$0xf] }
  0xd0   : > { %2463 = vmatmul.bf16.gmra.mxu0 %v1836_v44  ;;  %1855 = vst [vmem:[#allocation1 + $0x2] ss:$9 sm:$0xff] %v929_v0  ;;  %v992_v44 = vrot.slane %v990_v41, 1  ;;  %v1016_v0 = vsel %vm701_vm0, %v459_v52, %v639_v59  ;;  %v464_v41 = vld [vmem:[%s10119_s27 + $0x84] sm:$0xf]  ;;  %v1073_v50 = vrot.slane %v1071_v45, 3 }
  0xd1   : > { %1857 = vst [vmem:[#allocation1 + $0x3] ss:$9 sm:$0xff] %v932_v1  ;;  %v460_v1 = vld [vmem:[%s10119_s27 + $0x74] sm:$0xf]  ;;  %v645_v54 = vrot.slane %v465_v47, 3 }
  0xd2   : > { %1859 = vst [vmem:[#allocation1 + $0x4] ss:$9 sm:$0xff] %v935_v2  ;;  %v640_v2 = vrot.slane %v460_v1, 3 }
  0xd3   : > { %1861 = vst [vmem:[#allocation1 + $0x5] ss:$9 sm:$0xff] %v938_v4  ;;  %v1020_v4 = vsel %vm709_vm2, %v459_v52, %v639_v59 }
  0xd4   : > { %1862 = vst [vmem:[#allocation1 + $0x6] ss:$9 sm:$0xff] %v941_v5  ;;  %v1023_v5 = vsel %vm713_vm3, %v459_v52, %v639_v59  ;;  %v1022_v9 = vrot.slane %v1020_v4, 2  ;;  %v1029_v10 = vsel %vm705_vm1, %v460_v1, %v640_v2  ;;  %v1032_v12 = vsel %vm709_vm2, %v460_v1, %v640_v2 }
  0xd5   : > { %1864 = vst [vmem:[#allocation1 + $0x7] ss:$9 sm:$0xff] %v944_v6  ;;  %v1019_v6 = vrot.slane %v1017_v3, 1  ;;  %v1025_v11 = vrot.slane %v1023_v5, 3  ;;  %v1031_v17 = vrot.slane %v1029_v10, 1  ;;  %v1034_v18 = vrot.slane %v1032_v12, 2 }
  0xd6   : > { %v1088_v59 = vsel %vm701_vm0, %v465_v47, %v645_v54 }
  0xdc   : > { %v1865_v15 = vld [vmem:[#allocation1] sm:$0xff] }
  0xdd   : > { %1867 = vst [vmem:[#allocation1] ss:$9 sm:$0xff] %v947_v13  ;;  %v10273_v7 = vpop.f32.mrf.mxu0  ;;  %v1035_v13 = vsel %vm713_vm3, %v460_v1, %v640_v2 }
  0xde   : > { %1869 = vst [vmem:[#allocation1 + $0x1] ss:$9 sm:$0xff] %v950_v16  ;;  %v1028_v16 = vsel %vm701_vm0, %v460_v1, %v640_v2  ;;  %v1095_v1 = vsel %vm713_vm3, %v465_v47, %v645_v54 }
  0xdf   : > { %1870 = vst [vmem:[#allocation1 + $0x2] ss:$9 sm:$0xff] %v953_v19  ;;  %v1037_v19 = vrot.slane %v1035_v13, 3  ;;  %v1097_v5 = vrot.slane %v1095_v1, 3 }
  0xe0   : > { %2468 = vmatmul.bf16.gmra.mxu0 %v1850_v63  ;;  %1872 = vst [vmem:[#allocation1 + $0x3] ss:$9 sm:$0xff] %v956_v20  ;;  %v1013_v63 = vrot.slane %v1011_v57, 3 }
  0xe1   : > { %1874 = vst [vmem:[#allocation1 + $0x4] ss:$9 sm:$0xff] %v959_v21  ;;  %v462_v21 = vld [vmem:[%s10119_s27 + $0x7c] sm:$0xf] }
  0xe2   : > { %1876 = vst [vmem:[#allocation1 + $0x5] ss:$9 sm:$0xff] %v962_v23  ;;  %v642_v23 = vrot.slane %v462_v21, 3 }
  0xe3   : > { %1877 = vst [vmem:[#allocation1 + $0x6] ss:$9 sm:$0xff] %v965_v24 }
  0xe4   : > { %1879 = vst [vmem:[#allocation1 + $0x7] ss:$9 sm:$0xff] %v968_v25  ;;  %v1053_v30 = vsel %vm705_vm1, %v462_v21, %v642_v23  ;;  %v1059_v33 = vsel %vm713_vm3, %v462_v21, %v642_v23  ;;  %v1052_v36 = vsel %vm701_vm0, %v462_v21, %v642_v23 }
  0xe5   : > { %v10282_v22 = vpop.f32.mrf.mxu0 }
  0xeb   : > { %v1880_v39 = vld [vmem:[#allocation1] sm:$0xff] }
  0xec   : > { %1882 = vst [vmem:[#allocation1] ss:$9 sm:$0xff] %v971_v32  ;;  %v1056_v32 = vsel %vm709_vm2, %v462_v21, %v642_v23 }
  0xed   : > { %1884 = vst [vmem:[#allocation1 + $0x1] ss:$9 sm:$0xff] %v974_v34 }
  0xee   : > { %1885 = vst [vmem:[#allocation1 + $0x2] ss:$9 sm:$0xff] %v977_v37  ;;  %v1055_v37 = vrot.slane %v1053_v30, 1 }
  0xef   : > { %1887 = vst [vmem:[#allocation1 + $0x3] ss:$9 sm:$0xff] %v980_v38  ;;  %v1058_v38 = vrot.slane %v1056_v32, 2 }
  0xf0   : > { %2473 = vmatmul.bf16.gmra.mxu0 %v1865_v15  ;;  %1889 = vst [vmem:[#allocation1 + $0x4] ss:$9 sm:$0xff] %v983_v40  ;;  %v641_v15 = vrot.slane %v461_v8, 3  ;;  %v1064_v40 = vsel %vm701_vm0, %v463_v28, %v643_v35 }
  0xf1   : > { %1891 = vst [vmem:[#allocation1 + $0x5] ss:$9 sm:$0xff] %v986_v42  ;;  %v644_v42 = vrot.slane %v464_v41, 3 }
  0xf2   : > { %1892 = vst [vmem:[#allocation1 + $0x6] ss:$9 sm:$0xff] %v989_v43  ;;  %v1040_v20 = vsel %vm701_vm0, %v461_v8, %v641_v15  ;;  %v1041_v24 = vsel %vm705_vm1, %v461_v8, %v641_v15  ;;  %v1044_v25 = vsel %vm709_vm2, %v461_v8, %v641_v15  ;;  %v1047_v26 = vsel %vm713_vm3, %v461_v8, %v641_v15 }
  0xf3   : > { %1894 = vst [vmem:[#allocation1 + $0x7] ss:$9 sm:$0xff] %v992_v44  ;;  %v1043_v27 = vrot.slane %v1041_v24, 1  ;;  %v1046_v29 = vrot.slane %v1044_v25, 2  ;;  %v1049_v31 = vrot.slane %v1047_v26, 3  ;;  %v1065_v43 = vsel %vm705_vm1, %v463_v28, %v643_v35 }
  0xf4   : > { %v1068_v44 = vsel %vm709_vm2, %v463_v28, %v643_v35  ;;  %v1067_v46 = vrot.slane %v1065_v43, 1  ;;  %v1077_v49 = vsel %vm705_vm1, %v464_v41, %v644_v42  ;;  %v1083_v52 = vsel %vm713_vm3, %v464_v41, %v644_v42  ;;  %v470_v35 = vld [vmem:[%s10119_s27 + $0x9c] sm:$0xf] }
  0xf5   : > { %v1070_v48 = vrot.slane %v1068_v44, 2  ;;  %v1076_v55 = vsel %vm701_vm0, %v464_v41, %v644_v42 }
  0xfa   : > { %v1895_v58 = vld [vmem:[#allocation1] sm:$0xff] }
  0xfb   : > { %1897 = vst [vmem:[#allocation1] ss:$9 sm:$0xff] %v995_v51  ;;  %v1080_v51 = vsel %vm709_vm2, %v464_v41, %v644_v42 }
  0xfc   : > { %1899 = vst [vmem:[#allocation1 + $0x1] ss:$9 sm:$0xff] %v998_v53  ;;  %v1082_v57 = vrot.slane %v1080_v51, 2 }
  0xfd   : > { %1900 = vst [vmem:[#allocation1 + $0x2] ss:$9 sm:$0xff] %v1001_v56  ;;  %v1079_v56 = vrot.slane %v1077_v49, 1 }
  0xfe   : > { %1901 = vst [vmem:[#allocation1 + $0x3] ss:$9 sm:$0xff] %v1004_v60  ;;  %v467_v60 = vld [vmem:[%s10119_s27 + $0x90] sm:$0xf] }
  0xff   : > { %1903 = vst [vmem:[#allocation1 + $0x4] ss:$9 sm:$0xff] %v1007_v61  ;;  %v466_v61 = vld [vmem:[%s10119_s27 + $0x8c] sm:$0x1] }
 0x100   : > { %2478 = vmatmul.bf16.gmra.mxu0 %v1880_v39  ;;  %1905 = vst [vmem:[#allocation1 + $0x5] ss:$9 sm:$0xff] %v1010_v62  ;;  %v1061_v39 = vrot.slane %v1059_v33, 3  ;;  %v1089_v62 = vsel %vm705_vm1, %v465_v47, %v645_v54  ;;  %v646_v2 = vrot.slane %v466_v61, 3 }
 0x101   : > { %1907 = vst [vmem:[#allocation1 + $0x6] ss:$9 sm:$0xff] %v1013_v63  ;;  %v647_v63 = vrot.slane %v467_v60, 3  ;;  %v1091_v3 = vrot.slane %v1089_v62, 1 }
 0x102   : > { %1908 = vst [vmem:[#allocation1 + $0x7] ss:$9 sm:$0xff] %v1016_v0  ;;  %v1092_v0 = vsel %vm709_vm2, %v465_v47, %v645_v54  ;;  %v1100_v10 = vsel %vm701_vm0, %v466_v61, %v646_v2 }
 0x103   : > { %v1094_v4 = vrot.slane %v1092_v0, 2  ;;  %v1107_v8 = vsel %vm709_vm2, %v467_v60, %v647_v63  ;;  %v1103_v12 = vsel %vm701_vm0, %v467_v60, %v647_v63 }
 0x104   : > { %v1109_v15 = vrot.slane %v1107_v8, 2 }
 0x109   : > { %v1909_v14 = vld [vmem:[#allocation1] sm:$0xff] }
 0x10a   : > { %1911 = vst [vmem:[#allocation1] ss:$9 sm:$0xff] %v1019_v6  ;;  %v1104_v6 = vsel %vm705_vm1, %v467_v60, %v647_v63 }
 0x10b   : > { %1913 = vst [vmem:[#allocation1 + $0x1] ss:$9 sm:$0xff] %v1022_v9  ;;  %v1106_v13 = vrot.slane %v1104_v6, 1 }
 0x10c   : > { %1915 = vst [vmem:[#allocation1 + $0x2] ss:$9 sm:$0xff] %v1025_v11  ;;  %v1110_v11 = vsel %vm713_vm3, %v467_v60, %v647_v63 }
 0x10d   : > { %1916 = vst [vmem:[#allocation1 + $0x3] ss:$9 sm:$0xff] %v1028_v16  ;;  %v1112_v16 = vrot.slane %v1110_v11, 3 }
 0x10e   : > { %1918 = vst [vmem:[#allocation1 + $0x4] ss:$9 sm:$0xff] %v1031_v17 }
 0x10f   : > { %1920 = vst [vmem:[#allocation1 + $0x5] ss:$9 sm:$0xff] %v1034_v18  ;;  %v469_v18 = vld [vmem:[%s10119_s27 + $0x98] sm:$0xf] }
 0x110   : > { %2483 = vmatmul.bf16.gmra.mxu0 %v1895_v58  ;;  %1922 = vst [vmem:[#allocation1 + $0x6] ss:$9 sm:$0xff] %v1037_v19  ;;  %v1085_v58 = vrot.slane %v1083_v52, 3  ;;  %v649_v19 = vrot.slane %v469_v18, 3 }
 0x111   : > { %1923 = vst [vmem:[#allocation1 + $0x7] ss:$9 sm:$0xff] %v1040_v20 }
 0x112   : > { %v1127_v32 = vsel %vm701_vm0, %v469_v18, %v649_v19 }
 0x118   : > { %v10291_v34 = vld [vmem:[#allocation1] sm:$0xff] }
 0x119   : > { %1926 = vst [vmem:[#allocation1] ss:$9 sm:$0xff] %v1043_v27  ;;  %v1128_v27 = vsel %vm705_vm1, %v469_v18, %v649_v19 }
 0x11a   : > { %1928 = vst [vmem:[#allocation1 + $0x1] ss:$9 sm:$0xff] %v1046_v29  ;;  %v1131_v29 = vsel %vm709_vm2, %v469_v18, %v649_v19  ;;  %v1130_v33 = vrot.slane %v1128_v27, 1 }
 0x11b   : > { %1930 = vst [vmem:[#allocation1 + $0x2] ss:$9 sm:$0xff] %v1049_v31  ;;  %v1134_v31 = vsel %vm713_vm3, %v469_v18, %v649_v19 }
 0x11c   : > { %1931 = vst [vmem:[#allocation1 + $0x3] ss:$9 sm:$0xff] %v1052_v36  ;;  %v1133_v36 = vrot.slane %v1131_v29, 2 }
 0x11d   : > { %1933 = vst [vmem:[#allocation1 + $0x4] ss:$9 sm:$0xff] %v1055_v37  ;;  %v1136_v37 = vrot.slane %v1134_v31, 3 }
 0x11e   : > { %1935 = vst [vmem:[#allocation1 + $0x5] ss:$9 sm:$0xff] %v1058_v38  ;;  %v650_v38 = vrot.slane %v470_v35, 3 }
 0x11f   : > { %1937 = vst [vmem:[#allocation1 + $0x6] ss:$9 sm:$0xff] %v1061_v39  ;;  %v471_v39 = vld [vmem:[%s10119_s27 + $0xa0] sm:$0xf] }
 0x120   : > { %2488 = vmatmul.bf16.gmra.mxu0 %v1909_v14  ;;  %1938 = vst [vmem:[#allocation1 + $0x7] ss:$9 sm:$0xff] %v1064_v40  ;;  %v468_v14 = vld [vmem:[%s10119_s27 + $0x94] sm:$0xf]  ;;  %v651_v40 = vrot.slane %v471_v39, 3  ;;  %v1140_v41 = vsel %vm705_vm1, %v470_v35, %v650_v38  ;;  %v1143_v42 = vsel %vm709_vm2, %v470_v35, %v650_v38  ;;  %v1146_v43 = vsel %vm713_vm3, %v470_v35, %v650_v38 }
 0x121   : > { %v648_v17 = vrot.slane %v468_v14, 3  ;;  %v1139_v44 = vsel %vm701_vm0, %v470_v35, %v650_v38  ;;  %v1142_v45 = vrot.slane %v1140_v41, 1 }
 0x122   : > { %v1152_v47 = vsel %vm705_vm1, %v471_v39, %v651_v40  ;;  %v1155_v49 = vsel %vm709_vm2, %v471_v39, %v651_v40  ;;  %v1158_v51 = vsel %vm713_vm3, %v471_v39, %v651_v40  ;;  %v1151_v52 = vsel %vm701_vm0, %v471_v39, %v651_v40  ;;  %v478_v39 = vld [vmem:[%s10119_s27 + $0xbc] sm:$0xf] }
 0x123   : > { %v1116_v20 = vsel %vm705_vm1, %v468_v14, %v648_v17  ;;  %v1119_v21 = vsel %vm709_vm2, %v468_v14, %v648_v17  ;;  %v1122_v23 = vsel %vm713_vm3, %v468_v14, %v648_v17  ;;  %v1115_v24 = vsel %vm701_vm0, %v468_v14, %v648_v17  ;;  %v475_v17 = vld [vmem:[%s10119_s27 + $0xb0] sm:$0x1] }
 0x124   : > { %v1118_v25 = vrot.slane %v1116_v20, 1  ;;  %v1121_v26 = vrot.slane %v1119_v21, 2  ;;  %v1124_v28 = vrot.slane %v1122_v23, 3  ;;  %v1154_v54 = vrot.slane %v1152_v47, 1 }
 0x125   : > { %v655_v23 = vrot.slane %v475_v17, 3  ;;  %v658_v41 = vrot.slane %v478_v39, 3 }
 0x127   : > { %v10303_v53 = vld [vmem:[#allocation1] sm:$0xff] }
 0x128   : > { %1941 = vst [vmem:[#allocation1] ss:$9 sm:$0xff] %v1067_v46  ;;  %v1145_v46 = vrot.slane %v1143_v42, 2 }
 0x129   : > { %1943 = vst [vmem:[#allocation1 + $0x1] ss:$9 sm:$0xff] %v1070_v48  ;;  %v1148_v48 = vrot.slane %v1146_v43, 3 }
 0x12a   : > { %1945 = vst [vmem:[#allocation1 + $0x2] ss:$9 sm:$0xff] %v1073_v50 }
 0x12b   : > { %1946 = vst [vmem:[#allocation1 + $0x3] ss:$9 sm:$0xff] %v1076_v55  ;;  %v472_v55 = vld [vmem:[%s10119_s27 + $0xa4] sm:$0xf] }
 0x12c   : > { %1948 = vst [vmem:[#allocation1 + $0x4] ss:$9 sm:$0xff] %v1079_v56  ;;  %v1157_v56 = vrot.slane %v1155_v49, 2  ;;  %v1227_v49 = vsel %vm705_vm1, %v478_v39, %v658_v41 }
 0x12d   : > { %1950 = vst [vmem:[#allocation1 + $0x5] ss:$9 sm:$0xff] %v1082_v57  ;;  %v1160_v57 = vrot.slane %v1158_v51, 3 }
 0x12e   : > { %1952 = vst [vmem:[#allocation1 + $0x6] ss:$9 sm:$0xff] %v1085_v58  ;;  %v652_v58 = vrot.slane %v472_v55, 3 }
 0x12f   : > { %1953 = vst [vmem:[#allocation1 + $0x7] ss:$9 sm:$0xff] %v1088_v59  ;;  %v473_v59 = vld [vmem:[%s10119_s27 + $0xa8] sm:$0xf] }
 0x130   : > { %v653_v60 = vrot.slane %v473_v59, 3  ;;  %v1164_v61 = vsel %vm705_vm1, %v472_v55, %v652_v58  ;;  %v1167_v62 = vsel %vm709_vm2, %v472_v55, %v652_v58  ;;  %v1170_v63 = vsel %vm713_vm3, %v472_v55, %v652_v58 }
 0x131   : > { %v1163_v0 = vsel %vm701_vm0, %v472_v55, %v652_v58  ;;  %v1166_v1 = vrot.slane %v1164_v61, 1  ;;  %v1169_v2 = vrot.slane %v1167_v62, 2  ;;  %v1226_v55 = vsel %vm701_vm0, %v478_v39, %v658_v41 }
 0x132   : > { %v1182_v8 = vsel %vm713_vm3, %v473_v59, %v653_v60  ;;  %v1233_v61 = vsel %vm713_vm3, %v478_v39, %v658_v41 }
 0x133   : > { %v1184_v14 = vrot.slane %v1182_v8, 3 }
 0x136   : > { %v10314_v9 = vld [vmem:[#allocation1] sm:$0xff] }
 0x137   : > { %1956 = vst [vmem:[#allocation1] ss:$9 sm:$0xff] %v1091_v3  ;;  %v1176_v3 = vsel %vm705_vm1, %v473_v59, %v653_v60 }
 0x138   : > { %1958 = vst [vmem:[#allocation1 + $0x1] ss:$9 sm:$0xff] %v1094_v4  ;;  %v1172_v4 = vrot.slane %v1170_v63, 3  ;;  %v1178_v11 = vrot.slane %v1176_v3, 1 }
 0x139   : > { %1960 = vst [vmem:[#allocation1 + $0x2] ss:$9 sm:$0xff] %v1097_v5  ;;  %v1179_v5 = vsel %vm709_vm2, %v473_v59, %v653_v60 }
 0x13a   : > { %1961 = vst [vmem:[#allocation1 + $0x3] ss:$9 sm:$0xff] %v1100_v10  ;;  %v1175_v10 = vsel %vm701_vm0, %v473_v59, %v653_v60  ;;  %v480_v60 = vld [vmem:[%s10119_s27 + $0xc4] sm:$0xf] }
 0x13b   : > { %1962 = vst [vmem:[#allocation1 + $0x4] ss:$9 sm:$0xff] %v1103_v12  ;;  %v474_v12 = vld [vmem:[%s10119_s27 + $0xac] sm:$0xf]  ;;  %v660_v62 = vrot.slane %v480_v60, 3 }
 0x13c   : > { %1964 = vst [vmem:[#allocation1 + $0x5] ss:$9 sm:$0xff] %v1106_v13  ;;  %v1181_v13 = vrot.slane %v1179_v5, 2 }
 0x13d   : > { %1966 = vst [vmem:[#allocation1 + $0x6] ss:$9 sm:$0xff] %v1109_v15  ;;  %v654_v15 = vrot.slane %v474_v12, 3  ;;  %v1251_v8 = vsel %vm705_vm1, %v480_v60, %v660_v62 }
 0x13e   : > { %1968 = vst [vmem:[#allocation1 + $0x7] ss:$9 sm:$0xff] %v1112_v16  ;;  %v476_v16 = vld [vmem:[%s10119_s27 + $0xb4] sm:$0xf] }
 0x13f   : > { %v1188_v18 = vsel %vm705_vm1, %v474_v12, %v654_v15  ;;  %v656_v19 = vrot.slane %v476_v16, 3  ;;  %v1191_v20 = vsel %vm709_vm2, %v474_v12, %v654_v15  ;;  %v1194_v21 = vsel %vm713_vm3, %v474_v12, %v654_v15 }
 0x140   : > { %v1196_v27 = vrot.slane %v1194_v21, 3 }
 0x141   : > { %v1206_v31 = vsel %vm709_vm2, %v476_v16, %v656_v19  ;;  %v1209_v40 = vsel %vm713_vm3, %v476_v16, %v656_v19 }
 0x142   : > { %v1211_v43 = vrot.slane %v1209_v40, 3 }
 0x145   : > { %v10327_v30 = vld [vmem:[#allocation1] sm:$0xff] }
 0x146   : > { %1970 = vst [vmem:[#allocation1] ss:$9 sm:$0xff] %v1115_v24  ;;  %v1187_v24 = vsel %vm701_vm0, %v474_v12, %v654_v15  ;;  %v1254_v12 = vsel %vm709_vm2, %v480_v60, %v660_v62  ;;  %v481_v15 = vld [vmem:[%s10119_s27 + $0xc8] sm:$0xf] }
 0x147   : > { %1972 = vst [vmem:[#allocation1 + $0x1] ss:$9 sm:$0xff] %v1118_v25  ;;  %v1190_v25 = vrot.slane %v1188_v18, 1  ;;  %v482_v18 = vld [vmem:[%s10119_s27 + $0xcc] sm:$0xf] }
 0x148   : > { %1974 = vst [vmem:[#allocation1 + $0x2] ss:$9 sm:$0xff] %v1121_v26  ;;  %v1193_v26 = vrot.slane %v1191_v20, 2  ;;  %v662_v20 = vrot.slane %v482_v18, 3 }
 0x149   : > { %1976 = vst [vmem:[#allocation1 + $0x3] ss:$9 sm:$0xff] %v1124_v28  ;;  %v1203_v28 = vsel %vm705_vm1, %v476_v16, %v656_v19 }
 0x14a   : > { %1977 = vst [vmem:[#allocation1 + $0x4] ss:$9 sm:$0xff] %v1127_v32  ;;  %v1199_v32 = vsel %vm701_vm0, %v475_v17, %v655_v23  ;;  %v1205_v35 = vrot.slane %v1203_v28, 1  ;;  %v661_v17 = vrot.slane %v481_v15, 3 }
 0x14b   : > { %1979 = vst [vmem:[#allocation1 + $0x5] ss:$9 sm:$0xff] %v1130_v33  ;;  %v1202_v33 = vsel %vm701_vm0, %v476_v16, %v656_v19  ;;  %v1256_v16 = vrot.slane %v1254_v12, 2  ;;  %v1257_v19 = vsel %vm713_vm3, %v480_v60, %v660_v62 }
 0x14c   : > { %1981 = vst [vmem:[#allocation1 + $0x6] ss:$9 sm:$0xff] %v1133_v36  ;;  %v477_v36 = vld [vmem:[%s10119_s27 + $0xb8] sm:$0xf]  ;;  %v1263_v21 = vsel %vm705_vm1, %v481_v15, %v661_v17  ;;  %v1259_v23 = vrot.slane %v1257_v19, 3 }
 0x14d   : > { %1983 = vst [vmem:[#allocation1 + $0x7] ss:$9 sm:$0xff] %v1136_v37  ;;  %v1208_v37 = vrot.slane %v1206_v31, 2  ;;  %v657_v38 = vrot.slane %v477_v36, 3  ;;  %v1275_v31 = vsel %vm705_vm1, %v482_v18, %v662_v20 }
 0x14f   : > { %v1215_v42 = vsel %vm705_vm1, %v477_v36, %v657_v38 }
 0x150   : > { %v1217_v47 = vrot.slane %v1215_v42, 1  ;;  %v1281_v42 = vsel %vm713_vm3, %v482_v18, %v662_v20 }
 0x154   : > { %v10339_v50 = vld [vmem:[#allocation1] sm:$0xff] }
 0x155   : > { %1985 = vst [vmem:[#allocation1] ss:$9 sm:$0xff] %v1139_v44  ;;  %v1218_v44 = vsel %vm709_vm2, %v477_v36, %v657_v38 }
 0x156   : > { %1987 = vst [vmem:[#allocation1 + $0x1] ss:$9 sm:$0xff] %v1142_v45  ;;  %v1221_v45 = vsel %vm713_vm3, %v477_v36, %v657_v38 }
 0x157   : > { %1989 = vst [vmem:[#allocation1 + $0x2] ss:$9 sm:$0xff] %v1145_v46  ;;  %v1214_v46 = vsel %vm701_vm0, %v477_v36, %v657_v38  ;;  %v1274_v36 = vsel %vm701_vm0, %v482_v18, %v662_v20  ;;  %v483_v38 = vld [vmem:[%s10119_s27 + $0xd0] sm:$0xf] }
 0x158   : > { %1991 = vst [vmem:[#allocation1 + $0x3] ss:$9 sm:$0xff] %v1148_v48  ;;  %v1220_v48 = vrot.slane %v1218_v44, 2  ;;  %v663_v40 = vrot.slane %v483_v38, 3 }
 0x159   : > { %1992 = vst [vmem:[#allocation1 + $0x4] ss:$9 sm:$0xff] %v1151_v52  ;;  %v1223_v52 = vrot.slane %v1221_v45, 3 }
 0x15a   : > { %1994 = vst [vmem:[#allocation1 + $0x5] ss:$9 sm:$0xff] %v1154_v54  ;;  %v1230_v54 = vsel %vm709_vm2, %v478_v39, %v658_v41  ;;  %v485_v41 = vld [vmem:[%s10119_s27 + $0xd8] sm:$0xf]  ;;  %v1287_v44 = vsel %vm705_vm1, %v483_v38, %v663_v40 }
 0x15b   : > { %1996 = vst [vmem:[#allocation1 + $0x6] ss:$9 sm:$0xff] %v1157_v56  ;;  %v1229_v56 = vrot.slane %v1227_v49, 1  ;;  %v1232_v58 = vrot.slane %v1230_v54, 2  ;;  %v665_v45 = vrot.slane %v485_v41, 3  ;;  %v1289_v54 = vrot.slane %v1287_v44, 1 }
 0x15c   : > { %1998 = vst [vmem:[#allocation1 + $0x7] ss:$9 sm:$0xff] %v1160_v57  ;;  %v479_v57 = vld [vmem:[%s10119_s27 + $0xc0] sm:$0xf] }
 0x15d   : > { %v659_v59 = vrot.slane %v479_v57, 3 }
 0x15f   : > { %v1239_v63 = vsel %vm705_vm1, %v479_v57, %v659_v59  ;;  %v1238_v3 = vsel %vm701_vm0, %v479_v57, %v659_v59 }
 0x163   : > { %v10351_v6 = vld [vmem:[#allocation1] sm:$0xff] }
 0x164   : > { %2000 = vst [vmem:[#allocation1] ss:$9 sm:$0xff] %v1163_v0  ;;  %v1235_v0 = vrot.slane %v1233_v61, 3 }
 0x165   : > { %2002 = vst [vmem:[#allocation1 + $0x1] ss:$9 sm:$0xff] %v1166_v1  ;;  %v1242_v1 = vsel %vm709_vm2, %v479_v57, %v659_v59 }
 0x166   : > { %2004 = vst [vmem:[#allocation1 + $0x2] ss:$9 sm:$0xff] %v1169_v2  ;;  %v1245_v2 = vsel %vm713_vm3, %v479_v57, %v659_v59  ;;  %v1244_v5 = vrot.slane %v1242_v1, 2  ;;  %v1305_v1 = vsel %vm709_vm2, %v485_v41, %v665_v45 }
 0x167   : > { %2006 = vst [vmem:[#allocation1 + $0x3] ss:$9 sm:$0xff] %v1172_v4  ;;  %v1241_v4 = vrot.slane %v1239_v63, 1 }
 0x168   : > { %2007 = vst [vmem:[#allocation1 + $0x4] ss:$9 sm:$0xff] %v1175_v10 }
 0x169   : > { %2009 = vst [vmem:[#allocation1 + $0x5] ss:$9 sm:$0xff] %v1178_v11  ;;  %v1247_v11 = vrot.slane %v1245_v2, 3  ;;  %v1308_v2 = vsel %vm713_vm3, %v485_v41, %v665_v45 }
 0x16a   : > { %2011 = vst [vmem:[#allocation1 + $0x6] ss:$9 sm:$0xff] %v1181_v13  ;;  %v1250_v13 = vsel %vm701_vm0, %v480_v60, %v660_v62  ;;  %v1301_v60 = vsel %vm701_vm0, %v485_v41, %v665_v45  ;;  %v486_v62 = vld [vmem:[%s10119_s27 + $0xdc] sm:$0xf] }
 0x16b   : > { %2013 = vst [vmem:[#allocation1 + $0x7] ss:$9 sm:$0xff] %v1184_v14  ;;  %v1253_v14 = vrot.slane %v1251_v8, 1  ;;  %v666_v63 = vrot.slane %v486_v62, 3  ;;  %v1310_v8 = vrot.slane %v1308_v2, 3 }
 0x16d   : > { %v1320_v12 = vsel %vm713_vm3, %v486_v62, %v666_v63 }
 0x172   : > { %v10363_v29 = vld [vmem:[#allocation1] sm:$0xff] }
 0x173   : > { %2015 = vst [vmem:[#allocation1] ss:$9 sm:$0xff] %v1187_v24  ;;  %v1266_v24 = vsel %vm709_vm2, %v481_v15, %v661_v17 }
 0x174   : > { %2017 = vst [vmem:[#allocation1 + $0x1] ss:$9 sm:$0xff] %v1190_v25  ;;  %v1269_v25 = vsel %vm713_vm3, %v481_v15, %v661_v17  ;;  %v1268_v28 = vrot.slane %v1266_v24, 2  ;;  %v489_v24 = vld [vmem:[%s10119_s27 + $0xe8] sm:$0xf] }
 0x175   : > { %2019 = vst [vmem:[#allocation1 + $0x2] ss:$9 sm:$0xff] %v1193_v26  ;;  %v1262_v26 = vsel %vm701_vm0, %v481_v15, %v661_v17 }
 0x176   : > { %2021 = vst [vmem:[#allocation1 + $0x3] ss:$9 sm:$0xff] %v1196_v27  ;;  %v1265_v27 = vrot.slane %v1263_v21, 1  ;;  %v488_v21 = vld [vmem:[%s10119_s27 + $0xe4] sm:$0xf] }
 0x177   : > { %2022 = vst [vmem:[#allocation1 + $0x4] ss:$9 sm:$0xff] %v1199_v32 }
 0x178   : > { %2023 = vst [vmem:[#allocation1 + $0x5] ss:$9 sm:$0xff] %v1202_v33  ;;  %v1271_v33 = vrot.slane %v1269_v25, 3 }
 0x179   : > { %2025 = vst [vmem:[#allocation1 + $0x6] ss:$9 sm:$0xff] %v1205_v35  ;;  %v1278_v35 = vsel %vm709_vm2, %v482_v18, %v662_v20  ;;  %v1322_v18 = vrot.slane %v1320_v12, 3 }
 0x17a   : > { %2027 = vst [vmem:[#allocation1 + $0x7] ss:$9 sm:$0xff] %v1208_v37  ;;  %v1277_v37 = vrot.slane %v1275_v31, 1  ;;  %v1280_v39 = vrot.slane %v1278_v35, 2 }
 0x181   : > { %v10376_v51 = vld [vmem:[#allocation1] sm:$0xff] }
 0x182   : > { %2030 = vst [vmem:[#allocation1] ss:$9 sm:$0xff] %v1211_v43  ;;  %v484_v43 = vld [vmem:[%s10119_s27 + $0xd4] sm:$0x1] }
 0x183   : > { %2031 = vst [vmem:[#allocation1 + $0x1] ss:$9 sm:$0xff] %v1214_v46  ;;  %v1283_v46 = vrot.slane %v1281_v42, 3  ;;  %v664_v49 = vrot.slane %v484_v43, 3 }
 0x184   : > { %2033 = vst [vmem:[#allocation1 + $0x2] ss:$9 sm:$0xff] %v1217_v47  ;;  %v1290_v47 = vsel %vm709_vm2, %v483_v38, %v663_v40 }
 0x185   : > { %2035 = vst [vmem:[#allocation1 + $0x3] ss:$9 sm:$0xff] %v1220_v48  ;;  %v1293_v48 = vsel %vm713_vm3, %v483_v38, %v663_v40  ;;  %v1298_v59 = vsel %vm701_vm0, %v484_v43, %v664_v49 }
 0x186   : > { %2037 = vst [vmem:[#allocation1 + $0x4] ss:$9 sm:$0xff] %v1223_v52  ;;  %v1286_v52 = vsel %vm701_vm0, %v483_v38, %v663_v40  ;;  %v1295_v57 = vrot.slane %v1293_v48, 3 }
 0x187   : > { %2038 = vst [vmem:[#allocation1 + $0x5] ss:$9 sm:$0xff] %v1226_v55  ;;  %v1292_v55 = vrot.slane %v1290_v47, 2  ;;  %v491_v47 = vld [vmem:[%s10119_s27 + $0xf0] sm:$0xf] }
 0x188   : > { %2040 = vst [vmem:[#allocation1 + $0x6] ss:$9 sm:$0xff] %v1229_v56 }
 0x189   : > { %2042 = vst [vmem:[#allocation1 + $0x7] ss:$9 sm:$0xff] %v1232_v58  ;;  %v1302_v58 = vsel %vm705_vm1, %v485_v41, %v665_v45  ;;  %v490_v45 = vld [vmem:[%s10119_s27 + $0xec] sm:$0xf] }
 0x18a   : > { %v1304_v61 = vrot.slane %v1302_v58, 1 }
 0x190   : > { %v10388_v10 = vld [vmem:[#allocation1] sm:$0xff] }
 0x191   : > { %2045 = vst [vmem:[#allocation1] ss:$9 sm:$0xff] %v1235_v0  ;;  %v487_v0 = vld [vmem:[%s10119_s27 + $0xe0] sm:$0xf] }
 0x192   : > { %2046 = vst [vmem:[#allocation1 + $0x1] ss:$9 sm:$0xff] %v1238_v3  ;;  %v667_v3 = vrot.slane %v487_v0, 3 }
 0x193   : > { %2048 = vst [vmem:[#allocation1 + $0x2] ss:$9 sm:$0xff] %v1241_v4  ;;  %v1307_v4 = vrot.slane %v1305_v1, 2 }
 0x194   : > { %2050 = vst [vmem:[#allocation1 + $0x3] ss:$9 sm:$0xff] %v1244_v5  ;;  %v1314_v5 = vsel %vm705_vm1, %v486_v62, %v666_v63  ;;  %v1326_v17 = vsel %vm705_vm1, %v487_v0, %v667_v3  ;;  %v1325_v19 = vsel %vm701_vm0, %v487_v0, %v667_v3  ;;  %v1329_v25 = vsel %vm709_vm2, %v487_v0, %v667_v3 }
 0x195   : > { %2052 = vst [vmem:[#allocation1 + $0x4] ss:$9 sm:$0xff] %v1247_v11  ;;  %v1317_v11 = vsel %vm709_vm2, %v486_v62, %v666_v63  ;;  %v1328_v20 = vrot.slane %v1326_v17, 1  ;;  %v494_v17 = vld [vmem:[%s10119_s27 + $0xfc] sm:$0xf] }
 0x196   : > { %2053 = vst [vmem:[#allocation1 + $0x5] ss:$9 sm:$0xff] %v1250_v13  ;;  %v1313_v13 = vsel %vm701_vm0, %v486_v62, %v666_v63 }
 0x197   : > { %2055 = vst [vmem:[#allocation1 + $0x6] ss:$9 sm:$0xff] %v1253_v14  ;;  %v1316_v14 = vrot.slane %v1314_v5, 1 }
 0x198   : > { %2057 = vst [vmem:[#allocation1 + $0x7] ss:$9 sm:$0xff] %v1256_v16  ;;  %v1319_v16 = vrot.slane %v1317_v11, 2  ;;  %v10455_v11 = vpop.f32.mrf.mxu0 }
 0x19f   : > { %v10400_v32 = vld [vmem:[#allocation1] sm:$0xff] }
 0x1a0   : > { %2060 = vst [vmem:[#allocation1] ss:$9 sm:$0xff] %v1259_v23  ;;  %v668_v23 = vrot.slane %v488_v21, 3 }
 0x1a1   : > { %2061 = vst [vmem:[#allocation1 + $0x1] ss:$9 sm:$0xff] %v1262_v26  ;;  %v1332_v26 = vsel %vm713_vm3, %v487_v0, %v667_v3 }
 0x1a2   : > { %2063 = vst [vmem:[#allocation1 + $0x2] ss:$9 sm:$0xff] %v1265_v27  ;;  %v669_v27 = vrot.slane %v489_v24, 3  ;;  %v1338_v31 = vsel %vm705_vm1, %v488_v21, %v668_v23  ;;  %v1341_v35 = vsel %vm709_vm2, %v488_v21, %v668_v23 }
 0x1a3   : > { %2065 = vst [vmem:[#allocation1 + $0x3] ss:$9 sm:$0xff] %v1268_v28  ;;  %v1331_v28 = vrot.slane %v1329_v25, 2  ;;  %v1340_v38 = vrot.slane %v1338_v31, 1  ;;  %v1343_v40 = vrot.slane %v1341_v35, 2  ;;  %v10468_v35 = vpop.f32.mrf.mxu0  ;;  %2493 = vmatmul.bf16.gmra.mxu0 %v10291_v34 }
 0x1a4   : > { %2067 = vst [vmem:[#allocation1 + $0x4] ss:$9 sm:$0xff] %v1271_v33  ;;  %v1334_v33 = vrot.slane %v1332_v26, 3  ;;  %v1350_v41 = vsel %vm705_vm1, %v489_v24, %v669_v27  ;;  %v1349_v43 = vsel %vm701_vm0, %v489_v24, %v669_v27  ;;  %v1353_v48 = vsel %vm709_vm2, %v489_v24, %v669_v27 }
 0x1a5   : > { %2068 = vst [vmem:[#allocation1 + $0x5] ss:$9 sm:$0xff] %v1274_v36  ;;  %v1344_v36 = vsel %vm713_vm3, %v488_v21, %v668_v23  ;;  %v1352_v44 = vrot.slane %v1350_v41, 1  ;;  %v1356_v49 = vsel %vm713_vm3, %v489_v24, %v669_v27  ;;  %v674_v26 = vrot.slane %v494_v17, 3 }
 0x1a6   : > { %2070 = vst [vmem:[#allocation1 + $0x6] ss:$9 sm:$0xff] %v1277_v37  ;;  %v1337_v37 = vsel %vm701_vm0, %v488_v21, %v668_v23  ;;  %v1346_v42 = vrot.slane %v1344_v36, 3  ;;  %v495_v36 = vld [vmem:[%s10119_s27 + $0x100] sm:$0xf] }
 0x1a7   : > { %2072 = vst [vmem:[#allocation1 + $0x7] ss:$9 sm:$0xff] %v1280_v39  ;;  %v1407_v41 = vsel %vm713_vm3, %v494_v17, %v674_v26 }
 0x1ae   : > { %v10412_v56 = vld [vmem:[#allocation1] sm:$0xff] }
 0x1af   : > { %2075 = vst [vmem:[#allocation1] ss:$9 sm:$0xff] %v1283_v46  ;;  %v670_v46 = vrot.slane %v490_v45, 3 }
 0x1b0   : > { %2076 = vst [vmem:[#allocation1 + $0x1] ss:$9 sm:$0xff] %v1286_v52  ;;  %v671_v52 = vrot.slane %v491_v47, 3 }
 0x1b1   : > { %2078 = vst [vmem:[#allocation1 + $0x2] ss:$9 sm:$0xff] %v1289_v54  ;;  %v1355_v54 = vrot.slane %v1353_v48, 2  ;;  %v1365_v58 = vsel %vm709_vm2, %v490_v45, %v670_v46 }
 0x1b2   : > { %2080 = vst [vmem:[#allocation1 + $0x3] ss:$9 sm:$0xff] %v1292_v55  ;;  %v1362_v55 = vsel %vm705_vm1, %v490_v45, %v670_v46  ;;  %v1367_v63 = vrot.slane %v1365_v58, 2  ;;  %v1374_v0 = vsel %vm705_vm1, %v491_v47, %v671_v52  ;;  %v1373_v2 = vsel %vm701_vm0, %v491_v47, %v671_v52 }
 0x1b3   : > { %2082 = vst [vmem:[#allocation1 + $0x4] ss:$9 sm:$0xff] %v1295_v57  ;;  %v1358_v57 = vrot.slane %v1356_v49, 3  ;;  %v1376_v3 = vrot.slane %v1374_v0, 1  ;;  %v1380_v12 = vsel %vm713_vm3, %v491_v47, %v671_v52 }
 0x1b4   : > { %2083 = vst [vmem:[#allocation1 + $0x5] ss:$9 sm:$0xff] %v1298_v59  ;;  %v1368_v59 = vsel %vm713_vm3, %v490_v45, %v670_v46 }
 0x1b5   : > { %2084 = vst [vmem:[#allocation1 + $0x6] ss:$9 sm:$0xff] %v1301_v60  ;;  %v1361_v60 = vsel %vm701_vm0, %v490_v45, %v670_v46  ;;  %v1370_v1 = vrot.slane %v1368_v59, 3  ;;  %v1409_v46 = vrot.slane %v1407_v41, 3  ;;  %v10483_v59 = vpop.f32.mrf.mxu0 }
 0x1b6   : > { %2086 = vst [vmem:[#allocation1 + $0x7] ss:$9 sm:$0xff] %v1304_v61  ;;  %v1364_v61 = vrot.slane %v1362_v55, 1 }
 0x1bd   : > { %v10425_v15 = vld [vmem:[#allocation1] sm:$0xff] }
 0x1be   : > { %2089 = vst [vmem:[#allocation1] ss:$9 sm:$0xff] %v1307_v4  ;;  %v492_v4 = vld [vmem:[%s10119_s27 + $0xf4] sm:$0xf] }
 0x1bf   : > { %2091 = vst [vmem:[#allocation1 + $0x1] ss:$9 sm:$0xff] %v1310_v8  ;;  %v672_v5 = vrot.slane %v492_v4, 3  ;;  %v1377_v8 = vsel %vm709_vm2, %v491_v47, %v671_v52 }
 0x1c0   : > { %2092 = vst [vmem:[#allocation1 + $0x2] ss:$9 sm:$0xff] %v1313_v13  ;;  %v493_v13 = vld [vmem:[%s10119_s27 + $0xf8] sm:$0x1] }
 0x1c1   : > { %2094 = vst [vmem:[#allocation1 + $0x3] ss:$9 sm:$0xff] %v1316_v14  ;;  %v1379_v14 = vrot.slane %v1377_v8, 2  ;;  %v673_v21 = vrot.slane %v493_v13, 3  ;;  %v1385_v23 = vsel %vm701_vm0, %v492_v4, %v672_v5 }
 0x1c2   : > { %2096 = vst [vmem:[#allocation1 + $0x4] ss:$9 sm:$0xff] %v1319_v16  ;;  %v1386_v16 = vsel %vm705_vm1, %v492_v4, %v672_v5 }
 0x1c3   : > { %2098 = vst [vmem:[#allocation1 + $0x5] ss:$9 sm:$0xff] %v1322_v18  ;;  %v1382_v18 = vrot.slane %v1380_v12, 3  ;;  %v1388_v24 = vrot.slane %v1386_v16, 1  ;;  %v1397_v31 = vsel %vm701_vm0, %v493_v13, %v673_v21  ;;  %v10495_v16 = vpop.f32.mrf.mxu0  ;;  %2498 = vmatmul.bf16.gmra.mxu0 %v10303_v53 }
 0x1c4   : > { %2099 = vst [vmem:[#allocation1 + $0x6] ss:$9 sm:$0xff] %v1325_v19  ;;  %v1389_v19 = vsel %vm709_vm2, %v492_v4, %v672_v5 }
 0x1c5   : > { %2101 = vst [vmem:[#allocation1 + $0x7] ss:$9 sm:$0xff] %v1328_v20  ;;  %v1392_v20 = vsel %vm713_vm3, %v492_v4, %v672_v5  ;;  %v1391_v27 = vrot.slane %v1389_v19, 2 }
 0x1cc   : > { %v10437_v39 = vld [vmem:[#allocation1] sm:$0xff] }
 0x1cd   : > { %2104 = vst [vmem:[#allocation1] ss:$9 sm:$0xff] %v1331_v28  ;;  %v1394_v28 = vrot.slane %v1392_v20, 3 }
 0x1ce   : > { %2106 = vst [vmem:[#allocation1 + $0x1] ss:$9 sm:$0xff] %v1334_v33  ;;  %v1400_v33 = vsel %vm701_vm0, %v494_v17, %v674_v26 }
 0x1cf   : > { %2107 = vst [vmem:[#allocation1 + $0x2] ss:$9 sm:$0xff] %v1337_v37  ;;  %v675_v37 = vrot.slane %v495_v36, 3 }
 0x1d0   : > { %2109 = vst [vmem:[#allocation1 + $0x3] ss:$9 sm:$0xff] %v1340_v38  ;;  %v1401_v38 = vsel %vm705_vm1, %v494_v17, %v674_v26 }
 0x1d1   : > { %2111 = vst [vmem:[#allocation1 + $0x4] ss:$9 sm:$0xff] %v1343_v40  ;;  %v1404_v40 = vsel %vm709_vm2, %v494_v17, %v674_v26  ;;  %v1413_v45 = vsel %vm705_vm1, %v495_v36, %v675_v37  ;;  %v1416_v34 = vsel %vm709_vm2, %v495_v36, %v675_v37  ;;  %v1419_v47 = vsel %vm713_vm3, %v495_v36, %v675_v37 }
 0x1d2   : > { %2113 = vst [vmem:[#allocation1 + $0x5] ss:$9 sm:$0xff] %v1346_v42  ;;  %v1403_v42 = vrot.slane %v1401_v38, 1  ;;  %v1412_v52 = vsel %vm701_vm0, %v495_v36, %v675_v37  ;;  %v1418_v55 = vrot.slane %v1416_v34, 2  ;;  %v500_v36 = vld [vmem:[%s10119_s27 + $0x114] sm:$0xf] }
 0x1d3   : > { %2114 = vst [vmem:[#allocation1 + $0x6] ss:$9 sm:$0xff] %v1349_v43  ;;  %v496_v43 = vld [vmem:[%s10119_s27 + $0x104] sm:$0xf] }
 0x1d4   : > { %2116 = vst [vmem:[#allocation1 + $0x7] ss:$9 sm:$0xff] %v1352_v44  ;;  %v1406_v44 = vrot.slane %v1404_v40, 2  ;;  %v676_v49 = vrot.slane %v496_v43, 3 }
 0x1d6   : > { %v1424_v58 = vsel %vm701_vm0, %v496_v43, %v676_v49  ;;  %v1428_v0 = vsel %vm709_vm2, %v496_v43, %v676_v49 }
 0x1d7   : > { %v1430_v4 = vrot.slane %v1428_v0, 2  ;;  %v502_v0 = vld [vmem:[%s10119_s27 + $0x11c] sm:$0x1] }
 0x1db   : > { %v10449_v62 = vld [vmem:[#allocation1] sm:$0xff] }
 0x1dc   : > { %2119 = vst [vmem:[#allocation1] ss:$9 sm:$0xff] %v1355_v54  ;;  %v1415_v54 = vrot.slane %v1413_v45, 1 }
 0x1dd   : > { %2121 = vst [vmem:[#allocation1 + $0x1] ss:$9 sm:$0xff] %v1358_v57  ;;  %v1421_v57 = vrot.slane %v1419_v47, 3 }
 0x1de   : > { %2122 = vst [vmem:[#allocation1 + $0x2] ss:$9 sm:$0xff] %v1361_v60  ;;  %v497_v60 = vld [vmem:[%s10119_s27 + $0x108] sm:$0xf] }
 0x1df   : > { %2124 = vst [vmem:[#allocation1 + $0x3] ss:$9 sm:$0xff] %v1364_v61  ;;  %v677_v61 = vrot.slane %v497_v60, 3 }
 0x1e0   : > { %2126 = vst [vmem:[#allocation1 + $0x4] ss:$9 sm:$0xff] %v1367_v63  ;;  %v1425_v63 = vsel %vm705_vm1, %v496_v43, %v676_v49 }
 0x1e1   : > { %2128 = vst [vmem:[#allocation1 + $0x5] ss:$9 sm:$0xff] %v1370_v1  ;;  %v1431_v1 = vsel %vm713_vm3, %v496_v43, %v676_v49  ;;  %v1437_v5 = vsel %vm705_vm1, %v497_v60, %v677_v61  ;;  %v1440_v12 = vsel %vm709_vm2, %v497_v60, %v677_v61  ;;  %v1443_v13 = vsel %vm713_vm3, %v497_v60, %v677_v61 }
 0x1e2   : > { %2129 = vst [vmem:[#allocation1 + $0x6] ss:$9 sm:$0xff] %v1373_v2  ;;  %v1427_v2 = vrot.slane %v1425_v63, 1  ;;  %v1433_v8 = vrot.slane %v1431_v1, 3  ;;  %v1439_v19 = vrot.slane %v1437_v5, 1  ;;  %v1442_v20 = vrot.slane %v1440_v12, 2 }
 0x1e3   : > { %2131 = vst [vmem:[#allocation1 + $0x7] ss:$9 sm:$0xff] %v1376_v3  ;;  %v498_v3 = vld [vmem:[%s10119_s27 + $0x10c] sm:$0xf]  ;;  %v1445_v21 = vrot.slane %v1443_v13, 3 }
 0x1e4   : > { %v678_v17 = vrot.slane %v498_v3, 3 }
 0x1e6   : > { %v1449_v53 = vsel %vm705_vm1, %v498_v3, %v678_v17 }
 0x1ea   : > { %v10464_v25 = vld [vmem:[#allocation1] sm:$0xff] }
 0x1eb   : > { %2134 = vst [vmem:[#allocation1] ss:$9 sm:$0xff] %v1379_v14 }
 0x1ec   : > { %2136 = vst [vmem:[#allocation1 + $0x1] ss:$9 sm:$0xff] %v1382_v18  ;;  %v1436_v18 = vsel %vm701_vm0, %v497_v60, %v677_v61 }
 0x1ed   : > { %2137 = vst [vmem:[#allocation1 + $0x2] ss:$9 sm:$0xff] %v1385_v23  ;;  %v1448_v23 = vsel %vm701_vm0, %v498_v3, %v678_v17 }
 0x1ee   : > { %2139 = vst [vmem:[#allocation1 + $0x3] ss:$9 sm:$0xff] %v1388_v24  ;;  %v499_v24 = vld [vmem:[%s10119_s27 + $0x110] sm:$0xf] }
 0x1ef   : > { %2141 = vst [vmem:[#allocation1 + $0x4] ss:$9 sm:$0xff] %v1391_v27  ;;  %v679_v26 = vrot.slane %v499_v24, 3  ;;  %v10502_v27 = vpop.f32.mrf.mxu0 }
 0x1f0   : > { %2143 = vst [vmem:[#allocation1 + $0x5] ss:$9 sm:$0xff] %v1394_v28  ;;  %v1452_v28 = vsel %vm709_vm2, %v498_v3, %v678_v17 }
 0x1f1   : > { %2144 = vst [vmem:[#allocation1 + $0x6] ss:$9 sm:$0xff] %v1397_v31  ;;  %v1455_v31 = vsel %vm713_vm3, %v498_v3, %v678_v17  ;;  %v1454_v37 = vrot.slane %v1452_v28, 2  ;;  %v1461_v38 = vsel %vm705_vm1, %v499_v24, %v679_v26  ;;  %v1464_v41 = vsel %vm709_vm2, %v499_v24, %v679_v26 }
 0x1f2   : > { %2145 = vst [vmem:[#allocation1 + $0x7] ss:$9 sm:$0xff] %v1400_v33  ;;  %v1451_v33 = vrot.slane %v1449_v53, 1  ;;  %v1457_v40 = vrot.slane %v1455_v31, 3  ;;  %v1460_v45 = vsel %vm701_vm0, %v499_v24, %v679_v26  ;;  %v1466_v34 = vrot.slane %v1464_v41, 2 }
 0x1f7   : > { %v10513_v49 = vpop.f32.mrf.mxu0  ;;  %2503 = vmatmul.bf16.gmra.mxu0 %v10314_v9 }
 0x1f9   : > { %v10479_v48 = vld [vmem:[#allocation1] sm:$0xff] }
 0x1fa   : > { %2148 = vst [vmem:[#allocation1] ss:$9 sm:$0xff] %v1403_v42  ;;  %v1467_v42 = vsel %vm713_vm3, %v499_v24, %v679_v26 }
 0x1fb   : > { %2150 = vst [vmem:[#allocation1 + $0x1] ss:$9 sm:$0xff] %v1406_v44  ;;  %v680_v44 = vrot.slane %v500_v36, 3  ;;  %v1469_v47 = vrot.slane %v1467_v42, 3 }
 0x1fc   : > { %2152 = vst [vmem:[#allocation1 + $0x2] ss:$9 sm:$0xff] %v1409_v46  ;;  %v1463_v46 = vrot.slane %v1461_v38, 1 }
 0x1fd   : > { %2153 = vst [vmem:[#allocation1 + $0x3] ss:$9 sm:$0xff] %v1412_v52  ;;  %v1472_v52 = vsel %vm701_vm0, %v500_v36, %v680_v44  ;;  %v1479_v60 = vsel %vm713_vm3, %v500_v36, %v680_v44 }
 0x1fe   : > { %2155 = vst [vmem:[#allocation1 + $0x4] ss:$9 sm:$0xff] %v1415_v54  ;;  %v501_v54 = vld [vmem:[%s10119_s27 + $0x118] sm:$0xf] }
 0x1ff   : > { %2157 = vst [vmem:[#allocation1 + $0x5] ss:$9 sm:$0xff] %v1418_v55  ;;  %v681_v55 = vrot.slane %v501_v54, 3  ;;  %v10521_v63 = vpop.f32.mrf.mxu0 }
 0x200   : > { %2159 = vst [vmem:[#allocation1 + $0x6] ss:$9 sm:$0xff] %v1421_v57  ;;  %v1473_v57 = vsel %vm705_vm1, %v500_v36, %v680_v44 }
 0x201   : > { %2160 = vst [vmem:[#allocation1 + $0x7] ss:$9 sm:$0xff] %v1424_v58  ;;  %v1476_v58 = vsel %vm709_vm2, %v500_v36, %v680_v44  ;;  %v1475_v61 = vrot.slane %v1473_v57, 1  ;;  %v1485_v1 = vsel %vm705_vm1, %v501_v54, %v681_v55  ;;  %v1488_v3 = vsel %vm709_vm2, %v501_v54, %v681_v55 }
 0x202   : > { %v1478_v9 = vrot.slane %v1476_v58, 2  ;;  %v1484_v12 = vsel %vm701_vm0, %v501_v54, %v681_v55  ;;  %v1487_v13 = vrot.slane %v1485_v1, 1  ;;  %v1490_v17 = vrot.slane %v1488_v3, 2 }
 0x207   : > { %v10533_v24 = vpop.f32.mrf.mxu0  ;;  %2508 = vmatmul.bf16.gmra.mxu0 %v10327_v30 }
 0x208   : > { %v10493_v14 = vld [vmem:[#allocation1] sm:$0xff] }
 0x209   : > { %2163 = vst [vmem:[#allocation1] ss:$9 sm:$0xff] %v1427_v2  ;;  %v1481_v2 = vrot.slane %v1479_v60, 3 }
 0x20a   : > { %2165 = vst [vmem:[#allocation1 + $0x1] ss:$9 sm:$0xff] %v1430_v4  ;;  %v1491_v4 = vsel %vm713_vm3, %v501_v54, %v681_v55  ;;  %v506_v55 = vld [vmem:[%s10119_s27 + $0x12c] sm:$0xf] }
 0x20b   : > { %2167 = vst [vmem:[#allocation1 + $0x2] ss:$9 sm:$0xff] %v1433_v8  ;;  %v682_v8 = vrot.slane %v502_v0, 3  ;;  %v686_v57 = vrot.slane %v506_v55, 3 }
 0x20c   : > { %2168 = vst [vmem:[#allocation1 + $0x3] ss:$9 sm:$0xff] %v1436_v18  ;;  %v503_v18 = vld [vmem:[%s10119_s27 + $0x120] sm:$0xf] }
 0x20d   : > { %2170 = vst [vmem:[#allocation1 + $0x4] ss:$9 sm:$0xff] %v1439_v19  ;;  %v1493_v19 = vrot.slane %v1491_v4, 3  ;;  %v1536_v3 = vsel %vm705_vm1, %v506_v55, %v686_v57 }
 0x20e   : > { %2172 = vst [vmem:[#allocation1 + $0x5] ss:$9 sm:$0xff] %v1442_v20  ;;  %v1496_v20 = vsel %vm701_vm0, %v502_v0, %v682_v8  ;;  %v1539_v8 = vsel %vm709_vm2, %v506_v55, %v686_v57 }
 0x20f   : > { %2174 = vst [vmem:[#allocation1 + $0x6] ss:$9 sm:$0xff] %v1445_v21  ;;  %v683_v21 = vrot.slane %v503_v18, 3  ;;  %v10545_v44 = vpop.f32.mrf.mxu0 }
 0x210   : > { %2175 = vst [vmem:[#allocation1 + $0x7] ss:$9 sm:$0xff] %v1448_v23  ;;  %v504_v23 = vld [vmem:[%s10119_s27 + $0x124] sm:$0xf] }
 0x211   : > { %v684_v26 = vrot.slane %v504_v23, 3  ;;  %v1500_v53 = vsel %vm705_vm1, %v503_v18, %v683_v21  ;;  %v1503_v28 = vsel %vm709_vm2, %v503_v18, %v683_v21  ;;  %v1506_v31 = vsel %vm713_vm3, %v503_v18, %v683_v21 }
 0x212   : > { %v1502_v36 = vrot.slane %v1500_v53, 1 }
 0x213   : > { %v1512_v38 = vsel %vm705_vm1, %v504_v23, %v684_v26  ;;  %v1515_v41 = vsel %vm709_vm2, %v504_v23, %v684_v26  ;;  %v1518_v42 = vsel %vm713_vm3, %v504_v23, %v684_v26 }
 0x217   : > { %v10510_v43 = vld [vmem:[#allocation1] sm:$0xff] }
 0x218   : > { %2178 = vst [vmem:[#allocation1] ss:$9 sm:$0xff] %v1451_v33  ;;  %v1499_v33 = vsel %vm701_vm0, %v503_v18, %v683_v21  ;;  %v507_v18 = vld [vmem:[%s10119_s27 + $0x130] sm:$0xf] }
 0x219   : > { %2180 = vst [vmem:[#allocation1 + $0x1] ss:$9 sm:$0xff] %v1454_v37  ;;  %v1505_v37 = vrot.slane %v1503_v28, 2 }
 0x21a   : > { %2182 = vst [vmem:[#allocation1 + $0x2] ss:$9 sm:$0xff] %v1457_v40  ;;  %v1508_v40 = vrot.slane %v1506_v31, 3 }
 0x21b   : > { %2183 = vst [vmem:[#allocation1 + $0x3] ss:$9 sm:$0xff] %v1460_v45  ;;  %v1511_v45 = vsel %vm701_vm0, %v504_v23, %v684_v26  ;;  %v687_v23 = vrot.slane %v507_v18, 3  ;;  %v508_v26 = vld [vmem:[%s10119_s27 + $0x134] sm:$0xf] }
 0x21c   : > { %2185 = vst [vmem:[#allocation1 + $0x4] ss:$9 sm:$0xff] %v1463_v46  ;;  %v1514_v46 = vrot.slane %v1512_v38, 1  ;;  %v688_v53 = vrot.slane %v508_v26, 3 }
 0x21d   : > { %2187 = vst [vmem:[#allocation1 + $0x5] ss:$9 sm:$0xff] %v1466_v34  ;;  %v505_v34 = vld [vmem:[%s10119_s27 + $0x128] sm:$0xf]  ;;  %v1548_v28 = vsel %vm705_vm1, %v507_v18, %v687_v23  ;;  %v1551_v31 = vsel %vm709_vm2, %v507_v18, %v687_v23 }
 0x21e   : > { %2189 = vst [vmem:[#allocation1 + $0x6] ss:$9 sm:$0xff] %v1469_v47  ;;  %v1517_v47 = vrot.slane %v1515_v41, 2  ;;  %v685_v54 = vrot.slane %v505_v34, 3  ;;  %v1553_v38 = vrot.slane %v1551_v31, 2 }
 0x21f   : > { %2190 = vst [vmem:[#allocation1 + $0x7] ss:$9 sm:$0xff] %v1472_v52  ;;  %v1520_v52 = vrot.slane %v1518_v42, 3  ;;  %v1563_v42 = vsel %vm709_vm2, %v508_v26, %v688_v53 }
 0x220   : > { %v1524_v58 = vsel %vm705_vm1, %v505_v34, %v685_v54  ;;  %v1527_v60 = vsel %vm709_vm2, %v505_v34, %v685_v54  ;;  %v1530_v0 = vsel %vm713_vm3, %v505_v34, %v685_v54 }
 0x221   : > { %v1526_v1 = vrot.slane %v1524_v58, 1  ;;  %v1532_v4 = vrot.slane %v1530_v0, 3 }
 0x226   : > { %v10527_v5 = vld [vmem:[#allocation1] sm:$0xff] }
 0x227   : > { %2193 = vst [vmem:[#allocation1] ss:$9 sm:$0xff] %v1475_v61  ;;  %v10552_v61 = vpop.f32.mrf.mxu0  ;;  %2513 = vmatmul.bf16.gmra.mxu0 %v10339_v50  ;;  %v1538_v50 = vrot.slane %v1536_v3, 1 }
 0x228   : > { %2195 = vst [vmem:[#allocation1 + $0x1] ss:$9 sm:$0xff] %v1478_v9  ;;  %v1523_v9 = vsel %vm701_vm0, %v505_v34, %v685_v54  ;;  %v1566_v34 = vsel %vm713_vm3, %v508_v26, %v688_v53  ;;  %v509_v54 = vld [vmem:[%s10119_s27 + $0x138] sm:$0xf] }
 0x229   : > { %2197 = vst [vmem:[#allocation1 + $0x2] ss:$9 sm:$0xff] %v1481_v2  ;;  %v1529_v2 = vrot.slane %v1527_v60, 2  ;;  %v689_v58 = vrot.slane %v509_v54, 3  ;;  %v510_v60 = vld [vmem:[%s10119_s27 + $0x13c] sm:$0xf] }
 0x22a   : > { %2198 = vst [vmem:[#allocation1 + $0x3] ss:$9 sm:$0xff] %v1484_v12 }
 0x22b   : > { %2200 = vst [vmem:[#allocation1 + $0x4] ss:$9 sm:$0xff] %v1487_v13  ;;  %v1542_v13 = vsel %vm713_vm3, %v506_v55, %v686_v57  ;;  %v1571_v3 = vsel %vm701_vm0, %v509_v54, %v689_v58 }
 0x22c   : > { %2202 = vst [vmem:[#allocation1 + $0x5] ss:$9 sm:$0xff] %v1490_v17  ;;  %v1535_v17 = vsel %vm701_vm0, %v506_v55, %v686_v57  ;;  %v1565_v55 = vrot.slane %v1563_v42, 2  ;;  %v1568_v57 = vrot.slane %v1566_v34, 3 }
 0x22d   : > { %2204 = vst [vmem:[#allocation1 + $0x6] ss:$9 sm:$0xff] %v1493_v19  ;;  %v1541_v19 = vrot.slane %v1539_v8, 2 }
 0x22e   : > { %2205 = vst [vmem:[#allocation1 + $0x7] ss:$9 sm:$0xff] %v1496_v20  ;;  %v1544_v20 = vrot.slane %v1542_v13, 3 }
 0x22f   : > { %v10564_v21 = vpop.f32.mrf.mxu0 }
 0x235   : > { %v10542_v30 = vld [vmem:[#allocation1] sm:$0xff] }
 0x236   : > { %2207 = vst [vmem:[#allocation1] ss:$9 sm:$0xff] %v1499_v33  ;;  %v1554_v33 = vsel %vm713_vm3, %v507_v18, %v687_v23 }
 0x237   : > { %2209 = vst [vmem:[#allocation1 + $0x1] ss:$9 sm:$0xff] %v1502_v36  ;;  %v1547_v36 = vsel %vm701_vm0, %v507_v18, %v687_v23  ;;  %v1556_v41 = vrot.slane %v1554_v33, 3  ;;  %v511_v33 = vld [vmem:[%s10119_s27 + $0x140] sm:$0x1] }
 0x238   : > { %2211 = vst [vmem:[#allocation1 + $0x2] ss:$9 sm:$0xff] %v1505_v37  ;;  %v1550_v37 = vrot.slane %v1548_v28, 1 }
 0x239   : > { %2213 = vst [vmem:[#allocation1 + $0x3] ss:$9 sm:$0xff] %v1508_v40  ;;  %v1560_v40 = vsel %vm705_vm1, %v508_v26, %v688_v53 }
 0x23a   : > { %2214 = vst [vmem:[#allocation1 + $0x4] ss:$9 sm:$0xff] %v1511_v45 }
 0x23b   : > { %2216 = vst [vmem:[#allocation1 + $0x5] ss:$9 sm:$0xff] %v1514_v46  ;;  %v10575_v46 = vpop.f32.mrf.mxu0  ;;  %2518 = vmatmul.bf16.gmra.mxu0 %v10351_v6  ;;  %v690_v6 = vrot.slane %v510_v60, 3 }
 0x23c   : > { %2218 = vst [vmem:[#allocation1 + $0x6] ss:$9 sm:$0xff] %v1517_v47  ;;  %v1559_v47 = vsel %vm701_vm0, %v508_v26, %v688_v53  ;;  %v512_v53 = vld [vmem:[%s10119_s27 + $0x144] sm:$0xf] }
 0x23d   : > { %2220 = vst [vmem:[#allocation1 + $0x7] ss:$9 sm:$0xff] %v1520_v52  ;;  %v1562_v52 = vrot.slane %v1560_v40, 1  ;;  %v1584_v13 = vsel %vm705_vm1, %v510_v60, %v690_v6 }
 0x23e   : > { %v1586_v23 = vrot.slane %v1584_v13, 1  ;;  %v515_v13 = vld [vmem:[%s10119_s27 + $0x150] sm:$0xf] }
 0x243   : > { %v10582_v0 = vpop.f32.mrf.mxu0 }
 0x244   : > { %v10559_v12 = vld [vmem:[#allocation1] sm:$0xff] }
 0x245   : > { %15474 = vst [vmem:[#allocation17_spill] sm:$0xff] %v10559_v12 }
 0x246   : > { %2222 = vst [vmem:[#allocation1] ss:$9 sm:$0xff] %v1523_v9  ;;  %v1572_v9 = vsel %vm705_vm1, %v509_v54, %v689_v58 }
 0x247   : > { %2224 = vst [vmem:[#allocation1 + $0x1] ss:$9 sm:$0xff] %v1526_v1  ;;  %v1575_v1 = vsel %vm709_vm2, %v509_v54, %v689_v58 }
 0x248   : > { %2226 = vst [vmem:[#allocation1 + $0x2] ss:$9 sm:$0xff] %v1529_v2  ;;  %v1578_v2 = vsel %vm713_vm3, %v509_v54, %v689_v58  ;;  %v1577_v8 = vrot.slane %v1575_v1, 2 }
 0x249   : > { %2228 = vst [vmem:[#allocation1 + $0x3] ss:$9 sm:$0xff] %v1532_v4  ;;  %v1574_v4 = vrot.slane %v1572_v9, 1 }
 0x24a   : > { %2229 = vst [vmem:[#allocation1 + $0x4] ss:$9 sm:$0xff] %v1535_v17  ;;  %v1580_v17 = vrot.slane %v1578_v2, 3  ;;  %v514_v2 = vld [vmem:[%s10119_s27 + $0x14c] sm:$0xf] }
 0x24b   : > { %2231 = vst [vmem:[#allocation1 + $0x5] ss:$9 sm:$0xff] %v1538_v50  ;;  %v1587_v50 = vsel %vm709_vm2, %v510_v60, %v690_v6  ;;  %v10595_v31 = vpop.f32.mrf.mxu0  ;;  %2523 = vmatmul.bf16.gmra.mxu0 %v10363_v29 }
 0x24c   : > { %2233 = vst [vmem:[#allocation1 + $0x6] ss:$9 sm:$0xff] %v1541_v19  ;;  %v1590_v19 = vsel %vm713_vm3, %v510_v60, %v690_v6  ;;  %v1589_v26 = vrot.slane %v1587_v50, 2  ;;  %v695_v50 = vrot.slane %v515_v13, 3 }
 0x24d   : > { %2235 = vst [vmem:[#allocation1 + $0x7] ss:$9 sm:$0xff] %v1544_v20  ;;  %v1583_v20 = vsel %vm701_vm0, %v510_v60, %v690_v6  ;;  %v1592_v28 = vrot.slane %v1590_v19, 3 }
 0x254   : > { %v10573_v45 = vld [vmem:[#allocation1] sm:$0xff] }
 0x255   : > { %15475 = vst [vmem:[#allocation18_spill] sm:$0xff] %v10573_v45 }
 0x256   : > { %2237 = vst [vmem:[#allocation1] ss:$9 sm:$0xff] %v1547_v36  ;;  %v692_v36 = vrot.slane %v512_v53, 3 }
 0x257   : > { %2239 = vst [vmem:[#allocation1 + $0x1] ss:$9 sm:$0xff] %v1550_v37  ;;  %v513_v37 = vld [vmem:[%s10119_s27 + $0x148] sm:$0xf] }
 0x258   : > { %2241 = vst [vmem:[#allocation1 + $0x2] ss:$9 sm:$0xff] %v1553_v38  ;;  %v691_v38 = vrot.slane %v511_v33, 3  ;;  %v693_v40 = vrot.slane %v513_v37, 3  ;;  %v1602_v42 = vsel %vm709_vm2, %v512_v53, %v692_v36  ;;  %v1598_v29 = vsel %vm701_vm0, %v512_v53, %v692_v36 }
 0x259   : > { %2243 = vst [vmem:[#allocation1 + $0x3] ss:$9 sm:$0xff] %v1556_v41  ;;  %v1599_v41 = vsel %vm705_vm1, %v512_v53, %v692_v36 }
 0x25a   : > { %2244 = vst [vmem:[#allocation1 + $0x4] ss:$9 sm:$0xff] %v1559_v47  ;;  %v1595_v34 = vsel %vm701_vm0, %v511_v33, %v691_v38  ;;  %v1605_v47 = vsel %vm713_vm3, %v512_v53, %v692_v36  ;;  %v1601_v54 = vrot.slane %v1599_v41, 1  ;;  %v1614_v6 = vsel %vm709_vm2, %v513_v37, %v693_v40 }
 0x25b   : > { %2246 = vst [vmem:[#allocation1 + $0x5] ss:$9 sm:$0xff] %v1562_v52  ;;  %v10604_v52 = vpop.f32.mrf.mxu0  ;;  %v1607_v60 = vrot.slane %v1605_v47, 3  ;;  %v1610_v9 = vsel %vm701_vm0, %v513_v37, %v693_v40  ;;  %v1635_v36 = vsel %vm705_vm1, %v515_v13, %v695_v50  ;;  %v1634_v41 = vsel %vm701_vm0, %v515_v13, %v695_v50 }
 0x25c   : > { %2248 = vst [vmem:[#allocation1 + $0x6] ss:$9 sm:$0xff] %v1565_v55  ;;  %v1604_v55 = vrot.slane %v1602_v42, 2  ;;  %v1637_v42 = vrot.slane %v1635_v36, 1  ;;  %v519_v36 = vld [vmem:[%s10119_s27 + $0x160] sm:$0xf] }
 0x25d   : > { %2250 = vst [vmem:[#allocation1 + $0x7] ss:$9 sm:$0xff] %v1568_v57  ;;  %v1611_v57 = vsel %vm705_vm1, %v513_v37, %v693_v40 }
 0x25e   : > { %v1613_v1 = vrot.slane %v1611_v57, 1 }
 0x264   : > { %v10590_v18 = vld [vmem:[#allocation1] sm:$0xff] }
 0x265   : > { %15476 = vst [vmem:[#allocation19_spill] sm:$0xff] %v10590_v18 }
 0x266   : > { %2252 = vst [vmem:[#allocation1] ss:$9 sm:$0xff] %v1571_v3  ;;  %v1616_v3 = vrot.slane %v1614_v6, 2 }
 0x267   : > { %2254 = vst [vmem:[#allocation1 + $0x1] ss:$9 sm:$0xff] %v1574_v4  ;;  %v694_v4 = vrot.slane %v514_v2, 3 }
 0x268   : > { %2256 = vst [vmem:[#allocation1 + $0x2] ss:$9 sm:$0xff] %v1577_v8  ;;  %v10613_v8 = vpop.f32.mrf.mxu0  ;;  %2528 = vmatmul.bf16.gmra.mxu0 %v10376_v51 }
 0x269   : > { %2258 = vst [vmem:[#allocation1 + $0x3] ss:$9 sm:$0xff] %v1580_v17  ;;  %v1617_v17 = vsel %vm713_vm3, %v513_v37, %v693_v40  ;;  %v1623_v19 = vsel %vm705_vm1, %v514_v2, %v694_v4  ;;  %v1622_v53 = vsel %vm701_vm0, %v514_v2, %v694_v4  ;;  %v1638_v37 = vsel %vm709_vm2, %v515_v13, %v695_v50 }
 0x26a   : > { %2259 = vst [vmem:[#allocation1 + $0x4] ss:$9 sm:$0xff] %v1583_v20  ;;  %v1619_v20 = vrot.slane %v1617_v17, 3  ;;  %v1640_v47 = vrot.slane %v1638_v37, 2  ;;  %v699_v37 = vrot.slane %v519_v36, 3 }
 0x26b   : > { %2261 = vst [vmem:[#allocation1 + $0x5] ss:$9 sm:$0xff] %v1586_v23  ;;  %v1626_v23 = vsel %vm709_vm2, %v514_v2, %v694_v4 }
 0x26c   : > { %2263 = vst [vmem:[#allocation1 + $0x6] ss:$9 sm:$0xff] %v1589_v26  ;;  %v1629_v26 = vsel %vm713_vm3, %v514_v2, %v694_v4  ;;  %v1628_v33 = vrot.slane %v1626_v23, 2 }
 0x26d   : > { %2265 = vst [vmem:[#allocation1 + $0x7] ss:$9 sm:$0xff] %v1592_v28  ;;  %v1625_v28 = vrot.slane %v1623_v19, 1  ;;  %v1631_v38 = vrot.slane %v1629_v26, 3  ;;  %v518_v26 = vld [vmem:[%s10119_s27 + $0x15c] sm:$0xf] }
 0x270   : > { %v10626_v40 = vpop.f32.mrf.mxu0 }
 0x274   : > { %v10608_v58 = vld [vmem:[#allocation1] sm:$0xff] }
 0x275   : > { %15477 = vst [vmem:[#allocation20_spill] sm:$0xff] %v10608_v58 }
 0x276   : > { %2267 = vst [vmem:[#allocation1] ss:$9 sm:$0xff] %v1595_v34  ;;  %v516_v34 = vld [vmem:[%s10119_s27 + $0x154] sm:$0xf] }
 0x277   : > { %2268 = vst [vmem:[#allocation1 + $0x1] ss:$9 sm:$0xff] %v1598_v29  ;;  %v696_v29 = vrot.slane %v516_v34, 3 }
 0x278   : > { %2270 = vst [vmem:[#allocation1 + $0x2] ss:$9 sm:$0xff] %v1601_v54  ;;  %v517_v54 = vld [vmem:[%s10119_s27 + $0x158] sm:$0xf]  ;;  %v10633_v6 = vpop.f32.mrf.mxu0  ;;  %2533 = vmatmul.bf16.gmra.mxu0 %v10388_v10 }
 0x279   : > { %2272 = vst [vmem:[#allocation1 + $0x3] ss:$9 sm:$0xff] %v1604_v55  ;;  %v1641_v55 = vsel %vm713_vm3, %v515_v13, %v695_v50  ;;  %v697_v57 = vrot.slane %v517_v54, 3  ;;  %v1653_v2 = vsel %vm713_vm3, %v516_v34, %v696_v29 }
 0x27a   : > { %2274 = vst [vmem:[#allocation1 + $0x4] ss:$9 sm:$0xff] %v1607_v60  ;;  %v1647_v60 = vsel %vm705_vm1, %v516_v34, %v696_v29  ;;  %v1655_v50 = vrot.slane %v1653_v2, 3 }
 0x27b   : > { %2275 = vst [vmem:[#allocation1 + $0x5] ss:$9 sm:$0xff] %v1610_v9  ;;  %v1643_v9 = vrot.slane %v1641_v55, 3  ;;  %v1649_v4 = vrot.slane %v1647_v60, 1  ;;  %v1659_v19 = vsel %vm705_vm1, %v517_v54, %v697_v57  ;;  %v1658_v10 = vsel %vm701_vm0, %v517_v54, %v697_v57 }
 0x27c   : > { %2277 = vst [vmem:[#allocation1 + $0x6] ss:$9 sm:$0xff] %v1613_v1  ;;  %v1650_v1 = vsel %vm709_vm2, %v516_v34, %v696_v29  ;;  %v1661_v23 = vrot.slane %v1659_v19, 1 }
 0x27d   : > { %2279 = vst [vmem:[#allocation1 + $0x7] ss:$9 sm:$0xff] %v1616_v3  ;;  %v1646_v3 = vsel %vm701_vm0, %v516_v34, %v696_v29  ;;  %v1652_v17 = vrot.slane %v1650_v1, 2 }
 0x284   : > { %v10623_v51 = vld [vmem:[#allocation1] sm:$0xff] }
 0x285   : > { %15478 = vst [vmem:[#allocation21_spill] sm:$0xff] %v10623_v51 }
 0x286   : > { %2282 = vst [vmem:[#allocation1] ss:$9 sm:$0xff] %v1619_v20  ;;  %v1662_v20 = vsel %vm709_vm2, %v517_v54, %v697_v57 }
 0x287   : > { %2283 = vst [vmem:[#allocation1 + $0x1] ss:$9 sm:$0xff] %v1622_v53  ;;  %v1664_v53 = vrot.slane %v1662_v20, 2  ;;  %v520_v20 = vld [vmem:[%s10119_s27 + $0x164] sm:$0x1]  ;;  %s8906_s27 = sshll.u32 %s10110_s26, 3 }
 0x288   : > { %2285 = vst [vmem:[#allocation1 + $0x2] ss:$9 sm:$0xff] %v1625_v28  ;;  %v10645_v28 = vpop.f32.mrf.mxu0 }
 0x289   : > { %2287 = vst [vmem:[#allocation1 + $0x3] ss:$9 sm:$0xff] %v1628_v33  ;;  %v698_v33 = vrot.slane %v518_v26, 3 }
 0x28a   : > { %2289 = vst [vmem:[#allocation1 + $0x4] ss:$9 sm:$0xff] %v1631_v38  ;;  %v1665_v38 = vsel %vm713_vm3, %v517_v54, %v697_v57  ;;  %v10662_v54 = vld [vmem:[%s15481_s4] ss:$0 sm:$0xff] }
 0x28b   : > { %2290 = vst [vmem:[#allocation1 + $0x5] ss:$9 sm:$0xff] %v1634_v41  ;;  %v1671_v41 = vsel %vm705_vm1, %v518_v26, %v698_v33  ;;  %v1674_v34 = vsel %vm709_vm2, %v518_v26, %v698_v33  ;;  %v1670_v29 = vsel %vm701_vm0, %v518_v26, %v698_v33 }
 0x28c   : > { %2292 = vst [vmem:[#allocation1 + $0x6] ss:$9 sm:$0xff] %v1637_v42  ;;  %v1667_v42 = vrot.slane %v1665_v38, 3  ;;  %v1673_v55 = vrot.slane %v1671_v41, 1  ;;  %v1676_v60 = vrot.slane %v1674_v34, 2 }
 0x28d   : > { %2294 = vst [vmem:[#allocation1 + $0x7] ss:$9 sm:$0xff] %v1640_v47  ;;  %v1677_v47 = vsel %vm713_vm3, %v518_v26, %v698_v33  ;;  %v700_v26 = vrot.slane %v520_v20, 3  ;;  %v2642_v33 = vmul.f32 %v10662_v54, %v10273_v7 }
 0x28e   : > { %v1679_v57 = vrot.slane %v1677_v47, 3  ;;  %v2645_v47 = vmul.f32 %v10662_v54, %v10468_v35 }
 0x290   : > { %v10656_v2 = vpop.f32.mrf.mxu0  ;;  %2538 = vmatmul.bf16.gmra.mxu0 %v10400_v32  ;;  %v10669_v32 = vld [vmem:[%s15482_s5] ss:$0 sm:$0xff] }
 0x291   : > { %v2729_v34 = vadd.f32 %v10669_v32, %v2642_v33 }
 0x294   : > { %v10640_v13 = vld [vmem:[#allocation1] sm:$0xff] }
 0x295   : > { %15479 = vst [vmem:[#allocation22_spill] sm:$0xff] %v10640_v13 }
 0x296   : > { %2297 = vst [vmem:[#allocation1] ss:$9 sm:$0xff] %v1643_v9  ;;  %v1683_v9 = vsel %vm705_vm1, %v519_v36, %v699_v37 }
 0x297   : > { %2298 = vst [vmem:[#allocation1 + $0x1] ss:$9 sm:$0xff] %v1646_v3  ;;  %v1686_v3 = vsel %vm709_vm2, %v519_v36, %v699_v37 }
 0x298   : > { %2300 = vst [vmem:[#allocation1 + $0x2] ss:$9 sm:$0xff] %v1649_v4  ;;  %v1682_v4 = vsel %vm701_vm0, %v519_v36, %v699_v37  ;;  %v1688_v19 = vrot.slane %v1686_v3, 2 }
 0x299   : > { %2302 = vst [vmem:[#allocation1 + $0x3] ss:$9 sm:$0xff] %v1652_v17  ;;  %v1685_v17 = vrot.slane %v1683_v9, 1  ;;  %v2644_v9 = vmul.f32 %v10662_v54, %v10455_v11 }
 0x29a   : > { %2304 = vst [vmem:[#allocation1 + $0x4] ss:$9 sm:$0xff] %v1655_v50  ;;  %v2643_v50 = vmul.f32 %v10662_v54, %v10282_v22 }
 0x29b   : > { %2305 = vst [vmem:[#allocation1 + $0x5] ss:$9 sm:$0xff] %v1658_v10 }
 0x29c   : > { %2307 = vst [vmem:[#allocation1 + $0x6] ss:$9 sm:$0xff] %v1661_v23  ;;  %v2730_v10 = vadd.f32 %v10669_v32, %v2643_v50  ;;  %v1689_v23 = vsel %vm713_vm3, %v519_v36, %v699_v37 }
 0x29d   : > { %2309 = vst [vmem:[#allocation1 + $0x7] ss:$9 sm:$0xff] %v1664_v53  ;;  %v10676_v53 = vpop.f32.mrf.mxu0  ;;  %v1691_v38 = vrot.slane %v1689_v23, 3  ;;  %v3235_v23 = vlaneseq }
 0x29e   : > { %v2813_v41 = vmax.f32 %v2730_v10, 0.0 }
 0x2a0   : > { %v2981_v36 = vrot.slane %v2813_v41, 2  ;;  %v2982_v37 = vrot.slane %v2813_v41, 4  ;;  %v2983_v7 = vrot.slane %v2813_v41, 6 }
 0x2a4   : > { %v10654_v1 = vld [vmem:[#allocation1] sm:$0xff] }
 0x2a5   : > { %15480 = vst [vmem:[#allocation23_spill] sm:$0xff] %v10654_v1 }
 0x2a6   : > { %2312 = vst [vmem:[#allocation1] ss:$9 sm:$0xff] %v1667_v42  ;;  %v1694_v42 = vsel %vm701_vm0, %v520_v20, %v700_v26  ;;  %v2731_v20 = vadd.f32 %v10669_v32, %v2644_v9 }
 0x2a7   : > { %2313 = vst [vmem:[#allocation1 + $0x1] ss:$9 sm:$0xff] %v1670_v29  ;;  %v10686_v29 = vpop.f32.mrf.mxu0  ;;  %2543 = vmatmul.bf16.gmra.mxu0 %v10412_v56 }
 0x2a8   : > { %2315 = vst [vmem:[#allocation1 + $0x2] ss:$9 sm:$0xff] %v1673_v55  ;;  %v2812_v55 = vmax.f32 %v2729_v34, 0.0  ;;  %v2814_v34 = vmax.f32 %v2731_v20, 0.0 }
 0x2a9   : > { %2317 = vst [vmem:[#allocation1 + $0x3] ss:$9 sm:$0xff] %v1676_v60  ;;  %v2732_v60 = vadd.f32 %v10669_v32, %v2645_v47 }
 0x2aa   : > { %2319 = vst [vmem:[#allocation1 + $0x4] ss:$9 sm:$0xff] %v1679_v57  ;;  %v2978_v35 = vrot.slane %v2812_v55, 2  ;;  %v2980_v56 = vrot.slane %v2812_v55, 6  ;;  %v2985_v9 = vrot.slane %v2814_v34, 4 }
 0x2ab   : > { %2320 = vst [vmem:[#allocation1 + $0x5] ss:$9 sm:$0xff] %v1682_v4  ;;  %v2815_v3 = vmax.f32 %v2732_v60, 0.0  ;;  %v10695_v4 = vstv %s8906_s27  ;;  %s15996_s27 = sld [smem:[#allocation146_spill]] }
 0x2ac   : > { %2322 = vst [vmem:[#allocation1 + $0x6] ss:$9 sm:$0xff] %v1685_v17  ;;  %v2979_v17 = vrot.slane %v2812_v55, 4  ;;  %vm3245_vm4 = vcmp.ge.s32.totalorder %v10695_v4, 1  ;;  %vm3255_vm5 = vcmp.le.s32.totalorder %v10695_v4, 64 }
 0x2ad   : > { %2324 = vst [vmem:[#allocation1 + $0x7] ss:$9 sm:$0xff] %v1688_v19  ;;  %v2647_v19 = vmul.f32 %v10662_v54, %v10495_v16  ;;  %v2987_v11 = vrot.slane %v2815_v3, 2  ;;  %v2988_v26 = vrot.slane %v2815_v3, 4  ;;  %v2989_v33 = vrot.slane %v2815_v3, 6  ;;  %vm10709_vm6 = vmand %vm3245_vm4, %vm3255_vm5 }
 0x2ae   : > { %v2646_v16 = vmul.f32 %v10662_v54, %v10483_v59  ;;  %v2648_v59 = vmul.f32 %v10662_v54, %v10502_v27  ;;  %v2649_v27 = vmul.f32 %v10662_v54, %v10513_v49 }
 0x2af   : > { %v10699_v50 = vpop.f32.mrf.mxu0 }
 0x2b0   : > { %v2735_v20 = vadd.f32 %v10669_v32, %v2648_v59 }
 0x2b1   : > { %s15997_s3 = smov %s15996_s27 }
 0x2b4   : > { %v10681_v22 = vld [vmem:[#allocation1] sm:$0xff] }
 0x2b5   : > { %15483 = vst [vmem:[#allocation24_spill] sm:$0xff] %v10681_v22 }
 0x2b6   : > { %2327 = vst [vmem:[#allocation1] ss:$9 sm:$0xff] %v1691_v38  ;;  %v2734_v38 = vadd.f32 %v10669_v32, %v2647_v19 }
 0x2b7   : > { %2328 = vst [vmem:[#allocation1 + $0x1] ss:$9 sm:$0xff] %v1694_v42 }
 0x2b8   : > { %3481 = vst [vmem:[#allocation1 + $0x20] ss:$4 sm:$0xff] %v2813_v41  ;;  %v10707_v41 = vshrl.u32 %v3235_v23, 7 }
 0x2b9   : > { %3483 = vst [vmem:[#allocation1 + $0x21] ss:$4 sm:$0xff] %v2981_v36  ;;  %v2733_v36 = vadd.f32 %v10669_v32, %v2646_v16 }
 0x2ba   : > { %3485 = vst [vmem:[#allocation1 + $0x22] ss:$4 sm:$0xff] %v2982_v37  ;;  %vm3275_vm7 = vcmp.ge.s32.totalorder %v10707_v41, 1  ;;  %v2817_v37 = vmax.f32 %v2734_v38, 0.0  ;;  %v2736_v38 = vadd.f32 %v10669_v32, %v2649_v27 }
 0x2bb   : > { %3487 = vst [vmem:[#allocation1 + $0x23] ss:$4 sm:$0xff] %v2983_v7  ;;  %v10719_v7 = vpop.f32.mrf.mxu0  ;;  %2548 = vmatmul.bf16.gmra.mxu0 %v10425_v15  ;;  %vm3284_vm8 = vmand %vm10709_vm6, %vm3275_vm7  ;;  %v2816_v15 = vmax.f32 %v2733_v36, 0.0 }
 0x2bc   : > { %15485 = vst [vmem:[#allocation26_spill] sm:$0xff] %v10707_v41  ;;  %v2993_v19 = vrot.slane %v2817_v37, 2  ;;  %v2994_v23 = vrot.slane %v2817_v37, 4  ;;  %v2995_v49 = vrot.slane %v2817_v37, 6 }
 0x2bd   : > { %v2991_v27 = vrot.slane %v2816_v15, 4 }
 0x2be   : > { %v10693_v57 = vld [vmem:[#allocation1] sm:$0xff] }
 0x2bf   : > { %15484 = vst [vmem:[#allocation25_spill] sm:$0xff] %v10693_v57 }
 0x2c0   : > { %3473 = vst [vmem:[#allocation1] ss:$4 sm:$0xff] %v2812_v55  ;;  %v2984_v55 = vrot.slane %v2814_v34, 2 }
 0x2c1   : > { %3475 = vst [vmem:[#allocation1 + $0x1] ss:$4 sm:$0xff] %v2978_v35 }
 0x2c2   : > { %3477 = vst [vmem:[#allocation1 + $0x2] ss:$4 sm:$0xff] %v2979_v17  ;;  %v3489_v10 = vld.sshfl [vmem:[#allocation1 + $0x20] sm:$0xff pattern:$0x73625140]  ;;  %v2986_v17 = vrot.slane %v2814_v34, 6 }
 0x2c3   : > { %3479 = vst [vmem:[#allocation1 + $0x3] ss:$4 sm:$0xff] %v2980_v56  ;;  %v3991_v47 = vsel %vm10709_vm6, %v3489_v10, 0.0  ;;  %v10742_v36 = vpop.f32.mrf.mxu0 }
 0x2c4   : > { %3494 = vst [vmem:[#allocation1 + $0x20] ss:$4 sm:$0xff] %v2815_v3  ;;  %v10726_v3 = vpack.c.bf16 %v3991_v47, %v3991_v47  ;;  %v10740_v47 = vmax.f32 %v2735_v20, 0.0 }
 0x2c5   : > { %3495 = vst [vmem:[#allocation1 + $0x21] ss:$4 sm:$0xff] %v2987_v11 }
 0x2c6   : > { %3496 = vst [vmem:[#allocation1 + $0x22] ss:$4 sm:$0xff] %v2988_v26  ;;  %v4187_v16 = vshrl.u32 %v10726_v3, 16  ;;  %v2998_v22 = vrot.slane %v10740_v47, 6 }
 0x2c7   : > { %3497 = vst [vmem:[#allocation1 + $0x23] ss:$4 sm:$0xff] %v2989_v33  ;;  %v4183_v33 = vshll.u32 %v10726_v3, 16 }
 0x2c8   : > { %15488 = vst [vmem:[#allocation27_spill] sm:$0xff] %v10726_v3 }
 0x2ca   : > { %v3488_v60 = vld.sshfl [vmem:[#allocation1] sm:$0xff pattern:$0x73625140] }
 0x2cb   : > { %3490 = vst [vmem:[#allocation1] ss:$4 sm:$0xff] %v2814_v34  ;;  %v3990_v35 = vsel %vm3284_vm8, %v3488_v60, 0.0  ;;  %v2650_v34 = vmul.f32 %v10662_v54, %v10521_v63  ;;  %v4189_v63 = vrot.slane %v4187_v16, 4 }
 0x2cc   : > { %3491 = vst [vmem:[#allocation1 + $0x1] ss:$4 sm:$0xff] %v2984_v55  ;;  %v10730_v56 = vpack.c.bf16 %v3990_v35, %v3990_v35 }
 0x2cd   : > { %3492 = vst [vmem:[#allocation1 + $0x2] ss:$4 sm:$0xff] %v2985_v9  ;;  %v2990_v9 = vrot.slane %v2816_v15, 2  ;;  %v2737_v20 = vadd.f32 %v10669_v32, %v2650_v34 }
 0x2ce   : > { %15489 = vst [vmem:[#allocation28_spill] sm:$0xff] %v10730_v56  ;;  %v3499_v11 = vld.sshfl [vmem:[#allocation1 + $0x20] sm:$0xff pattern:$0x73625140]  ;;  %v4174_v10 = vshrl.u32 %v10730_v56, 16  ;;  %v4177_v26 = vshll.u32 %v10730_v56, 16 }
 0x2cf   : > { %3493 = vst [vmem:[#allocation1 + $0x3] ss:$4 sm:$0xff] %v2986_v17  ;;  %v3993_v59 = vsel %vm10709_vm6, %v3499_v11, 0.0  ;;  %v4185_v17 = vrot.slane %v4183_v33, 5 }
 0x2d0   : > { %3504 = vst [vmem:[#allocation1 + $0x20] ss:$4 sm:$0xff] %v2817_v37  ;;  %v4176_v55 = vrot.slane %v4174_v10, 4  ;;  %v4179_v60 = vrot.slane %v4177_v26, 5  ;;  %v2651_v37 = vmul.f32 %v10662_v54, %v10533_v24  ;;  %v10753_v11 = vpack.c.bf16 %v3993_v59, %v3993_v59 }
 0x2d1   : > { %3505 = vst [vmem:[#allocation1 + $0x21] ss:$4 sm:$0xff] %v2993_v19  ;;  %v2819_v19 = vmax.f32 %v2736_v38, 0.0  ;;  %v2992_v26 = vrot.slane %v2816_v15, 6  ;;  %v4190_v59 = vor.u32 %v4189_v63, %v4185_v17 }
 0x2d2   : > { %3506 = vst [vmem:[#allocation1 + $0x22] ss:$4 sm:$0xff] %v2994_v23  ;;  %v4180_v35 = vor.u32 %v4179_v60, %v4176_v55  ;;  %v2738_v16 = vadd.f32 %v10669_v32, %v2651_v37  ;;  %v4203_v55 = vshll.u32 %v10753_v11, 16 }
 0x2d3   : > { %3507 = vst [vmem:[#allocation1 + $0x23] ss:$4 sm:$0xff] %v2995_v49  ;;  %v2999_v60 = vrot.slane %v2819_v19, 2 }
 0x2d4   : > { %15492 = vst [vmem:[#allocation29_spill] sm:$0xff] %v10753_v11  ;;  %v4181_v24 = vrot.slane %v4180_v35, 4  ;;  %v3000_v35 = vrot.slane %v2819_v19, 4 }
 0x2d6   : > { %v3498_v10 = vld.sshfl [vmem:[#allocation1] sm:$0xff pattern:$0x73625140]  ;;  %v4186_v34 = vsel %vm10749_vm11, %v4181_v24, %v4185_v17  ;;  %v10783_v24 = vmax.f32 %v2738_v16, 0.0 }
 0x2d7   : > { %3500 = vst [vmem:[#allocation1] ss:$4 sm:$0xff] %v2816_v15  ;;  %v3992_v33 = vsel %vm10709_vm6, %v3498_v10, 0.0  ;;  %v10764_v15 = vmax.f32 %v2737_v20, 0.0  ;;  %v10769_v10 = vpop.f32.mrf.mxu0  ;;  %2553 = vmatmul.bf16.gmra.mxu0 %v10437_v39  ;;  %v8941_v20 = vrot.slane %v10730_v56, 9 }
 0x2d8   : > { %3501 = vst [vmem:[#allocation1 + $0x1] ss:$4 sm:$0xff] %v2990_v9  ;;  %v10760_v38 = vpack.c.bf16 %v3992_v33, %v3992_v33  ;;  %v2652_v9 = vmul.f32 %v10662_v54, %v10545_v44  ;;  %v4922_v44 = vrot.slane %v10726_v3, 5  ;;  %v4191_v33 = vrot.slane %v4190_v59, 4 }
 0x2d9   : > { %3502 = vst [vmem:[#allocation1 + $0x2] ss:$4 sm:$0xff] %v2991_v27  ;;  %v4207_v27 = vshrl.u32 %v10753_v11, 16  ;;  %v3002_v3 = vrot.slane %v10764_v15, 2  ;;  %v10796_v59 = vrot.slane %v4203_v55, 5 }
 0x2da   : > { %15493 = vst [vmem:[#allocation30_spill] sm:$0xff] %v10760_v38  ;;  %v3509_v49 = vld.sshfl [vmem:[#allocation1 + $0x20] sm:$0xff pattern:$0x73625140]  ;;  %v4193_v17 = vshll.u32 %v10760_v38, 16  ;;  %v4197_v63 = vshrl.u32 %v10760_v38, 16  ;;  %v10790_v13 = vsel %vm10773_vm14, %v8941_v20, %v4922_v44 }
 0x2db   : > { %3503 = vst [vmem:[#allocation1 + $0x3] ss:$4 sm:$0xff] %v2992_v26  ;;  %v3001_v26 = vrot.slane %v2819_v19, 6  ;;  %v3995_v39 = vsel %vm10709_vm6, %v3509_v49, 0.0  ;;  %v3004_v20 = vrot.slane %v10764_v15, 6 }
 0x2dc   : > { %3514 = vst [vmem:[#allocation1 + $0x20] ss:$4 sm:$0xff] %v2819_v19  ;;  %v4195_v57 = vrot.slane %v4193_v17, 5  ;;  %v4199_v1 = vrot.slane %v4197_v63, 4  ;;  %v2739_v19 = vadd.f32 %v10669_v32, %v2652_v9  ;;  %v4209_v17 = vrot.slane %v4207_v27, 4  ;;  %v9296_v9 = vld [vmem:[%s15498_s2 + $0x38] sm:$0xff] }
 0x2dd   : > { %3515 = vst [vmem:[#allocation1 + $0x21] ss:$4 sm:$0xff] %v2999_v60  ;;  %v10798_v60 = vunpack.c.l.b16 %v4186_v34  ;;  %v3003_v63 = vrot.slane %v10764_v15, 4  ;;  %v10808_v56 = vpack.c.bf16 %v3995_v39, %v3995_v39  ;;  %9560 = vmatpush.bf16.msra.mxu1 %v9296_v9  ;;  %6412 = vmatpush.bf16.msrb.mxu0 %v9296_v9  ;;  %v4924_v34 = vrot.slane %v4922_v44, 4  ;;  %v9295_v44 = vld [vmem:[%s15498_s2 + $0x30] sm:$0xff] }
 0x2de   : > { %3516 = vst [vmem:[#allocation1 + $0x22] ss:$4 sm:$0xff] %v3000_v35  ;;  %v4196_v16 = vsel %vm10749_vm11, %v4191_v33, %v4195_v57  ;;  %v4200_v49 = vor.u32 %v4199_v1, %v4195_v57  ;;  %v2653_v33 = vmul.f32 %v10662_v54, %v10552_v61  ;;  %v10818_v27 = vmax.f32 %v2739_v19, 0.0 }
 0x2df   : > { %3517 = vst [vmem:[#allocation1 + $0x23] ss:$4 sm:$0xff] %v3001_v26  ;;  %v10800_v35 = vunpack.c.l.b16 %v4196_v16  ;;  %v10820_v16 = vpop.f32.mrf.mxu0  ;;  %v4925_v26 = vrot.slane %v10760_v38, 5  ;;  %v15500_v61 = vrot.slane %v10740_v47, 2  ;;  %v4210_v9 = vor.u32 %v4209_v17, %v10796_v59  ;;  %v9312_v17 = vld [vmem:[%s15498_s2 + $0xb8] sm:$0xff] }
 0x2e0   : > { %15496 = vst [vmem:[#allocation31_spill] sm:$0xff] %v10798_v60  ;;  %v10815_v57 = vrot.slane %v4200_v49, 4  ;;  %v15502_v60 = vrot.slane %v10740_v47, 4  ;;  %v4928_v49 = vrot.slane %v10753_v11, 5  ;;  %9576 = vmatpush.bf16.msra.mxu3 %v9312_v17 }
 0x2e1   : > { %15497 = vst [vmem:[#allocation32_spill] sm:$0xff] %v10800_v35  ;;  %9561 = vmatpush.bf16.msra.mxu1 %v9295_v44  ;;  %6413 = vmatpush.bf16.msrb.mxu0 %v9295_v44  ;;  %v9294_v44 = vld [vmem:[%s15498_s2 + $0x28] sm:$0xff] }
 0x2e2   : > { %15499 = vst [vmem:[#allocation33_spill] sm:$0xff] %v10808_v56  ;;  %v3508_v55 = vld.sshfl [vmem:[#allocation1] sm:$0xff pattern:$0x73625140]  ;;  %v4206_v19 = vsel %vm10749_vm11, %v10815_v57, %v10796_v59  ;;  %v4227_v57 = vshrl.u32 %v10808_v56, 16 }
 0x2e3   : > { %3510 = vst [vmem:[#allocation1] ss:$4 sm:$0xff] %v10740_v47  ;;  %v3994_v39 = vsel %vm10709_vm6, %v3508_v55, 0.0  ;;  %v4223_v55 = vshll.u32 %v10808_v56, 16  ;;  %v2654_v47 = vmul.f32 %v10662_v54, %v10564_v21  ;;  %v9311_v21 = vld [vmem:[%s15498_s2 + $0xb0] sm:$0xff] }
 0x2e4   : > { %3511 = vst [vmem:[#allocation1 + $0x1] ss:$4 sm:$0xff] %v15500_v61  ;;  %v10828_v1 = vpack.c.bf16 %v3994_v39, %v3994_v39  ;;  %v4926_v39 = vsel %vm10773_vm14, %v4924_v34, %v4925_v26  ;;  %v4927_v61 = vrot.slane %v4925_v26, 4  ;;  %v3226_v34 = vadd.s32 1, %v10695_v4  ;;  %9577 = vmatpush.bf16.msra.mxu3 %v9311_v21 }
 0x2e5   : > { %3512 = vst [vmem:[#allocation1 + $0x2] ss:$4 sm:$0xff] %v15502_v60  ;;  %v5613_v59 = vunpack.c.l.b16 %v4926_v39  ;;  %v2740_v60 = vadd.f32 %v10669_v32, %v2653_v33  ;;  %v5612_v39 = vunpack.c.l.b16 %v10790_v13  ;;  %v10866_v26 = vrot.slane %v4223_v55, 5  ;;  %v10872_v13 = vld [vmem:[%s15498_s2 + $0x78] sm:$0xff]  ;;  %9562 = vmatpush.bf16.msra.mxu1 %v9294_v44  ;;  %6414 = vmatpush.bf16.msrb.mxu0 %v9294_v44  ;;  %v10906_v44 = vld [vmem:[%s15498_s2 + $0x70] sm:$0xff] }
 0x2e6   : > { %15501 = vst [vmem:[#allocation34_spill] sm:$0xff] %v10828_v1  ;;  %v3519_v35 = vld.sshfl [vmem:[#allocation1 + $0x20] sm:$0xff pattern:$0x73625140]  ;;  %v4213_v33 = vshll.u32 %v10828_v1, 16  ;;  %vm3246_vm15 = vcmp.ge.s32.totalorder %v3226_v34, 1  ;;  %9568 = vmatpush.bf16.msra.mxu2 %v10872_v13 }
 0x2e7   : > { %3513 = vst [vmem:[#allocation1 + $0x3] ss:$4 sm:$0xff] %v2998_v22  ;;  %v10853_v22 = vsel %vm10773_vm14, %v4927_v61, %v4928_v49  ;;  %v4211_v61 = vrot.slane %v4210_v9, 4  ;;  %v10877_v17 = vpack.c.b16 %v5613_v59, %v5612_v39  ;;  %v3010_v9 = vrot.slane %v10818_v27, 6  ;;  %v10880_v55 = vpop.f32.mrf.mxu0  ;;  %2558 = vmatmul.bf16.gmra.mxu0 %v10449_v62  ;;  %v9293_v62 = vld [vmem:[%s15498_s2 + $0x20] sm:$0xff] }
 0x2e8   : > { %3522 = vst [vmem:[#allocation1 + $0x20] ss:$4 sm:$0xff] %v3002_v3  ;;  %v3997_v3 = vsel %vm10709_vm6, %v3519_v35, 0.0  ;;  %v4215_v35 = vrot.slane %v4213_v33, 5  ;;  %vm3256_vm0 = vcmp.le.s32.totalorder %v3226_v34, 64  ;;  %v10885_v11 = vmax.f32 %v2740_v60, 0.0 }
 0x2e9   : > { %3523 = vst [vmem:[#allocation1 + $0x21] ss:$4 sm:$0xff] %v3003_v63  ;;  %v4217_v63 = vshrl.u32 %v10828_v1, 16  ;;  %v10883_v38 = vpack.c.bf16 %v3997_v3, %v3997_v3  ;;  %v10889_v33 = vadd.s32 64, %v10707_v41  ;;  %v10897_v60 = vunpack.c.l.b16 %v4206_v19  ;;  %vm10913_vm1 = vmand %vm3246_vm15, %vm3256_vm0  ;;  %9563 = vmatpush.bf16.msra.mxu1 %v9293_v62  ;;  %6415 = vmatpush.bf16.msrb.mxu0 %v9293_v62  ;;  %v11311_v19 = vld [vmem:[%s15482_s5] ss:$0 sm:$0xff] }
 0x2ea   : > { %3524 = vst [vmem:[#allocation1 + $0x22] ss:$4 sm:$0xff] %v3004_v20  ;;  %v4229_v20 = vrot.slane %v4227_v57, 4  ;;  %v4216_v57 = vsel %vm10749_vm11, %v4211_v61, %v4215_v35  ;;  %v4931_v51 = vrot.slane %v10828_v1, 5  ;;  %v4930_v21 = vrot.slane %v4928_v49, 4  ;;  %9569 = vmatpush.bf16.msra.mxu2 %v10906_v44  ;;  %vm10939_vm3 = vmand %vm10913_vm1, %vm3275_vm7  ;;  %v9291_v1 = vld [vmem:[%s15498_s2 + $0x10] sm:$0xff] }
 0x2eb   : > { %3525 = vst [vmem:[#allocation1 + $0x23] ss:$4 sm:$0xff] %v10783_v24  ;;  %v4219_v59 = vrot.slane %v4217_v63, 4  ;;  %v10899_v3 = vunpack.c.l.b16 %v4216_v57  ;;  %v4243_v58 = vshll.u32 %v10883_v38, 16  ;;  %v4247_v34 = vshrl.u32 %v10883_v38, 16 }
 0x2ec   : > { %15503 = vst [vmem:[#allocation35_spill] sm:$0xff] %v10877_v17  ;;  %v2741_v17 = vadd.f32 %v10669_v32, %v2654_v47  ;;  %v9310_v47 = vld [vmem:[%s15498_s2 + $0xa8] sm:$0xff]  ;;  %vm3382_vm2 = vcmp.le.s32.totalorder %v10889_v33, 64  ;;  %v4933_v49 = vrot.slane %v4931_v51, 4 }
 0x2ed   : > { %15504 = vst [vmem:[#allocation36_spill] sm:$0xff] %v10880_v55  ;;  %v4220_v63 = vor.u32 %v4219_v59, %v4215_v35  ;;  %v4932_v35 = vsel %vm10773_vm14, %v4930_v21, %v4931_v51  ;;  %9578 = vmatpush.bf16.msra.mxu3 %v9310_v47  ;;  %v5614_v51 = vunpack.c.l.b16 %v10853_v22  ;;  %v10950_v47 = vld [vmem:[%s15498_s2 + $0x68] sm:$0xff]  ;;  %v4934_v22 = vrot.slane %v10808_v56, 5  ;;  %vm10968_vm4 = vmand %vm10709_vm6, %vm3382_vm2 }
 0x2ee   : > { %15505 = vst [vmem:[#allocation37_spill] sm:$0xff] %v10883_v38  ;;  %v3518_v39 = vld.sshfl [vmem:[#allocation1] sm:$0xff pattern:$0x73625140]  ;;  %v10930_v59 = vmax.f32 %v2741_v17, 0.0  ;;  %v15513_v17 = vrot.slane %v10818_v27, 2  ;;  %9570 = vmatpush.bf16.msra.mxu2 %v10950_v47  ;;  %vm11298_vm5 = vmand %vm10913_vm1, %vm3382_vm2 }
 0x2ef   : > { %15506 = vst [vmem:[#allocation38_spill] sm:$0xff] %v10897_v60  ;;  %v3996_v61 = vsel %vm10709_vm6, %v3518_v39, 0.0  ;;  %v4221_v39 = vrot.slane %v4220_v63, 4  ;;  %v9309_v63 = vld [vmem:[%s15498_s2 + $0xa0] sm:$0xff]  ;;  %v10962_v18 = vpop.f32.mrf.mxu0  ;;  %v10981_v42 = vsel %vm10773_vm14, %v4933_v49, %v4934_v22 }
 0x2f0   : > { %15507 = vst [vmem:[#allocation39_spill] sm:$0xff] %v10899_v3  ;;  %v10920_v57 = vpack.c.bf16 %v3996_v61, %v3996_v61  ;;  %v9292_v61 = vld [vmem:[%s15498_s2 + $0x18] sm:$0xff]  ;;  %v5615_v3 = vunpack.c.l.b16 %v4932_v35 }
 0x2f1   : > { %3520 = vst [vmem:[#allocation1] ss:$4 sm:$0xff] %v10764_v15  ;;  %v4230_v15 = vor.u32 %v4229_v20, %v10866_v26  ;;  %v4226_v21 = vsel %vm10749_vm11, %v4221_v39, %v10866_v26  ;;  %9564 = vmatpush.bf16.msra.mxu1 %v9292_v61  ;;  %v10972_v26 = vrot.slane %v4243_v58, 5  ;;  %v4249_v39 = vrot.slane %v4247_v34, 4  ;;  %6416 = vmatpush.bf16.msrb.mxu0 %v9292_v61  ;;  %v10998_v34 = vld [vmem:[%s15498_s2 + $0x60] sm:$0xff] }
 0x2f2   : > { %15510 = vst [vmem:[#allocation40_spill] sm:$0xff] %v10920_v57  ;;  %v3526_v20 = vld.sshfl [vmem:[#allocation1 + $0x20] sm:$0xff pattern:$0x73625140]  ;;  %v4233_v62 = vshll.u32 %v10920_v57, 16  ;;  %v4237_v60 = vshrl.u32 %v10920_v57, 16  ;;  %v2655_v58 = vmul.f32 %v10662_v54, %v10575_v46  ;;  %9579 = vmatpush.bf16.msra.mxu3 %v9309_v63  ;;  %9571 = vmatpush.bf16.msra.mxu2 %v10998_v34 }
 0x2f3   : > { %3531 = vst [vmem:[#allocation1 + $0x20] ss:$4 sm:$0xff] %v15513_v17  ;;  %v15514_v17 = vrot.slane %v10818_v27, 4  ;;  %v4231_v45 = vrot.slane %v4230_v15, 4  ;;  %v3999_v35 = vsel %vm10939_vm3, %v3526_v20, 0.0  ;;  %v9308_v46 = vld [vmem:[%s15498_s2 + $0x98] sm:$0xff] }
 0x2f4   : > { %v4235_v12 = vrot.slane %v4233_v62, 5  ;;  %3533 = vst [vmem:[#allocation1 + $0x22] ss:$4 sm:$0xff] %v3010_v9  ;;  %v4239_v15 = vrot.slane %v4237_v60, 4  ;;  %v10977_v62 = vpack.c.b16 %v5615_v3, %v5614_v51  ;;  %v2656_v9 = vmul.f32 %v10662_v54, %v10582_v0 }
 0x2f5   : > { %3532 = vst [vmem:[#allocation1 + $0x21] ss:$4 sm:$0xff] %v15514_v17  ;;  %v15518_v3 = vrot.slane %v10783_v24, 2  ;;  %v11003_v0 = vunpack.c.l.b16 %v4226_v21  ;;  %v15521_v61 = vrot.slane %v10783_v24, 4  ;;  %9565 = vmatpush.bf16.msra.mxu1 %v9291_v1  ;;  %v11011_v51 = vpack.c.bf16 %v3999_v35, %v3999_v35  ;;  %6417 = vmatpush.bf16.msrb.mxu0 %v9291_v1 }
 0x2f6   : > { %15517 = vst [vmem:[#allocation41_spill] sm:$0xff] %v10977_v62  ;;  %v4236_v60 = vsel %vm10749_vm11, %v4231_v45, %v4235_v12  ;;  %v4240_v45 = vor.u32 %v4239_v15, %v4235_v12  ;;  %v15522_v62 = vrot.slane %v10783_v24, 6  ;;  %v4936_v21 = vrot.slane %v4934_v22, 4  ;;  %9580 = vmatpush.bf16.msra.mxu3 %v9308_v46  ;;  %v9290_v24 = vld [vmem:[%s15498_s2 + $0x8] sm:$0xff]  ;;  %v11033_v22 = vld [vmem:[%s15498_s2 + $0x58] sm:$0xff] }
 0x2f7   : > { %3534 = vst [vmem:[#allocation1 + $0x23] ss:$4 sm:$0xff] %v10885_v11  ;;  %v11005_v49 = vunpack.c.l.b16 %v4236_v60  ;;  %v4937_v15 = vrot.slane %v10920_v57, 5  ;;  %v3014_v35 = vrot.slane %v10930_v59, 2  ;;  %9572 = vmatpush.bf16.msra.mxu2 %v11033_v22 }
 0x2f8   : > { %v3521_v17 = vld.sshfl [vmem:[#allocation1] sm:$0xff pattern:$0x73625140]  ;;  %15519 = vst [vmem:[#allocation42_spill] sm:$0xff] %v11003_v0  ;;  %v4241_v12 = vrot.slane %v4240_v45, 4  ;;  %v4261_v45 = vshll.u32 %v11011_v51, 16 }
 0x2f9   : > { %3527 = vst [vmem:[#allocation1] ss:$4 sm:$0xff] %v15518_v3  ;;  %v3998_v20 = vsel %vm10968_vm4, %v3521_v17, 0.0  ;;  %v4250_v3 = vor.u32 %v4249_v39, %v10972_v26  ;;  %v3015_v17 = vrot.slane %v10930_v59, 4  ;;  %v2742_v39 = vadd.f32 %v10669_v32, %v2655_v58  ;;  %9566 = vmatpush.bf16.msra.mxu1 %v9290_v24  ;;  %6418 = vmatpush.bf16.msrb.mxu0 %v9290_v24 }
 0x2fa   : > { %15520 = vst [vmem:[#allocation43_spill] sm:$0xff] %v11005_v49  ;;  %v11013_v63 = vpack.c.bf16 %v3998_v20, %v3998_v20  ;;  %v4246_v58 = vsel %vm10749_vm11, %v4241_v12, %v10972_v26  ;;  %v4938_v60 = vsel %vm10773_vm14, %v4936_v21, %v4937_v15  ;;  %v4258_v20 = vshrl.u32 %v11011_v51, 16 }
 0x2fb   : > { %3528 = vst [vmem:[#allocation1 + $0x1] ss:$4 sm:$0xff] %v15521_v61  ;;  %v4251_v46 = vrot.slane %v4250_v3, 4  ;;  %v5617_v61 = vunpack.c.l.b16 %v4938_v60  ;;  %v5616_v12 = vunpack.c.l.b16 %v10981_v42  ;;  %v4939_v0 = vrot.slane %v4937_v15, 4  ;;  %v9289_v42 = vld [vmem:[%s15498_s2] sm:$0xff]  ;;  %v11065_v15 = vld [vmem:[%s15498_s2 + $0x50] sm:$0xff] }
 0x2fc   : > { %3529 = vst [vmem:[#allocation1 + $0x2] ss:$4 sm:$0xff] %v15522_v62  ;;  %v2743_v62 = vadd.f32 %v10669_v32, %v2656_v9  ;;  %v4253_v1 = vshll.u32 %v11013_v63, 16  ;;  %v11044_v9 = vpop.f32.mrf.mxu0  ;;  %2563 = vmatmul.bf16.gmra.mxu0 %v10464_v25  ;;  %v4940_v21 = vrot.slane %v10883_v38, 5  ;;  %v3011_v49 = vrot.slane %v10885_v11, 2  ;;  %9573 = vmatpush.bf16.msra.mxu2 %v11065_v15 }
 0x2fd   : > { %3530 = vst [vmem:[#allocation1 + $0x3] ss:$4 sm:$0xff] %v10818_v27  ;;  %v9307_v27 = vld [vmem:[%s15498_s2 + $0x90] sm:$0xff]  ;;  %v3012_v25 = vrot.slane %v10885_v11, 4  ;;  %v3016_v3 = vrot.slane %v10930_v59, 6  ;;  %v2657_v60 = vmul.f32 %v10662_v54, %v10595_v31  ;;  %v11057_v57 = vmax.f32 %v2742_v39, 0.0  ;;  %9567 = vmatpush.bf16.msra.mxu1 %v9289_v42  ;;  %6419 = vmatpush.bf16.msrb.mxu0 %v9289_v42 }
 0x2fe   : > { %v3536_v55 = vld.sshfl [vmem:[#allocation1 + $0x20] sm:$0xff pattern:$0x73625140]  ;;  %v4255_v26 = vrot.slane %v4253_v1, 5  ;;  %9581 = vmatpush.bf16.msra.mxu3 %v9307_v27  ;;  %v11072_v24 = vpack.c.b16 %v5617_v61, %v5616_v12  ;;  %v11078_v39 = vmax.f32 %v2743_v62, 0.0  ;;  %v4260_v1 = vrot.slane %v4258_v20, 4 }
 0x2ff   : > { %3541 = vst [vmem:[#allocation1 + $0x20] ss:$4 sm:$0xff] %v3014_v35  ;;  %v9306_v35 = vld [vmem:[%s15498_s2 + $0x88] sm:$0xff]  ;;  %v4263_v38 = vrot.slane %v4261_v45, 5  ;;  %v11086_v61 = vunpack.c.l.b16 %v4246_v58  ;;  %v2744_v62 = vadd.f32 %v10669_v32, %v2657_v60  ;;  %v4942_v20 = vrot.slane %v4940_v21, 4 }
 0x300   : > { %3542 = vst [vmem:[#allocation1 + $0x21] ss:$4 sm:$0xff] %v3015_v17  ;;  %v4256_v31 = vsel %vm10749_vm11, %v4251_v46, %v4255_v26  ;;  %v11076_v17 = vsel %vm10773_vm14, %v4939_v0, %v4940_v21  ;;  %v4001_v46 = vsel %vm10913_vm1, %v3536_v55, 0.0  ;;  %v3013_v0 = vrot.slane %v10885_v11, 6  ;;  %v11095_v26 = vld [vmem:[%s15498_s2 + $0x48] sm:$0xff]  ;;  %v9305_v55 = vld [vmem:[%s15498_s2 + $0x80] sm:$0xff] }
 0x301   : > { %15523 = vst [vmem:[#allocation44_spill] sm:$0xff] %v11072_v24  ;;  %v11080_v27 = vunpack.c.l.b16 %v4256_v31  ;;  %v2658_v45 = vmul.f32 %v10662_v54, %v10604_v52  ;;  %6581 = vmatpush.bf16.msra.mxu0 %v10872_v13  ;;  %v4943_v58 = vrot.slane %v11013_v63, 5  ;;  %v11106_v52 = vpack.c.bf16 %v4001_v46, %v4001_v46  ;;  %9574 = vmatpush.bf16.msra.mxu2 %v11095_v26 }
 0x302   : > { %3543 = vst [vmem:[#allocation1 + $0x22] ss:$4 sm:$0xff] %v3016_v3  ;;  %9582 = vmatpush.bf16.msra.mxu3 %v9306_v35  ;;  %v3020_v13 = vrot.slane %v11078_v39, 2  ;;  %v3021_v3 = vrot.slane %v11078_v39, 4  ;;  %v3022_v63 = vrot.slane %v11078_v39, 6  ;;  %v11119_v60 = vmax.f32 %v2744_v62, 0.0 }
 0x303   : > { %15524 = vst [vmem:[#allocation45_spill] sm:$0xff] %v11080_v27  ;;  %v11128_v35 = vld [vmem:[%s15498_s2 + $0x40] sm:$0xff]  ;;  %v8942_v31 = vrot.slane %v11011_v51, 9 }
 0x304   : > { %v3535_v56 = vld.sshfl [vmem:[#allocation1] sm:$0xff pattern:$0x73625140]  ;;  %3544 = vst [vmem:[#allocation1 + $0x23] ss:$4 sm:$0xff] %v11057_v57  ;;  %v11108_v12 = vpop.f32.mrf.mxu0 }
 0x305   : > { %15525 = vst [vmem:[#allocation46_spill] sm:$0xff] %v11086_v61  ;;  %v4000_v11 = vsel %vm10913_vm1, %v3535_v56, 0.0  ;;  %v4944_v56 = vsel %vm10773_vm14, %v4942_v20, %v4943_v58  ;;  %6582 = vmatpush.bf16.msra.mxu0 %v10906_v44  ;;  %9575 = vmatpush.bf16.msra.mxu2 %v11128_v35  ;;  %v3017_v58 = vrot.slane %v11057_v57, 2 }
 0x306   : > { %3537 = vst [vmem:[#allocation1] ss:$4 sm:$0xff] %v3011_v49  ;;  %v11110_v21 = vpack.c.bf16 %v4000_v11, %v4000_v11  ;;  %9583 = vmatpush.bf16.msra.mxu3 %v9305_v55  ;;  %v4281_v55 = vshrl.u32 %v11106_v52, 16 }
 0x307   : > { %3538 = vst [vmem:[#allocation1 + $0x1] ss:$4 sm:$0xff] %v3012_v25  ;;  %v4264_v25 = vor.u32 %v4263_v38, %v4260_v1  ;;  %v2745_v38 = vadd.f32 %v10669_v32, %v2658_v45  ;;  %v5619_v45 = vunpack.c.l.b16 %v4944_v56  ;;  %v5618_v56 = vunpack.c.l.b16 %v11076_v17 }
 0x308   : > { %3539 = vst [vmem:[#allocation1 + $0x2] ss:$4 sm:$0xff] %v3013_v0  ;;  %v4267_v42 = vshll.u32 %v11110_v21, 16  ;;  %v4947_v1 = vrot.slane %v11110_v21, 5  ;;  %v4950_v0 = vrot.slane %v11106_v52, 5  ;;  %v2660_v17 = vmul.f32 %v10662_v54, %v10626_v40 }
 0x309   : > { %3540 = vst [vmem:[#allocation1 + $0x3] ss:$4 sm:$0xff] %v10930_v59  ;;  %v2659_v59 = vmul.f32 %v10662_v54, %v10613_v8  ;;  %v11134_v62 = vrot.slane %v4264_v25, 4  ;;  %v4277_v8 = vshll.u32 %v11106_v52, 16  ;;  %v11154_v49 = vmax.f32 %v2745_v38, 0.0  ;;  %6583 = vmatpush.bf16.msra.mxu0 %v10950_v47 }
 0x30a   : > { %v11136_v20 = vrot.slane %v4267_v42, 5  ;;  %v11143_v44 = vsel %vm10773_vm14, %v8942_v31, %v4947_v1  ;;  %v4949_v11 = vrot.slane %v4947_v1, 4  ;;  %v3018_v42 = vrot.slane %v11057_v57, 4 }
 0x30b   : > { %v3546_v46 = vld.sshfl [vmem:[#allocation1 + $0x20] sm:$0xff pattern:$0x73625140]  ;;  %v2746_v31 = vadd.f32 %v10669_v32, %v2659_v59  ;;  %v11175_v59 = vrot.slane %v4277_v8, 5  ;;  %v3026_v40 = vrot.slane %v11154_v49, 2 }
 0x30c   : > { %3551 = vst [vmem:[#allocation1 + $0x20] ss:$4 sm:$0xff] %v3020_v13  ;;  %v4003_v25 = vsel %vm10913_vm1, %v3546_v46, 0.0  ;;  %v3019_v46 = vrot.slane %v11057_v57, 6  ;;  %v11166_v13 = vpop.f32.mrf.mxu0  ;;  %2568 = vmatmul.bf16.gmra.mxu0 %v10479_v48  ;;  %v4283_v57 = vrot.slane %v4281_v55, 4  ;;  %v5366_v48 = vunpack.c.l.b16 %v11106_v52  ;;  %v15691_v41 = vld [vmem:[#allocation46_spill] sm:$0xff] }
 0x30d   : > { %3552 = vst [vmem:[#allocation1 + $0x21] ss:$4 sm:$0xff] %v3021_v3  ;;  %v11160_v3 = vsel %vm10773_vm14, %v4949_v11, %v4950_v0  ;;  %v11173_v38 = vpack.c.bf16 %v4003_v25, %v4003_v25  ;;  %v11178_v24 = vmax.f32 %v2746_v31, 0.0  ;;  %6584 = vmatpush.bf16.msra.mxu0 %v10998_v34  ;;  %v2747_v55 = vadd.f32 %v10669_v32, %v2660_v17 }
 0x30e   : > { %3553 = vst [vmem:[#allocation1 + $0x22] ss:$4 sm:$0xff] %v3022_v63  ;;  %v11169_v63 = vpack.c.b16 %v5619_v45, %v5618_v56  ;;  %v4952_v45 = vrot.slane %v4950_v0, 4  ;;  %v3024_v17 = vrot.slane %v11119_v60, 4 }
 0x30f   : > { %3554 = vst [vmem:[#allocation1 + $0x23] ss:$4 sm:$0xff] %v11119_v60  ;;  %v4297_v34 = vshll.u32 %v11173_v38, 16 }
 0x310   : > { %v3545_v1 = vld.sshfl [vmem:[#allocation1] sm:$0xff pattern:$0x73625140]  ;;  %15526 = vst [vmem:[#allocation47_spill] sm:$0xff] %v11169_v63 }
 0x311   : > { %3547 = vst [vmem:[#allocation1] ss:$4 sm:$0xff] %v3017_v58  ;;  %v4002_v47 = vsel %vm10913_vm1, %v3545_v1, 0.0  ;;  %v4284_v1 = vor.u32 %v4283_v57, %v11175_v59  ;;  %6585 = vmatpush.bf16.msra.mxu0 %v11033_v22  ;;  %v3030_v57 = vrot.slane %v11178_v24, 4 }
 0x312   : > { %3548 = vst [vmem:[#allocation1 + $0x1] ss:$4 sm:$0xff] %v3018_v42  ;;  %v4092_v11 = vpack.c.bf16 %v4002_v47, %v4002_v47  ;;  %v15270_v42 = vrot.slane %v11173_v38, 5 }
 0x313   : > { %3549 = vst [vmem:[#allocation1 + $0x2] ss:$4 sm:$0xff] %v3019_v46 }
 0x314   : > { %3550 = vst [vmem:[#allocation1 + $0x3] ss:$4 sm:$0xff] %v11078_v39  ;;  %v5367_v58 = vunpack.c.l.b16 %v4092_v11  ;;  %v4953_v25 = vrot.slane %v4092_v11, 5  ;;  %v4287_v56 = vshll.u32 %v4092_v11, 16  ;;  %v4291_v8 = vshrl.u32 %v4092_v11, 16 }
 0x315   : > { %v3023_v39 = vrot.slane %v11119_v60, 2  ;;  %v3025_v11 = vrot.slane %v11119_v60, 6  ;;  %v2661_v60 = vmul.f32 %v10662_v54, %v10633_v6  ;;  %6586 = vmatpush.bf16.msra.mxu0 %v11065_v15  ;;  %v2662_v6 = vmul.f32 %v10662_v54, %v10645_v28 }
 0x316   : > { %v11186_v46 = vpack.c.b16 %v5367_v58, %v5366_v48  ;;  %v4954_v52 = vsel %vm10773_vm14, %v4952_v45, %v4953_v25  ;;  %v4955_v0 = vrot.slane %v4953_v25, 4  ;;  %v3556_v31 = vld.sshfl [vmem:[#allocation1 + $0x20] sm:$0xff pattern:$0x73625140]  ;;  %v4289_v47 = vrot.slane %v4287_v56, 5  ;;  %v11201_v45 = vpop.f32.mrf.mxu0 }
 0x317   : > { %v4293_v63 = vrot.slane %v4291_v8, 4  ;;  %3561 = vst [vmem:[#allocation1 + $0x20] ss:$4 sm:$0xff] %v3026_v40  ;;  %v5622_v58 = vunpack.c.l.b16 %v4954_v52  ;;  %v4285_v56 = vrot.slane %v4284_v1, 4  ;;  %v11203_v8 = vmax.f32 %v2747_v55, 0.0 }
 0x318   : > { %15527 = vst [vmem:[#allocation48_spill] sm:$0xff] %v11186_v46  ;;  %6445 = vmatmul.bf16.vlgmr.msra.gmra.mxu1 %v11186_v46  ;;  %v4957_v48 = vsel %vm10773_vm14, %v4955_v0, %v15270_v42  ;;  %v11207_v40 = vrot.slane %v4297_v34, 5  ;;  %v5621_v46 = vunpack.c.l.b16 %v11160_v3  ;;  %v4005_v1 = vsel %vm10913_vm1, %v3556_v31, 0.0 }
 0x319   : > { %v5623_v25 = vunpack.c.l.b16 %v4957_v48  ;;  %v4294_v22 = vor.u32 %v4293_v63, %v4289_v47  ;;  %v4290_v0 = vsel %vm10749_vm11, %v4285_v56, %v4289_v47  ;;  %v3031_v63 = vrot.slane %v11178_v24, 6  ;;  %6587 = vmatpush.bf16.msra.mxu0 %v11095_v26 }
 0x31a   : > { %v4271_v55 = vshrl.u32 %v11110_v21, 16  ;;  %v4301_v15 = vshrl.u32 %v11173_v38, 16  ;;  %v3032_v28 = vrot.slane %v11203_v8, 2  ;;  %v5494_v54 = vunpack.c.l.b16 %v4290_v0 }
 0x31b   : > { %v3555_v61 = vld.sshfl [vmem:[#allocation1] sm:$0xff pattern:$0x73625140]  ;;  %v11210_v27 = vpack.c.b16 %v5623_v25, %v5622_v58  ;;  %v4295_v42 = vrot.slane %v4294_v22, 4  ;;  %v3027_v22 = vrot.slane %v11154_v49, 4 }
 0x31c   : > { %3557 = vst [vmem:[#allocation1] ss:$4 sm:$0xff] %v3023_v39  ;;  %v4004_v3 = vsel %vm10913_vm1, %v3555_v61, 0.0  ;;  %v5620_v39 = vunpack.c.l.b16 %v11143_v44  ;;  %v11230_v61 = vpack.c.bf16 %v4005_v1, %v4005_v1  ;;  %v2749_v44 = vadd.f32 %v10669_v32, %v2662_v6 }
 0x31d   : > { %15528 = vst [vmem:[#allocation49_spill] sm:$0xff] %v11210_v27  ;;  %6783 = vmatmul.bf16.vlgmr.msra.gmra.mxu3 %v11210_v27  ;;  %v4300_v52 = vsel %vm10749_vm11, %v4295_v42, %v11207_v40  ;;  %v4094_v34 = vpack.c.bf16 %v4004_v3, %v4004_v3  ;;  %v4303_v0 = vrot.slane %v4301_v15, 4  ;;  %v4273_v1 = vrot.slane %v4271_v55, 4  ;;  %6588 = vmatpush.bf16.msra.mxu0 %v11128_v35 }
 0x31e   : > { %3558 = vst [vmem:[#allocation1 + $0x1] ss:$4 sm:$0xff] %v3024_v17  ;;  %v5495_v31 = vunpack.c.l.b16 %v4300_v52  ;;  %v11233_v47 = vld.sshfl [vmem:[#allocation1 + $0x20] sm:$0xff pattern:$0x73625140]  ;;  %v2748_v17 = vadd.f32 %v10669_v32, %v2661_v60  ;;  %v11237_v42 = vpack.c.b16 %v5621_v46, %v5620_v39  ;;  %v11242_v56 = vpop.f32.mrf.mxu0  ;;  %2573 = vmatmul.bf16.gmra.mxu0 %v10493_v14  ;;  %v4962_v32 = vrot.slane %v11230_v61, 5 }
 0x31f   : > { %3559 = vst [vmem:[#allocation1 + $0x2] ss:$4 sm:$0xff] %v3025_v11  ;;  %v4959_v48 = vrot.slane %v4094_v34, 5  ;;  %v4307_v58 = vshll.u32 %v4094_v34, 16  ;;  %v4311_v25 = vshrl.u32 %v4094_v34, 16  ;;  %v5369_v26 = vunpack.c.l.b16 %v4094_v34 }
 0x320   : > { %3560 = vst [vmem:[#allocation1 + $0x3] ss:$4 sm:$0xff] %v11154_v49  ;;  %v11240_v11 = vpack.c.b16 %v5495_v31, %v5494_v54  ;;  %v3028_v6 = vrot.slane %v11154_v49, 6  ;;  %v3029_v14 = vrot.slane %v11178_v24, 2  ;;  %v11253_v3 = vmax.f32 %v2748_v17, 0.0 }
 0x321   : > { %15529 = vst [vmem:[#allocation50_spill] sm:$0xff] %v11237_v42  ;;  %v4961_v60 = vrot.slane %v4959_v48, 4  ;;  %v11249_v46 = vrot.slane %v4307_v58, 5  ;;  %v11257_v55 = vmax.f32 %v2749_v44, 0.0  ;;  %v5368_v52 = vunpack.c.l.b16 %v11173_v38 }
 0x322   : > { %3568 = vst [vmem:[#allocation1 + $0x20] ss:$4 sm:$0xff] %v3030_v57  ;;  %6614 = vmatmul.bf16.vlgmr.msra.gmra.mxu2 %v11240_v11  ;;  %v4313_v57 = vrot.slane %v4311_v25, 4  ;;  %v15531_v34 = vrot.slane %v11173_v38, 5  ;;  %v3036_v39 = vrot.slane %v11253_v3, 4  ;;  %v4274_v35 = vor.u32 %v4273_v1, %v11136_v20 }
 0x323   : > { %15530 = vst [vmem:[#allocation51_spill] sm:$0xff] %v11240_v11  ;;  %v4963_v49 = vsel %vm10773_vm14, %v4961_v60, %v4962_v32  ;;  %v3037_v17 = vrot.slane %v11253_v3, 6  ;;  %v11274_v38 = vld [vmem:[%s15481_s4] ss:$0 sm:$0xff]  ;;  %v11278_v58 = vpack.c.b16 %v5369_v26, %v5368_v52  ;;  %v4321_v52 = vshrl.u32 %v11230_v61, 16 }
 0x324   : > { %3569 = vst [vmem:[#allocation1 + $0x21] ss:$4 sm:$0xff] %v3031_v63  ;;  %v4317_v63 = vshll.u32 %v11230_v61, 16  ;;  %v4958_v15 = vrot.slane %v15531_v34, 4  ;;  %v4314_v54 = vor.u32 %v4313_v57, %v11249_v46  ;;  %v2663_v44 = vmul.f32 %v11274_v38, %v10656_v2 }
 0x325   : > { %3570 = vst [vmem:[#allocation1 + $0x22] ss:$4 sm:$0xff] %v11203_v8  ;;  %v5625_v25 = vunpack.c.l.b16 %v4963_v49  ;;  %v3038_v57 = vrot.slane %v11257_v55, 2  ;;  %v2664_v34 = vmul.f32 %v11274_v38, %v10676_v53 }
 0x326   : > { %3571 = vst [vmem:[#allocation1 + $0x23] ss:$4 sm:$0xff] %v3032_v28  ;;  %v4304_v28 = vor.u32 %v4303_v0, %v11207_v40  ;;  %v4960_v40 = vsel %vm10773_vm14, %v4958_v15, %v4959_v48  ;;  %v4315_v60 = vrot.slane %v4314_v54, 4  ;;  %v11282_v0 = vrot.slane %v4317_v63, 5  ;;  %v11292_v26 = vpop.f32.mrf.mxu0 }
 0x327   : > { %v3562_v31 = vld.sshfl [vmem:[#allocation1] sm:$0xff pattern:$0x73625140]  ;;  %15532 = vst [vmem:[#allocation52_spill] sm:$0xff] %v11278_v58  ;;  %v2750_v49 = vadd.f32 %v11311_v19, %v2663_v44  ;;  %v4275_v54 = vrot.slane %v4274_v35, 4  ;;  %v2751_v35 = vadd.f32 %v11311_v19, %v2664_v34  ;;  %v3034_v34 = vrot.slane %v11203_v8, 6 }
 0x328   : > { %3564 = vst [vmem:[#allocation1] ss:$4 sm:$0xff] %v3027_v22  ;;  %v4006_v1 = vsel %vm10913_vm1, %v3562_v31, 0.0  ;;  %6450 = vmatmul.bf16.gmra.mxu1 %v11278_v58  ;;  %v3227_v22 = vadd.s32 2, %v10695_v4  ;;  %v4305_v53 = vrot.slane %v4304_v28, 4  ;;  %v4320_v63 = vsel %vm10749_vm11, %v4315_v60, %v11282_v0 }
 0x329   : > { %3565 = vst [vmem:[#allocation1 + $0x1] ss:$4 sm:$0xff] %v3028_v6  ;;  %v11290_v2 = vpack.c.bf16 %v4006_v1, %v4006_v1  ;;  %v5624_v6 = vunpack.c.l.b16 %v4960_v40  ;;  %v4007_v40 = vsel %vm11298_vm5, %v11233_v47, 0.0  ;;  %v5497_v60 = vunpack.c.l.b16 %v4320_v63 }
 0x32a   : > { %3566 = vst [vmem:[#allocation1 + $0x2] ss:$4 sm:$0xff] %v11178_v24  ;;  %v15535_v24 = vsel %vm10749_vm11, %v11134_v62, %v11136_v20  ;;  %vm3247_vm6 = vcmp.ge.s32.totalorder %v3227_v22, 1  ;;  %vm3257_vm8 = vcmp.le.s32.totalorder %v3227_v22, 64  ;;  %v4280_v1 = vsel %vm10749_vm11, %v4275_v54, %v11175_v59 }
 0x32b   : > { %3567 = vst [vmem:[#allocation1 + $0x3] ss:$4 sm:$0xff] %v3029_v14  ;;  %v5492_v28 = vunpack.c.l.b16 %v15535_v24  ;;  %v11319_v31 = vpack.c.b16 %v5625_v25, %v5624_v6  ;;  %v4310_v14 = vsel %vm10749_vm11, %v4305_v53, %v11249_v46  ;;  %v4327_v44 = vshll.u32 %v11290_v2, 16  ;;  %vm11352_vm9 = vmand %vm3247_vm6, %vm3257_vm8 }
 0x32c   : > { %v4965_v62 = vrot.slane %v11290_v2, 5  ;;  %v4331_v20 = vshrl.u32 %v11290_v2, 16  ;;  %v5496_v47 = vunpack.c.l.b16 %v4310_v14  ;;  %v3035_v48 = vrot.slane %v11253_v3, 2  ;;  %vm11364_vm10 = vmand %vm11352_vm9, %vm3275_vm7 }
 0x32d   : > { %v3573_v15 = vld.sshfl [vmem:[#allocation1 + $0x20] sm:$0xff pattern:$0x73625140]  ;;  %15536 = vst [vmem:[#allocation53_spill] sm:$0xff] %v11319_v31  ;;  %6788 = vmatmul.bf16.gmra.mxu3 %v11319_v31  ;;  %v11334_v46 = vrot.slane %v4327_v44, 5  ;;  %v11341_v6 = vmax.f32 %v2750_v49, 0.0  ;;  %v5493_v22 = vunpack.c.l.b16 %v4280_v1  ;;  %vm3409_vm12 = vmand %vm11352_vm9, %vm3382_vm2 }
 0x32e   : > { %3578 = vst [vmem:[#allocation1 + $0x20] ss:$4 sm:$0xff] %v3036_v39  ;;  %v3033_v39 = vrot.slane %v11203_v8, 4  ;;  %v4333_v25 = vrot.slane %v4331_v20, 4  ;;  %v4323_v53 = vrot.slane %v4321_v52, 4  ;;  %v11343_v63 = vmax.f32 %v2751_v35, 0.0 }
 0x32f   : > { %3579 = vst [vmem:[#allocation1 + $0x21] ss:$4 sm:$0xff] %v3037_v17  ;;  %v4097_v17 = vpack.c.bf16 %v4007_v40, %v4007_v40  ;;  %v11345_v24 = vpack.c.b16 %v5497_v60, %v5496_v47  ;;  %v4967_v14 = vrot.slane %v4965_v62, 4  ;;  %v11348_v40 = vpop.f32.mrf.mxu0  ;;  %2578 = vmatmul.bf16.gmra.mxu0 %v10510_v43  ;;  %v3042_v52 = vrot.slane %v11341_v6, 4 }
 0x330   : > { %3580 = vst [vmem:[#allocation1 + $0x22] ss:$4 sm:$0xff] %v11257_v55  ;;  %v3043_v49 = vrot.slane %v11341_v6, 6  ;;  %v4334_v54 = vor.u32 %v4333_v25, %v11334_v46  ;;  %v2665_v43 = vmul.f32 %v11274_v38, %v10686_v29  ;;  %v5371_v35 = vunpack.c.l.b16 %v11290_v2 }
 0x331   : > { %3581 = vst [vmem:[#allocation1 + $0x23] ss:$4 sm:$0xff] %v3038_v57  ;;  %v5370_v57 = vunpack.c.l.b16 %v11230_v61  ;;  %v4964_v60 = vrot.slane %v4962_v32, 4  ;;  %v4968_v20 = vrot.slane %v4097_v17, 5  ;;  %v4324_v47 = vor.u32 %v4323_v53, %v11282_v0 }
 0x332   : > { %15537 = vst [vmem:[#allocation54_spill] sm:$0xff] %v11345_v24  ;;  %v3572_v8 = vld.sshfl [vmem:[#allocation1] sm:$0xff pattern:$0x73625140]  ;;  %6619 = vmatmul.bf16.gmra.mxu2 %v11345_v24  ;;  %v4337_v25 = vshll.u32 %v4097_v17, 16  ;;  %v4009_v31 = vsel %vm11352_vm9, %v3573_v15, 0.0  ;;  %v11377_v1 = vpack.c.b16 %v5493_v22, %v5492_v28  ;;  %v2666_v2 = vmul.f32 %v11274_v38, %v10699_v50 }
 0x333   : > { %3574 = vst [vmem:[#allocation1] ss:$4 sm:$0xff] %v3033_v39  ;;  %v3044_v29 = vrot.slane %v11343_v63, 2  ;;  %v4969_v61 = vsel %vm10773_vm14, %v4967_v14, %v4968_v20  ;;  %v4008_v32 = vsel %vm11364_vm10, %v3572_v8, 0.0  ;;  %v4335_v39 = vrot.slane %v4334_v54, 4 }
 0x334   : > { %3575 = vst [vmem:[#allocation1 + $0x1] ss:$4 sm:$0xff] %v3034_v34  ;;  %v2752_v15 = vadd.f32 %v11311_v19, %v2665_v43  ;;  %v11390_v28 = vpack.c.b16 %v5371_v35, %v5370_v57  ;;  %v11394_v17 = vpack.c.bf16 %v4009_v31, %v4009_v31  ;;  %v5627_v50 = vunpack.c.l.b16 %v4969_v61 }
 0x335   : > { %15542 = vst [vmem:[#allocation55_spill] sm:$0xff] %v11377_v1  ;;  %v4339_v34 = vrot.slane %v4337_v25, 5  ;;  %v11396_v53 = vpack.c.bf16 %v4008_v32, %v4008_v32  ;;  %v4325_v14 = vrot.slane %v4324_v47, 4  ;;  %v3039_v57 = vrot.slane %v11257_v55, 4 }
 0x336   : > { %3576 = vst [vmem:[#allocation1 + $0x2] ss:$4 sm:$0xff] %v11253_v3  ;;  %v4966_v3 = vsel %vm10773_vm14, %v4964_v60, %v4965_v62  ;;  %v4351_v44 = vshll.u32 %v11394_v17, 16  ;;  %v4355_v60 = vshrl.u32 %v11394_v17, 16  ;;  %v3041_v47 = vrot.slane %v11341_v6, 2 }
 0x337   : > { %3577 = vst [vmem:[#allocation1 + $0x3] ss:$4 sm:$0xff] %v3035_v48  ;;  %v2753_v48 = vadd.f32 %v11311_v19, %v2666_v2  ;;  %v11401_v8 = vpop.f32.mrf.mxu0  ;;  %v5626_v62 = vunpack.c.l.b16 %v4966_v3  ;;  %v4340_v31 = vsel %vm10749_vm11, %v4335_v39, %v4339_v34  ;;  %v4330_v54 = vsel %vm10749_vm11, %v4325_v14, %v11334_v46 }
 0x338   : > { %v11387_v0 = vld.sshfl [vmem:[#allocation1 + $0x20] sm:$0xff pattern:$0x73625140]  ;;  %15543 = vst [vmem:[#allocation56_spill] sm:$0xff] %v11390_v28  ;;  %6455 = vmatmul.bf16.gmra.mxu1 %v11390_v28  ;;  %v4342_v43 = vshrl.u32 %v11396_v53, 16  ;;  %v4345_v35 = vshll.u32 %v11396_v53, 16  ;;  %v5499_v25 = vunpack.c.l.b16 %v4340_v31  ;;  %v2667_v32 = vmul.f32 %v11274_v38, %v10719_v7 }
 0x339   : > { %3588 = vst [vmem:[#allocation1 + $0x20] ss:$4 sm:$0xff] %v3042_v52  ;;  %v3040_v52 = vrot.slane %v11257_v55, 6  ;;  %v11413_v22 = vpack.c.b16 %v5627_v50, %v5626_v62  ;;  %v11419_v55 = vmax.f32 %v2753_v48, 0.0  ;;  %v4972_v2 = vrot.slane %v11394_v17, 5 }
 0x33a   : > { %3589 = vst [vmem:[#allocation1 + $0x21] ss:$4 sm:$0xff] %v3043_v49  ;;  %v11407_v49 = vmax.f32 %v2752_v15, 0.0  ;;  %v5498_v39 = vunpack.c.l.b16 %v4330_v54  ;;  %v4344_v3 = vrot.slane %v4342_v43, 4  ;;  %v4347_v50 = vrot.slane %v4345_v35, 5 }
 0x33b   : > { %3590 = vst [vmem:[#allocation1 + $0x22] ss:$4 sm:$0xff] %v11343_v63  ;;  %v11432_v34 = vrot.slane %v4351_v44, 5  ;;  %v4357_v48 = vrot.slane %v4355_v60, 4  ;;  %v8943_v7 = vrot.slane %v11396_v53, 9  ;;  %v5372_v54 = vunpack.c.l.b16 %v11396_v53 }
 0x33c   : > { %3591 = vst [vmem:[#allocation1 + $0x23] ss:$4 sm:$0xff] %v3044_v29  ;;  %v3048_v29 = vrot.slane %v11407_v49, 4  ;;  %v3049_v61 = vrot.slane %v11407_v49, 6  ;;  %v11437_v62 = vpack.c.b16 %v5499_v25, %v5498_v39  ;;  %v4348_v35 = vor.u32 %v4347_v50, %v4344_v3 }
 0x33d   : > { %15544 = vst [vmem:[#allocation57_spill] sm:$0xff] %v11413_v22  ;;  %6793 = vmatmul.bf16.gmra.mxu3 %v11413_v22  ;;  %v4011_v60 = vsel %vm11352_vm9, %v11387_v0, 0.0  ;;  %v3046_v25 = vrot.slane %v11343_v63, 6 }
 0x33e   : > { %v3582_v20 = vld.sshfl [vmem:[#allocation1] sm:$0xff pattern:$0x73625140]  ;;  %15545 = vst [vmem:[#allocation58_spill] sm:$0xff] %v11437_v62  ;;  %v4349_v50 = vrot.slane %v4348_v35, 4 }
 0x33f   : > { %3584 = vst [vmem:[#allocation1] ss:$4 sm:$0xff] %v3039_v57  ;;  %v4010_v46 = vsel %vm11352_vm9, %v3582_v20, 0.0  ;;  %v3050_v57 = vrot.slane %v11419_v55, 2  ;;  %v11439_v31 = vpop.f32.mrf.mxu0  ;;  %2583 = vmatmul.bf16.gmra.mxu0 %v10527_v5  ;;  %v4358_v5 = vor.u32 %v4357_v48, %v11432_v34  ;;  %v3045_v20 = vrot.slane %v11343_v63, 4 }
 0x340   : > { %3585 = vst [vmem:[#allocation1 + $0x1] ss:$4 sm:$0xff] %v3040_v52  ;;  %v11429_v15 = vpack.c.bf16 %v4010_v46, %v4010_v46  ;;  %v2754_v52 = vadd.f32 %v11311_v19, %v2667_v32  ;;  %v11468_v32 = vpack.c.bf16 %v4011_v60, %v4011_v60  ;;  %v3052_v63 = vrot.slane %v11419_v55, 6 }
 0x341   : > { %3586 = vst [vmem:[#allocation1 + $0x2] ss:$4 sm:$0xff] %v11341_v6  ;;  %v4974_v6 = vrot.slane %v4972_v2, 4  ;;  %v4359_v48 = vrot.slane %v4358_v5, 4 }
 0x342   : > { %3587 = vst [vmem:[#allocation1 + $0x3] ss:$4 sm:$0xff] %v3041_v47  ;;  %6624 = vmatmul.bf16.gmra.mxu2 %v11437_v62  ;;  %v4975_v44 = vrot.slane %v11429_v15, 5  ;;  %v4361_v43 = vshll.u32 %v11429_v15, 16  ;;  %v5373_v47 = vunpack.c.l.b16 %v11394_v17  ;;  %v3047_v17 = vrot.slane %v11407_v49, 2 }
 0x343   : > { %v11434_v14 = vld.sshfl [vmem:[#allocation1 + $0x20] sm:$0xff pattern:$0x73625140] }
 0x344   : > { %3598 = vst [vmem:[#allocation1 + $0x20] ss:$4 sm:$0xff] %v3048_v29  ;;  %v4976_v53 = vsel %vm10773_vm14, %v4974_v6, %v4975_v44  ;;  %v4973_v29 = vsel %vm10773_vm14, %v8943_v7, %v4972_v2  ;;  %v11462_v46 = vrot.slane %v4361_v43, 5  ;;  %v11466_v0 = vpack.c.b16 %v5373_v47, %v5372_v54 }
 0x345   : > { %3599 = vst [vmem:[#allocation1 + $0x21] ss:$4 sm:$0xff] %v3049_v61  ;;  %v11464_v61 = vmax.f32 %v2754_v52, 0.0  ;;  %v5629_v3 = vunpack.c.l.b16 %v4976_v53  ;;  %v2668_v2 = vmul.f32 %v11274_v38, %v10742_v36  ;;  %v4371_v6 = vshll.u32 %v11468_v32, 16 }
 0x346   : > { %3600 = vst [vmem:[#allocation1 + $0x22] ss:$4 sm:$0xff] %v11419_v55  ;;  %v2669_v52 = vmul.f32 %v11274_v38, %v10769_v10  ;;  %v4364_v54 = vsel %vm10749_vm11, %v4359_v48, %v11462_v46  ;;  %v4375_v36 = vshrl.u32 %v11468_v32, 16  ;;  %v4354_v10 = vsel %vm10749_vm11, %v4349_v50, %v11432_v34 }
 0x347   : > { %3601 = vst [vmem:[#allocation1 + $0x23] ss:$4 sm:$0xff] %v3050_v57  ;;  %v5628_v57 = vunpack.c.l.b16 %v4973_v29  ;;  %v11475_v7 = vpop.f32.mrf.mxu0  ;;  %v3053_v35 = vrot.slane %v11464_v61, 2  ;;  %v3054_v5 = vrot.slane %v11464_v61, 4  ;;  %v4365_v47 = vshrl.u32 %v11429_v15, 16 }
 0x348   : > { %15546 = vst [vmem:[#allocation59_spill] sm:$0xff] %v11466_v0  ;;  %6460 = vmatmul.bf16.gmra.mxu1 %v11466_v0  ;;  %v2755_v53 = vadd.f32 %v11311_v19, %v2668_v2  ;;  %v2756_v29 = vadd.f32 %v11311_v19, %v2669_v52  ;;  %v4978_v34 = vrot.slane %v11468_v32, 5  ;;  %v3051_v50 = vrot.slane %v11419_v55, 4  ;;  %v15562_v0 = vld [vmem:[#allocation18_spill] sm:$0xff] }
 0x349   : > { %v3592_v39 = vld.sshfl [vmem:[#allocation1] sm:$0xff pattern:$0x73625140]  ;;  %v4367_v48 = vrot.slane %v4365_v47, 4 }
 0x34a   : > { %3594 = vst [vmem:[#allocation1] ss:$4 sm:$0xff] %v3045_v20  ;;  %v4012_v43 = vsel %vm11352_vm9, %v3592_v39, 0.0  ;;  %v11491_v20 = vpack.c.b16 %v5629_v3, %v5628_v57  ;;  %v11503_v39 = vrot.slane %v4371_v6, 5  ;;  %v5500_v3 = vunpack.c.l.b16 %v4354_v10 }
 0x34b   : > { %3595 = vst [vmem:[#allocation1 + $0x1] ss:$4 sm:$0xff] %v3046_v25  ;;  %v5501_v25 = vunpack.c.l.b16 %v4364_v54  ;;  %v4013_v6 = vsel %vm11352_vm9, %v11434_v14, 0.0  ;;  %v11515_v52 = vmax.f32 %v2756_v29, 0.0  ;;  %v2670_v54 = vmul.f32 %v11274_v38, %v10820_v16  ;;  %v15549_v29 = vld [vmem:[#allocation36_spill] sm:$0xff] }
 0x34c   : > { %3596 = vst [vmem:[#allocation1 + $0x2] ss:$4 sm:$0xff] %v11407_v49  ;;  %v11498_v49 = vpack.c.bf16 %v4012_v43, %v4012_v43  ;;  %v4977_v10 = vrot.slane %v4975_v44, 4  ;;  %v4980_v14 = vrot.slane %v4978_v34, 4 }
 0x34d   : > { %3597 = vst [vmem:[#allocation1 + $0x3] ss:$4 sm:$0xff] %v3047_v17  ;;  %6798 = vmatmul.bf16.gmra.mxu3 %v11491_v20  ;;  %v4377_v17 = vrot.slane %v4375_v36, 4  ;;  %v11509_v2 = vpack.c.b16 %v5501_v25, %v5500_v3  ;;  %v11531_v25 = vpack.c.bf16 %v4013_v6, %v4013_v6  ;;  %v3059_v44 = vrot.slane %v11515_v52, 2 }
 0x34e   : > { %v11489_v60 = vld.sshfl [vmem:[#allocation1 + $0x20] sm:$0xff pattern:$0x73625140]  ;;  %15547 = vst [vmem:[#allocation60_spill] sm:$0xff] %v11491_v20  ;;  %v15272_v57 = vrot.slane %v11498_v49, 5  ;;  %v4381_v55 = vshll.u32 %v11498_v49, 16 }
 0x34f   : > { %3606 = vst [vmem:[#allocation1 + $0x20] ss:$4 sm:$0xff] %v3052_v63  ;;  %v11507_v63 = vmax.f32 %v2755_v53, 0.0  ;;  %v4378_v43 = vor.u32 %v4377_v17, %v11503_v39  ;;  %v11526_v47 = vpop.f32.mrf.mxu0  ;;  %2588 = vmatmul.bf16.gmra.mxu0 %v10542_v30  ;;  %v4368_v53 = vor.u32 %v4367_v48, %v11462_v46  ;;  %v2671_v17 = vmul.f32 %v11274_v38, %v15549_v29 }
 0x350   : > { %3607 = vst [vmem:[#allocation1 + $0x21] ss:$4 sm:$0xff] %v11464_v61  ;;  %v11541_v3 = vrot.slane %v4381_v55, 5  ;;  %v3060_v48 = vrot.slane %v11515_v52, 4  ;;  %v4979_v29 = vsel %vm10773_vm14, %v4977_v10, %v4978_v34 }
 0x351   : > { %3608 = vst [vmem:[#allocation1 + $0x22] ss:$4 sm:$0xff] %v3053_v35  ;;  %v5374_v35 = vunpack.c.l.b16 %v11429_v15  ;;  %v3058_v16 = vrot.slane %v11507_v63, 6  ;;  %v4982_v15 = vsel %vm10773_vm14, %v4980_v14, %v15272_v57  ;;  %v4379_v30 = vrot.slane %v4378_v43, 4 }
 0x352   : > { %3609 = vst [vmem:[#allocation1 + $0x23] ss:$4 sm:$0xff] %v3054_v5  ;;  %6629 = vmatmul.bf16.gmra.mxu2 %v11509_v2  ;;  %v5375_v5 = vunpack.c.l.b16 %v11468_v32  ;;  %v2757_v32 = vadd.f32 %v11311_v19, %v2670_v54  ;;  %v5631_v14 = vunpack.c.l.b16 %v4982_v15  ;;  %v4369_v57 = vrot.slane %v4368_v53, 4 }
 0x353   : > { %15548 = vst [vmem:[#allocation61_spill] sm:$0xff] %v11509_v2  ;;  %v4385_v2 = vshrl.u32 %v11498_v49, 16  ;;  %v4391_v54 = vshll.u32 %v11531_v25, 16  ;;  %v3056_v43 = vrot.slane %v11507_v63, 2  ;;  %v2758_v55 = vadd.f32 %v11311_v19, %v2671_v17 }
 0x354   : > { %v3602_v36 = vld.sshfl [vmem:[#allocation1] sm:$0xff pattern:$0x73625140]  ;;  %v11547_v6 = vpack.c.b16 %v5375_v5, %v5374_v35  ;;  %v4395_v35 = vshrl.u32 %v11531_v25, 16  ;;  %v11559_v34 = vmax.f32 %v2757_v32, 0.0  ;;  %v5630_v5 = vunpack.c.l.b16 %v4979_v29 }
 0x355   : > { %3604 = vst [vmem:[#allocation1] ss:$4 sm:$0xff] %v3051_v50  ;;  %v3055_v50 = vrot.slane %v11464_v61, 6  ;;  %v3057_v61 = vrot.slane %v11507_v63, 4  ;;  %v4384_v10 = vsel %vm10749_vm11, %v4379_v30, %v11541_v3  ;;  %v4984_v17 = vrot.slane %v11531_v25, 5 }
 0x356   : > { %15550 = vst [vmem:[#allocation36_spill] sm:$0xff] %v11547_v6  ;;  %v4387_v32 = vrot.slane %v4385_v2, 4  ;;  %v11576_v29 = vrot.slane %v4391_v54, 5  ;;  %v5503_v30 = vunpack.c.l.b16 %v4384_v10  ;;  %v4397_v20 = vrot.slane %v4395_v35, 4 }
 0x357   : > { %v11568_v15 = vpop.f32.mrf.mxu0  ;;  %v4986_v54 = vrot.slane %v4984_v17, 4 }
 0x358   : > { %6465 = vmatmul.bf16.gmra.mxu1 %v11547_v6  ;;  %v11571_v6 = vpack.c.b16 %v5631_v14, %v5630_v5  ;;  %v4398_v5 = vor.u32 %v4397_v20, %v11576_v29  ;;  %v4015_v20 = vsel %vm11352_vm9, %v11489_v60, 0.0 }
 0x359   : > { %v11544_v46 = vld.sshfl [vmem:[#allocation1 + $0x20] sm:$0xff pattern:$0x73625140] }
 0x35a   : > { %3615 = vst [vmem:[#allocation1 + $0x20] ss:$4 sm:$0xff] %v3058_v16  ;;  %v4014_v16 = vsel %vm11352_vm9, %v3602_v36, 0.0  ;;  %v11579_v36 = vmax.f32 %v2758_v55, 0.0  ;;  %v4388_v55 = vor.u32 %v4387_v32, %v11541_v3  ;;  %v5376_v3 = vunpack.c.l.b16 %v11498_v49 }
 0x35b   : > { %3616 = vst [vmem:[#allocation1 + $0x21] ss:$4 sm:$0xff] %v11515_v52  ;;  %v5377_v32 = vunpack.c.l.b16 %v11531_v25 }
 0x35c   : > { %3617 = vst [vmem:[#allocation1 + $0x22] ss:$4 sm:$0xff] %v3059_v44  ;;  %v11566_v53 = vld.sshfl [vmem:[#allocation1] sm:$0xff pattern:$0x73625140]  ;;  %v4374_v44 = vsel %vm10749_vm11, %v4369_v57, %v11503_v39  ;;  %v2672_v39 = vmul.f32 %v11274_v38, %v10962_v18  ;;  %v2673_v57 = vmul.f32 %v11274_v38, %v11044_v9  ;;  %v3061_v18 = vrot.slane %v11515_v52, 6 }
 0x35d   : > { %3618 = vst [vmem:[#allocation1 + $0x23] ss:$4 sm:$0xff] %v3060_v48  ;;  %v11581_v48 = vpack.c.bf16 %v4014_v16, %v4014_v16  ;;  %6803 = vmatmul.bf16.gmra.mxu3 %v11571_v6  ;;  %v5502_v2 = vunpack.c.l.b16 %v4374_v44  ;;  %v3066_v9 = vrot.slane %v11579_v36, 4  ;;  %v15554_v52 = vld [vmem:[#allocation17_spill] sm:$0xff]  ;;  %v4389_v60 = vrot.slane %v4388_v55, 4 }
 0x35e   : > { %3611 = vst [vmem:[#allocation1] ss:$4 sm:$0xff] %v3055_v50  ;;  %v3064_v50 = vrot.slane %v11559_v34, 6  ;;  %v2759_v44 = vadd.f32 %v11311_v19, %v2672_v39  ;;  %v2760_v39 = vadd.f32 %v11311_v19, %v2673_v57 }
 0x35f   : > { %15551 = vst [vmem:[#allocation62_spill] sm:$0xff] %v11571_v6  ;;  %v11593_v35 = vpack.c.b16 %v5503_v30, %v5502_v2  ;;  %v4401_v16 = vshll.u32 %v11581_v48, 16  ;;  %v11606_v30 = vpop.f32.mrf.mxu0  ;;  %2593 = vmatmul.bf16.gmra.mxu0 %v15554_v52  ;;  %v3062_v2 = vrot.slane %v11559_v34, 2  ;;  %v11626_v6 = vpack.c.bf16 %v4015_v20, %v4015_v20 }
 0x360   : > { %3612 = vst [vmem:[#allocation1 + $0x1] ss:$4 sm:$0xff] %v11507_v63  ;;  %v15552_v63 = vrot.slane %v11498_v49, 5  ;;  %v11628_v57 = vmax.f32 %v2759_v44, 0.0  ;;  %v11641_v55 = vmax.f32 %v2760_v39, 0.0 }
 0x361   : > { %3613 = vst [vmem:[#allocation1 + $0x2] ss:$4 sm:$0xff] %v3056_v43  ;;  %v3065_v43 = vrot.slane %v11579_v36, 2  ;;  %v4411_v44 = vshll.u32 %v11626_v6, 16  ;;  %v4415_v20 = vshrl.u32 %v11626_v6, 16 }
 0x362   : > { %3614 = vst [vmem:[#allocation1 + $0x3] ss:$4 sm:$0xff] %v3057_v61  ;;  %v4983_v14 = vrot.slane %v15552_v63, 4  ;;  %v4987_v61 = vrot.slane %v11581_v48, 5  ;;  %6634 = vmatmul.bf16.gmra.mxu2 %v11593_v35  ;;  %v4399_v63 = vrot.slane %v4398_v5, 4  ;;  %v3072_v39 = vrot.slane %v11641_v55, 4 }
 0x363   : > { %15553 = vst [vmem:[#allocation63_spill] sm:$0xff] %v11593_v35  ;;  %v11624_v35 = vrot.slane %v4401_v16, 5  ;;  %v4405_v16 = vshrl.u32 %v11581_v48, 16 }
 0x364   : > { %v11598_v10 = vld.sshfl [vmem:[#allocation1 + $0x20] sm:$0xff pattern:$0x73625140]  ;;  %v4985_v49 = vsel %vm10773_vm14, %v4983_v14, %v4984_v17  ;;  %v4988_v25 = vsel %vm10773_vm14, %v4986_v54, %v4987_v61  ;;  %v9328_v17 = vld [vmem:[%s15498_s2 + $0x138] sm:$0xff]  ;;  %v11633_v14 = vpack.c.b16 %v5377_v32, %v5376_v3  ;;  %v3228_v54 = vadd.s32 3, %v10695_v4 }
 0x365   : > { %3625 = vst [vmem:[#allocation1 + $0x20] ss:$4 sm:$0xff] %v3064_v50  ;;  %v3063_v50 = vrot.slane %v11559_v34, 4  ;;  %v5633_v5 = vunpack.c.l.b16 %v4988_v25  ;;  %7088 = vmatpush.bf16.msrb.mxu2 %v9328_v17  ;;  %v4404_v59 = vsel %vm10749_vm11, %v4399_v63, %v11624_v35  ;;  %v2674_v3 = vmul.f32 %v11274_v38, %v11108_v12 }
 0x366   : > { %3626 = vst [vmem:[#allocation1 + $0x21] ss:$4 sm:$0xff] %v11579_v36  ;;  %vm3248_vm13 = vcmp.ge.s32.totalorder %v3228_v54, 1  ;;  %vm3258_vm15 = vcmp.le.s32.totalorder %v3228_v54, 64  ;;  %v5505_v25 = vunpack.c.l.b16 %v4404_v59  ;;  %v3067_v12 = vrot.slane %v11579_v36, 6 }
 0x367   : > { %3627 = vst [vmem:[#allocation1 + $0x22] ss:$4 sm:$0xff] %v3065_v43  ;;  %v5632_v43 = vunpack.c.l.b16 %v4985_v49  ;;  %v11656_v32 = vpop.f32.mrf.mxu0  ;;  %v4407_v63 = vrot.slane %v4405_v16, 4  ;;  %vm11668_vm0 = vmand %vm3248_vm13, %vm3258_vm15  ;;  %v2761_v54 = vadd.f32 %v11311_v19, %v2674_v3  ;;  %v3069_v59 = vrot.slane %v11628_v57, 4 }
 0x368   : > { %3628 = vst [vmem:[#allocation1 + $0x23] ss:$4 sm:$0xff] %v3066_v9  ;;  %6470 = vmatmul.bf16.gmra.mxu1 %v11633_v14  ;;  %v4394_v9 = vsel %vm10749_vm11, %v4389_v60, %v11576_v29  ;;  %v3071_v29 = vrot.slane %v11641_v55, 2  ;;  %v4989_v36 = vrot.slane %v4987_v61, 4  ;;  %vm11688_vm1 = vmand %vm11668_vm0, %vm3275_vm7  ;;  %v9320_v61 = vld [vmem:[%s15498_s2 + $0xf8] sm:$0xff]  ;;  %v2676_v3 = vmul.f32 %v11274_v38, %v11201_v45 }
 0x369   : > { %v11622_v52 = vld.sshfl [vmem:[#allocation1] sm:$0xff pattern:$0x73625140]  ;;  %15555 = vst [vmem:[#allocation17_spill] sm:$0xff] %v11633_v14  ;;  %v5504_v49 = vunpack.c.l.b16 %v4394_v9  ;;  %v3068_v9 = vrot.slane %v11628_v57, 2  ;;  %6919 = vmatpush.bf16.msrb.mxu1 %v9320_v61  ;;  %vm3418_vm3 = vmand %vm11668_vm0, %vm3382_vm2 }
 0x36a   : > { %3621 = vst [vmem:[#allocation1] ss:$4 sm:$0xff] %v3061_v18  ;;  %v3070_v18 = vrot.slane %v11628_v57, 6  ;;  %v4018_v45 = vsel %vm11668_vm0, %v11622_v52, 0.0 }
 0x36b   : > { %3622 = vst [vmem:[#allocation1 + $0x1] ss:$4 sm:$0xff] %v11559_v34  ;;  %v4016_v34 = vsel %vm3409_vm12, %v11566_v53, 0.0  ;;  %v11682_v16 = vpack.c.b16 %v5505_v25, %v5504_v49  ;;  %v2844_v49 = vmax.f32 %v2761_v54, 0.0 }
 0x36c   : > { %3623 = vst [vmem:[#allocation1 + $0x2] ss:$4 sm:$0xff] %v3062_v2  ;;  %v11660_v2 = vpack.c.b16 %v5633_v5, %v5632_v43  ;;  %v4106_v60 = vpack.c.bf16 %v4016_v34, %v4016_v34  ;;  %v11674_v43 = vrot.slane %v4411_v44, 5  ;;  %v4417_v5 = vrot.slane %v4415_v20, 4 }
 0x36d   : > { %3624 = vst [vmem:[#allocation1 + $0x3] ss:$4 sm:$0xff] %v3063_v50  ;;  %v4990_v50 = vrot.slane %v11626_v6, 5  ;;  %v5378_v20 = vunpack.c.l.b16 %v11581_v48  ;;  %v3076_v48 = vrot.slane %v2844_v49, 6  ;;  %v2675_v44 = vmul.f32 %v11274_v38, %v11166_v13 }
 0x36e   : > { %15556 = vst [vmem:[#allocation64_spill] sm:$0xff] %v11660_v2  ;;  %6808 = vmatmul.bf16.gmra.mxu3 %v11660_v2  ;;  %v4993_v2 = vrot.slane %v4106_v60, 5  ;;  %v4418_v25 = vor.u32 %v4417_v5, %v11674_v43 }
 0x36f   : > { %v11663_v53 = vld.sshfl [vmem:[#allocation1 + $0x20] sm:$0xff pattern:$0x73625140]  ;;  %15559 = vst [vmem:[#allocation65_spill] sm:$0xff] %v11682_v16  ;;  %v11703_v14 = vpop.f32.mrf.mxu0  ;;  %2598 = vmatmul.bf16.gmra.mxu0 %v15562_v0  ;;  %v11719_v0 = vpack.c.bf16 %v4018_v45, %v4018_v45  ;;  %v3075_v45 = vrot.slane %v2844_v49, 4 }
 0x370   : > { %3635 = vst [vmem:[#allocation1 + $0x20] ss:$4 sm:$0xff] %v3070_v18  ;;  %v4992_v18 = vrot.slane %v4990_v50, 4  ;;  %v4419_v54 = vrot.slane %v4418_v25, 4 }
 0x371   : > { %3636 = vst [vmem:[#allocation1 + $0x21] ss:$4 sm:$0xff] %v11641_v55  ;;  %v4439_v25 = vshrl.u32 %v11719_v0, 16 }
 0x372   : > { %3637 = vst [vmem:[#allocation1 + $0x22] ss:$4 sm:$0xff] %v3071_v29  ;;  %v5379_v29 = vunpack.c.l.b16 %v11626_v6  ;;  %6639 = vmatmul.bf16.gmra.mxu2 %v11682_v16  ;;  %v4017_v6 = vsel %vm11688_vm1, %v11544_v46, 0.0  ;;  %v4019_v46 = vsel %vm11668_vm0, %v11598_v10, 0.0  ;;  %v4435_v10 = vshll.u32 %v11719_v0, 16 }
 0x373   : > { %3638 = vst [vmem:[#allocation1 + $0x23] ss:$4 sm:$0xff] %v3072_v39  ;;  %v4408_v39 = vor.u32 %v4407_v63, %v11624_v35  ;;  %v4991_v35 = vsel %vm10773_vm14, %v4989_v36, %v4990_v50 }
 0x374   : > { %v11680_v34 = vld.sshfl [vmem:[#allocation1] sm:$0xff pattern:$0x73625140]  ;;  %v11717_v63 = vpack.c.b16 %v5379_v29, %v5378_v20  ;;  %v5634_v50 = vunpack.c.l.b16 %v4991_v35  ;;  %v11735_v20 = vpack.c.bf16 %v4019_v46, %v4019_v46 }
 0x375   : > { %3631 = vst [vmem:[#allocation1] ss:$4 sm:$0xff] %v3067_v12  ;;  %v4421_v12 = vshll.u32 %v4106_v60, 16  ;;  %v2763_v60 = vadd.f32 %v11311_v19, %v2676_v3  ;;  %v4409_v52 = vrot.slane %v4408_v39, 4 }
 0x376   : > { %3632 = vst [vmem:[#allocation1 + $0x1] ss:$4 sm:$0xff] %v11628_v57  ;;  %v4994_v57 = vsel %vm10773_vm14, %v4992_v18, %v4993_v2  ;;  %v3073_v2 = vrot.slane %v11641_v55, 6  ;;  %v3074_v18 = vrot.slane %v2844_v49, 2 }
 0x377   : > { %3633 = vst [vmem:[#allocation1 + $0x2] ss:$4 sm:$0xff] %v3068_v9  ;;  %v4423_v5 = vrot.slane %v4421_v12, 5  ;;  %v11721_v9 = vpack.c.bf16 %v4017_v6, %v4017_v6  ;;  %v5635_v36 = vunpack.c.l.b16 %v4994_v57  ;;  %v2846_v61 = vmax.f32 %v2763_v60, 0.0  ;;  %v11740_v55 = vpop.f32.mrf.mxu0 }
 0x378   : > { %3634 = vst [vmem:[#allocation1 + $0x3] ss:$4 sm:$0xff] %v3069_v59  ;;  %6475 = vmatmul.bf16.gmra.mxu1 %v11717_v63  ;;  %v4414_v3 = vsel %vm10749_vm11, %v4409_v52, %v11674_v43  ;;  %v2762_v43 = vadd.f32 %v11311_v19, %v2675_v44  ;;  %v4997_v57 = vrot.slane %v11719_v0, 5 }
 0x379   : > { %15563 = vst [vmem:[#allocation18_spill] sm:$0xff] %v11717_v63  ;;  %v4424_v29 = vsel %vm10749_vm11, %v4419_v54, %v4423_v5  ;;  %v4426_v39 = vshrl.u32 %v11721_v9, 16  ;;  %v4429_v13 = vshll.u32 %v11721_v9, 16  ;;  %v11747_v6 = vpack.c.b16 %v5635_v36, %v5634_v50 }
 0x37a   : > { %v11726_v59 = vld.sshfl [vmem:[#allocation1 + $0x20] sm:$0xff pattern:$0x73625140]  ;;  %v5506_v35 = vunpack.c.l.b16 %v4414_v3  ;;  %v3080_v60 = vrot.slane %v2846_v61, 2  ;;  %v5507_v52 = vunpack.c.l.b16 %v4424_v29  ;;  %v11755_v5 = vrot.slane %v4435_v10, 5  ;;  %v9327_v29 = vld [vmem:[%s15498_s2 + $0x130] sm:$0xff] }
 0x37b   : > { %3645 = vst [vmem:[#allocation1 + $0x20] ss:$4 sm:$0xff] %v3076_v48  ;;  %v2678_v48 = vmul.f32 %v11274_v38, %v11292_v26  ;;  %v3081_v46 = vrot.slane %v2846_v61, 4  ;;  %v4428_v50 = vrot.slane %v4426_v39, 4  ;;  %v4431_v36 = vrot.slane %v4429_v13, 5  ;;  %7089 = vmatpush.bf16.msrb.mxu2 %v9327_v29 }
 0x37c   : > { %15564 = vst [vmem:[#allocation66_spill] sm:$0xff] %v11747_v6  ;;  %v3082_v26 = vrot.slane %v2846_v61, 6  ;;  %v2845_v3 = vmax.f32 %v2762_v43, 0.0  ;;  %v8944_v10 = vrot.slane %v11721_v9, 9  ;;  %v4999_v54 = vrot.slane %v4997_v57, 4 }
 0x37d   : > { %v5380_v39 = vunpack.c.l.b16 %v11721_v9  ;;  %v5381_v13 = vunpack.c.l.b16 %v11719_v0  ;;  %v2677_v9 = vmul.f32 %v11274_v38, %v11242_v56 }
 0x37e   : > { %6813 = vmatmul.bf16.gmra.mxu3 %v11747_v6  ;;  %v3077_v0 = vrot.slane %v2845_v3, 2 }
 0x37f   : > { %v11745_v12 = vld.sshfl [vmem:[#allocation1] sm:$0xff pattern:$0x73625140]  ;;  %v11770_v43 = vpop.f32.mrf.mxu0  ;;  %v11789_v29 = vpack.c.b16 %v5381_v13, %v5380_v39  ;;  %v4021_v39 = vsel %vm11668_vm0, %v11663_v53, 0.0  ;;  %v4449_v13 = vshrl.u32 %v11735_v20, 16 }
 0x380   : > { %3641 = vst [vmem:[#allocation1] ss:$4 sm:$0xff] %v3073_v2  ;;  %v4441_v2 = vrot.slane %v4439_v25, 4  ;;  %v4432_v25 = vor.u32 %v4431_v36, %v4428_v50  ;;  %v3078_v36 = vrot.slane %v2845_v3, 4 }
 0x381   : > { %3642 = vst [vmem:[#allocation1 + $0x1] ss:$4 sm:$0xff] %v2844_v49  ;;  %v2765_v49 = vadd.f32 %v11311_v19, %v2678_v48  ;;  %v4020_v48 = vsel %vm11668_vm0, %v11680_v34, 0.0  ;;  %v3079_v34 = vrot.slane %v2845_v3, 6 }
 0x382   : > { %3643 = vst [vmem:[#allocation1 + $0x2] ss:$4 sm:$0xff] %v3074_v18  ;;  %v11757_v44 = vld.sshfl [vmem:[#allocation1 + $0x20] sm:$0xff pattern:$0x73625140]  ;;  %v11764_v18 = vpack.c.b16 %v5507_v52, %v5506_v35  ;;  %v4998_v52 = vsel %vm10773_vm14, %v8944_v10, %v4997_v57  ;;  %v4433_v56 = vrot.slane %v4432_v25, 4  ;;  %v2764_v57 = vadd.f32 %v11311_v19, %v2677_v9 }
 0x383   : > { %3644 = vst [vmem:[#allocation1 + $0x3] ss:$4 sm:$0xff] %v3075_v45  ;;  %v4445_v45 = vshll.u32 %v11735_v20, 16  ;;  %v2848_v35 = vmax.f32 %v2765_v49, 0.0  ;;  %v2680_v49 = vmul.f32 %v11274_v38, %v11401_v8  ;;  %v5636_v10 = vunpack.c.l.b16 %v4998_v52 }
 0x384   : > { %3652 = vst [vmem:[#allocation1 + $0x20] ss:$4 sm:$0xff] %v2846_v61  ;;  %v4442_v61 = vor.u32 %v4441_v2, %v11755_v5  ;;  %6644 = vmatmul.bf16.gmra.mxu2 %v11764_v18  ;;  %v11785_v2 = vpack.c.bf16 %v4020_v48, %v4020_v48  ;;  %v4438_v48 = vsel %vm10749_vm11, %v4433_v56, %v11755_v5 }
 0x385   : > { %3653 = vst [vmem:[#allocation1 + $0x21] ss:$4 sm:$0xff] %v3080_v60  ;;  %v15566_v60 = vld [vmem:[#allocation19_spill] sm:$0xff]  ;;  %v3087_v25 = vrot.slane %v2848_v35, 4  ;;  %v2767_v52 = vadd.f32 %v11311_v19, %v2680_v49  ;;  %v2679_v5 = vmul.f32 %v11274_v38, %v11348_v40  ;;  %v15570_v49 = vrot.slane %v11735_v20, 5 }
 0x386   : > { %15565 = vst [vmem:[#allocation67_spill] sm:$0xff] %v11764_v18  ;;  %2603 = vmatmul.bf16.gmra.mxu0 %v15566_v60  ;;  %v4443_v60 = vrot.slane %v4442_v61, 4  ;;  %v11791_v18 = vrot.slane %v4445_v45, 5  ;;  %v4459_v61 = vshrl.u32 %v11785_v2, 16  ;;  %v3088_v45 = vrot.slane %v2848_v35, 6 }
 0x387   : > { %3654 = vst [vmem:[#allocation1 + $0x22] ss:$4 sm:$0xff] %v3081_v46  ;;  %v15567_v46 = vrot.slane %v11735_v20, 5  ;;  %v11811_v9 = vpop.f32.mrf.mxu0  ;;  %v5003_v56 = vrot.slane %v11785_v2, 5 }
 0x388   : > { %3655 = vst [vmem:[#allocation1 + $0x23] ss:$4 sm:$0xff] %v3082_v26  ;;  %6480 = vmatmul.bf16.gmra.mxu1 %v11789_v29  ;;  %v4448_v53 = vsel %vm10749_vm11, %v4443_v60, %v11791_v18  ;;  %v4451_v60 = vrot.slane %v4449_v13, 4 }
 0x389   : > { %v5001_v50 = vsel %vm10773_vm14, %v4999_v54, %v15567_v46  ;;  %15568 = vst [vmem:[#allocation19_spill] sm:$0xff] %v11789_v29  ;;  %v3086_v46 = vrot.slane %v2848_v35, 2  ;;  %v2850_v29 = vmax.f32 %v2767_v52, 0.0  ;;  %v5383_v52 = vunpack.c.l.b16 %v11785_v2 }
 0x38a   : > { %v11787_v26 = vld.sshfl [vmem:[#allocation1] sm:$0xff pattern:$0x73625140]  ;;  %v5637_v54 = vunpack.c.l.b16 %v5001_v50  ;;  %v9319_v50 = vld [vmem:[%s15498_s2 + $0xf0] sm:$0xff] }
 0x38b   : > { %3648 = vst [vmem:[#allocation1] ss:$4 sm:$0xff] %v2845_v3  ;;  %v4455_v3 = vshll.u32 %v11785_v2, 16  ;;  %6920 = vmatpush.bf16.msrb.mxu1 %v9319_v50  ;;  %v5005_v50 = vrot.slane %v5003_v56, 4 }
 0x38c   : > { %3649 = vst [vmem:[#allocation1 + $0x1] ss:$4 sm:$0xff] %v3077_v0  ;;  %v2847_v0 = vmax.f32 %v2764_v57, 0.0  ;;  %v5509_v57 = vunpack.c.l.b16 %v4448_v53 }
 0x38d   : > { %3650 = vst [vmem:[#allocation1 + $0x2] ss:$4 sm:$0xff] %v3078_v36  ;;  %v11817_v36 = vpack.c.b16 %v5637_v54, %v5636_v10  ;;  %v5002_v10 = vrot.slane %v15570_v49, 4  ;;  %v11827_v54 = vrot.slane %v4455_v3, 5  ;;  %v2682_v3 = vmul.f32 %v11274_v38, %v11475_v7 }
 0x38e   : > { %3651 = vst [vmem:[#allocation1 + $0x3] ss:$4 sm:$0xff] %v3079_v34  ;;  %v11819_v34 = vpack.c.bf16 %v4021_v39, %v4021_v39  ;;  %v4461_v39 = vrot.slane %v4459_v61, 4  ;;  %v3084_v13 = vrot.slane %v2847_v0, 4  ;;  %v5382_v61 = vunpack.c.l.b16 %v11735_v20 }
 0x38f   : > { %v11803_v8 = vld.sshfl [vmem:[#allocation1 + $0x20] sm:$0xff pattern:$0x73625140]  ;;  %15569 = vst [vmem:[#allocation68_spill] sm:$0xff] %v11817_v36  ;;  %6818 = vmatmul.bf16.gmra.mxu3 %v11817_v36  ;;  %v11842_v40 = vpop.f32.mrf.mxu0  ;;  %v4022_v38 = vsel %vm11668_vm0, %v11745_v12, 0.0  ;;  %v3093_v20 = vrot.slane %v2850_v29, 4 }
 0x390   : > { %3662 = vst [vmem:[#allocation1 + $0x20] ss:$4 sm:$0xff] %v2848_v35  ;;  %v5508_v35 = vunpack.c.l.b16 %v4438_v48  ;;  %v4465_v6 = vshll.u32 %v11819_v34, 16  ;;  %v4452_v48 = vor.u32 %v4451_v60, %v11791_v18  ;;  %v4462_v49 = vor.u32 %v4461_v39, %v11827_v54 }
 0x391   : > { %3663 = vst [vmem:[#allocation1 + $0x21] ss:$4 sm:$0xff] %v3086_v46  ;;  %v3083_v46 = vrot.slane %v2847_v0, 2  ;;  %v3092_v18 = vrot.slane %v2850_v29, 2  ;;  %v15573_v2 = vrot.slane %v11819_v34, 5 }
 0x392   : > { %3664 = vst [vmem:[#allocation1 + $0x22] ss:$4 sm:$0xff] %v3087_v25  ;;  %v2766_v25 = vadd.f32 %v11311_v19, %v2679_v5  ;;  %v11835_v36 = vpack.c.b16 %v5509_v57, %v5508_v35  ;;  %v15572_v5 = vld [vmem:[#allocation20_spill] sm:$0xff]  ;;  %v11848_v60 = vrot.slane %v4465_v6, 5  ;;  %v4453_v57 = vrot.slane %v4452_v48, 4 }
 0x393   : > { %3665 = vst [vmem:[#allocation1 + $0x23] ss:$4 sm:$0xff] %v3088_v45  ;;  %v3085_v45 = vrot.slane %v2847_v0, 6  ;;  %v5007_v35 = vsel %vm10773_vm14, %v5005_v50, %v15573_v2  ;;  %v2769_v6 = vadd.f32 %v11311_v19, %v2682_v3  ;;  %v4463_v12 = vrot.slane %v4462_v49, 4  ;;  %v11874_v19 = vld [vmem:[%s15481_s4] ss:$0 sm:$0xff] }
 0x394   : > { %15571 = vst [vmem:[#allocation69_spill] sm:$0xff] %v11835_v36  ;;  %6649 = vmatmul.bf16.gmra.mxu2 %v11835_v36  ;;  %v2849_v7 = vmax.f32 %v2766_v25, 0.0  ;;  %v4023_v50 = vsel %vm11668_vm0, %v11726_v59, 0.0  ;;  %v4469_v48 = vshrl.u32 %v11819_v34, 16  ;;  %v4458_v3 = vsel %vm10749_vm11, %v4453_v57, %v11827_v54 }
 0x395   : > { %v11833_v53 = vld.sshfl [vmem:[#allocation1] sm:$0xff pattern:$0x73625140]  ;;  %v4468_v59 = vsel %vm10749_vm11, %v4463_v12, %v11848_v60 }
 0x396   : > { %3658 = vst [vmem:[#allocation1] ss:$4 sm:$0xff] %v2847_v0  ;;  %2608 = vmatmul.bf16.gmra.mxu0 %v15572_v5  ;;  %v5004_v0 = vsel %vm10773_vm14, %v5002_v10, %v5003_v56  ;;  %v11859_v56 = vpop.f32.mrf.mxu1  ;;  %v11862_v10 = vpack.c.b16 %v5383_v52, %v5382_v61  ;;  %v5639_v5 = vunpack.c.l.b16 %v5007_v35  ;;  %v2852_v61 = vmax.f32 %v2769_v6, 0.0 }
 0x397   : > { %3659 = vst [vmem:[#allocation1 + $0x1] ss:$4 sm:$0xff] %v3083_v46  ;;  %v3094_v46 = vrot.slane %v2850_v29, 6  ;;  %v5638_v25 = vunpack.c.l.b16 %v5004_v0  ;;  %v11884_v52 = vpop.f32.mrf.mxu0  ;;  %v3090_v0 = vrot.slane %v2849_v7, 4  ;;  %v3091_v54 = vrot.slane %v2849_v7, 6 }
 0x398   : > { %3660 = vst [vmem:[#allocation1 + $0x2] ss:$4 sm:$0xff] %v3084_v13  ;;  %v11864_v13 = vpack.c.bf16 %v4022_v38, %v4022_v38  ;;  %6485 = vmatmul.bf16.gmra.mxu1 %v11862_v10  ;;  %v5384_v35 = vunpack.c.l.b16 %v11819_v34  ;;  %v4471_v57 = vrot.slane %v4469_v48, 4  ;;  %v3098_v36 = vrot.slane %v2852_v61, 2 }
 0x399   : > { %3661 = vst [vmem:[#allocation1 + $0x3] ss:$4 sm:$0xff] %v3085_v45  ;;  %v2681_v45 = vmul.f32 %v11874_v19, %v11439_v31  ;;  %v11888_v38 = vpack.c.b16 %v5639_v5, %v5638_v25  ;;  %v5510_v25 = vunpack.c.l.b16 %v4458_v3  ;;  %v5511_v5 = vunpack.c.l.b16 %v4468_v59 }
 0x39a   : > { %v11857_v39 = vld.sshfl [vmem:[#allocation1 + $0x20] sm:$0xff pattern:$0x73625140]  ;;  %15574 = vst [vmem:[#allocation20_spill] sm:$0xff] %v11862_v10  ;;  %v4475_v49 = vshll.u32 %v11864_v13, 16  ;;  %v5009_v31 = vrot.slane %v11864_v13, 5 }
 0x39b   : > { %3672 = vst [vmem:[#allocation1 + $0x20] ss:$4 sm:$0xff] %v2850_v29  ;;  %v3089_v29 = vrot.slane %v2849_v7, 2  ;;  %v3099_v16 = vrot.slane %v2852_v61, 4 }
 0x39c   : > { %3673 = vst [vmem:[#allocation1 + $0x21] ss:$4 sm:$0xff] %v3092_v18  ;;  %v4479_v18 = vshrl.u32 %v11864_v13, 16  ;;  %v11909_v48 = vrot.slane %v4475_v49, 5  ;;  %v5011_v62 = vrot.slane %v5009_v31, 4 }
 0x39d   : > { %3674 = vst [vmem:[#allocation1 + $0x22] ss:$4 sm:$0xff] %v3093_v20  ;;  %v11890_v20 = vpack.c.bf16 %v4023_v50, %v4023_v50  ;;  %v15576_v50 = vrot.slane %v11819_v34, 5  ;;  %v3100_v34 = vrot.slane %v2852_v61, 6 }
 0x39e   : > { %3675 = vst [vmem:[#allocation1 + $0x23] ss:$4 sm:$0xff] %v3094_v46  ;;  %v11899_v46 = vld [vmem:[%s15482_s5] ss:$0 sm:$0xff]  ;;  %v11902_v12 = vpop.f32.mrf.mxu1  ;;  %v4481_v63 = vrot.slane %v4479_v18, 4 }
 0x39f   : > { %15575 = vst [vmem:[#allocation70_spill] sm:$0xff] %v11888_v38  ;;  %v2768_v6 = vadd.f32 %v11899_v46, %v2681_v45  ;;  %6823 = vmatmul.bf16.gmra.mxu3 %v11888_v38  ;;  %v5008_v10 = vrot.slane %v15576_v50, 4  ;;  %v5385_v45 = vunpack.c.l.b16 %v11864_v13  ;;  %v4485_v13 = vshll.u32 %v11890_v20, 16  ;;  %v11927_v38 = vpop.f32.mrf.mxu0 }
 0x3a0   : > { %v11893_v2 = vld.sshfl [vmem:[#allocation1] sm:$0xff pattern:$0x73625140]  ;;  %v11915_v59 = vpop.f32.mrf.mxu3 }
 0x3a1   : > { %3668 = vst [vmem:[#allocation1] ss:$4 sm:$0xff] %v2849_v7  ;;  %v2683_v7 = vmul.f32 %v11874_v19, %v11526_v47  ;;  %v2851_v50 = vmax.f32 %v2768_v6, 0.0  ;;  %v11918_v47 = vpack.c.b16 %v5511_v5, %v5510_v25  ;;  %v5010_v49 = vsel %vm10773_vm14, %v5008_v10, %v5009_v31 }
 0x3a2   : > { %3669 = vst [vmem:[#allocation1 + $0x1] ss:$4 sm:$0xff] %v3089_v29  ;;  %v4472_v29 = vor.u32 %v4471_v57, %v11848_v60  ;;  %v4024_v60 = vsel %vm11668_vm0, %v11787_v26, 0.0  ;;  %v11934_v10 = vpack.c.b16 %v5385_v45, %v5384_v35  ;;  %v3229_v57 = vadd.s32 4, %v10695_v4 }
 0x3a3   : > { %3670 = vst [vmem:[#allocation1 + $0x2] ss:$4 sm:$0xff] %v3090_v0  ;;  %v2770_v18 = vadd.f32 %v11899_v46, %v2683_v7  ;;  %v2684_v0 = vmul.f32 %v11874_v19, %v11568_v15  ;;  %v3095_v6 = vrot.slane %v2851_v50, 2  ;;  %v3096_v25 = vrot.slane %v2851_v50, 4 }
 0x3a4   : > { %3671 = vst [vmem:[#allocation1 + $0x3] ss:$4 sm:$0xff] %v3091_v54  ;;  %v4482_v54 = vor.u32 %v4481_v63, %v11909_v48  ;;  %6654 = vmatmul.bf16.gmra.mxu2 %v11918_v47  ;;  %v5640_v63 = vunpack.c.l.b16 %v5010_v49  ;;  %v4473_v31 = vrot.slane %v4472_v29, 4  ;;  %v11945_v7 = vpack.c.bf16 %v4024_v60, %v4024_v60 }
 0x3a5   : > { %v11913_v3 = vld.sshfl [vmem:[#allocation1 + $0x20] sm:$0xff pattern:$0x73625140]  ;;  %15577 = vst [vmem:[#allocation71_spill] sm:$0xff] %v11918_v47  ;;  %v6615_v26 = vpop.f32.mrf.mxu2  ;;  %v11951_v35 = vmax.f32 %v2770_v18, 0.0  ;;  %v3097_v29 = vrot.slane %v2851_v50, 6  ;;  %v2685_v49 = vmul.f32 %v11874_v19, %v11606_v30 }
 0x3a6   : > { %3682 = vst [vmem:[#allocation1 + $0x20] ss:$4 sm:$0xff] %v2852_v61  ;;  %v15578_v61 = vld [vmem:[#allocation21_spill] sm:$0xff]  ;;  %v11941_v5 = vpop.f32.mrf.mxu1  ;;  %v11955_v45 = vadd.f32 %v6615_v26, %v11859_v56  ;;  %v4489_v60 = vshrl.u32 %v11890_v20, 16  ;;  %vm3249_vm4 = vcmp.ge.s32.totalorder %v3229_v57, 1  ;;  %vm3259_vm5 = vcmp.le.s32.totalorder %v3229_v57, 64 }
 0x3a7   : > { %3683 = vst [vmem:[#allocation1 + $0x21] ss:$4 sm:$0xff] %v3098_v36  ;;  %2613 = vmatmul.bf16.gmra.mxu0 %v15578_v61  ;;  %v15580_v36 = vrot.slane %v11890_v20, 5  ;;  %v3101_v17 = vrot.slane %v11951_v35, 2  ;;  %v3102_v56 = vrot.slane %v11951_v35, 4  ;;  %v4478_v30 = vsel %vm10749_vm11, %v4473_v31, %v11909_v48  ;;  %vm11989_vm6 = vmand %vm3249_vm4, %vm3259_vm5 }
 0x3a8   : > { %3684 = vst [vmem:[#allocation1 + $0x22] ss:$4 sm:$0xff] %v3099_v16  ;;  %v11943_v16 = vrot.slane %v4485_v13, 5  ;;  %6490 = vmatmul.bf16.gmra.mxu1 %v11934_v10  ;;  %v11964_v18 = vpop.f32.mrf.mxu3  ;;  %v2772_v48 = vadd.f32 %v11899_v46, %v2685_v49  ;;  %v4491_v22 = vrot.slane %v4489_v60, 4  ;;  %v5512_v57 = vunpack.c.l.b16 %v4478_v30  ;;  %vm3320_vm8 = vmand %vm11989_vm6, %vm3275_vm7 }
 0x3a9   : > { %15579 = vst [vmem:[#allocation21_spill] sm:$0xff] %v11934_v10  ;;  %v5013_v15 = vsel %vm10773_vm14, %v5011_v62, %v15580_v36  ;;  %v2771_v62 = vadd.f32 %v11899_v46, %v2684_v0  ;;  %v4025_v0 = vsel %vm3418_vm3, %v11757_v44, 0.0  ;;  %v4499_v36 = vshrl.u32 %v11945_v7, 16  ;;  %vm12331_vm9 = vmand %vm11989_vm6, %vm3382_vm2 }
 0x3aa   : > { %3685 = vst [vmem:[#allocation1 + $0x23] ss:$4 sm:$0xff] %v3100_v34  ;;  %v4483_v34 = vrot.slane %v4482_v54, 4  ;;  %v5641_v13 = vunpack.c.l.b16 %v5013_v15  ;;  %v4495_v54 = vshll.u32 %v11945_v7, 16  ;;  %v3103_v15 = vrot.slane %v11951_v35, 6 }
 0x3ab   : > { %v11960_v61 = vld.sshfl [vmem:[#allocation1] sm:$0xff pattern:$0x73625140]  ;;  %v11974_v26 = vmax.f32 %v2771_v62, 0.0  ;;  %v5015_v10 = vrot.slane %v11945_v7, 5  ;;  %v12014_v30 = vmax.f32 %v2772_v48, 0.0  ;;  %v2687_v48 = vmul.f32 %v11874_v19, %v11703_v14 }
 0x3ac   : > { %3678 = vst [vmem:[#allocation1] ss:$4 sm:$0xff] %v2851_v50  ;;  %v4488_v44 = vsel %vm10749_vm11, %v4483_v34, %v11943_v16  ;;  %v11979_v50 = vpop.f32.mrf.mxu0  ;;  %v11985_v31 = vpack.c.b16 %v5641_v13, %v5640_v63  ;;  %v9318_v34 = vld [vmem:[%s15498_s2 + $0xe8] sm:$0xff]  ;;  %v12002_v60 = vrot.slane %v4495_v54, 5  ;;  %v4027_v14 = vsel %vm11989_vm6, %v11803_v8, 0.0 }
 0x3ad   : > { %3679 = vst [vmem:[#allocation1 + $0x1] ss:$4 sm:$0xff] %v3095_v6  ;;  %v4115_v6 = vpack.c.bf16 %v4025_v0, %v4025_v0  ;;  %v6617_v63 = vpop.f32.mrf.mxu2  ;;  %v5513_v13 = vunpack.c.l.b16 %v4488_v44  ;;  %6921 = vmatpush.bf16.msrb.mxu1 %v9318_v34  ;;  %v5017_v54 = vrot.slane %v5015_v10, 4 }
 0x3ae   : > { %3680 = vst [vmem:[#allocation1 + $0x2] ss:$4 sm:$0xff] %v3096_v25  ;;  %v9326_v25 = vld [vmem:[%s15498_s2 + $0x128] sm:$0xff]  ;;  %v11999_v49 = vpop.f32.mrf.mxu1  ;;  %v6618_v0 = vadd.f32 %v6617_v63, %v11902_v12  ;;  %v5386_v12 = vunpack.c.l.b16 %v11890_v20  ;;  %v4026_v63 = vsel %vm3320_vm8, %v11833_v53, 0.0 }
 0x3af   : > { %15581 = vst [vmem:[#allocation72_spill] sm:$0xff] %v11985_v31  ;;  %6828 = vmatmul.bf16.gmra.mxu3 %v11985_v31  ;;  %7090 = vmatpush.bf16.msrb.mxu2 %v9326_v25  ;;  %v12020_v44 = vpack.c.b16 %v5513_v13, %v5512_v57  ;;  %v4505_v34 = vshll.u32 %v4115_v6, 16  ;;  %v5387_v31 = vunpack.c.l.b16 %v11945_v7  ;;  %v3107_v57 = vrot.slane %v12014_v30, 2 }
 0x3b0   : > { %3681 = vst [vmem:[#allocation1 + $0x3] ss:$4 sm:$0xff] %v3097_v29  ;;  %v4501_v29 = vrot.slane %v4499_v36, 4  ;;  %v5018_v36 = vrot.slane %v4115_v6, 5  ;;  %v3108_v7 = vrot.slane %v12014_v30, 4  ;;  %v12041_v13 = vpack.c.bf16 %v4026_v63, %v4026_v63 }
 0x3b1   : > { %v11982_v47 = vld.sshfl [vmem:[#allocation1 + $0x20] sm:$0xff pattern:$0x73625140]  ;;  %15585 = vst [vmem:[#allocation73_spill] sm:$0xff] %v12020_v44 }
 0x3b2   : > { %3690 = vst [vmem:[#allocation1 + $0x20] ss:$4 sm:$0xff] %v3101_v17  ;;  %v2686_v17 = vmul.f32 %v11874_v19, %v11656_v32  ;;  %v4492_v32 = vor.u32 %v4491_v22, %v11943_v16  ;;  %v4502_v25 = vor.u32 %v4501_v29, %v12002_v60  ;;  %v5019_v53 = vsel %vm10773_vm14, %v5017_v54, %v5018_v36 }
 0x3b3   : > { %3691 = vst [vmem:[#allocation1 + $0x21] ss:$4 sm:$0xff] %v3102_v56  ;;  %v15584_v56 = vrot.slane %v11890_v20, 5  ;;  %v15586_v20 = vld [vmem:[#allocation22_spill] sm:$0xff]  ;;  %v3109_v29 = vrot.slane %v12014_v30, 6 }
 0x3b4   : > { %3692 = vst [vmem:[#allocation1 + $0x22] ss:$4 sm:$0xff] %v3103_v15  ;;  %v12017_v15 = vpop.f32.mrf.mxu3  ;;  %v12030_v16 = vpop.f32.mrf.mxu0  ;;  %6659 = vmatmul.bf16.gmra.mxu2 %v12020_v44  ;;  %v4493_v6 = vrot.slane %v4492_v32, 4  ;;  %v4503_v36 = vrot.slane %v4502_v25, 4  ;;  %v4507_v32 = vrot.slane %v4505_v34, 5  ;;  %v2774_v44 = vadd.f32 %v11899_v46, %v2687_v48 }
 0x3b5   : > { %v5014_v28 = vrot.slane %v15584_v56, 4  ;;  %3693 = vst [vmem:[#allocation1 + $0x23] ss:$4 sm:$0xff] %v11974_v26  ;;  %v2773_v56 = vadd.f32 %v11899_v46, %v2686_v17  ;;  %v6620_v17 = vpop.f32.mrf.mxu2  ;;  %v4510_v34 = vshrl.u32 %v12041_v13, 16 }
 0x3b6   : > { %v12051_v54 = vpop.f32.mrf.mxu1  ;;  %v4508_v48 = vsel %vm10749_vm11, %v4503_v36, %v4507_v32 }
 0x3b7   : > { %v5016_v22 = vsel %vm10773_vm14, %v5014_v28, %v5015_v10  ;;  %2618 = vmatmul.bf16.gmra.mxu0 %v15586_v20  ;;  %v12045_v28 = vadd.f32 %v11915_v59, %v11955_v45  ;;  %v12048_v10 = vadd.f32 %v11964_v18, %v6618_v0  ;;  %v12053_v20 = vld.sshfl [vmem:[#allocation1] sm:$0xff pattern:$0x73625140]  ;;  %v12057_v63 = vmax.f32 %v2773_v56, 0.0 }
 0x3b8   : > { %v6621_v59 = vadd.f32 %v6620_v17, %v11941_v5  ;;  %v12061_v45 = vpack.c.b16 %v5387_v31, %v5386_v12  ;;  %3688 = vst [vmem:[#allocation1] ss:$4 sm:$0xff] %v11951_v35  ;;  %v5642_v18 = vunpack.c.l.b16 %v5016_v22  ;;  %v5643_v0 = vunpack.c.l.b16 %v5019_v53 }
 0x3b9   : > { %15587 = vst [vmem:[#allocation22_spill] sm:$0xff] %v12045_v28  ;;  %v4513_v56 = vshll.u32 %v12041_v13, 16  ;;  %v2688_v5 = vmul.f32 %v11874_v19, %v11740_v55  ;;  %v4498_v35 = vsel %vm10749_vm11, %v4493_v6, %v12002_v60  ;;  %v4028_v31 = vsel %vm11989_vm6, %v11893_v2, 0.0 }
 0x3ba   : > { %15588 = vst [vmem:[#allocation74_spill] sm:$0xff] %v12048_v10  ;;  %v12064_v10 = vpack.c.bf16 %v4027_v14, %v4027_v14  ;;  %6495 = vmatmul.bf16.gmra.mxu1 %v12061_v45  ;;  %v12078_v12 = vmax.f32 %v2774_v44, 0.0  ;;  %v12086_v53 = vpack.c.b16 %v5643_v0, %v5642_v18  ;;  %v12089_v6 = vpack.c.bf16 %v4028_v31, %v4028_v31 }
 0x3bb   : > { %15589 = vst [vmem:[#allocation75_spill] sm:$0xff] %v12061_v45  ;;  %v4512_v2 = vrot.slane %v4510_v34, 4  ;;  %v4515_v14 = vrot.slane %v4513_v56, 5  ;;  %v2775_v44 = vadd.f32 %v11899_v46, %v2688_v5  ;;  %v5514_v36 = vunpack.c.l.b16 %v4498_v35 }
 0x3bc   : > { %v12055_v8 = vld.sshfl [vmem:[#allocation1 + $0x20] sm:$0xff pattern:$0x73625140]  ;;  %v6791_v25 = vpop.f32.mrf.mxu3  ;;  %v12082_v22 = vpop.f32.mrf.mxu0  ;;  %v4523_v55 = vshrl.u32 %v12064_v10, 16  ;;  %15590 = vst [vmem:[#allocation76_spill] sm:$0xff] %v12086_v53  ;;  %v5022_v60 = vrot.slane %v12064_v10, 5  ;;  %v5515_v32 = vunpack.c.l.b16 %v4508_v48 }
 0x3bd   : > { %3699 = vst [vmem:[#allocation1 + $0x20] ss:$4 sm:$0xff] %v3107_v57  ;;  %v4519_v57 = vshll.u32 %v12064_v10, 16  ;;  %v3113_v18 = vrot.slane %v12078_v12, 2  ;;  %v3114_v56 = vrot.slane %v12078_v12, 4  ;;  %v8945_v5 = vrot.slane %v12041_v13, 9 }
 0x3be   : > { %3700 = vst [vmem:[#allocation1 + $0x21] ss:$4 sm:$0xff] %v3108_v7  ;;  %v2689_v7 = vmul.f32 %v11874_v19, %v11770_v43  ;;  %v12094_v17 = vpop.f32.mrf.mxu1  ;;  %v4525_v34 = vrot.slane %v4523_v55, 4  ;;  %v5024_v28 = vrot.slane %v5022_v60, 4  ;;  %v12104_v43 = vadd.f32 %v12017_v15, %v6621_v59 }
 0x3bf   : > { %3701 = vst [vmem:[#allocation1 + $0x22] ss:$4 sm:$0xff] %v3109_v29  ;;  %v6622_v29 = vpop.f32.mrf.mxu2  ;;  %6833 = vmatmul.bf16.gmra.mxu3 %v12086_v53  ;;  %v12099_v31 = vrot.slane %v4519_v57, 5  ;;  %v3115_v45 = vrot.slane %v12078_v12, 6  ;;  %v4516_v48 = vor.u32 %v4515_v14, %v4512_v2  ;;  %v12114_v57 = vmax.f32 %v2775_v44, 0.0  ;;  %v15594_v14 = vld [vmem:[#allocation23_spill] sm:$0xff] }
 0x3c0   : > { %3702 = vst [vmem:[#allocation1 + $0x23] ss:$4 sm:$0xff] %v12057_v63  ;;  %v6623_v0 = vadd.f32 %v6622_v29, %v11999_v49  ;;  %v2776_v55 = vadd.f32 %v11899_v46, %v2689_v7  ;;  %v12117_v29 = vpack.c.b16 %v5515_v32, %v5514_v36  ;;  %v5389_v15 = vunpack.c.l.b16 %v12064_v10 }
 0x3c1   : > { %15591 = vst [vmem:[#allocation77_spill] sm:$0xff] %v12104_v43  ;;  %v5388_v59 = vunpack.c.l.b16 %v12041_v13  ;;  %v4526_v43 = vor.u32 %v4525_v34, %v12099_v31  ;;  %v4529_v35 = vshll.u32 %v12089_v6, 16  ;;  %v3104_v44 = vrot.slane %v11974_v26, 2 }
 0x3c2   : > { %v12110_v24 = vadd.f32 %v6791_v25, %v6623_v0  ;;  %15593 = vst [vmem:[#allocation79_spill] sm:$0xff] %v12117_v29  ;;  %v4029_v25 = vsel %vm11989_vm6, %v11857_v39, 0.0  ;;  %v3105_v7 = vrot.slane %v11974_v26, 4  ;;  %v2690_v13 = vmul.f32 %v11874_v19, %v11811_v9 }
 0x3c3   : > { %v5023_v10 = vsel %vm10773_vm14, %v8945_v5, %v5022_v60  ;;  %v15595_v36 = vrot.slane %v12089_v6, 5  ;;  %v4517_v32 = vrot.slane %v4516_v48, 4  ;;  %v12142_v0 = vmax.f32 %v2776_v55, 0.0 }
 0x3c4   : > { %v12107_v53 = vpop.f32.mrf.mxu3  ;;  %15592 = vst [vmem:[#allocation78_spill] sm:$0xff] %v12110_v24  ;;  %v12123_v2 = vpop.f32.mrf.mxu0  ;;  %6664 = vmatmul.bf16.gmra.mxu2 %v12117_v29  ;;  %v12149_v60 = vpack.c.b16 %v5389_v15, %v5388_v59  ;;  %v4527_v5 = vrot.slane %v4526_v43, 4  ;;  %v5644_v48 = vunpack.c.l.b16 %v5023_v10  ;;  %v2777_v55 = vadd.f32 %v11899_v46, %v2690_v13 }
 0x3c5   : > { %v5026_v39 = vsel %vm10773_vm14, %v5024_v28, %v15595_v36  ;;  %v12153_v28 = vld.sshfl [vmem:[#allocation1] sm:$0xff pattern:$0x73625140]  ;;  %v3119_v43 = vrot.slane %v12142_v0, 2  ;;  %v2691_v13 = vmul.f32 %v11874_v19, %v11842_v40 }
 0x3c6   : > { %15596 = vst [vmem:[#allocation23_spill] sm:$0xff] %v12149_v60  ;;  %v12184_v40 = vmax.f32 %v2777_v55, 0.0 }
 0x3c7   : > { %v12112_v49 = vld.sshfl [vmem:[#allocation1 + $0x20] sm:$0xff pattern:$0x73625140]  ;;  %2623 = vmatmul.bf16.gmra.mxu0 %v15594_v14  ;;  %v6625_v34 = vpop.f32.mrf.mxu2  ;;  %v12151_v14 = vrot.slane %v4529_v35, 5  ;;  %3695 = vst [vmem:[#allocation1] ss:$4 sm:$0xff] %v3104_v44  ;;  %v2778_v55 = vadd.f32 %v11899_v46, %v2691_v13 }
 0x3c8   : > { %3709 = vst [vmem:[#allocation1 + $0x20] ss:$4 sm:$0xff] %v3113_v18  ;;  %v3106_v18 = vrot.slane %v11974_v26, 6  ;;  %v6626_v9 = vadd.f32 %v6625_v34, %v12051_v54  ;;  %v5645_v26 = vunpack.c.l.b16 %v5026_v39  ;;  %v4533_v54 = vshrl.u32 %v12089_v6, 16 }
 0x3c9   : > { %3710 = vst [vmem:[#allocation1 + $0x21] ss:$4 sm:$0xff] %v3114_v56  ;;  %v12146_v56 = vpack.c.bf16 %v4029_v25, %v4029_v25  ;;  %v4522_v25 = vsel %vm10749_vm11, %v4517_v32, %v12099_v31  ;;  %v4030_v35 = vsel %vm11989_vm6, %v11960_v61, 0.0  ;;  %v3120_v44 = vrot.slane %v12142_v0, 4  ;;  %v9336_v31 = vld [vmem:[%s15498_s2 + $0x178] sm:$0xff] }
 0x3ca   : > { %3711 = vst [vmem:[#allocation1 + $0x22] ss:$4 sm:$0xff] %v3115_v45  ;;  %v12144_v45 = vpop.f32.mrf.mxu1  ;;  %6500 = vmatmul.bf16.gmra.mxu1 %v12149_v60  ;;  %v3121_v61 = vrot.slane %v12142_v0, 6  ;;  %v12180_v39 = vpack.c.b16 %v5645_v26, %v5644_v48  ;;  %v5516_v32 = vunpack.c.l.b16 %v4522_v25  ;;  %7257 = vmatpush.bf16.msrb.mxu3 %v9336_v31  ;;  %v12186_v34 = vpack.c.bf16 %v4030_v35, %v4030_v35 }
 0x3cb   : > { %3712 = vst [vmem:[#allocation1 + $0x23] ss:$4 sm:$0xff] %v12114_v57  ;;  %v4539_v15 = vshll.u32 %v12146_v56, 16  ;;  %v4543_v59 = vshrl.u32 %v12146_v56, 16  ;;  %v5028_v24 = vrot.slane %v12146_v56, 5  ;;  %v4535_v60 = vrot.slane %v4533_v54, 4 }
 0x3cc   : > { %v6796_v36 = vpop.f32.mrf.mxu3  ;;  %3696 = vst [vmem:[#allocation1 + $0x1] ss:$4 sm:$0xff] %v3105_v7  ;;  %v4532_v7 = vsel %vm10749_vm11, %v4527_v5, %v12151_v14  ;;  %v12176_v10 = vpop.f32.mrf.mxu0  ;;  %v12195_v25 = vadd.f32 %v12107_v53, %v6626_v9  ;;  %v3110_v54 = vrot.slane %v12057_v63, 2  ;;  %v3112_v31 = vrot.slane %v12057_v63, 6 }
 0x3cd   : > { %3697 = vst [vmem:[#allocation1 + $0x2] ss:$4 sm:$0xff] %v3106_v18  ;;  %v12192_v48 = vrot.slane %v4539_v15, 5  ;;  %v4545_v26 = vrot.slane %v4543_v59, 4  ;;  %v15599_v53 = vrot.slane %v12089_v6, 5  ;;  %v5030_v59 = vrot.slane %v5028_v24, 4 }
 0x3ce   : > { %3698 = vst [vmem:[#allocation1 + $0x3] ss:$4 sm:$0xff] %v12014_v30  ;;  %v5517_v30 = vunpack.c.l.b16 %v4532_v7  ;;  %v5390_v7 = vunpack.c.l.b16 %v12089_v6 }
 0x3cf   : > { %15597 = vst [vmem:[#allocation80_spill] sm:$0xff] %v12180_v39  ;;  %v6627_v5 = vpop.f32.mrf.mxu2  ;;  %6838 = vmatmul.bf16.gmra.mxu3 %v12180_v39  ;;  %v5027_v9 = vrot.slane %v15599_v53, 4  ;;  %v2692_v39 = vmul.f32 %v11874_v19, %v11884_v52  ;;  %v4031_v53 = vsel %vm11989_vm6, %v11913_v3, 0.0 }
 0x3d0   : > { %15598 = vst [vmem:[#allocation81_spill] sm:$0xff] %v12195_v25  ;;  %v6628_v35 = vadd.f32 %v6627_v5, %v12094_v17  ;;  %v4536_v17 = vor.u32 %v4535_v60, %v12151_v14  ;;  %v12208_v13 = vpack.c.b16 %v5517_v30, %v5516_v32  ;;  %v5391_v5 = vunpack.c.l.b16 %v12146_v56  ;;  %v15601_v60 = vld [vmem:[#allocation24_spill] sm:$0xff] }
 0x3d1   : > { %v12213_v25 = vmax.f32 %v2778_v55, 0.0  ;;  %v2693_v56 = vmul.f32 %v11874_v19, %v11927_v38  ;;  %v5029_v52 = vsel %vm10773_vm14, %v5027_v9, %v5028_v24  ;;  %v9325_v38 = vld [vmem:[%s15498_s2 + $0x120] sm:$0xff]  ;;  %v12245_v9 = vpack.c.bf16 %v4031_v53, %v4031_v53 }
 0x3d2   : > { %v12182_v18 = vld.sshfl [vmem:[#allocation1 + $0x20] sm:$0xff pattern:$0x73625140]  ;;  %v12189_v29 = vpop.f32.mrf.mxu1  ;;  %15600 = vst [vmem:[#allocation82_spill] sm:$0xff] %v12208_v13  ;;  %v12223_v14 = vadd.f32 %v6796_v36, %v6628_v35  ;;  %7091 = vmatpush.bf16.msrb.mxu2 %v9325_v38 }
 0x3d3   : > { %3719 = vst [vmem:[#allocation1 + $0x20] ss:$4 sm:$0xff] %v3119_v43  ;;  %v3111_v43 = vrot.slane %v12057_v63, 4  ;;  %v4546_v63 = vor.u32 %v4545_v26, %v12192_v48  ;;  %v3125_v30 = vrot.slane %v12213_v25, 2  ;;  %v4537_v26 = vrot.slane %v4536_v17, 4  ;;  %v9317_v36 = vld [vmem:[%s15498_s2 + $0xe0] sm:$0xff] }
 0x3d4   : > { %3720 = vst [vmem:[#allocation1 + $0x21] ss:$4 sm:$0xff] %v3120_v44  ;;  %v6799_v15 = vpop.f32.mrf.mxu3  ;;  %v15329_v44 = vrot.slane %v12186_v34, 5  ;;  %v12217_v6 = vpop.f32.mrf.mxu0  ;;  %6669 = vmatmul.bf16.gmra.mxu2 %v12208_v13  ;;  %v12249_v17 = vpack.c.b16 %v5391_v5, %v5390_v7  ;;  %v2780_v13 = vadd.f32 %v11899_v46, %v2693_v56  ;;  %6922 = vmatpush.bf16.msrb.mxu1 %v9317_v36  ;;  %v4559_v5 = vshll.u32 %v12245_v9, 16 }
 0x3d5   : > { %3721 = vst [vmem:[#allocation1 + $0x22] ss:$4 sm:$0xff] %v3121_v61  ;;  %v4549_v61 = vshll.u32 %v12186_v34, 16  ;;  %v12228_v32 = vld.sshfl [vmem:[#allocation1] sm:$0xff pattern:$0x73625140] }
 0x3d6   : > { %3722 = vst [vmem:[#allocation1 + $0x23] ss:$4 sm:$0xff] %v12184_v40  ;;  %v5032_v3 = vsel %vm10773_vm14, %v5030_v59, %v15329_v44  ;;  %v2779_v59 = vadd.f32 %v11899_v46, %v2692_v39  ;;  %v4553_v44 = vshrl.u32 %v12186_v34, 16 }
 0x3d7   : > { %2628 = vmatmul.bf16.gmra.mxu0 %v15601_v60  ;;  %15602 = vst [vmem:[#allocation24_spill] sm:$0xff] %v12223_v14  ;;  %v6630_v55 = vpop.f32.mrf.mxu2  ;;  %v4547_v60 = vrot.slane %v4546_v63, 4  ;;  %v4551_v24 = vrot.slane %v4549_v61, 5  ;;  %v5646_v63 = vunpack.c.l.b16 %v5029_v52  ;;  %v5647_v61 = vunpack.c.l.b16 %v5032_v3 }
 0x3d8   : > { %3705 = vst [vmem:[#allocation1] ss:$4 sm:$0xff] %v3110_v54  ;;  %v6631_v54 = vadd.f32 %v6630_v55, %v12144_v45  ;;  %v4032_v45 = vsel %vm11989_vm6, %v12053_v20, 0.0  ;;  %v12269_v53 = vmax.f32 %v2779_v59, 0.0  ;;  %v12273_v52 = vmax.f32 %v2780_v13, 0.0 }
 0x3d9   : > { %3706 = vst [vmem:[#allocation1 + $0x1] ss:$4 sm:$0xff] %v3111_v43  ;;  %v4552_v7 = vsel %vm10749_vm11, %v4547_v60, %v4551_v24  ;;  %v12275_v20 = vpack.c.b16 %v5647_v61, %v5646_v63  ;;  %v2694_v55 = vmul.f32 %v11874_v19, %v11979_v50  ;;  %v15606_v61 = vrot.slane %v12186_v34, 5 }
 0x3da   : > { %v12243_v35 = vpop.f32.mrf.mxu1  ;;  %15603 = vst [vmem:[#allocation83_spill] sm:$0xff] %v12249_v17  ;;  %6505 = vmatmul.bf16.gmra.mxu1 %v12249_v17  ;;  %v12260_v43 = vadd.f32 %v6799_v15, %v6631_v54  ;;  %v12277_v15 = vpack.c.bf16 %v4032_v45, %v4032_v45  ;;  %v3129_v3 = vrot.slane %v12269_v53, 4  ;;  %v5519_v38 = vunpack.c.l.b16 %v4552_v7 }
 0x3db   : > { %3707 = vst [vmem:[#allocation1 + $0x2] ss:$4 sm:$0xff] %v3112_v31  ;;  %v4542_v31 = vsel %vm10749_vm11, %v4537_v26, %v12192_v48  ;;  %v5034_v48 = vrot.slane %v12245_v9, 5  ;;  %v3130_v36 = vrot.slane %v12269_v53, 6  ;;  %v2695_v54 = vmul.f32 %v11874_v19, %v12030_v16 }
 0x3dc   : > { %3708 = vst [vmem:[#allocation1 + $0x3] ss:$4 sm:$0xff] %v12078_v12  ;;  %v6801_v39 = vpop.f32.mrf.mxu3  ;;  %v4563_v12 = vshrl.u32 %v12245_v9, 16  ;;  %v12271_v56 = vpop.f32.mrf.mxu0  ;;  %v5518_v26 = vunpack.c.l.b16 %v4542_v31  ;;  %v5033_v45 = vrot.slane %v15606_v61, 4  ;;  %v3131_v50 = vrot.slane %v12273_v52, 2 }
 0x3dd   : > { %v12252_v14 = vld.sshfl [vmem:[#allocation1 + $0x20] sm:$0xff pattern:$0x73625140]  ;;  %15604 = vst [vmem:[#allocation84_spill] sm:$0xff] %v12260_v43  ;;  %v5036_v43 = vrot.slane %v5034_v48, 4  ;;  %v3116_v61 = vrot.slane %v12114_v57, 2 }
 0x3de   : > { %3729 = vst [vmem:[#allocation1 + $0x20] ss:$4 sm:$0xff] %v3125_v30  ;;  %v4555_v30 = vrot.slane %v4553_v44, 4  ;;  %v12287_v44 = vrot.slane %v4559_v5, 5  ;;  %v4565_v13 = vrot.slane %v4563_v12, 4  ;;  %v5392_v12 = vunpack.c.l.b16 %v12186_v34 }
 0x3df   : > { %15605 = vst [vmem:[#allocation85_spill] sm:$0xff] %v12275_v20  ;;  %v6632_v60 = vpop.f32.mrf.mxu2  ;;  %6843 = vmatmul.bf16.gmra.mxu3 %v12275_v20  ;;  %v5393_v20 = vunpack.c.l.b16 %v12245_v9  ;;  %v4033_v9 = vsel %vm11989_vm6, %v11982_v47, 0.0 }
 0x3e0   : > { %v6633_v63 = vadd.f32 %v6632_v60, %v12189_v29  ;;  %v4556_v31 = vor.u32 %v4555_v30, %v4551_v24  ;;  %v2781_v29 = vadd.f32 %v11899_v46, %v2694_v55  ;;  %v12303_v60 = vpack.c.b16 %v5519_v38, %v5518_v26 }
 0x3e1   : > { %v4566_v24 = vor.u32 %v4565_v13, %v12287_v44  ;;  %v4569_v30 = vshll.u32 %v12277_v15, 16  ;;  %v3117_v26 = vrot.slane %v12114_v57, 4  ;;  %v5035_v38 = vsel %vm10773_vm14, %v5033_v45, %v5034_v48 }
 0x3e2   : > { %v12284_v59 = vpop.f32.mrf.mxu1  ;;  %v12300_v16 = vadd.f32 %v6801_v39, %v6633_v63  ;;  %15608 = vst [vmem:[#allocation87_spill] sm:$0xff] %v12303_v60  ;;  %v4557_v34 = vrot.slane %v4556_v31, 4  ;;  %v15609_v39 = vld [vmem:[#allocation25_spill] sm:$0xff]  ;;  %v3118_v13 = vrot.slane %v12114_v57, 6  ;;  %v3230_v63 = vadd.s32 5, %v10695_v4 }
 0x3e3   : > { %v12336_v48 = vmax.f32 %v2781_v29, 0.0  ;;  %v12342_v57 = vpack.c.bf16 %v4033_v9, %v4033_v9  ;;  %v5648_v62 = vunpack.c.l.b16 %v5035_v38  ;;  %v2696_v9 = vmul.f32 %v11874_v19, %v12082_v22 }
 0x3e4   : > { %v6804_v5 = vpop.f32.mrf.mxu3  ;;  %15607 = vst [vmem:[#allocation86_spill] sm:$0xff] %v12300_v16  ;;  %v12310_v17 = vpop.f32.mrf.mxu0  ;;  %6674 = vmatmul.bf16.gmra.mxu2 %v12303_v60  ;;  %vm3250_vm10 = vcmp.ge.s32.totalorder %v3230_v63, 1  ;;  %vm3260_vm12 = vcmp.le.s32.totalorder %v3230_v63, 64 }
 0x3e5   : > { %v12294_v7 = vld.sshfl [vmem:[#allocation1 + $0x20] sm:$0xff pattern:$0x73625140]  ;;  %v3135_v29 = vrot.slane %v12336_v48, 4  ;;  %vm12382_vm13 = vmand %vm3250_vm10, %vm3260_vm12  ;;  %v2783_v60 = vadd.f32 %v11899_v46, %v2696_v9 }
 0x3e6   : > { %3736 = vst [vmem:[#allocation1 + $0x20] ss:$4 sm:$0xff] %v3129_v3  ;;  %v2782_v3 = vadd.f32 %v11899_v46, %v2695_v54  ;;  %v12325_v54 = vpack.c.b16 %v5393_v20, %v5392_v12  ;;  %v12344_v20 = vld.sshfl [vmem:[#allocation1] sm:$0xff pattern:$0x73625140]  ;;  %vm12402_vm15 = vmand %vm12382_vm13, %vm3275_vm7 }
 0x3e7   : > { %3737 = vst [vmem:[#allocation1 + $0x21] ss:$4 sm:$0xff] %v3130_v36  ;;  %2633 = vmatmul.bf16.gmra.mxu0 %v15609_v39  ;;  %v15610_v36 = vrot.slane %v12277_v15, 5  ;;  %v6635_v45 = vpop.f32.mrf.mxu2  ;;  %v4035_v27 = vsel %vm12402_vm15, %v12055_v8, 0.0  ;;  %v2698_v8 = vmul.f32 %v11874_v19, %v12176_v10  ;;  %v4036_v10 = vsel %vm12382_vm13, %v12228_v32, 0.0  ;;  %vm3436_vm0 = vmand %vm12382_vm13, %vm3382_vm2 }
 0x3e8   : > { %3738 = vst [vmem:[#allocation1 + $0x22] ss:$4 sm:$0xff] %v12273_v52  ;;  %v12346_v12 = vmax.f32 %v2782_v3, 0.0  ;;  %v6636_v16 = vadd.f32 %v6635_v45, %v12243_v35  ;;  %v3136_v3 = vrot.slane %v12336_v48, 6  ;;  %v2697_v35 = vmul.f32 %v11874_v19, %v12123_v2 }
 0x3e9   : > { %3739 = vst [vmem:[#allocation1 + $0x23] ss:$4 sm:$0xff] %v3131_v50  ;;  %v5038_v55 = vsel %vm10773_vm14, %v5036_v43, %v15610_v36  ;;  %v4567_v43 = vrot.slane %v4566_v24, 4  ;;  %v12340_v50 = vrot.slane %v4569_v30, 5  ;;  %v4562_v36 = vsel %vm10749_vm11, %v4557_v34, %v12287_v44 }
 0x3ea   : > { %15611 = vst [vmem:[#allocation25_spill] sm:$0xff] %v12325_v54  ;;  %v12338_v31 = vpop.f32.mrf.mxu1  ;;  %v5649_v39 = vunpack.c.l.b16 %v5038_v55  ;;  %v4034_v24 = vsel %vm12331_vm9, %v12153_v28, 0.0  ;;  %v4573_v30 = vshrl.u32 %v12277_v15, 16  ;;  %6510 = vmatmul.bf16.gmra.mxu1 %v12325_v54  ;;  %v4583_v34 = vshrl.u32 %v12342_v57, 16  ;;  %v15614_v55 = vld [vmem:[#allocation28_spill] sm:$0xff] }
 0x3eb   : > { %3715 = vst [vmem:[#allocation1] ss:$4 sm:$0xff] %v3116_v61  ;;  %v4572_v28 = vsel %vm10749_vm11, %v4567_v43, %v12340_v50  ;;  %v4579_v61 = vshll.u32 %v12342_v57, 16  ;;  %v12375_v47 = vadd.f32 %v6804_v5, %v6636_v16  ;;  %v4124_v45 = vpack.c.bf16 %v4034_v24, %v4034_v24  ;;  %v15619_v5 = vld [vmem:[#allocation27_spill] sm:$0xff] }
 0x3ec   : > { %3716 = vst [vmem:[#allocation1 + $0x1] ss:$4 sm:$0xff] %v3117_v26  ;;  %v6806_v44 = vpop.f32.mrf.mxu3  ;;  %v3137_v26 = vrot.slane %v12346_v12, 2  ;;  %v12372_v38 = vpop.f32.mrf.mxu0  ;;  %v12377_v2 = vpack.c.b16 %v5649_v39, %v5648_v62  ;;  %v5040_v43 = vrot.slane %v12342_v57, 5  ;;  %v4575_v54 = vrot.slane %v4573_v30, 4 }
 0x3ed   : > { %3717 = vst [vmem:[#allocation1 + $0x2] ss:$4 sm:$0xff] %v3118_v13  ;;  %v5356_v13 = vunpack.c.l.b16 %v15614_v55  ;;  %v5520_v58 = vunpack.c.l.b16 %v4562_v36  ;;  %v5521_v55 = vunpack.c.l.b16 %v4572_v28  ;;  %v5357_v16 = vunpack.c.l.b16 %v15619_v5  ;;  %v9316_v5 = vld [vmem:[%s15498_s2 + $0xd8] sm:$0xff] }
 0x3ee   : > { %3718 = vst [vmem:[#allocation1 + $0x3] ss:$4 sm:$0xff] %v12142_v0  ;;  %v2784_v62 = vadd.f32 %v11899_v46, %v2697_v35  ;;  %v12393_v63 = vrot.slane %v4579_v61, 5  ;;  %v4585_v24 = vrot.slane %v4583_v34, 4  ;;  %v15620_v36 = vrot.slane %v12277_v15, 5  ;;  %v9335_v61 = vld [vmem:[%s15498_s2 + $0x170] sm:$0xff]  ;;  %6923 = vmatpush.bf16.msrb.mxu1 %v9316_v5 }
 0x3ef   : > { %15615 = vst [vmem:[#allocation28_spill] sm:$0xff] %v12375_v47  ;;  %v6637_v39 = vpop.f32.mrf.mxu2  ;;  %6848 = vmatmul.bf16.gmra.mxu3 %v12377_v2  ;;  %v5420_v35 = vpack.c.b16 %v5357_v16, %v5356_v13  ;;  %v5042_v34 = vrot.slane %v5040_v43, 4  ;;  %v3123_v13 = vrot.slane %v12184_v40, 4  ;;  %v12418_v16 = vmax.f32 %v2783_v60, 0.0 }
 0x3f0   : > { %v12369_v22 = vld.sshfl [vmem:[#allocation1 + $0x20] sm:$0xff pattern:$0x73625140]  ;;  %15616 = vst [vmem:[#allocation88_spill] sm:$0xff] %v12377_v2  ;;  %v6638_v30 = vadd.f32 %v6637_v39, %v12284_v59  ;;  %v9324_v59 = vld [vmem:[%s15498_s2 + $0x118] sm:$0xff]  ;;  %v4576_v39 = vor.u32 %v4575_v54, %v12340_v50  ;;  %v12420_v28 = vpack.c.b16 %v5521_v55, %v5520_v58  ;;  %v4589_v47 = vshll.u32 %v4124_v45, 16  ;;  %7258 = vmatpush.bf16.msrb.mxu3 %v9335_v61 }
 0x3f1   : > { %3746 = vst [vmem:[#allocation1 + $0x20] ss:$4 sm:$0xff] %v3135_v29  ;;  %v12422_v2 = vmax.f32 %v2784_v62, 0.0  ;;  %7092 = vmatpush.bf16.msrb.mxu2 %v9324_v59  ;;  %v4586_v11 = vor.u32 %v4585_v24, %v12393_v63  ;;  %v3141_v54 = vrot.slane %v12418_v16, 4  ;;  %v5394_v60 = vunpack.c.l.b16 %v12277_v15 }
 0x3f2   : > { %3747 = vst [vmem:[#allocation1 + $0x21] ss:$4 sm:$0xff] %v3136_v3  ;;  %v12390_v29 = vpop.f32.mrf.mxu1  ;;  %v5039_v3 = vrot.slane %v15620_v36, 4  ;;  %v12428_v42 = vadd.f32 %v6806_v44, %v6638_v30  ;;  %v5395_v58 = vunpack.c.l.b16 %v12342_v57  ;;  %v3142_v55 = vrot.slane %v12418_v16, 6  ;;  %v9714_v57 = vld [vmem:[%s15498_s2 + $0xb8] sm:$0xff] }
 0x3f3   : > { %3748 = vst [vmem:[#allocation1 + $0x22] ss:$4 sm:$0xff] %v12346_v12  ;;  %v4577_v15 = vrot.slane %v4576_v39, 4  ;;  %v2699_v62 = vmul.f32 %v11874_v19, %v12217_v6  ;;  %v12452_v24 = vpack.c.bf16 %v4035_v27, %v4035_v27  ;;  %v4587_v61 = vrot.slane %v4586_v11, 4 }
 0x3f4   : > { %3749 = vst [vmem:[#allocation1 + $0x23] ss:$4 sm:$0xff] %v3137_v26  ;;  %v5043_v26 = vrot.slane %v4124_v45, 5  ;;  %v6809_v36 = vpop.f32.mrf.mxu3  ;;  %v5041_v50 = vsel %vm10773_vm14, %v5039_v3, %v5040_v43  ;;  %v12435_v45 = vpop.f32.mrf.mxu0  ;;  %6679 = vmatmul.bf16.gmra.mxu2 %v12420_v28  ;;  %v3124_v43 = vrot.slane %v12184_v40, 6  ;;  %v3143_v3 = vrot.slane %v12422_v2, 2 }
 0x3f5   : > { %15623 = vst [vmem:[#allocation27_spill] sm:$0xff] %v12420_v28  ;;  %v4591_v59 = vrot.slane %v4589_v47, 5  ;;  %v5650_v19 = vunpack.c.l.b16 %v5041_v50  ;;  %v2785_v27 = vadd.f32 %v11899_v46, %v2698_v8  ;;  %v4582_v32 = vsel %vm10749_vm11, %v4577_v15, %v12393_v63  ;;  %v12486_v50 = vld.sshfl [vmem:[#allocation1] sm:$0xff pattern:$0x73625140] }
 0x3f6   : > { %15624 = vst [vmem:[#allocation89_spill] sm:$0xff] %v12428_v42  ;;  %v5044_v44 = vsel %vm10773_vm14, %v5042_v34, %v5043_v26  ;;  %v12460_v26 = vpack.c.b16 %v5395_v58, %v5394_v60  ;;  %v12466_v5 = vpack.c.bf16 %v4036_v10, %v4036_v10  ;;  %v4037_v11 = vsel %vm12382_vm13, %v12112_v49, 0.0  ;;  %v15630_v10 = vld [vmem:[#allocation30_spill] sm:$0xff] }
 0x3f7   : > { %6420 = vmatmul.bf16.vlgmr.msrb.gmra.mxu0 %v5420_v35  ;;  %v6640_v9 = vpop.f32.mrf.mxu2  ;;  %v5651_v6 = vunpack.c.l.b16 %v5044_v44  ;;  %v2786_v47 = vadd.f32 %v11899_v46, %v2699_v62  ;;  %v4594_v63 = vshrl.u32 %v12452_v24, 16  ;;  %v4592_v49 = vsel %vm10749_vm11, %v4587_v61, %v4591_v59  ;;  %v15628_v44 = vld [vmem:[#allocation29_spill] sm:$0xff]  ;;  %3726 = vst [vmem:[#allocation1 + $0x1] ss:$4 sm:$0xff] %v3123_v13 }
 0x3f8   : > { %6750 = vmatpush.bf16.msrb.mxu0 %v9714_v57  ;;  %v6641_v34 = vadd.f32 %v6640_v9, %v12338_v31  ;;  %15625 = vst [vmem:[#allocation90_spill] sm:$0xff] %v12460_v26  ;;  %v9715_v31 = vld [vmem:[%s15498_s2 + $0xb0] sm:$0xff]  ;;  %v4603_v58 = vshll.u32 %v12466_v5, 16  ;;  %v4607_v46 = vshrl.u32 %v12466_v5, 16  ;;  %v15627_v8 = vrot.slane %v12184_v40, 2  ;;  %v9716_v9 = vld [vmem:[%s15498_s2 + $0xa8] sm:$0xff] }
 0x3f9   : > { %v5359_v15 = vunpack.c.l.b16 %v15628_v44  ;;  %v12494_v57 = vmax.f32 %v2785_v27, 0.0  ;;  %v5522_v62 = vunpack.c.l.b16 %v4582_v32  ;;  %v12504_v61 = vmax.f32 %v2786_v47, 0.0  ;;  %3727 = vst [vmem:[#allocation1 + $0x2] ss:$4 sm:$0xff] %v3124_v43 }
 0x3fa   : > { %v12457_v35 = vpop.f32.mrf.mxu1  ;;  %6515 = vmatmul.bf16.gmra.mxu1 %v12460_v26  ;;  %v12481_v60 = vadd.f32 %v6809_v36, %v6641_v34  ;;  %3725 = vst [vmem:[#allocation1] ss:$4 sm:$0xff] %v15627_v8  ;;  %v12496_v36 = vpack.c.b16 %v5651_v6, %v5650_v19  ;;  %v5523_v59 = vunpack.c.l.b16 %v4592_v49  ;;  %v12506_v34 = vpack.c.bf16 %v4037_v11, %v4037_v11  ;;  %v12520_v11 = vld [vmem:[%s15481_s4] ss:$0 sm:$0xff] }
 0x3fb   : > { %v12454_v30 = vld.sshfl [vmem:[#allocation1 + $0x20] sm:$0xff pattern:$0x73625140]  ;;  %v5047_v27 = vrot.slane %v12466_v5, 5  ;;  %v3147_v19 = vrot.slane %v12494_v57, 4  ;;  %v4596_v13 = vrot.slane %v4594_v63, 4  ;;  %v2700_v43 = vmul.f32 %v12520_v11, %v12271_v56 }
 0x3fc   : > { %3756 = vst [vmem:[#allocation1 + $0x20] ss:$4 sm:$0xff] %v3141_v54  ;;  %6751 = vmatpush.bf16.msrb.mxu0 %v9715_v31  ;;  %v12477_v39 = vpop.f32.mrf.mxu3  ;;  %v4597_v54 = vshll.u32 %v12452_v24, 16  ;;  %v12513_v31 = vrot.slane %v4603_v58, 5  ;;  %v3148_v47 = vrot.slane %v12494_v57, 6  ;;  %v4609_v8 = vrot.slane %v4607_v46, 4 }
 0x3fd   : > { %3757 = vst [vmem:[#allocation1 + $0x21] ss:$4 sm:$0xff] %v3142_v55  ;;  %v12488_v55 = vpop.f32.mrf.mxu0  ;;  %v3126_v63 = vrot.slane %v12213_v25, 4  ;;  %v9718_v58 = vld [vmem:[%s15498_s2 + $0xa0] sm:$0xff]  ;;  %v15352_v56 = vrot.slane %v12506_v34, 5  ;;  %v12536_v46 = vpack.c.b16 %v5523_v59, %v5522_v62  ;;  %v5397_v42 = vunpack.c.l.b16 %v12466_v5  ;;  %v9720_v5 = vld [vmem:[%s15498_s2 + $0x98] sm:$0xff] }
 0x3fe   : > { %3758 = vst [vmem:[#allocation1 + $0x22] ss:$4 sm:$0xff] %v12422_v2  ;;  %v4599_v32 = vrot.slane %v4597_v54, 5  ;;  %v8946_v54 = vrot.slane %v12452_v24, 9  ;;  %v12544_v26 = vld [vmem:[%s15482_s5] ss:$0 sm:$0xff] }
 0x3ff   : > { %15626 = vst [vmem:[#allocation91_spill] sm:$0xff] %v12481_v60  ;;  %v6642_v6 = vpop.f32.mrf.mxu2  ;;  %6853 = vmatmul.bf16.gmra.mxu3 %v12496_v36  ;;  %v5049_v60 = vrot.slane %v5047_v27, 4  ;;  %v2787_v28 = vadd.f32 %v12544_v26, %v2700_v43  ;;  %v4613_v62 = vshll.u32 %v12506_v34, 16 }
 0x400   : > { %3759 = vst [vmem:[#allocation1 + $0x23] ss:$4 sm:$0xff] %v3143_v3  ;;  %v5358_v3 = vunpack.c.l.b16 %v15630_v10  ;;  %6752 = vmatpush.bf16.msrb.mxu0 %v9716_v9  ;;  %v6643_v49 = vadd.f32 %v6642_v6, %v12390_v29  ;;  %v3149_v10 = vrot.slane %v12504_v61, 2  ;;  %v5396_v6 = vunpack.c.l.b16 %v12452_v24  ;;  %v9334_v24 = vld [vmem:[%s15498_s2 + $0x168] sm:$0xff] }
 0x401   : > { %15629 = vst [vmem:[#allocation29_spill] sm:$0xff] %v12496_v36  ;;  %v4600_v36 = vor.u32 %v4599_v32, %v4596_v13  ;;  %v5048_v13 = vsel %vm10773_vm14, %v8946_v54, %v5047_v27  ;;  %7259 = vmatpush.bf16.msrb.mxu3 %v9334_v24 }
 0x402   : > { %v12510_v40 = vpop.f32.mrf.mxu1  ;;  %3728 = vst [vmem:[#allocation1 + $0x3] ss:$4 sm:$0xff] %v12213_v25  ;;  %v5421_v29 = vpack.c.b16 %v5359_v15, %v5358_v3  ;;  %v4610_v15 = vor.u32 %v4609_v8, %v12513_v31  ;;  %v12563_v59 = vadd.f32 %v12477_v39, %v6643_v49  ;;  %v12576_v43 = vpack.c.b16 %v5397_v42, %v5396_v6  ;;  %v9721_v42 = vld [vmem:[%s15498_s2 + $0x90] sm:$0xff] }
 0x403   : > { %15631 = vst [vmem:[#allocation30_spill] sm:$0xff] %v12536_v46  ;;  %v4601_v8 = vrot.slane %v4600_v36, 4  ;;  %v12578_v39 = vmax.f32 %v2787_v28, 0.0  ;;  %v5652_v54 = vunpack.c.l.b16 %v5048_v13  ;;  %v3151_v28 = vrot.slane %v12504_v61, 6 }
 0x404   : > { %6753 = vmatpush.bf16.msrb.mxu0 %v9718_v58  ;;  %v12533_v9 = vpop.f32.mrf.mxu3  ;;  %v3127_v58 = vrot.slane %v12213_v25, 6  ;;  %6684 = vmatmul.bf16.gmra.mxu2 %v12536_v46  ;;  %v4038_v25 = vsel %vm12382_vm13, %v12344_v20, 0.0  ;;  %15632 = vst [vmem:[#allocation92_spill] sm:$0xff] %v12563_v59  ;;  %v5051_v20 = vsel %vm10773_vm14, %v5049_v60, %v15352_v56  ;;  %v3132_v56 = vrot.slane %v12273_v52, 4 }
 0x405   : > { %v12549_v3 = vpop.f32.mrf.mxu0  ;;  %15633 = vst [vmem:[#allocation93_spill] sm:$0xff] %v12576_v43  ;;  %v12582_v27 = vpack.c.bf16 %v4038_v25, %v4038_v25  ;;  %v3152_v6 = vrot.slane %v12578_v39, 2  ;;  %v3134_v46 = vrot.slane %v12336_v48, 2 }
 0x407   : > { %v12530_v44 = vld.sshfl [vmem:[#allocation1 + $0x20] sm:$0xff pattern:$0x73625140]  ;;  %6425 = vmatmul.bf16.gmra.mxu0 %v5421_v29  ;;  %v6645_v49 = vpop.f32.mrf.mxu2  ;;  %v12580_v29 = vrot.slane %v4613_v62, 5  ;;  %v4623_v62 = vshll.u32 %v12582_v27, 16  ;;  %v4627_v25 = vshrl.u32 %v12582_v27, 16 }
 0x408   : > { %3766 = vst [vmem:[#allocation1 + $0x20] ss:$4 sm:$0xff] %v3147_v19  ;;  %6754 = vmatpush.bf16.msrb.mxu0 %v9720_v5  ;;  %v3128_v19 = vrot.slane %v12269_v53, 2  ;;  %v6646_v60 = vadd.f32 %v6645_v49, %v12457_v35  ;;  %v5653_v5 = vunpack.c.l.b16 %v5051_v20  ;;  %v4039_v35 = vsel %vm12382_vm13, %v12182_v18, 0.0  ;;  %v9722_v18 = vld [vmem:[%s15498_s2 + $0x88] sm:$0xff] }
 0x409   : > { %3767 = vst [vmem:[#allocation1 + $0x21] ss:$4 sm:$0xff] %v3148_v47  ;;  %v12572_v32 = vld.sshfl [vmem:[#allocation1] sm:$0xff pattern:$0x73625140]  ;;  %v12614_v13 = vpack.c.bf16 %v4039_v35, %v4039_v35  ;;  %v5053_v20 = vrot.slane %v12582_v27, 5 }
 0x40a   : > { %3768 = vst [vmem:[#allocation1 + $0x22] ss:$4 sm:$0xff] %v12504_v61  ;;  %v12574_v47 = vpop.f32.mrf.mxu1  ;;  %6520 = vmatmul.bf16.gmra.mxu1 %v12576_v43  ;;  %v12625_v43 = vrot.slane %v4623_v62, 5 }
 0x40b   : > { %3769 = vst [vmem:[#allocation1 + $0x23] ss:$4 sm:$0xff] %v3149_v10  ;;  %v4611_v10 = vrot.slane %v4610_v15, 4 }
 0x40c   : > { %3732 = vst [vmem:[#allocation1] ss:$4 sm:$0xff] %v3126_v63  ;;  %6755 = vmatpush.bf16.msrb.mxu0 %v9721_v42  ;;  %v6816_v36 = vpop.f32.mrf.mxu3  ;;  %v4606_v63 = vsel %vm10749_vm11, %v4601_v8, %v12513_v31  ;;  %v3153_v31 = vrot.slane %v12578_v39, 4  ;;  %v15635_v8 = vld [vmem:[#allocation34_spill] sm:$0xff] }
 0x40d   : > { %3733 = vst [vmem:[#allocation1 + $0x1] ss:$4 sm:$0xff] %v3127_v58  ;;  %v4616_v58 = vsel %vm10749_vm11, %v4611_v10, %v12580_v29  ;;  %v12602_v15 = vpop.f32.mrf.mxu0  ;;  %v5360_v49 = vunpack.c.l.b16 %v15635_v8  ;;  %v15636_v10 = vld [vmem:[#allocation33_spill] sm:$0xff]  ;;  %v4629_v8 = vrot.slane %v4627_v25, 4 }
 0x40e   : > { %3734 = vst [vmem:[#allocation1 + $0x2] ss:$4 sm:$0xff] %v12269_v53  ;;  %v4617_v53 = vshrl.u32 %v12506_v34, 16  ;;  %v5361_v42 = vunpack.c.l.b16 %v15636_v10  ;;  %v5525_v59 = vunpack.c.l.b16 %v4616_v58  ;;  %v12628_v10 = vadd.f32 %v12533_v9, %v6646_v60 }
 0x40f   : > { %3735 = vst [vmem:[#allocation1 + $0x3] ss:$4 sm:$0xff] %v3128_v19  ;;  %v12609_v19 = vpack.c.b16 %v5653_v5, %v5652_v54  ;;  %v5524_v5 = vunpack.c.l.b16 %v4606_v63  ;;  %v6647_v35 = vpop.f32.mrf.mxu2  ;;  %v9323_v63 = vld [vmem:[%s15498_s2 + $0x110] sm:$0xff]  ;;  %v5055_v60 = vrot.slane %v5053_v20, 4 }
 0x410   : > { %6756 = vmatpush.bf16.msrb.mxu0 %v9722_v18  ;;  %v4619_v18 = vrot.slane %v4617_v53, 4  ;;  %15637 = vst [vmem:[#allocation34_spill] sm:$0xff] %v12628_v10  ;;  %v6648_v1 = vadd.f32 %v6647_v35, %v12510_v40  ;;  %v5422_v40 = vpack.c.b16 %v5361_v42, %v5360_v49  ;;  %7093 = vmatpush.bf16.msrb.mxu2 %v9323_v63  ;;  %v5399_v10 = vunpack.c.l.b16 %v12582_v27 }
 0x411   : > { %15634 = vst [vmem:[#allocation94_spill] sm:$0xff] %v12609_v19  ;;  %6858 = vmatmul.bf16.gmra.mxu3 %v12609_v19  ;;  %v12645_v25 = vpack.c.b16 %v5525_v59, %v5524_v5  ;;  %v4633_v19 = vshll.u32 %v12614_v13, 16  ;;  %v15641_v59 = vrot.slane %v12614_v13, 5 }
 0x412   : > { %v12606_v24 = vld.sshfl [vmem:[#allocation1 + $0x20] sm:$0xff pattern:$0x73625140]  ;;  %v12621_v54 = vpop.f32.mrf.mxu1  ;;  %v12648_v35 = vadd.f32 %v6816_v36, %v6648_v1  ;;  %v9315_v1 = vld [vmem:[%s15498_s2 + $0xd0] sm:$0xff] }
 0x413   : > { %3774 = vst [vmem:[#allocation1 + $0x20] ss:$4 sm:$0xff] %v3151_v28  ;;  %v3133_v28 = vrot.slane %v12273_v52, 6  ;;  %v9723_v52 = vld [vmem:[%s15498_s2 + $0x80] sm:$0xff]  ;;  %6924 = vmatpush.bf16.msrb.mxu1 %v9315_v1  ;;  %v4635_v5 = vrot.slane %v4633_v19, 5  ;;  %v4041_v19 = vsel %vm12382_vm13, %v12252_v14, 0.0 }
 0x414   : > { %3775 = vst [vmem:[#allocation1 + $0x21] ss:$4 sm:$0xff] %v12578_v39  ;;  %6757 = vmatpush.bf16.msrb.mxu0 %v9723_v52  ;;  %v12638_v53 = vpop.f32.mrf.mxu3  ;;  %v5398_v52 = vunpack.c.l.b16 %v12506_v34  ;;  %6689 = vmatmul.bf16.gmra.mxu2 %v12645_v25  ;;  %v15643_v14 = vld [vmem:[#allocation40_spill] sm:$0xff] }
 0x415   : > { %3776 = vst [vmem:[#allocation1 + $0x22] ss:$4 sm:$0xff] %v3152_v6  ;;  %v15638_v6 = vrot.slane %v12506_v34, 5  ;;  %v12654_v58 = vpop.f32.mrf.mxu0  ;;  %v5362_v1 = vunpack.c.l.b16 %v15643_v14 }
 0x416   : > { %3777 = vst [vmem:[#allocation1 + $0x23] ss:$4 sm:$0xff] %v3153_v31  ;;  %v12643_v62 = vld.sshfl [vmem:[#allocation1] sm:$0xff pattern:$0x73625140]  ;;  %v4620_v31 = vor.u32 %v4619_v18, %v12580_v29  ;;  %v5057_v29 = vsel %vm10773_vm14, %v5055_v60, %v15641_v59  ;;  %v12672_v49 = vpack.c.b16 %v5399_v10, %v5398_v52  ;;  %v4637_v60 = vshrl.u32 %v12614_v13, 16 }
 0x417   : > { %v5052_v9 = vrot.slane %v15638_v6, 4  ;;  %15639 = vst [vmem:[#allocation33_spill] sm:$0xff] %v12645_v25  ;;  %v4630_v6 = vor.u32 %v4629_v8, %v12625_v43  ;;  %6430 = vmatmul.bf16.gmra.mxu0 %v5422_v40  ;;  %v3138_v8 = vrot.slane %v12346_v12, 4  ;;  %v3140_v52 = vrot.slane %v12418_v16, 2 }
 0x418   : > { %3742 = vst [vmem:[#allocation1] ss:$4 sm:$0xff] %v3132_v56  ;;  %v4040_v56 = vsel %vm12382_vm13, %v12486_v50, 0.0  ;;  %v4621_v36 = vrot.slane %v4620_v31, 4  ;;  %v6650_v50 = vpop.f32.mrf.mxu2 }
 0x419   : > { %15640 = vst [vmem:[#allocation95_spill] sm:$0xff] %v12648_v35  ;;  %v5054_v34 = vsel %vm10773_vm14, %v5052_v9, %v5053_v20  ;;  %v4631_v42 = vrot.slane %v4630_v6, 4  ;;  %v4130_v18 = vpack.c.bf16 %v4040_v56, %v4040_v56  ;;  %v5655_v20 = vunpack.c.l.b16 %v5057_v29 }
 0x41a   : > { %3743 = vst [vmem:[#allocation1 + $0x1] ss:$4 sm:$0xff] %v3133_v28  ;;  %v12670_v27 = vpop.f32.mrf.mxu1  ;;  %v5654_v28 = vunpack.c.l.b16 %v5054_v34  ;;  %6525 = vmatmul.bf16.gmra.mxu1 %v12672_v49  ;;  %v4626_v9 = vsel %vm10749_vm11, %v4621_v36, %v12625_v43  ;;  %v12694_v43 = vpack.c.bf16 %v4041_v19, %v4041_v19  ;;  %v15644_v36 = vld [vmem:[#allocation37_spill] sm:$0xff] }
 0x41b   : > { %3744 = vst [vmem:[#allocation1 + $0x2] ss:$4 sm:$0xff] %v12336_v48  ;;  %v6651_v48 = vadd.f32 %v6650_v50, %v12574_v47  ;;  %v4636_v47 = vsel %vm10749_vm11, %v4631_v42, %v4635_v5  ;;  %v4643_v40 = vshll.u32 %v4130_v18, 16  ;;  %v4647_v31 = vshrl.u32 %v4130_v18, 16 }
 0x41c   : > { %3745 = vst [vmem:[#allocation1 + $0x3] ss:$4 sm:$0xff] %v3134_v46  ;;  %v6821_v63 = vpop.f32.mrf.mxu3  ;;  %v3139_v46 = vrot.slane %v12346_v12, 6  ;;  %v12690_v12 = vpack.c.b16 %v5655_v20, %v5654_v28  ;;  %v5059_v56 = vrot.slane %v4130_v18, 5  ;;  %v5526_v59 = vunpack.c.l.b16 %v4626_v9 }
 0x41d   : > { %v12686_v10 = vpop.f32.mrf.mxu0  ;;  %v5527_v29 = vunpack.c.l.b16 %v4636_v47  ;;  %v5363_v50 = vunpack.c.l.b16 %v15644_v36  ;;  %v4639_v28 = vrot.slane %v4637_v60, 4  ;;  %v4645_v20 = vrot.slane %v4643_v40, 5 }
 0x41e   : > { %15642 = vst [vmem:[#allocation96_spill] sm:$0xff] %v12690_v12  ;;  %v4649_v35 = vrot.slane %v4647_v31, 4  ;;  %v12703_v19 = vadd.f32 %v12638_v53, %v6651_v48  ;;  %v15646_v9 = vrot.slane %v12614_v13, 5  ;;  %v5062_v36 = vrot.slane %v12694_v43, 5 }
 0x41f   : > { %v12711_v60 = vpack.c.b16 %v5527_v29, %v5526_v59  ;;  %v5400_v40 = vunpack.c.l.b16 %v12614_v13  ;;  %v4640_v31 = vor.u32 %v4639_v28, %v4635_v5  ;;  %v4653_v48 = vshll.u32 %v12694_v43, 16 }
 0x420   : > { %v6652_v42 = vpop.f32.mrf.mxu2  ;;  %15645 = vst [vmem:[#allocation40_spill] sm:$0xff] %v12703_v19  ;;  %v5058_v47 = vrot.slane %v15646_v9, 4  ;;  %v4650_v53 = vor.u32 %v4649_v35, %v4645_v20  ;;  %v3145_v5 = vrot.slane %v12422_v2, 6 }
 0x421   : > { %6863 = vmatmul.bf16.gmra.mxu3 %v12690_v12  ;;  %v5423_v12 = vpack.c.b16 %v5363_v50, %v5362_v1  ;;  %15647 = vst [vmem:[#allocation37_spill] sm:$0xff] %v12711_v60  ;;  %v3144_v1 = vrot.slane %v12422_v2, 4  ;;  %v4641_v59 = vrot.slane %v4640_v31, 4  ;;  %v12736_v50 = vrot.slane %v4653_v48, 5 }
 0x422   : > { %v12697_v34 = vpop.f32.mrf.mxu1  ;;  %v5060_v13 = vsel %vm10773_vm14, %v5058_v47, %v5059_v56  ;;  %v4651_v29 = vrot.slane %v4650_v53, 4  ;;  %v3146_v2 = vrot.slane %v12494_v57, 2 }
 0x423   : > { %v12692_v6 = vld.sshfl [vmem:[#allocation1] sm:$0xff pattern:$0x73625140]  ;;  %v4646_v0 = vsel %vm10749_vm11, %v4641_v59, %v4645_v20 }
 0x424   : > { %3752 = vst [vmem:[#allocation1] ss:$4 sm:$0xff] %v3138_v8  ;;  %v6653_v8 = vadd.f32 %v6652_v42, %v12621_v54  ;;  %v12706_v14 = vpop.f32.mrf.mxu3  ;;  %6694 = vmatmul.bf16.gmra.mxu2 %v12711_v60 }
 0x425   : > { %3753 = vst [vmem:[#allocation1 + $0x1] ss:$4 sm:$0xff] %v3139_v46  ;;  %v5061_v46 = vrot.slane %v5059_v56, 4  ;;  %v12715_v54 = vpop.f32.mrf.mxu0 }
 0x426   : > { %3754 = vst [vmem:[#allocation1 + $0x2] ss:$4 sm:$0xff] %v12418_v16  ;;  %v5401_v16 = vunpack.c.l.b16 %v4130_v18  ;;  %v12721_v42 = vadd.f32 %v6821_v63, %v6653_v8  ;;  %v5656_v8 = vunpack.c.l.b16 %v5060_v13 }
 0x427   : > { %3755 = vst [vmem:[#allocation1 + $0x3] ss:$4 sm:$0xff] %v3140_v52  ;;  %6435 = vmatmul.bf16.gmra.mxu0 %v5423_v12  ;;  %v4042_v52 = vsel %vm12382_vm13, %v12572_v32, 0.0  ;;  %v5063_v35 = vsel %vm10773_vm14, %v5061_v46, %v5062_v36  ;;  %v3231_v32 = vadd.s32 6, %v10695_v4 }
 0x428   : > { %15648 = vst [vmem:[#allocation97_spill] sm:$0xff] %v12721_v42  ;;  %v12733_v12 = vpack.c.b16 %v5401_v16, %v5400_v40  ;;  %v6655_v63 = vpop.f32.mrf.mxu2  ;;  %v12738_v28 = vpack.c.bf16 %v4042_v52, %v4042_v52  ;;  %v5657_v9 = vunpack.c.l.b16 %v5063_v35  ;;  %v4043_v40 = vsel %vm3436_vm0, %v12294_v7, 0.0 }
 0x429   : > { %v6656_v56 = vadd.f32 %v6655_v63, %v12670_v27  ;;  %v4657_v16 = vshrl.u32 %v12694_v43, 16  ;;  %vm3251_vm1 = vcmp.ge.s32.totalorder %v3231_v32, 1  ;;  %vm3261_vm3 = vcmp.le.s32.totalorder %v3231_v32, 64 }
 0x42a   : > { %v12731_v18 = vpop.f32.mrf.mxu1  ;;  %6530 = vmatmul.bf16.gmra.mxu1 %v12733_v12  ;;  %v4656_v27 = vsel %vm10749_vm11, %v4651_v29, %v12736_v50  ;;  %v4663_v53 = vshll.u32 %v12738_v28, 16  ;;  %v4667_v48 = vshrl.u32 %v12738_v28, 16  ;;  %v12761_v7 = vpack.c.b16 %v5657_v9, %v5656_v8  ;;  %vm12765_vm4 = vmand %vm3251_vm1, %vm3261_vm3 }
 0x42b   : > { %v5365_v52 = vunpack.c.l.b16 %v11110_v21  ;;  %v5065_v20 = vrot.slane %v12738_v28, 5  ;;  %v5529_v32 = vunpack.c.l.b16 %v4656_v27  ;;  %v4659_v63 = vrot.slane %v4657_v16, 4  ;;  %vm3338_vm5 = vmand %vm12765_vm4, %vm3275_vm7 }
 0x42c   : > { %v6826_v46 = vpop.f32.mrf.mxu3  ;;  %15649 = vst [vmem:[#allocation98_spill] sm:$0xff] %v12761_v7  ;;  %v4665_v29 = vrot.slane %v4663_v53, 5  ;;  %v5403_v53 = vunpack.c.l.b16 %v12738_v28  ;;  %v4044_v42 = vsel %vm3338_vm5, %v12643_v62, 0.0  ;;  %v4045_v62 = vsel %vm12765_vm4, %v12369_v22, 0.0  ;;  %vm3445_vm6 = vmand %vm12765_vm4, %vm3382_vm2 }
 0x42d   : > { %v12756_v31 = vpop.f32.mrf.mxu0  ;;  %v5067_v16 = vrot.slane %v5065_v20, 4 }
 0x42e   : > { %v12746_v47 = vld.sshfl [vmem:[#allocation1] sm:$0xff pattern:$0x73625140] }
 0x42f   : > { %3762 = vst [vmem:[#allocation1] ss:$4 sm:$0xff] %v3144_v1  ;;  %v4133_v1 = vpack.c.bf16 %v4043_v40, %v4043_v40  ;;  %v5064_v40 = vrot.slane %v5062_v36, 4 }
 0x430   : > { %3763 = vst [vmem:[#allocation1 + $0x1] ss:$4 sm:$0xff] %v3145_v5  ;;  %v5528_v5 = vunpack.c.l.b16 %v4646_v0  ;;  %v6657_v59 = vpop.f32.mrf.mxu2 }
 0x431   : > { %3764 = vst [vmem:[#allocation1 + $0x2] ss:$4 sm:$0xff] %v12494_v57  ;;  %6868 = vmatmul.bf16.gmra.mxu3 %v12761_v7  ;;  %v5364_v57 = vunpack.c.l.b16 %v11011_v51  ;;  %v6658_v21 = vadd.f32 %v6657_v59, %v12697_v34  ;;  %v5068_v0 = vrot.slane %v4133_v1, 5  ;;  %v12785_v51 = vadd.f32 %v12706_v14, %v6656_v56 }
 0x432   : > { %3765 = vst [vmem:[#allocation1 + $0x3] ss:$4 sm:$0xff] %v3146_v2  ;;  %v12769_v35 = vpop.f32.mrf.mxu1  ;;  %v4669_v2 = vrot.slane %v4667_v48, 4  ;;  %v12787_v27 = vpack.c.b16 %v5529_v32, %v5528_v5  ;;  %v5402_v34 = vunpack.c.l.b16 %v12694_v43  ;;  %v4660_v48 = vor.u32 %v4659_v63, %v12736_v50 }
 0x433   : > { %v12778_v8 = vpack.c.b16 %v5365_v52, %v5364_v57  ;;  %15652 = vst [vmem:[#allocation99_spill] sm:$0xff] %v12785_v51  ;;  %v4673_v57 = vshll.u32 %v4133_v1, 16  ;;  %v12796_v36 = vadd.f32 %v6826_v46, %v6658_v21  ;;  %v3150_v14 = vrot.slane %v12504_v61, 4 }
 0x434   : > { %v12780_v9 = vpop.f32.mrf.mxu3  ;;  %15653 = vst [vmem:[#allocation100_spill] sm:$0xff] %v12787_v27  ;;  %v4670_v52 = vor.u32 %v4669_v2, %v4665_v29  ;;  %6699 = vmatmul.bf16.gmra.mxu2 %v12787_v27  ;;  %v5066_v43 = vsel %vm10773_vm14, %v5064_v40, %v5065_v20  ;;  %v5069_v50 = vsel %vm10773_vm14, %v5067_v16, %v5068_v0  ;;  %v4661_v5 = vrot.slane %v4660_v48, 4  ;;  %v9333_v16 = vld [vmem:[%s15498_s2 + $0x160] sm:$0xff] }
 0x435   : > { %v12792_v59 = vpop.f32.mrf.mxu0  ;;  %15654 = vst [vmem:[#allocation101_spill] sm:$0xff] %v12796_v36  ;;  %v12809_v56 = vpack.c.bf16 %v4044_v42, %v4044_v42  ;;  %v12811_v1 = vpack.c.b16 %v5403_v53, %v5402_v34  ;;  %v4675_v61 = vrot.slane %v4673_v57, 5  ;;  %v2701_v20 = vmul.f32 %v12520_v11, %v12310_v17  ;;  %7260 = vmatpush.bf16.msrb.mxu3 %v9333_v16 }
 0x436   : > { %v4671_v32 = vrot.slane %v4670_v52, 4  ;;  %v5658_v2 = vunpack.c.l.b16 %v5066_v43  ;;  %v5659_v21 = vunpack.c.l.b16 %v5069_v50  ;;  %v4135_v42 = vpack.c.bf16 %v4045_v62, %v4045_v62 }
 0x437   : > { %6440 = vmatmul.bf16.gmra.mxu0 %v12778_v8  ;;  %15655 = vst [vmem:[#allocation102_spill] sm:$0xff] %v12811_v1  ;;  %v4046_v0 = vsel %vm12765_vm4, %v12692_v6, 0.0  ;;  %v4678_v17 = vshrl.u32 %v12809_v56, 16  ;;  %v4666_v34 = vsel %vm10749_vm11, %v4661_v5, %v4665_v29 }
 0x438   : > { %v6660_v46 = vpop.f32.mrf.mxu2  ;;  %v4676_v53 = vsel %vm10749_vm11, %v4671_v32, %v4675_v61  ;;  %v4687_v52 = vshll.u32 %v4135_v42, 16  ;;  %v4691_v57 = vshrl.u32 %v4135_v42, 16  ;;  %v12834_v43 = vpack.c.b16 %v5659_v21, %v5658_v2 }
 0x439   : > { %v6661_v63 = vadd.f32 %v6660_v46, %v12731_v18  ;;  %v12816_v40 = vld.sshfl [vmem:[#allocation1] sm:$0xff pattern:$0x73625140]  ;;  %v4681_v18 = vshll.u32 %v12809_v56, 16  ;;  %v12836_v6 = vpack.c.bf16 %v4046_v0, %v4046_v0  ;;  %v5072_v50 = vrot.slane %v4135_v42, 5 }
 0x43a   : > { %v12804_v28 = vpop.f32.mrf.mxu1  ;;  %6535 = vmatmul.bf16.gmra.mxu1 %v12811_v1  ;;  %3772 = vst [vmem:[#allocation1] ss:$4 sm:$0xff] %v3150_v14  ;;  %v2788_v14 = vadd.f32 %v12544_v26, %v2701_v20  ;;  %v5530_v29 = vunpack.c.l.b16 %v4666_v34  ;;  %v5531_v46 = vunpack.c.l.b16 %v4676_v53  ;;  %v4680_v5 = vrot.slane %v4678_v17, 4  ;;  %v15660_v1 = vld [vmem:[#allocation31_spill] sm:$0xff] }
 0x43b   : > { %15656 = vst [vmem:[#allocation103_spill] sm:$0xff] %v12834_v43  ;;  %v4683_v32 = vrot.slane %v4681_v18, 5  ;;  %v12841_v36 = vrot.slane %v4687_v52, 5  ;;  %v4693_v51 = vrot.slane %v4691_v57, 4  ;;  %v2702_v20 = vmul.f32 %v12520_v11, %v12372_v38 }
 0x43c   : > { %v6831_v22 = vpop.f32.mrf.mxu3  ;;  %v12843_v16 = vmax.f32 %v2788_v14, 0.0  ;;  %v8947_v0 = vrot.slane %v12809_v56, 9  ;;  %v5074_v19 = vrot.slane %v5072_v50, 4  ;;  %v12851_v17 = vadd.f32 %v12780_v9, %v6661_v63 }
 0x43d   : > { %v12831_v48 = vpop.f32.mrf.mxu0  ;;  %v3154_v18 = vrot.slane %v12578_v39, 6  ;;  %v12854_v53 = vpack.c.b16 %v5531_v46, %v5530_v29  ;;  %v5404_v52 = vunpack.c.l.b16 %v12809_v56  ;;  %v4684_v57 = vor.u32 %v4683_v32, %v4680_v5 }
 0x43e   : > { %15657 = vst [vmem:[#allocation104_spill] sm:$0xff] %v12851_v17  ;;  %v5405_v14 = vunpack.c.l.b16 %v4135_v42  ;;  %v4694_v38 = vor.u32 %v4693_v51, %v12841_v36  ;;  %v2789_v39 = vadd.f32 %v12544_v26, %v2702_v20  ;;  %v4047_v56 = vsel %vm12765_vm4, %v12454_v30, 0.0 }
 0x43f   : > { %15658 = vst [vmem:[#allocation105_spill] sm:$0xff] %v12854_v53  ;;  %v3155_v51 = vrot.slane %v12843_v16, 2  ;;  %v5073_v63 = vsel %vm10773_vm14, %v8947_v0, %v5072_v50  ;;  %v15663_v42 = vrot.slane %v12836_v6, 5  ;;  %v4685_v46 = vrot.slane %v4684_v57, 4  ;;  %v9322_v57 = vld [vmem:[%s15498_s2 + $0x108] sm:$0xff] }
 0x440   : > { %v6662_v61 = vpop.f32.mrf.mxu2  ;;  %v12885_v32 = vpack.c.b16 %v5405_v14, %v5404_v52  ;;  %v4695_v20 = vrot.slane %v4694_v38, 4  ;;  %v2704_v52 = vmul.f32 %v12520_v11, %v12488_v55  ;;  %v4048_v55 = vsel %vm12765_vm4, %v12746_v47, 0.0  ;;  %7094 = vmatpush.bf16.msrb.mxu2 %v9322_v57 }
 0x441   : > { %6873 = vmatmul.bf16.gmra.mxu3 %v12834_v43  ;;  %v6663_v2 = vadd.f32 %v6662_v61, %v12769_v35  ;;  %v4697_v35 = vshll.u32 %v12836_v6, 16  ;;  %v15659_v43 = vld [vmem:[#allocation32_spill] sm:$0xff] }
 0x442   : > { %v12838_v62 = vpop.f32.mrf.mxu1  ;;  %v15661_v34 = vpack.c.b16 %v15659_v43, %v15660_v1  ;;  %v5076_v1 = vsel %vm10773_vm14, %v5074_v19, %v15663_v42  ;;  %v2703_v43 = vmul.f32 %v12520_v11, %v12435_v45  ;;  %v12883_v5 = vld.sshfl [vmem:[#allocation1] sm:$0xff pattern:$0x73625140]  ;;  %v12891_v19 = vmax.f32 %v2789_v39, 0.0 }
 0x443   : > { %v12864_v9 = vadd.f32 %v6831_v22, %v6663_v2  ;;  %v3156_v22 = vrot.slane %v12843_v16, 4  ;;  %v12887_v50 = vrot.slane %v4697_v35, 5  ;;  %v12889_v2 = vpack.c.bf16 %v4047_v56, %v4047_v56  ;;  %3779 = vst [vmem:[#allocation1] ss:$4 sm:$0xff] %v3154_v18  ;;  %v9314_v18 = vld [vmem:[%s15498_s2 + $0xc8] sm:$0xff] }
 0x444   : > { %v6834_v21 = vpop.f32.mrf.mxu3  ;;  %6704 = vmatmul.bf16.gmra.mxu2 %v12854_v53  ;;  %v5661_v45 = vunpack.c.l.b16 %v5076_v1  ;;  %3780 = vst [vmem:[#allocation1 + $0x1] ss:$4 sm:$0xff] %v12843_v16  ;;  %v2790_v38 = vadd.f32 %v12544_v26, %v2703_v43  ;;  %v4690_v35 = vsel %vm10749_vm11, %v4685_v46, %v12841_v36  ;;  %6925 = vmatpush.bf16.msrb.mxu1 %v9314_v18  ;;  %v3158_v36 = vrot.slane %v12891_v19, 2  ;;  %v12933_v18 = vld.sshfl [vmem:[#allocation1 + $0x20] sm:$0xff pattern:$0x73625140] }
 0x445   : > { %v12859_v61 = vpop.f32.mrf.mxu0  ;;  %15662 = vst [vmem:[#allocation32_spill] sm:$0xff] %v12864_v9  ;;  %v4700_v39 = vsel %vm10749_vm11, %v4695_v20, %v12887_v50  ;;  %v2791_v47 = vadd.f32 %v12544_v26, %v2704_v52  ;;  %v12924_v1 = vpack.c.bf16 %v4048_v55, %v4048_v55  ;;  %v3159_v46 = vrot.slane %v12891_v19, 4 }
 0x446   : > { %3781 = vst [vmem:[#allocation1 + $0x2] ss:$4 sm:$0xff] %v3155_v51  ;;  %v4707_v51 = vshll.u32 %v12889_v2, 16  ;;  %v5532_v20 = vunpack.c.l.b16 %v4690_v35  ;;  %v5533_v57 = vunpack.c.l.b16 %v4700_v39  ;;  %v15666_v35 = vrot.slane %v12836_v6, 5 }
 0x447   : > { %6589 = vmatmul.bf16.vlgmr.msra.gmra.mxu0 %v15661_v34  ;;  %v5660_v34 = vunpack.c.l.b16 %v5073_v63  ;;  %3782 = vst [vmem:[#allocation1 + $0x3] ss:$4 sm:$0xff] %v3156_v22  ;;  %v4711_v63 = vshrl.u32 %v12889_v2, 16  ;;  %v5078_v22 = vrot.slane %v12889_v2, 5 }
 0x448   : > { %v6665_v30 = vpop.f32.mrf.mxu2  ;;  %v12935_v52 = vrot.slane %v4707_v51, 5  ;;  %3784 = vst [vmem:[#allocation1 + $0x21] ss:$4 sm:$0xff] %v12891_v19  ;;  %v5077_v39 = vrot.slane %v15666_v35, 4  ;;  %v12947_v51 = vpack.c.b16 %v5533_v57, %v5532_v20  ;;  %v4717_v35 = vshll.u32 %v12924_v1, 16 }
 0x449   : > { %v6666_v0 = vadd.f32 %v6665_v30, %v12804_v28  ;;  %v3157_v28 = vrot.slane %v12843_v16, 6  ;;  %v4701_v16 = vshrl.u32 %v12836_v6, 16  ;;  %v12921_v42 = vpack.c.b16 %v5661_v45, %v5660_v34  ;;  %3785 = vst [vmem:[#allocation1 + $0x22] ss:$4 sm:$0xff] %v3158_v36  ;;  %v15670_v36 = vld [vmem:[#allocation38_spill] sm:$0xff] }
 0x44a   : > { %v12881_v29 = vpop.f32.mrf.mxu1  ;;  %6540 = vmatmul.bf16.gmra.mxu1 %v12885_v32  ;;  %v2873_v34 = vmax.f32 %v2790_v38, 0.0  ;;  %v4713_v55 = vrot.slane %v4711_v63, 4  ;;  %v5080_v38 = vrot.slane %v5078_v22, 4  ;;  %15667 = vst [vmem:[#allocation107_spill] sm:$0xff] %v12947_v51  ;;  %v5407_v63 = vunpack.c.l.b16 %v12889_v2 }
 0x44b   : > { %15664 = vst [vmem:[#allocation31_spill] sm:$0xff] %v12921_v42  ;;  %v12927_v43 = vadd.f32 %v6834_v21, %v6666_v0  ;;  %v4703_v9 = vrot.slane %v4701_v16, 4  ;;  %v3160_v21 = vrot.slane %v12891_v19, 6  ;;  %v15669_v16 = vld [vmem:[#allocation39_spill] sm:$0xff] }
 0x44c   : > { %v6836_v14 = vpop.f32.mrf.mxu3  ;;  %3783 = vst [vmem:[#allocation1 + $0x20] ss:$4 sm:$0xff] %v3157_v28  ;;  %v5406_v28 = vunpack.c.l.b16 %v12836_v6  ;;  %v3161_v19 = vrot.slane %v2873_v34, 2  ;;  %v15671_v20 = vpack.c.b16 %v15669_v16, %v15670_v36  ;;  %v3162_v57 = vrot.slane %v2873_v34, 4 }
 0x44d   : > { %v12915_v56 = vpop.f32.mrf.mxu0  ;;  %15665 = vst [vmem:[#allocation106_spill] sm:$0xff] %v12927_v43  ;;  %v12940_v43 = vmax.f32 %v2791_v47, 0.0  ;;  %v4704_v47 = vor.u32 %v4703_v9, %v12887_v50  ;;  %v4049_v6 = vsel %vm12765_vm4, %v12530_v44, 0.0  ;;  %v5079_v9 = vsel %vm10773_vm14, %v5077_v39, %v5078_v22 }
 0x44e   : > { %3786 = vst [vmem:[#allocation1 + $0x23] ss:$4 sm:$0xff] %v3159_v46  ;;  %v12965_v2 = vld.sshfl [vmem:[#allocation1] sm:$0xff pattern:$0x73625140]  ;;  %v15672_v50 = vrot.slane %v12924_v1, 5  ;;  %v12976_v16 = vpack.c.b16 %v5407_v63, %v5406_v28  ;;  %v12980_v22 = vpack.c.bf16 %v4049_v6, %v4049_v6  ;;  %v2705_v39 = vmul.f32 %v12520_v11, %v12549_v3 }
 0x44f   : > { %3789 = vst [vmem:[#allocation1] ss:$4 sm:$0xff] %v3160_v21  ;;  %v3163_v46 = vrot.slane %v2873_v34, 6  ;;  %v4705_v36 = vrot.slane %v4704_v47, 4  ;;  %v3165_v28 = vrot.slane %v12940_v43, 4  ;;  %v4050_v47 = vsel %vm12765_vm4, %v12816_v40, 0.0 }
 0x450   : > { %v6667_v45 = vpop.f32.mrf.mxu2  ;;  %15673 = vst [vmem:[#allocation39_spill] sm:$0xff] %v12976_v16  ;;  %v2792_v40 = vadd.f32 %v12544_v26, %v2705_v39 }
 0x451   : > { %6878 = vmatmul.bf16.gmra.mxu3 %v12921_v42  ;;  %v6668_v0 = vadd.f32 %v6667_v45, %v12838_v62  ;;  %v4714_v45 = vor.u32 %v4713_v55, %v12935_v52  ;;  %v3164_v55 = vrot.slane %v12940_v43, 2  ;;  %3790 = vst [vmem:[#allocation1 + $0x1] ss:$4 sm:$0xff] %v2873_v34  ;;  %v4710_v3 = vsel %vm10749_vm11, %v4705_v36, %v12935_v52 }
 0x452   : > { %v12930_v30 = vpop.f32.mrf.mxu1  ;;  %3791 = vst [vmem:[#allocation1 + $0x2] ss:$4 sm:$0xff] %v3161_v19  ;;  %v4721_v19 = vshrl.u32 %v12924_v1, 16  ;;  %v2706_v52 = vmul.f32 %v12520_v11, %v12602_v15 }
 0x453   : > { %v12951_v62 = vadd.f32 %v6836_v14, %v6668_v0  ;;  %v5082_v14 = vsel %vm10773_vm14, %v5080_v38, %v15672_v50  ;;  %v5662_v38 = vunpack.c.l.b16 %v5079_v9  ;;  %3792 = vst [vmem:[#allocation1 + $0x3] ss:$4 sm:$0xff] %v3162_v57  ;;  %v4731_v57 = vshrl.u32 %v12980_v22, 16 }
 0x454   : > { %v12942_v17 = vpop.f32.mrf.mxu3  ;;  %6709 = vmatmul.bf16.gmra.mxu2 %v12947_v51  ;;  %v5663_v50 = vunpack.c.l.b16 %v5082_v14  ;;  %v13009_v9 = vpack.c.bf16 %v4050_v47, %v4050_v47  ;;  %v5084_v14 = vrot.slane %v12980_v22, 5  ;;  %v2793_v47 = vadd.f32 %v12544_v26, %v2706_v52  ;;  %v15679_v52 = vld [vmem:[#allocation43_spill] sm:$0xff] }
 0x455   : > { %15668 = vst [vmem:[#allocation108_spill] sm:$0xff] %v12951_v62  ;;  %v12956_v42 = vpop.f32.mrf.mxu0  ;;  %v12978_v62 = vrot.slane %v4717_v35, 5  ;;  %v12987_v63 = vld.sshfl [vmem:[#allocation1 + $0x20] sm:$0xff pattern:$0x73625140]  ;;  %v4727_v35 = vshll.u32 %v12980_v22, 16 }
 0x456   : > { %3793 = vst [vmem:[#allocation1 + $0x20] ss:$4 sm:$0xff] %v3163_v46  ;;  %v13005_v6 = vpack.c.b16 %v5663_v50, %v5662_v38  ;;  %v4733_v38 = vrot.slane %v4731_v57, 4  ;;  %v15676_v51 = vrot.slane %v12924_v1, 5 }
 0x457   : > { %6594 = vmatmul.bf16.gmra.mxu0 %v15671_v20  ;;  %v4715_v20 = vrot.slane %v4714_v45, 4  ;;  %3794 = vst [vmem:[#allocation1 + $0x21] ss:$4 sm:$0xff] %v12940_v43  ;;  %v13015_v39 = vrot.slane %v4727_v35, 5 }
 0x458   : > { %v6670_v44 = vpop.f32.mrf.mxu2  ;;  %15674 = vst [vmem:[#allocation38_spill] sm:$0xff] %v13005_v6 }
 0x459   : > { %v6671_v21 = vadd.f32 %v6670_v44, %v12881_v29  ;;  %v4720_v29 = vsel %vm10749_vm11, %v4715_v20, %v12978_v62  ;;  %3795 = vst [vmem:[#allocation1 + $0x22] ss:$4 sm:$0xff] %v3164_v55  ;;  %v5534_v44 = vunpack.c.l.b16 %v4710_v3  ;;  %v4723_v20 = vrot.slane %v4721_v19, 4  ;;  %v15680_v19 = vld [vmem:[#allocation42_spill] sm:$0xff] }
 0x45a   : > { %v12974_v0 = vpop.f32.mrf.mxu1  ;;  %6545 = vmatmul.bf16.gmra.mxu1 %v12976_v16  ;;  %3796 = vst [vmem:[#allocation1 + $0x23] ss:$4 sm:$0xff] %v3165_v28  ;;  %v5535_v36 = vunpack.c.l.b16 %v4720_v29  ;;  %v2875_v55 = vmax.f32 %v2792_v40, 0.0  ;;  %v5086_v3 = vrot.slane %v5084_v14, 4  ;;  %v3166_v29 = vrot.slane %v12940_v43, 6 }
 0x45b   : > { %v13019_v15 = vadd.f32 %v12942_v17, %v6671_v21  ;;  %v4724_v57 = vor.u32 %v4723_v20, %v12978_v62  ;;  %v5408_v17 = vunpack.c.l.b16 %v12924_v1  ;;  %v4734_v21 = vor.u32 %v4733_v38, %v13015_v39 }
 0x45c   : > { %v6841_v34 = vpop.f32.mrf.mxu3  ;;  %v13028_v35 = vpack.c.b16 %v5535_v36, %v5534_v44  ;;  %v4737_v40 = vshll.u32 %v13009_v9, 16  ;;  %v3167_v43 = vrot.slane %v2875_v55, 2  ;;  %v4051_v62 = vsel %vm12765_vm4, %v12606_v24, 0.0 }
 0x45d   : > { %v12999_v45 = vpop.f32.mrf.mxu0  ;;  %15675 = vst [vmem:[#allocation109_spill] sm:$0xff] %v13019_v15  ;;  %v15681_v15 = vpack.c.b16 %v15679_v52, %v15680_v19  ;;  %v13046_v1 = vmax.f32 %v2793_v47, 0.0  ;;  %v3232_v36 = vadd.s32 7, %v10695_v4  ;;  %v3168_v20 = vrot.slane %v2875_v55, 4 }
 0x45e   : > { %15677 = vst [vmem:[#allocation110_spill] sm:$0xff] %v13028_v35  ;;  %v3169_v38 = vrot.slane %v2875_v55, 6  ;;  %v13057_v19 = vld.sshfl [vmem:[#allocation1] sm:$0xff pattern:$0x73625140]  ;;  %v4735_v52 = vrot.slane %v4734_v21, 4 }
 0x45f   : > { %3799 = vst [vmem:[#allocation1] ss:$4 sm:$0xff] %v3166_v29  ;;  %vm3252_vm8 = vcmp.ge.s32.totalorder %v3232_v36, 1  ;;  %vm3262_vm9 = vcmp.le.s32.totalorder %v3232_v36, 64  ;;  %v4741_v29 = vshrl.u32 %v13009_v9, 16 }
 0x460   : > { %v6672_v16 = vpop.f32.mrf.mxu2  ;;  %3800 = vst [vmem:[#allocation1 + $0x1] ss:$4 sm:$0xff] %v2875_v55  ;;  %vm13093_vm10 = vmand %vm3252_vm8, %vm3262_vm9 }
 0x461   : > { %6883 = vmatmul.bf16.gmra.mxu3 %v13005_v6  ;;  %v6673_v50 = vadd.f32 %v6672_v16, %v12930_v30  ;;  %v5083_v6 = vrot.slane %v15676_v51, 4  ;;  %v5409_v16 = vunpack.c.l.b16 %v12980_v22  ;;  %3801 = vst [vmem:[#allocation1 + $0x2] ss:$4 sm:$0xff] %v3167_v43  ;;  %vm3347_vm12 = vmand %vm13093_vm10, %vm3275_vm7 }
 0x462   : > { %v13012_v46 = vpop.f32.mrf.mxu1  ;;  %3802 = vst [vmem:[#allocation1 + $0x3] ss:$4 sm:$0xff] %v3168_v20  ;;  %vm3454_vm13 = vmand %vm13093_vm10, %vm3382_vm2 }
 0x463   : > { %v13031_v30 = vadd.f32 %v6841_v34, %v6673_v50  ;;  %v5085_v22 = vsel %vm10773_vm14, %v5083_v6, %v5084_v14  ;;  %v15682_v34 = vrot.slane %v13009_v9, 5  ;;  %v13059_v47 = vpack.c.b16 %v5409_v16, %v5408_v17 }
 0x464   : > { %v13022_v28 = vpop.f32.mrf.mxu3  ;;  %6714 = vmatmul.bf16.gmra.mxu2 %v13028_v35  ;;  %v13063_v6 = vpack.c.bf16 %v4051_v62, %v4051_v62  ;;  %v2707_v14 = vmul.f32 %v12520_v11, %v12654_v58  ;;  %v3170_v17 = vrot.slane %v13046_v1, 2  ;;  %v3171_v16 = vrot.slane %v13046_v1, 4  ;;  %v13079_v58 = vld.sshfl [vmem:[#allocation1 + $0x20] sm:$0xff pattern:$0x73625140]  ;;  %v15690_v35 = vld [vmem:[#allocation45_spill] sm:$0xff] }
 0x465   : > { %15678 = vst [vmem:[#allocation111_spill] sm:$0xff] %v13031_v30  ;;  %v13037_v51 = vpop.f32.mrf.mxu0  ;;  %v5088_v44 = vsel %vm10773_vm14, %v5086_v3, %v15682_v34  ;;  %v13061_v30 = vrot.slane %v4737_v40, 5  ;;  %v4052_v11 = vsel %vm3445_vm6, %v12883_v5, 0.0 }
 0x466   : > { %15683 = vst [vmem:[#allocation43_spill] sm:$0xff] %v13059_v47  ;;  %v5665_v34 = vunpack.c.l.b16 %v5088_v44  ;;  %v4747_v40 = vshll.u32 %v13063_v6, 16  ;;  %v4751_v43 = vshrl.u32 %v13063_v6, 16  ;;  %v5090_v44 = vrot.slane %v13063_v6, 5 }
 0x467   : > { %6599 = vmatmul.bf16.gmra.mxu0 %v15681_v15  ;;  %v4725_v15 = vrot.slane %v4724_v57, 4  ;;  %v5664_v57 = vunpack.c.l.b16 %v5085_v22  ;;  %3803 = vst [vmem:[#allocation1 + $0x20] ss:$4 sm:$0xff] %v3169_v38  ;;  %v4142_v22 = vpack.c.bf16 %v4052_v11, %v4052_v11 }
 0x468   : > { %v6675_v24 = vpop.f32.mrf.mxu2  ;;  %3804 = vst [vmem:[#allocation1 + $0x21] ss:$4 sm:$0xff] %v13046_v1  ;;  %v13102_v36 = vrot.slane %v4747_v40, 5 }
 0x469   : > { %v6676_v3 = vadd.f32 %v6675_v24, %v12974_v0  ;;  %v4730_v13 = vsel %vm10749_vm11, %v4725_v15, %v13015_v39  ;;  %v4740_v0 = vsel %vm10749_vm11, %v4735_v52, %v13061_v30  ;;  %v2794_v39 = vadd.f32 %v12544_v26, %v2707_v14  ;;  %3805 = vst [vmem:[#allocation1 + $0x22] ss:$4 sm:$0xff] %v3170_v17  ;;  %v9332_v17 = vld [vmem:[%s15498_s2 + $0x158] sm:$0xff] }
 0x46a   : > { %v13055_v50 = vpop.f32.mrf.mxu1  ;;  %6550 = vmatmul.bf16.gmra.mxu1 %v13059_v47  ;;  %v13090_v62 = vpack.c.b16 %v5665_v34, %v5664_v57  ;;  %v5536_v38 = vunpack.c.l.b16 %v4730_v13  ;;  %v5537_v15 = vunpack.c.l.b16 %v4740_v0  ;;  %3806 = vst [vmem:[#allocation1 + $0x23] ss:$4 sm:$0xff] %v3171_v16  ;;  %v4743_v24 = vrot.slane %v4741_v29, 4  ;;  %7261 = vmatpush.bf16.msrb.mxu3 %v9332_v17  ;;  %v9724_v17 = vld [vmem:[%s15481_s4] ss:$0 sm:$0xff] }
 0x46b   : > { %v4753_v52 = vrot.slane %v4751_v43, 4  ;;  %v3172_v14 = vrot.slane %v13046_v1, 6  ;;  %v2877_v57 = vmax.f32 %v2794_v39, 0.0  ;;  %v15687_v13 = vrot.slane %v13009_v9, 5 }
 0x46c   : > { %v6846_v21 = vpop.f32.mrf.mxu3  ;;  %15684 = vst [vmem:[#allocation42_spill] sm:$0xff] %v13090_v62  ;;  %v5092_v0 = vrot.slane %v5090_v44, 4  ;;  %v5093_v29 = vrot.slane %v4142_v22, 5  ;;  %v13118_v40 = vadd.f32 %v13022_v28, %v6676_v3  ;;  %v13120_v43 = vpack.c.b16 %v5537_v15, %v5536_v38 }
 0x46d   : > { %v13084_v55 = vpop.f32.mrf.mxu0  ;;  %v5089_v11 = vrot.slane %v15687_v13, 4  ;;  %v5410_v1 = vunpack.c.l.b16 %v13009_v9  ;;  %v4053_v39 = vsel %vm3347_vm12, %v12933_v18, 0.0  ;;  %v4757_v47 = vshll.u32 %v4142_v22, 16 }
 0x46e   : > { %15688 = vst [vmem:[#allocation112_spill] sm:$0xff] %v13118_v40  ;;  %v15692_v28 = vpack.c.b16 %v15690_v35, %v15691_v41  ;;  %v3173_v9 = vrot.slane %v2877_v57, 2  ;;  %v3174_v22 = vrot.slane %v2877_v57, 4  ;;  %v3175_v38 = vrot.slane %v2877_v57, 6 }
 0x46f   : > { %15689 = vst [vmem:[#allocation113_spill] sm:$0xff] %v13120_v43  ;;  %v5091_v18 = vsel %vm10773_vm14, %v5089_v11, %v5090_v44  ;;  %v4054_v41 = vsel %vm13093_vm10, %v12965_v2, 0.0  ;;  %v13146_v35 = vld.sshfl [vmem:[#allocation1] sm:$0xff pattern:$0x73625140]  ;;  %v2708_v11 = vmul.f32 %v9724_v17, %v12686_v10 }
 0x470   : > { %v6677_v26 = vpop.f32.mrf.mxu2  ;;  %3809 = vst [vmem:[#allocation1] ss:$4 sm:$0xff] %v3172_v14  ;;  %v9321_v14 = vld [vmem:[%s15498_s2 + $0x100] sm:$0xff] }
 0x471   : > { %6888 = vmatmul.bf16.gmra.mxu3 %v13090_v62  ;;  %v6678_v34 = vadd.f32 %v6677_v26, %v13012_v46  ;;  %v5411_v46 = vunpack.c.l.b16 %v13063_v6  ;;  %v4744_v26 = vor.u32 %v4743_v24, %v13061_v30  ;;  %v4754_v62 = vor.u32 %v4753_v52, %v13102_v36  ;;  %3810 = vst [vmem:[#allocation1 + $0x1] ss:$4 sm:$0xff] %v2877_v57 }
 0x472   : > { %v13099_v20 = vpop.f32.mrf.mxu1  ;;  %v5094_v30 = vsel %vm10773_vm14, %v5092_v0, %v5093_v29  ;;  %v13139_v6 = vpack.c.bf16 %v4053_v39, %v4053_v39  ;;  %v5666_v29 = vunpack.c.l.b16 %v5091_v18  ;;  %3811 = vst [vmem:[#allocation1 + $0x2] ss:$4 sm:$0xff] %v3173_v9  ;;  %7095 = vmatpush.bf16.msrb.mxu2 %v9321_v14  ;;  %v9725_v9 = vld [vmem:[%s15482_s5] ss:$0 sm:$0xff] }
 0x473   : > { %v13132_v3 = vadd.f32 %v6846_v21, %v6678_v34  ;;  %v13148_v24 = vpack.c.b16 %v5411_v46, %v5410_v1  ;;  %v4745_v52 = vrot.slane %v4744_v26, 4  ;;  %v4755_v44 = vrot.slane %v4754_v62, 4  ;;  %3812 = vst [vmem:[#allocation1 + $0x3] ss:$4 sm:$0xff] %v3174_v22 }
 0x474   : > { %v13113_v16 = vpop.f32.mrf.mxu3  ;;  %6719 = vmatmul.bf16.gmra.mxu2 %v13120_v43  ;;  %v4759_v34 = vrot.slane %v4757_v47, 5  ;;  %v5667_v39 = vunpack.c.l.b16 %v5094_v30  ;;  %v4144_v1 = vpack.c.bf16 %v4054_v41, %v4054_v41  ;;  %v4055_v47 = vsel %vm13093_vm10, %v12987_v63, 0.0 }
 0x475   : > { %v13127_v13 = vpop.f32.mrf.mxu0  ;;  %15693 = vst [vmem:[#allocation45_spill] sm:$0xff] %v13132_v3  ;;  %v4762_v62 = vshrl.u32 %v13139_v6, 16  ;;  %v4765_v10 = vshll.u32 %v13139_v6, 16  ;;  %v4750_v57 = vsel %vm10749_vm11, %v4745_v52, %v13102_v36  ;;  %v2795_v18 = vadd.f32 %v9725_v9, %v2708_v11 }
 0x476   : > { %15694 = vst [vmem:[#allocation46_spill] sm:$0xff] %v13148_v24  ;;  %v4760_v46 = vsel %vm10749_vm11, %v4755_v44, %v4759_v34  ;;  %v4771_v26 = vshll.u32 %v4144_v1, 16  ;;  %v2709_v30 = vmul.f32 %v9724_v17, %v12715_v54  ;;  %v13177_v22 = vpack.c.b16 %v5667_v39, %v5666_v29  ;;  %v9313_v17 = vld [vmem:[%s15498_s2 + $0xc0] sm:$0xff] }
 0x477   : > { %6604 = vmatmul.bf16.gmra.mxu0 %v15692_v28  ;;  %v4775_v28 = vshrl.u32 %v4144_v1, 16  ;;  %v13179_v41 = vpack.c.bf16 %v4055_v47, %v4055_v47  ;;  %v5097_v36 = vrot.slane %v4144_v1, 5  ;;  %v5538_v52 = vunpack.c.l.b16 %v4750_v57  ;;  %6926 = vmatpush.bf16.msrb.mxu1 %v9313_v17 }
 0x478   : > { %v6680_v21 = vpop.f32.mrf.mxu2  ;;  %15695 = vst [vmem:[#allocation114_spill] sm:$0xff] %v13177_v22  ;;  %v5539_v44 = vunpack.c.l.b16 %v4760_v46  ;;  %v4764_v34 = vrot.slane %v4762_v62, 4  ;;  %v13184_v3 = vrot.slane %v4771_v26, 5  ;;  %v2878_v11 = vmax.f32 %v2795_v18, 0.0 }
 0x479   : > { %v6681_v0 = vadd.f32 %v6680_v21, %v13055_v50  ;;  %v13164_v50 = vld.sshfl [vmem:[#allocation1 + $0x20] sm:$0xff pattern:$0x73625140]  ;;  %v4777_v40 = vrot.slane %v4775_v28, 4  ;;  %v8948_v39 = vrot.slane %v13139_v6, 9  ;;  %v5099_v47 = vrot.slane %v5097_v36, 4 }
 0x47a   : > { %v13141_v15 = vpop.f32.mrf.mxu1  ;;  %6555 = vmatmul.bf16.gmra.mxu1 %v13148_v24  ;;  %3813 = vst [vmem:[#allocation1 + $0x20] ss:$4 sm:$0xff] %v3175_v38  ;;  %v4767_v38 = vrot.slane %v4765_v10, 5  ;;  %v2796_v24 = vadd.f32 %v9725_v9, %v2709_v30  ;;  %v13197_v57 = vpack.c.b16 %v5539_v44, %v5538_v52  ;;  %v5412_v46 = vunpack.c.l.b16 %v13139_v6  ;;  %v15698_v30 = vld [vmem:[#allocation55_spill] sm:$0xff] }
 0x47b   : > { %v13195_v10 = vadd.f32 %v13113_v16, %v6681_v0  ;;  %v4778_v28 = vor.u32 %v4777_v40, %v13184_v3  ;;  %v4781_v9 = vshll.u32 %v13179_v41, 16  ;;  %v3176_v62 = vrot.slane %v2878_v11, 2 }
 0x47c   : > { %v6851_v2 = vpop.f32.mrf.mxu3  ;;  %15697 = vst [vmem:[#allocation116_spill] sm:$0xff] %v13197_v57  ;;  %v4768_v26 = vor.u32 %v4767_v38, %v4764_v34  ;;  %v2879_v16 = vmax.f32 %v2796_v24, 0.0  ;;  %v4056_v6 = vsel %vm13093_vm10, %v13057_v19, 0.0  ;;  %v3177_v0 = vrot.slane %v2878_v11, 4 }
 0x47d   : > { %v13171_v63 = vpop.f32.mrf.mxu0  ;;  %15696 = vst [vmem:[#allocation115_spill] sm:$0xff] %v13195_v10  ;;  %v5098_v40 = vsel %vm10773_vm14, %v8948_v39, %v5097_v36  ;;  %v3178_v44 = vrot.slane %v2878_v11, 6  ;;  %v13219_v24 = vld.sshfl [vmem:[#allocation1] sm:$0xff pattern:$0x73625140]  ;;  %v4779_v17 = vrot.slane %v4778_v28, 4 }
 0x47e   : > { %v4769_v34 = vrot.slane %v4768_v26, 4  ;;  %v4783_v19 = vrot.slane %v4781_v9, 5  ;;  %3816 = vst [vmem:[#allocation1] ss:$4 sm:$0xff] %v2878_v11  ;;  %v3179_v10 = vrot.slane %v2879_v16, 2  ;;  %v5668_v39 = vunpack.c.l.b16 %v5098_v40 }
 0x47f   : > { %3817 = vst [vmem:[#allocation1 + $0x1] ss:$4 sm:$0xff] %v3176_v62  ;;  %v4057_v11 = vsel %vm13093_vm10, %v13079_v58, 0.0  ;;  %v4785_v28 = vshrl.u32 %v13179_v41, 16 }
 0x480   : > { %v6682_v14 = vpop.f32.mrf.mxu2  ;;  %3818 = vst [vmem:[#allocation1 + $0x2] ss:$4 sm:$0xff] %v3177_v0 }
 0x481   : > { %6893 = vmatmul.bf16.gmra.mxu3 %v13177_v22  ;;  %v6683_v54 = vadd.f32 %v6682_v14, %v13099_v20  ;;  %v5413_v20 = vunpack.c.l.b16 %v4144_v1  ;;  %v15700_v1 = vrot.slane %v13179_v41, 5  ;;  %3819 = vst [vmem:[#allocation1 + $0x3] ss:$4 sm:$0xff] %v3178_v44 }
 0x482   : > { %v13181_v21 = vpop.f32.mrf.mxu1 }
 0x483   : > { %v13205_v14 = vadd.f32 %v6851_v2, %v6683_v54  ;;  %v5101_v52 = vsel %vm10773_vm14, %v5099_v47, %v15700_v1  ;;  %v13221_v54 = vpack.c.b16 %v5413_v20, %v5412_v46  ;;  %v3180_v47 = vrot.slane %v2879_v16, 4  ;;  %v13231_v20 = vld.sshfl [vmem:[#allocation1 + $0x20] sm:$0xff pattern:$0x73625140] }
 0x484   : > { %v13190_v29 = vpop.f32.mrf.mxu3  ;;  %6724 = vmatmul.bf16.gmra.mxu2 %v13197_v57  ;;  %v5669_v57 = vunpack.c.l.b16 %v5101_v52  ;;  %v3181_v1 = vrot.slane %v2879_v16, 6  ;;  %v4774_v46 = vsel %vm10749_vm11, %v4769_v34, %v13184_v3  ;;  %3820 = vst [vmem:[#allocation1 + $0x20] ss:$4 sm:$0xff] %v2879_v16  ;;  %v13240_v3 = vpack.c.bf16 %v4057_v11, %v4057_v11 }
 0x485   : > { %v13202_v18 = vpop.f32.mrf.mxu0  ;;  %15699 = vst [vmem:[#allocation55_spill] sm:$0xff] %v13205_v14  ;;  %v4146_v14 = vpack.c.bf16 %v4056_v6, %v4056_v6  ;;  %v5540_v52 = vunpack.c.l.b16 %v4774_v46 }
 0x486   : > { %15701 = vst [vmem:[#allocation117_spill] sm:$0xff] %v13221_v54  ;;  %v13238_v0 = vpack.c.b16 %v5669_v57, %v5668_v39  ;;  %v15703_v57 = vrot.slane %v13179_v41, 5  ;;  %v5106_v11 = vrot.slane %v13240_v3, 5 }
 0x487   : > { %6609 = vmatmul.bf16.gmra.mxu0 %v15698_v30  ;;  %v4791_v9 = vshll.u32 %v4146_v14, 16  ;;  %v4795_v6 = vshrl.u32 %v4146_v14, 16  ;;  %3821 = vst [vmem:[#allocation1 + $0x21] ss:$4 sm:$0xff] %v3179_v10  ;;  %v5103_v40 = vrot.slane %v4146_v14, 5  ;;  %v5415_v46 = vunpack.c.l.b16 %v4146_v14 }
 0x488   : > { %v6685_v38 = vpop.f32.mrf.mxu2  ;;  %15702 = vst [vmem:[#allocation118_spill] sm:$0xff] %v13238_v0  ;;  %v5102_v10 = vrot.slane %v15703_v57, 4 }
 0x489   : > { %v6686_v36 = vadd.f32 %v6685_v38, %v13141_v15  ;;  %v4784_v15 = vsel %vm10749_vm11, %v4779_v17, %v4783_v19  ;;  %3822 = vst [vmem:[#allocation1 + $0x22] ss:$4 sm:$0xff] %v3180_v47  ;;  %v4787_v38 = vrot.slane %v4785_v28, 4  ;;  %v4793_v17 = vrot.slane %v4791_v9, 5 }
 0x48a   : > { %v13217_v2 = vpop.f32.mrf.mxu1  ;;  %6560 = vmatmul.bf16.gmra.mxu1 %v13221_v54  ;;  %v5541_v44 = vunpack.c.l.b16 %v4784_v15  ;;  %3823 = vst [vmem:[#allocation1 + $0x23] ss:$4 sm:$0xff] %v3181_v1  ;;  %v4797_v54 = vrot.slane %v4795_v6, 4  ;;  %v5105_v39 = vrot.slane %v5103_v40, 4  ;;  %v5414_v1 = vunpack.c.l.b16 %v13179_v41  ;;  %v15707_v6 = vld [vmem:[#allocation35_spill] sm:$0xff] }
 0x48b   : > { %v13248_v47 = vadd.f32 %v13190_v29, %v6686_v36  ;;  %v4788_v15 = vor.u32 %v4787_v38, %v4783_v19  ;;  %v4801_v9 = vshll.u32 %v13240_v3, 16  ;;  %v4058_v29 = vsel %vm13093_vm10, %v13146_v35, 0.0 }
 0x48c   : > { %v6856_v26 = vpop.f32.mrf.mxu3  ;;  %v4798_v28 = vor.u32 %v4797_v54, %v4793_v17  ;;  %v5104_v41 = vsel %vm10773_vm14, %v5102_v10, %v5103_v40  ;;  %v5107_v14 = vsel %vm10773_vm14, %v5105_v39, %v5106_v11  ;;  %v13267_v19 = vpack.c.b16 %v5415_v46, %v5414_v1 }
 0x48d   : > { %v13235_v62 = vpop.f32.mrf.mxu0  ;;  %15704 = vst [vmem:[#allocation119_spill] sm:$0xff] %v13248_v47  ;;  %v5670_v57 = vunpack.c.l.b16 %v5104_v41  ;;  %v4059_v40 = vsel %vm13093_vm10, %v13164_v50, 0.0  ;;  %v4805_v10 = vshrl.u32 %v13240_v3, 16 }
 0x48e   : > { %15709 = vst [vmem:[#allocation122_spill] sm:$0xff] %v13267_v19 }
 0x48f   : > { %v15874_v33 = vld [vmem:[#allocation118_spill] sm:$0xff] }
 0x490   : > { %v6687_v34 = vpop.f32.mrf.mxu2 }
 0x491   : > { %6898 = vmatmul.bf16.gmra.mxu3 %v13238_v0  ;;  %v6688_v22 = vadd.f32 %v6687_v34, %v13181_v21  ;;  %v13250_v0 = vpack.c.b16 %v5541_v44, %v5540_v52  ;;  %v4789_v52 = vrot.slane %v4788_v15, 4  ;;  %v4799_v44 = vrot.slane %v4798_v28, 4 }
 0x492   : > { %v6523_v58 = vpop.f32.mrf.mxu1 }
 0x493   : > { %15705 = vst [vmem:[#allocation120_spill] sm:$0xff] %v13250_v0  ;;  %v13257_v34 = vadd.f32 %v6856_v26, %v6688_v22  ;;  %v4803_v22 = vrot.slane %v4801_v9, 5  ;;  %v4148_v26 = vpack.c.bf16 %v4058_v29, %v4058_v29  ;;  %v4794_v1 = vsel %vm10749_vm11, %v4789_v52, %v4793_v17 }
 0x494   : > { %v6859_v16 = vpop.f32.mrf.mxu3  ;;  %6729 = vmatmul.bf16.gmra.mxu2 %v13250_v0  ;;  %v13285_v29 = vpack.c.bf16 %v4059_v40, %v4059_v40  ;;  %v5416_v0 = vunpack.c.l.b16 %v13240_v3 }
 0x495   : > { %v13254_v21 = vpop.f32.mrf.mxu0  ;;  %15708 = vst [vmem:[#allocation35_spill] sm:$0xff] %v13257_v34  ;;  %v4804_v46 = vsel %vm10749_vm11, %v4799_v44, %v4803_v22  ;;  %v4811_v15 = vshll.u32 %v4148_v26, 16  ;;  %v4815_v28 = vshrl.u32 %v4148_v26, 16  ;;  %v5109_v41 = vrot.slane %v4148_v26, 5 }
 0x496   : > { %15706 = vst [vmem:[#allocation121_spill] sm:$0xff] %v13254_v21  ;;  %v5108_v34 = vrot.slane %v5106_v11, 4  ;;  %v9331_v11 = vld [vmem:[%s15498_s2 + $0x150] sm:$0xff] }
 0x497   : > { %6758 = vmatmul.bf16.vlgmr.msrb.gmra.mxu0 %v15707_v6  ;;  %v5671_v6 = vunpack.c.l.b16 %v5107_v14  ;;  %v5543_v14 = vunpack.c.l.b16 %v4804_v46  ;;  %v4813_v52 = vrot.slane %v4811_v15, 5  ;;  %v5111_v47 = vrot.slane %v5109_v41, 4  ;;  %v15715_v15 = vld [vmem:[#allocation41_spill] sm:$0xff]  ;;  %7262 = vmatpush.bf16.msrb.mxu3 %v9331_v11 }
 0x498   : > { %v6690_v36 = vpop.f32.mrf.mxu2  ;;  %v5110_v3 = vsel %vm10773_vm14, %v5108_v34, %v5109_v41 }
 0x499   : > { %v6691_v38 = vadd.f32 %v6690_v36, %v13217_v2  ;;  %v13283_v9 = vpack.c.b16 %v5671_v6, %v5670_v57  ;;  %v4807_v36 = vrot.slane %v4805_v10, 4  ;;  %v5112_v57 = vrot.slane %v13285_v29, 5 }
 0x49a   : > { %v6526_v54 = vpop.f32.mrf.mxu1  ;;  %6565 = vmatmul.bf16.gmra.mxu1 %v13267_v19  ;;  %v4821_v10 = vshll.u32 %v13285_v29, 16 }
 0x49b   : > { %v13275_v39 = vadd.f32 %v6859_v16, %v6691_v38  ;;  %15712 = vst [vmem:[#allocation125_spill] sm:$0xff] %v13283_v9  ;;  %v5542_v16 = vunpack.c.l.b16 %v4794_v1  ;;  %v4817_v38 = vrot.slane %v4815_v28, 4  ;;  %v4808_v40 = vor.u32 %v4807_v36, %v4803_v22 }
 0x49c   : > { %v6861_v35 = vpop.f32.mrf.mxu3  ;;  %v5113_v22 = vsel %vm10773_vm14, %v5111_v47, %v5112_v57  ;;  %v4823_v36 = vrot.slane %v4821_v10, 5  ;;  %v9330_v47 = vld [vmem:[%s15498_s2 + $0x148] sm:$0xff] }
 0x49d   : > { %15710 = vst [vmem:[#allocation123_spill] sm:$0xff] %v13275_v39  ;;  %v13281_v2 = vpop.f32.mrf.mxu0  ;;  %v13291_v6 = vpack.c.b16 %v5543_v14, %v5542_v16  ;;  %v4818_v1 = vor.u32 %v4817_v38, %v4813_v52  ;;  %v5672_v38 = vunpack.c.l.b16 %v5110_v3  ;;  %v5673_v34 = vunpack.c.l.b16 %v5113_v22  ;;  %7263 = vmatpush.bf16.msrb.mxu3 %v9330_v47 }
 0x49e   : > { %15711 = vst [vmem:[#allocation124_spill] sm:$0xff] %v13281_v2  ;;  %v5114_v47 = vrot.slane %v5112_v57, 4 }
 0x49f   : > { %15713 = vst [vmem:[#allocation126_spill] sm:$0xff] %v13291_v6  ;;  %v4819_v14 = vrot.slane %v4818_v1, 4 }
 0x4a0   : > { %v6692_v17 = vpop.f32.mrf.mxu2 }
 0x4a1   : > { %6903 = vmatmul.bf16.gmra.mxu3 %v13283_v9  ;;  %v6693_v44 = vadd.f32 %v6692_v17, %v6523_v58  ;;  %v5417_v9 = vunpack.c.l.b16 %v4148_v26  ;;  %v4060_v58 = vsel %vm13093_vm10, %v13219_v24, 0.0  ;;  %v4824_v5 = vsel %vm10749_vm11, %v4819_v14, %v4823_v36 }
 0x4a2   : > { %v13287_v50 = vpop.f32.mrf.mxu1  ;;  %v4150_v17 = vpack.c.bf16 %v4060_v58, %v4060_v58  ;;  %v5545_v11 = vunpack.c.l.b16 %v4824_v5 }
 0x4a3   : > { %v13293_v19 = vadd.f32 %v6861_v35, %v6693_v44  ;;  %v4809_v35 = vrot.slane %v4808_v40, 4  ;;  %v13309_v16 = vpack.c.b16 %v5417_v9, %v5416_v0  ;;  %v4061_v9 = vsel %vm3454_vm13, %v13231_v20, 0.0 }
 0x4a4   : > { %v6864_v39 = vpop.f32.mrf.mxu3  ;;  %6734 = vmatmul.bf16.gmra.mxu2 %v13291_v6  ;;  %v4825_v40 = vshrl.u32 %v13285_v29, 16  ;;  %v4831_v1 = vshll.u32 %v4150_v17, 16  ;;  %v4835_v10 = vshrl.u32 %v4150_v17, 16  ;;  %v5115_v20 = vrot.slane %v4150_v17, 5 }
 0x4a5   : > { %15714 = vst [vmem:[#allocation127_spill] sm:$0xff] %v13293_v19  ;;  %v2636_v46 = vpop.f32.mrf.mxu0  ;;  %v4814_v0 = vsel %vm10749_vm11, %v4809_v35, %v4813_v52  ;;  %v4151_v52 = vpack.c.bf16 %v4061_v9, %v4061_v9 }
 0x4a6   : > { %15716 = vst [vmem:[#allocation41_spill] sm:$0xff] %v13309_v16  ;;  %v9329_v46 = vld [vmem:[%s15498_s2 + $0x140] sm:$0xff]  ;;  %v4827_v22 = vrot.slane %v4825_v40, 4  ;;  %v4833_v35 = vrot.slane %v4831_v1, 5  ;;  %v5116_v57 = vsel %vm10773_vm14, %v5114_v47, %v5115_v20 }
 0x4a7   : > { %6763 = vmatmul.bf16.gmra.mxu0 %v15715_v15  ;;  %v13332_v15 = vpack.c.b16 %v5673_v34, %v5672_v38  ;;  %7264 = vmatpush.bf16.msrb.mxu3 %v9329_v46  ;;  %v5118_v19 = vrot.slane %v4151_v52, 5  ;;  %v5418_v34 = vunpack.c.l.b16 %v13285_v29  ;;  %v15721_v1 = vld [vmem:[#allocation44_spill] sm:$0xff] }
 0x4a8   : > { %v6695_v28 = vpop.f32.mrf.mxu2 }
 0x4a9   : > { %v6696_v24 = vadd.f32 %v6695_v28, %v6526_v54  ;;  %15718 = vst [vmem:[#allocation129_spill] sm:$0xff] %v13332_v15  ;;  %v4837_v28 = vrot.slane %v4835_v10, 4 }
 0x4aa   : > { %v6531_v26 = vpop.f32.mrf.mxu1  ;;  %6570 = vmatmul.bf16.gmra.mxu1 %v13309_v16  ;;  %v4841_v16 = vshll.u32 %v4151_v52, 16 }
 0x4ab   : > { %v13322_v44 = vadd.f32 %v6864_v39, %v6696_v24  ;;  %v5544_v39 = vunpack.c.l.b16 %v4814_v0  ;;  %v4828_v0 = vor.u32 %v4827_v22, %v4823_v36  ;;  %v4838_v5 = vor.u32 %v4837_v28, %v4833_v35  ;;  %v9352_v22 = vld [vmem:[%s15498_s2 + $0x1f8] sm:$0xff] }
 0x4ac   : > { %v6866_v41 = vpop.f32.mrf.mxu3  ;;  %v4843_v52 = vrot.slane %v4841_v16, 5  ;;  %7595 = vmatpush.bf16.msra.mxu1 %v9352_v22 }
 0x4ad   : > { %15717 = vst [vmem:[#allocation128_spill] sm:$0xff] %v13322_v44  ;;  %v13326_v54 = vpop.f32.mrf.mxu0  ;;  %v5117_v44 = vrot.slane %v5115_v20, 4  ;;  %v13336_v38 = vpack.c.b16 %v5545_v11, %v5544_v39  ;;  %v4829_v10 = vrot.slane %v4828_v0, 4  ;;  %v4839_v46 = vrot.slane %v4838_v5, 4 }
 0x4ae   : > { %v5674_v11 = vunpack.c.l.b16 %v5116_v57 }
 0x4af   : > { %15719 = vst [vmem:[#allocation130_spill] sm:$0xff] %v13336_v38  ;;  %v5119_v29 = vsel %vm10773_vm14, %v5117_v44, %v5118_v19  ;;  %v4834_v44 = vsel %vm10749_vm11, %v4829_v10, %v4833_v35 }
 0x4b0   : > { %v6697_v3 = vpop.f32.mrf.mxu2 }
 0x4b1   : > { %6908 = vmatmul.bf16.gmra.mxu3 %v13332_v15  ;;  %v6698_v14 = vadd.f32 %v6697_v3, %v13287_v50  ;;  %v5419_v15 = vunpack.c.l.b16 %v4150_v17  ;;  %v9360_v50 = vld [vmem:[%s15498_s2 + $0x238] sm:$0xff]  ;;  %v5675_v3 = vunpack.c.l.b16 %v5119_v29 }
 0x4b2   : > { %v6533_v58 = vpop.f32.mrf.mxu1  ;;  %7764 = vmatpush.bf16.msra.mxu2 %v9360_v50  ;;  %v15727_v50 = vld [vmem:[#allocation47_spill] sm:$0xff] }
 0x4b3   : > { %v13339_v9 = vadd.f32 %v6866_v41, %v6698_v14  ;;  %v13352_v41 = vpack.c.b16 %v5419_v15, %v5418_v34  ;;  %v4844_v15 = vsel %vm10749_vm11, %v4839_v46, %v4843_v52  ;;  %v5546_v14 = vunpack.c.l.b16 %v4834_v44 }
 0x4b4   : > { %v6869_v24 = vpop.f32.mrf.mxu3  ;;  %6739 = vmatmul.bf16.gmra.mxu2 %v13336_v38  ;;  %v5547_v47 = vunpack.c.l.b16 %v4844_v15 }
 0x4b5   : > { %15720 = vst [vmem:[#allocation131_spill] sm:$0xff] %v13339_v9  ;;  %v13341_v40 = vpop.f32.mrf.mxu0  ;;  %v15751_v9 = vld [vmem:[#allocation36_spill] sm:$0xff] }
 0x4b6   : > { %15722 = vst [vmem:[#allocation44_spill] sm:$0xff] %v13352_v41 }
 0x4b7   : > { %6768 = vmatmul.bf16.gmra.mxu0 %v15721_v1 }
 0x4b8   : > { %v6700_v36 = vpop.f32.mrf.mxu2 }
 0x4b9   : > { %v6701_v39 = vadd.f32 %v6700_v36, %v6531_v26  ;;  %v13366_v26 = vpack.c.b16 %v5675_v3, %v5674_v11 }
 0x4ba   : > { %v6536_v17 = vpop.f32.mrf.mxu1  ;;  %6575 = vmatmul.bf16.gmra.mxu1 %v13352_v41 }
 0x4bb   : > { %v13358_v19 = vadd.f32 %v6869_v24, %v6701_v39  ;;  %15724 = vst [vmem:[#allocation133_spill] sm:$0xff] %v13366_v26  ;;  %v13369_v24 = vpack.c.b16 %v5547_v47, %v5546_v14  ;;  %v15729_v39 = vld [vmem:[#allocation50_spill] sm:$0xff]  ;;  %v15731_v47 = vld [vmem:[#allocation48_spill] sm:$0xff] }
 0x4bc   : > { %v6871_v20 = vpop.f32.mrf.mxu3 }
 0x4bd   : > { %15723 = vst [vmem:[#allocation132_spill] sm:$0xff] %v13358_v19  ;;  %v13364_v16 = vpop.f32.mrf.mxu0 }
 0x4be   : > { %15725 = vst [vmem:[#allocation134_spill] sm:$0xff] %v13369_v24 }
 0x4c0   : > { %v6702_v34 = vpop.f32.mrf.mxu2 }
 0x4c1   : > { %6913 = vmatmul.bf16.gmra.mxu3 %v13366_v26  ;;  %v6703_v0 = vadd.f32 %v6702_v34, %v6533_v58 }
 0x4c2   : > { %v6538_v28 = vpop.f32.mrf.mxu1 }
 0x4c3   : > { %v13371_v1 = vadd.f32 %v6871_v20, %v6703_v0 }
 0x4c4   : > { %v6874_v5 = vpop.f32.mrf.mxu3  ;;  %6744 = vmatmul.bf16.gmra.mxu2 %v13369_v24 }
 0x4c5   : > { %15726 = vst [vmem:[#allocation135_spill] sm:$0xff] %v13371_v1  ;;  %v13373_v35 = vpop.f32.mrf.mxu0  ;;  %v15750_v1 = vld [vmem:[#allocation61_spill] sm:$0xff] }
 0x4c7   : > { %6773 = vmatmul.bf16.gmra.mxu0 %v15727_v50 }
 0x4c8   : > { %v6705_v29 = vpop.f32.mrf.mxu2 }
 0x4c9   : > { %v6706_v36 = vadd.f32 %v6705_v29, %v6536_v17 }
 0x4ca   : > { %v6541_v57 = vpop.f32.mrf.mxu1  ;;  %6927 = vmatmul.bf16.vlgmr.msrb.gmra.mxu1 %v12778_v8 }
 0x4cb   : > { %v13378_v46 = vadd.f32 %v6874_v5, %v6706_v36  ;;  %v15733_v5 = vld [vmem:[#allocation49_spill] sm:$0xff] }
 0x4cc   : > { %v6876_v10 = vpop.f32.mrf.mxu3 }
 0x4cd   : > { %15728 = vst [vmem:[#allocation47_spill] sm:$0xff] %v13378_v46  ;;  %v13380_v58 = vpop.f32.mrf.mxu0 }
 0x4d0   : > { %v6707_v11 = vpop.f32.mrf.mxu2 }
 0x4d1   : > { %7265 = vmatmul.bf16.vlgmr.msrb.gmra.mxu3 %v15729_v39  ;;  %v6708_v3 = vadd.f32 %v6707_v11, %v6538_v28 }
 0x4d2   : > { %v6543_v52 = vpop.f32.mrf.mxu1 }
 0x4d3   : > { %v13383_v20 = vadd.f32 %v6876_v10, %v6708_v3 }
 0x4d4   : > { %v6879_v22 = vpop.f32.mrf.mxu3  ;;  %7096 = vmatmul.bf16.vlgmr.msrb.gmra.mxu2 %v15698_v30  ;;  %v15735_v30 = vld [vmem:[#allocation51_spill] sm:$0xff] }
 0x4d5   : > { %15730 = vst [vmem:[#allocation50_spill] sm:$0xff] %v13383_v20  ;;  %v13385_v44 = vpop.f32.mrf.mxu0 }
 0x4d7   : > { %6778 = vmatmul.bf16.gmra.mxu0 %v15729_v39 }
 0x4d8   : > { %v6710_v8 = vpop.f32.mrf.mxu2 }
 0x4d9   : > { %v6711_v15 = vadd.f32 %v6710_v8, %v6541_v57 }
 0x4da   : > { %v6546_v17 = vpop.f32.mrf.mxu1  ;;  %6932 = vmatmul.bf16.gmra.mxu1 %v15731_v47 }
 0x4db   : > { %v13390_v34 = vadd.f32 %v6879_v22, %v6711_v15  ;;  %v15736_v22 = vld [vmem:[#allocation52_spill] sm:$0xff] }
 0x4dc   : > { %v6881_v14 = vpop.f32.mrf.mxu3 }
 0x4dd   : > { %15732 = vst [vmem:[#allocation48_spill] sm:$0xff] %v13390_v34  ;;  %v13392_v0 = vpop.f32.mrf.mxu0  ;;  %v15738_v34 = vld [vmem:[#allocation53_spill] sm:$0xff] }
 0x4e0   : > { %v6712_v50 = vpop.f32.mrf.mxu2 }
 0x4e1   : > { %7270 = vmatmul.bf16.gmra.mxu3 %v15733_v5  ;;  %v6713_v29 = vadd.f32 %v6712_v50, %v6543_v52  ;;  %v9344_v50 = vld [vmem:[%s15498_s2 + $0x1b8] sm:$0xff] }
 0x4e2   : > { %v6548_v28 = vpop.f32.mrf.mxu1  ;;  %7426 = vmatpush.bf16.msra.mxu0 %v9344_v50  ;;  %v15741_v50 = vld [vmem:[#allocation56_spill] sm:$0xff] }
 0x4e3   : > { %v13395_v10 = vadd.f32 %v6881_v14, %v6713_v29 }
 0x4e4   : > { %v6884_v36 = vpop.f32.mrf.mxu3  ;;  %7101 = vmatmul.bf16.gmra.mxu2 %v15735_v30 }
 0x4e5   : > { %15734 = vst [vmem:[#allocation49_spill] sm:$0xff] %v13395_v10  ;;  %v13397_v39 = vpop.f32.mrf.mxu0 }
 0x4e8   : > { %v6715_v11 = vpop.f32.mrf.mxu2 }
 0x4e9   : > { %v6716_v3 = vadd.f32 %v6715_v11, %v6546_v17  ;;  %v15740_v11 = vld [vmem:[#allocation54_spill] sm:$0xff] }
 0x4ea   : > { %v6551_v57 = vpop.f32.mrf.mxu1  ;;  %6937 = vmatmul.bf16.gmra.mxu1 %v15736_v22 }
 0x4eb   : > { %v13401_v15 = vadd.f32 %v6884_v36, %v6716_v3  ;;  %v9359_v36 = vld [vmem:[%s15498_s2 + $0x230] sm:$0xff] }
 0x4ec   : > { %v6886_v8 = vpop.f32.mrf.mxu3  ;;  %7765 = vmatpush.bf16.msra.mxu2 %v9359_v36 }
 0x4ed   : > { %15737 = vst [vmem:[#allocation51_spill] sm:$0xff] %v13401_v15  ;;  %v13403_v47 = vpop.f32.mrf.mxu0 }
 0x4f0   : > { %v6717_v52 = vpop.f32.mrf.mxu2 }
 0x4f1   : > { %7275 = vmatmul.bf16.gmra.mxu3 %v15738_v34  ;;  %v6718_v14 = vadd.f32 %v6717_v52, %v6548_v28  ;;  %v9343_v34 = vld [vmem:[%s15498_s2 + $0x1b0] sm:$0xff]  ;;  %v9342_v52 = vld [vmem:[%s15498_s2 + $0x1a8] sm:$0xff] }
 0x4f2   : > { %v6553_v5 = vpop.f32.mrf.mxu1  ;;  %7427 = vmatpush.bf16.msra.mxu0 %v9343_v34 }
 0x4f3   : > { %v13409_v30 = vadd.f32 %v6886_v8, %v6718_v14  ;;  %v9351_v8 = vld [vmem:[%s15498_s2 + $0x1f0] sm:$0xff] }
 0x4f4   : > { %v6889_v29 = vpop.f32.mrf.mxu3  ;;  %7106 = vmatmul.bf16.gmra.mxu2 %v15740_v11  ;;  %7596 = vmatpush.bf16.msra.mxu1 %v9351_v8  ;;  %v9341_v11 = vld [vmem:[%s15498_s2 + $0x1a0] sm:$0xff] }
 0x4f5   : > { %15739 = vst [vmem:[#allocation52_spill] sm:$0xff] %v13409_v30  ;;  %v13411_v17 = vpop.f32.mrf.mxu0 }
 0x4f6   : > { %7428 = vmatpush.bf16.msra.mxu0 %v9342_v52 }
 0x4f8   : > { %v6720_v3 = vpop.f32.mrf.mxu2 }
 0x4f9   : > { %v6721_v22 = vadd.f32 %v6720_v3, %v6551_v57  ;;  %v15743_v3 = vld [vmem:[#allocation57_spill] sm:$0xff] }
 0x4fa   : > { %v6556_v28 = vpop.f32.mrf.mxu1  ;;  %6942 = vmatmul.bf16.gmra.mxu1 %v15741_v50  ;;  %7429 = vmatpush.bf16.msra.mxu0 %v9341_v11  ;;  %v9340_v50 = vld [vmem:[%s15498_s2 + $0x198] sm:$0xff] }
 0x4fb   : > { %v13430_v36 = vadd.f32 %v6889_v29, %v6721_v22  ;;  %v15745_v29 = vld [vmem:[#allocation58_spill] sm:$0xff] }
 0x4fc   : > { %v6891_v14 = vpop.f32.mrf.mxu3  ;;  %v9339_v22 = vld [vmem:[%s15498_s2 + $0x190] sm:$0xff] }
 0x4fd   : > { %15742 = vst [vmem:[#allocation53_spill] sm:$0xff] %v13430_v36  ;;  %v13432_v57 = vpop.f32.mrf.mxu0 }
 0x4fe   : > { %7430 = vmatpush.bf16.msra.mxu0 %v9340_v50  ;;  %v15746_v50 = vld [vmem:[#allocation59_spill] sm:$0xff] }
 0x500   : > { %v6722_v30 = vpop.f32.mrf.mxu2 }
 0x501   : > { %7280 = vmatmul.bf16.gmra.mxu3 %v15743_v3  ;;  %v6723_v15 = vadd.f32 %v6722_v30, %v6553_v5  ;;  %v9338_v30 = vld [vmem:[%s15498_s2 + $0x188] sm:$0xff] }
 0x502   : > { %v6558_v34 = vpop.f32.mrf.mxu1  ;;  %7431 = vmatpush.bf16.msra.mxu0 %v9339_v22  ;;  %v15748_v22 = vld [vmem:[#allocation60_spill] sm:$0xff] }
 0x503   : > { %v13438_v52 = vadd.f32 %v6891_v14, %v6723_v15  ;;  %v9337_v15 = vld [vmem:[%s15498_s2 + $0x180] sm:$0xff] }
 0x504   : > { %v6894_v8 = vpop.f32.mrf.mxu3  ;;  %7111 = vmatmul.bf16.gmra.mxu2 %v15745_v29 }
 0x505   : > { %15744 = vst [vmem:[#allocation54_spill] sm:$0xff] %v13438_v52  ;;  %v13440_v10 = vpop.f32.mrf.mxu0 }
 0x506   : > { %7432 = vmatpush.bf16.msra.mxu0 %v9338_v30 }
 0x508   : > { %v6725_v11 = vpop.f32.mrf.mxu2 }
 0x509   : > { %v6726_v5 = vadd.f32 %v6725_v11, %v6556_v28 }
 0x50a   : > { %v6561_v3 = vpop.f32.mrf.mxu1  ;;  %6947 = vmatmul.bf16.gmra.mxu1 %v15746_v50  ;;  %7433 = vmatpush.bf16.msra.mxu0 %v9337_v15 }
 0x50b   : > { %v13453_v14 = vadd.f32 %v6894_v8, %v6726_v5 }
 0x50c   : > { %v6896_v36 = vpop.f32.mrf.mxu3 }
 0x50d   : > { %15747 = vst [vmem:[#allocation56_spill] sm:$0xff] %v13453_v14  ;;  %v13455_v29 = vpop.f32.mrf.mxu0  ;;  %7434 = vmatmul.bf16.vlgmr.msra.gmra.mxu0 %v15746_v50 }
 0x510   : > { %v6727_v28 = vpop.f32.mrf.mxu2 }
 0x511   : > { %7285 = vmatmul.bf16.gmra.mxu3 %v15748_v22  ;;  %v6728_v11 = vadd.f32 %v6727_v28, %v6558_v34  ;;  %v15753_v28 = vld [vmem:[#allocation62_spill] sm:$0xff] }
 0x512   : > { %v6563_v52 = vpop.f32.mrf.mxu1 }
 0x513   : > { %v13459_v46 = vadd.f32 %v6896_v36, %v6728_v11 }
 0x514   : > { %v6899_v20 = vpop.f32.mrf.mxu3  ;;  %7116 = vmatmul.bf16.gmra.mxu2 %v15750_v1 }
 0x515   : > { %15749 = vst [vmem:[#allocation57_spill] sm:$0xff] %v13459_v46  ;;  %v13461_v30 = vpop.f32.mrf.mxu0 }
 0x518   : > { %v6730_v8 = vpop.f32.mrf.mxu2 }
 0x519   : > { %v6731_v5 = vadd.f32 %v6730_v8, %v6561_v3  ;;  %v15755_v3 = vld [vmem:[#allocation63_spill] sm:$0xff] }
 0x51a   : > { %v6566_v19 = vpop.f32.mrf.mxu1  ;;  %6952 = vmatmul.bf16.gmra.mxu1 %v15751_v9 }
 0x51b   : > { %v13465_v24 = vadd.f32 %v6899_v20, %v6731_v5 }
 0x51c   : > { %v6901_v14 = vpop.f32.mrf.mxu3 }
 0x51d   : > { %15752 = vst [vmem:[#allocation58_spill] sm:$0xff] %v13465_v24  ;;  %v13467_v15 = vpop.f32.mrf.mxu0  ;;  %7439 = vmatmul.bf16.gmra.mxu0 %v15751_v9  ;;  %v15756_v24 = vld [vmem:[#allocation17_spill] sm:$0xff] }
 0x520   : > { %v6732_v50 = vpop.f32.mrf.mxu2 }
 0x521   : > { %7290 = vmatmul.bf16.gmra.mxu3 %v15753_v28  ;;  %v6733_v36 = vadd.f32 %v6732_v50, %v6563_v52  ;;  %v15758_v50 = vld [vmem:[#allocation64_spill] sm:$0xff] }
 0x522   : > { %v6568_v34 = vpop.f32.mrf.mxu1 }
 0x523   : > { %v13471_v46 = vadd.f32 %v6901_v14, %v6733_v36 }
 0x524   : > { %v6904_v11 = vpop.f32.mrf.mxu3  ;;  %7121 = vmatmul.bf16.gmra.mxu2 %v15755_v3 }
 0x525   : > { %15754 = vst [vmem:[#allocation59_spill] sm:$0xff] %v13471_v46  ;;  %v13473_v22 = vpop.f32.mrf.mxu0 }
 0x528   : > { %v6735_v1 = vpop.f32.mrf.mxu2 }
 0x529   : > { %v6736_v20 = vadd.f32 %v6735_v1, %v6566_v19  ;;  %v15760_v19 = vld [vmem:[#allocation65_spill] sm:$0xff] }
 0x52a   : > { %v6571_v8 = vpop.f32.mrf.mxu1  ;;  %6957 = vmatmul.bf16.gmra.mxu1 %v15756_v24  ;;  %v9358_v1 = vld [vmem:[%s15498_s2 + $0x228] sm:$0xff] }
 0x52b   : > { %v13477_v26 = vadd.f32 %v6904_v11, %v6736_v20  ;;  %7766 = vmatpush.bf16.msra.mxu2 %v9358_v1 }
 0x52c   : > { %v6906_v5 = vpop.f32.mrf.mxu3 }
 0x52d   : > { %15757 = vst [vmem:[#allocation36_spill] sm:$0xff] %v13477_v26  ;;  %v13479_v28 = vpop.f32.mrf.mxu0  ;;  %7444 = vmatmul.bf16.gmra.mxu0 %v15756_v24  ;;  %v15761_v24 = vld [vmem:[#allocation18_spill] sm:$0xff] }
 0x530   : > { %v6737_v9 = vpop.f32.mrf.mxu2 }
 0x531   : > { %7295 = vmatmul.bf16.gmra.mxu3 %v15758_v50  ;;  %v6738_v14 = vadd.f32 %v6737_v9, %v6568_v34  ;;  %v9350_v34 = vld [vmem:[%s15498_s2 + $0x1e8] sm:$0xff]  ;;  %v15763_v50 = vld [vmem:[#allocation66_spill] sm:$0xff] }
 0x532   : > { %v6573_v52 = vpop.f32.mrf.mxu1  ;;  %7597 = vmatpush.bf16.msra.mxu1 %v9350_v34 }
 0x533   : > { %v13483_v46 = vadd.f32 %v6906_v5, %v6738_v14 }
 0x534   : > { %v6909_v36 = vpop.f32.mrf.mxu3  ;;  %7126 = vmatmul.bf16.gmra.mxu2 %v15760_v19 }
 0x535   : > { %15759 = vst [vmem:[#allocation17_spill] sm:$0xff] %v13483_v46  ;;  %v13485_v3 = vpop.f32.mrf.mxu0 }
 0x538   : > { %v6740_v20 = vpop.f32.mrf.mxu2 }
 0x539   : > { %v6741_v9 = vadd.f32 %v6740_v20, %v6571_v8  ;;  %v15765_v8 = vld [vmem:[#allocation67_spill] sm:$0xff] }
 0x53a   : > { %v6576_v11 = vpop.f32.mrf.mxu1  ;;  %6962 = vmatmul.bf16.gmra.mxu1 %v15761_v24 }
 0x53b   : > { %v13495_v5 = vadd.f32 %v6909_v36, %v6741_v9  ;;  %v9368_v36 = vld [vmem:[%s15766_s8 + $0x38] sm:$0xff] }
 0x53c   : > { %v6911_v26 = vpop.f32.mrf.mxu3  ;;  %8229 = vmatpush.bf16.msra.mxu3 %v9368_v36 }
 0x53d   : > { %15762 = vst [vmem:[#allocation18_spill] sm:$0xff] %v13495_v5  ;;  %v13497_v14 = vpop.f32.mrf.mxu0  ;;  %7449 = vmatmul.bf16.gmra.mxu0 %v15761_v24 }
 0x540   : > { %v6742_v19 = vpop.f32.mrf.mxu2 }
 0x541   : > { %7300 = vmatmul.bf16.gmra.mxu3 %v15763_v50  ;;  %v6743_v41 = vadd.f32 %v6742_v19, %v6573_v52  ;;  %v15767_v50 = vld [vmem:[#allocation19_spill] sm:$0xff]  ;;  %v6591_v52 = vadd.f32 %v13432_v57, %v13326_v54  ;;  %v15771_v54 = vld [vmem:[#allocation69_spill] sm:$0xff] }
 0x542   : > { %v6578_v46 = vpop.f32.mrf.mxu1 }
 0x543   : > { %v13501_v38 = vadd.f32 %v6911_v26, %v6743_v41 }
 0x544   : > { %v6914_v1 = vpop.f32.mrf.mxu3  ;;  %7131 = vmatmul.bf16.gmra.mxu2 %v15765_v8 }
 0x545   : > { %15764 = vst [vmem:[#allocation136_spill] sm:$0xff] %v13501_v38  ;;  %v13503_v6 = vpop.f32.mrf.mxu0  ;;  %v15769_v38 = vld [vmem:[#allocation68_spill] sm:$0xff] }
 0x548   : > { %v6745_v34 = vpop.f32.mrf.mxu2 }
 0x549   : > { %v6746_v9 = vadd.f32 %v6745_v34, %v6576_v11  ;;  %v6593_v11 = vadd.f32 %v13440_v10, %v13341_v40  ;;  %v15773_v40 = vld [vmem:[#allocation70_spill] sm:$0xff] }
 0x54a   : > { %v6928_v20 = vpop.f32.mrf.mxu1  ;;  %6967 = vmatmul.bf16.gmra.mxu1 %v15767_v50 }
 0x54b   : > { %v13512_v41 = vadd.f32 %v6914_v1, %v6746_v9 }
 0x54c   : > { %v6916_v5 = vpop.f32.mrf.mxu3 }
 0x54d   : > { %15768 = vst [vmem:[#allocation19_spill] sm:$0xff] %v13512_v41  ;;  %v6759_v26 = vpop.f32.mrf.mxu0  ;;  %7454 = vmatmul.bf16.gmra.mxu0 %v15767_v50 }
 0x54e   : > { %v6760_v19 = vadd.f32 %v6759_v26, %v6591_v52  ;;  %v15772_v26 = vld [vmem:[#allocation20_spill] sm:$0xff] }
 0x550   : > { %v6929_v8 = vadd.f32 %v6928_v20, %v6760_v19  ;;  %v6747_v43 = vpop.f32.mrf.mxu2 }
 0x551   : > { %7305 = vmatmul.bf16.gmra.mxu3 %v15769_v38  ;;  %v6748_v2 = vadd.f32 %v6747_v43, %v6578_v46  ;;  %v6596_v43 = vadd.f32 %v13455_v29, %v13364_v16 }
 0x552   : > { %v6930_v24 = vpop.f32.mrf.mxu1 }
 0x553   : > { %v13518_v34 = vadd.f32 %v6916_v5, %v6748_v2 }
 0x554   : > { %v7266_v21 = vpop.f32.mrf.mxu3  ;;  %7136 = vmatmul.bf16.gmra.mxu2 %v15771_v54 }
 0x555   : > { %15770 = vst [vmem:[#allocation68_spill] sm:$0xff] %v13518_v34  ;;  %v6761_v36 = vpop.f32.mrf.mxu0  ;;  %v15774_v34 = vld [vmem:[#allocation71_spill] sm:$0xff] }
 0x556   : > { %v6762_v57 = vadd.f32 %v6761_v36, %v6593_v11 }
 0x558   : > { %v6931_v9 = vadd.f32 %v6930_v24, %v6762_v57  ;;  %v7097_v52 = vpop.f32.mrf.mxu2  ;;  %v6598_v24 = vadd.f32 %v13461_v30, %v13373_v35 }
 0x559   : > { %v7098_v50 = vadd.f32 %v7097_v52, %v6929_v8 }
 0x55a   : > { %v6933_v1 = vpop.f32.mrf.mxu1  ;;  %6972 = vmatmul.bf16.gmra.mxu1 %v15772_v26 }
 0x55b   : > { %v13524_v41 = vadd.f32 %v7266_v21, %v7098_v50 }
 0x55c   : > { %v7268_v20 = vpop.f32.mrf.mxu3 }
 0x55d   : > { %v6764_v46 = vpop.f32.mrf.mxu0  ;;  %7459 = vmatmul.bf16.gmra.mxu0 %v15772_v26 }
 0x55e   : > { %v6765_v19 = vadd.f32 %v6764_v46, %v6596_v43  ;;  %v15775_v43 = vld [vmem:[#allocation21_spill] sm:$0xff]  ;;  %v6601_v46 = vadd.f32 %v13467_v15, %v13380_v58  ;;  %v9357_v15 = vld [vmem:[%s15498_s2 + $0x220] sm:$0xff] }
 0x55f   : > { %7767 = vmatpush.bf16.msra.mxu2 %v9357_v15 }
 0x560   : > { %v6934_v10 = vadd.f32 %v6933_v1, %v6765_v19  ;;  %v7099_v5 = vpop.f32.mrf.mxu2 }
 0x561   : > { %7310 = vmatmul.bf16.gmra.mxu3 %v15773_v40  ;;  %v7100_v57 = vadd.f32 %v7099_v5, %v6931_v9  ;;  %v15776_v9 = vld [vmem:[#allocation72_spill] sm:$0xff] }
 0x562   : > { %v6935_v2 = vpop.f32.mrf.mxu1 }
 0x563   : > { %v13531_v29 = vadd.f32 %v7268_v20, %v7100_v57 }
 0x564   : > { %v7271_v11 = vpop.f32.mrf.mxu3  ;;  %7141 = vmatmul.bf16.gmra.mxu2 %v15774_v34 }
 0x565   : > { %v6766_v36 = vpop.f32.mrf.mxu0 }
 0x566   : > { %v6767_v16 = vadd.f32 %v6766_v36, %v6598_v24 }
 0x568   : > { %v6936_v8 = vadd.f32 %v6935_v2, %v6767_v16  ;;  %v7102_v52 = vpop.f32.mrf.mxu2  ;;  %v6603_v2 = vadd.f32 %v13473_v22, %v13385_v44  ;;  %v15777_v16 = vld [vmem:[#allocation73_spill] sm:$0xff]  ;;  %v15778_v44 = vld [vmem:[#allocation75_spill] sm:$0xff] }
 0x569   : > { %v7103_v50 = vadd.f32 %v7102_v52, %v6934_v10 }
 0x56a   : > { %v6938_v21 = vpop.f32.mrf.mxu1  ;;  %6977 = vmatmul.bf16.gmra.mxu1 %v15775_v43 }
 0x56b   : > { %v13536_v35 = vadd.f32 %v7271_v11, %v7103_v50 }
 0x56c   : > { %v7273_v1 = vpop.f32.mrf.mxu3 }
 0x56d   : > { %v6769_v26 = vpop.f32.mrf.mxu0  ;;  %7464 = vmatmul.bf16.gmra.mxu0 %v15775_v43  ;;  %v9349_v43 = vld [vmem:[%s15498_s2 + $0x1e0] sm:$0xff] }
 0x56e   : > { %v6770_v19 = vadd.f32 %v6769_v26, %v6601_v46  ;;  %7598 = vmatpush.bf16.msra.mxu1 %v9349_v43 }
 0x570   : > { %v6939_v5 = vadd.f32 %v6938_v21, %v6770_v19  ;;  %v7104_v20 = vpop.f32.mrf.mxu2 }
 0x571   : > { %7315 = vmatmul.bf16.gmra.mxu3 %v15776_v9  ;;  %v7105_v57 = vadd.f32 %v7104_v20, %v6936_v8  ;;  %v6606_v8 = vadd.f32 %v13479_v28, %v13392_v0  ;;  %v15780_v0 = vld [vmem:[#allocation79_spill] sm:$0xff] }
 0x572   : > { %v6940_v30 = vpop.f32.mrf.mxu1 }
 0x573   : > { %v13546_v10 = vadd.f32 %v7273_v1, %v7105_v57  ;;  %v6608_v57 = vadd.f32 %v13485_v3, %v13397_v39  ;;  %v6611_v39 = vadd.f32 %v13497_v14, %v13403_v47  ;;  %v15783_v47 = vld [vmem:[#allocation82_spill] sm:$0xff] }
 0x574   : > { %v7276_v24 = vpop.f32.mrf.mxu3  ;;  %7146 = vmatmul.bf16.gmra.mxu2 %v15777_v16 }
 0x575   : > { %v6771_v36 = vpop.f32.mrf.mxu0 }
 0x576   : > { %v6772_v58 = vadd.f32 %v6771_v36, %v6603_v2 }
 0x578   : > { %v6941_v21 = vadd.f32 %v6940_v30, %v6772_v58  ;;  %v7107_v52 = vpop.f32.mrf.mxu2  ;;  %v15779_v30 = vld [vmem:[#allocation76_spill] sm:$0xff] }
 0x579   : > { %v7108_v26 = vadd.f32 %v7107_v52, %v6939_v5 }
 0x57a   : > { %v6943_v11 = vpop.f32.mrf.mxu1  ;;  %6982 = vmatmul.bf16.gmra.mxu1 %v15778_v44 }
 0x57b   : > { %v13554_v1 = vadd.f32 %v7276_v24, %v7108_v26 }
 0x57c   : > { %v7278_v22 = vpop.f32.mrf.mxu3 }
 0x57d   : > { %v6774_v46 = vpop.f32.mrf.mxu0  ;;  %7469 = vmatmul.bf16.gmra.mxu0 %v15778_v44 }
 0x57e   : > { %v6775_v50 = vadd.f32 %v6774_v46, %v6606_v8  ;;  %v15781_v8 = vld [vmem:[#allocation23_spill] sm:$0xff] }
 0x580   : > { %v6944_v20 = vadd.f32 %v6943_v11, %v6775_v50  ;;  %v7109_v2 = vpop.f32.mrf.mxu2  ;;  %v9367_v11 = vld [vmem:[%s15766_s8 + $0x30] sm:$0xff]  ;;  %v15782_v50 = vld [vmem:[#allocation80_spill] sm:$0xff] }
 0x581   : > { %7320 = vmatmul.bf16.gmra.mxu3 %v15779_v30  ;;  %v7110_v15 = vadd.f32 %v7109_v2, %v6941_v21 }
 0x582   : > { %v6945_v19 = vpop.f32.mrf.mxu1  ;;  %8230 = vmatpush.bf16.msra.mxu3 %v9367_v11 }
 0x583   : > { %v13561_v5 = vadd.f32 %v7278_v22, %v7110_v15 }
 0x584   : > { %v7281_v36 = vpop.f32.mrf.mxu3  ;;  %7151 = vmatmul.bf16.gmra.mxu2 %v15780_v0 }
 0x585   : > { %v6776_v58 = vpop.f32.mrf.mxu0 }
 0x586   : > { %v6777_v28 = vadd.f32 %v6776_v58, %v6608_v57  ;;  %v6613_v58 = vadd.f32 %v13503_v6, %v13411_v17 }
 0x588   : > { %v6946_v52 = vadd.f32 %v6945_v19, %v6777_v28  ;;  %v7112_v43 = vpop.f32.mrf.mxu2 }
 0x589   : > { %v7113_v21 = vadd.f32 %v7112_v43, %v6944_v20 }
 0x58a   : > { %v6948_v24 = vpop.f32.mrf.mxu1  ;;  %6987 = vmatmul.bf16.gmra.mxu1 %v15781_v8 }
 0x58b   : > { %v13569_v26 = vadd.f32 %v7281_v36, %v7113_v21 }
 0x58c   : > { %v7283_v44 = vpop.f32.mrf.mxu3 }
 0x58d   : > { %v6779_v3 = vpop.f32.mrf.mxu0  ;;  %7474 = vmatmul.bf16.gmra.mxu0 %v15781_v8 }
 0x58e   : > { %v6780_v46 = vadd.f32 %v6779_v3, %v6611_v39  ;;  %v15784_v39 = vld [vmem:[#allocation22_spill] sm:$0xff] }
 0x590   : > { %v6949_v19 = vadd.f32 %v6948_v24, %v6780_v46  ;;  %v7114_v2 = vpop.f32.mrf.mxu2  ;;  %v15785_v24 = vld [vmem:[#allocation83_spill] sm:$0xff] }
 0x591   : > { %7325 = vmatmul.bf16.gmra.mxu3 %v15782_v50  ;;  %v7115_v28 = vadd.f32 %v7114_v2, %v6946_v52  ;;  %v15787_v52 = vld [vmem:[#allocation85_spill] sm:$0xff]  ;;  %v15788_v2 = vld [vmem:[#allocation74_spill] sm:$0xff] }
 0x592   : > { %v6950_v22 = vpop.f32.mrf.mxu1 }
 0x593   : > { %v13576_v20 = vadd.f32 %v7283_v44, %v7115_v28 }
 0x594   : > { %v7286_v57 = vpop.f32.mrf.mxu3  ;;  %7156 = vmatmul.bf16.gmra.mxu2 %v15783_v47 }
 0x595   : > { %v6781_v15 = vpop.f32.mrf.mxu0 }
 0x596   : > { %v6782_v14 = vadd.f32 %v6781_v15, %v6613_v58 }
 0x598   : > { %v6951_v43 = vadd.f32 %v6950_v22, %v6782_v14  ;;  %v7117_v11 = vpop.f32.mrf.mxu2  ;;  %v15789_v14 = vld [vmem:[#allocation87_spill] sm:$0xff] }
 0x599   : > { %v7118_v8 = vadd.f32 %v7117_v11, %v6949_v19  ;;  %v15791_v11 = vld [vmem:[#allocation77_spill] sm:$0xff] }
 0x59a   : > { %v6953_v36 = vpop.f32.mrf.mxu1  ;;  %6992 = vmatmul.bf16.gmra.mxu1 %v15785_v24 }
 0x59b   : > { %v6954_v3 = vadd.f32 %v6953_v36, %v15784_v39  ;;  %v13583_v6 = vadd.f32 %v7286_v57, %v7118_v8  ;;  %v15792_v8 = vld [vmem:[#allocation25_spill] sm:$0xff] }
 0x59c   : > { %v7288_v21 = vpop.f32.mrf.mxu3 }
 0x59d   : > { %v7435_v46 = vpop.f32.mrf.mxu0  ;;  %7479 = vmatmul.bf16.gmra.mxu0 %v15785_v24 }
 0x59e   : > { %v13581_v50 = vadd.f32 %v7435_v46, %v13524_v41 }
 0x5a0   : > { %15786 = vst [vmem:[#allocation69_spill] sm:$0xff] %v13581_v50  ;;  %v7119_v44 = vpop.f32.mrf.mxu2 }
 0x5a1   : > { %7330 = vmatmul.bf16.gmra.mxu3 %v15787_v52  ;;  %v7120_v28 = vadd.f32 %v7119_v44, %v6951_v43  ;;  %v15794_v52 = vld [vmem:[#allocation88_spill] sm:$0xff] }
 0x5a2   : > { %v6955_v17 = vpop.f32.mrf.mxu1 }
 0x5a3   : > { %v6956_v58 = vadd.f32 %v6955_v17, %v15788_v2  ;;  %v13592_v41 = vadd.f32 %v7288_v21, %v7120_v28  ;;  %v15795_v21 = vld [vmem:[#allocation78_spill] sm:$0xff] }
 0x5a4   : > { %v7291_v22 = vpop.f32.mrf.mxu3  ;;  %7161 = vmatmul.bf16.gmra.mxu2 %v15789_v14 }
 0x5a5   : > { %v7437_v15 = vpop.f32.mrf.mxu0 }
 0x5a6   : > { %v13590_v19 = vadd.f32 %v7437_v15, %v13531_v29 }
 0x5a8   : > { %15790 = vst [vmem:[#allocation20_spill] sm:$0xff] %v13590_v19  ;;  %v7122_v36 = vpop.f32.mrf.mxu2 }
 0x5a9   : > { %v7123_v46 = vadd.f32 %v7122_v36, %v6954_v3  ;;  %v15796_v36 = vld [vmem:[#allocation27_spill] sm:$0xff] }
 0x5aa   : > { %v6958_v57 = vpop.f32.mrf.mxu1  ;;  %6997 = vmatmul.bf16.gmra.mxu1 %v15792_v8 }
 0x5ab   : > { %v6959_v39 = vadd.f32 %v6958_v57, %v15791_v11  ;;  %v13596_v2 = vadd.f32 %v7291_v22, %v7123_v46 }
 0x5ac   : > { %v7293_v17 = vpop.f32.mrf.mxu3 }
 0x5ad   : > { %v7440_v24 = vpop.f32.mrf.mxu0  ;;  %7484 = vmatmul.bf16.gmra.mxu0 %v15792_v8  ;;  %v9348_v8 = vld [vmem:[%s15498_s2 + $0x1d8] sm:$0xff] }
 0x5ae   : > { %v13599_v43 = vadd.f32 %v7440_v24, %v13536_v35  ;;  %v9356_v35 = vld [vmem:[%s15498_s2 + $0x218] sm:$0xff]  ;;  %v15798_v24 = vld [vmem:[#allocation81_spill] sm:$0xff]  ;;  %7599 = vmatpush.bf16.msra.mxu1 %v9348_v8 }
 0x5af   : > { %7768 = vmatpush.bf16.msra.mxu2 %v9356_v35  ;;  %v15801_v35 = vld [vmem:[#allocation29_spill] sm:$0xff]  ;;  %v15803_v8 = vld [vmem:[#allocation30_spill] sm:$0xff] }
 0x5b0   : > { %15793 = vst [vmem:[#allocation70_spill] sm:$0xff] %v13599_v43  ;;  %v7124_v29 = vpop.f32.mrf.mxu2 }
 0x5b1   : > { %7335 = vmatmul.bf16.gmra.mxu3 %v15794_v52  ;;  %v7125_v28 = vadd.f32 %v7124_v29, %v6956_v58 }
 0x5b2   : > { %v6960_v44 = vpop.f32.mrf.mxu1 }
 0x5b3   : > { %v6961_v15 = vadd.f32 %v6960_v44, %v15795_v21  ;;  %v13604_v3 = vadd.f32 %v7293_v17, %v7125_v28  ;;  %v15799_v17 = vld [vmem:[#allocation90_spill] sm:$0xff] }
 0x5b4   : > { %v7296_v19 = vpop.f32.mrf.mxu3  ;;  %7166 = vmatmul.bf16.gmra.mxu2 %v15796_v36 }
 0x5b5   : > { %v7442_v57 = vpop.f32.mrf.mxu0 }
 0x5b6   : > { %v13608_v22 = vadd.f32 %v7442_v57, %v13546_v10 }
 0x5b8   : > { %15797 = vst [vmem:[#allocation71_spill] sm:$0xff] %v13608_v22  ;;  %v7127_v46 = vpop.f32.mrf.mxu2 }
 0x5b9   : > { %v7128_v44 = vadd.f32 %v7127_v46, %v6959_v39 }
 0x5ba   : > { %v6963_v11 = vpop.f32.mrf.mxu1  ;;  %7002 = vmatmul.bf16.gmra.mxu1 %v15799_v17 }
 0x5bb   : > { %v6964_v58 = vadd.f32 %v6963_v11, %v15798_v24  ;;  %v13618_v10 = vadd.f32 %v7296_v19, %v7128_v44  ;;  %v15802_v11 = vld [vmem:[#allocation24_spill] sm:$0xff] }
 0x5bc   : > { %v7298_v29 = vpop.f32.mrf.mxu3 }
 0x5bd   : > { %v7445_v21 = vpop.f32.mrf.mxu0  ;;  %7489 = vmatmul.bf16.gmra.mxu0 %v15799_v17 }
 0x5be   : > { %v13621_v28 = vadd.f32 %v7445_v21, %v13554_v1  ;;  %v13635_v1 = vld [vmem:[%s15481_s4] ss:$0 sm:$0xff]  ;;  %v15805_v21 = vld [vmem:[#allocation84_spill] sm:$0xff] }
 0x5bf   : > { %v2710_v44 = vmul.f32 %v13635_v1, %v12756_v31  ;;  %v15806_v31 = vld [vmem:[#allocation93_spill] sm:$0xff] }
 0x5c0   : > { %15800 = vst [vmem:[#allocation21_spill] sm:$0xff] %v13621_v28  ;;  %v7129_v52 = vpop.f32.mrf.mxu2  ;;  %v15809_v28 = vld [vmem:[#allocation86_spill] sm:$0xff] }
 0x5c1   : > { %7340 = vmatmul.bf16.gmra.mxu3 %v15801_v35  ;;  %v7130_v46 = vadd.f32 %v7129_v52, %v6961_v15 }
 0x5c2   : > { %v6965_v57 = vpop.f32.mrf.mxu1 }
 0x5c3   : > { %v6966_v39 = vadd.f32 %v6965_v57, %v15802_v11  ;;  %v13626_v22 = vadd.f32 %v7298_v29, %v7130_v46  ;;  %v9366_v57 = vld [vmem:[%s15766_s8 + $0x28] sm:$0xff]  ;;  %v2711_v11 = vmul.f32 %v13635_v1, %v12792_v59  ;;  %v2712_v59 = vmul.f32 %v13635_v1, %v12831_v48 }
 0x5c4   : > { %v7301_v24 = vpop.f32.mrf.mxu3  ;;  %7171 = vmatmul.bf16.gmra.mxu2 %v15803_v8  ;;  %8231 = vmatpush.bf16.msra.mxu3 %v9366_v57  ;;  %v15808_v8 = vld [vmem:[#allocation94_spill] sm:$0xff] }
 0x5c5   : > { %v7447_v36 = vpop.f32.mrf.mxu0 }
 0x5c6   : > { %v13630_v19 = vadd.f32 %v7447_v36, %v13561_v5  ;;  %v13646_v5 = vld [vmem:[%s15482_s5] ss:$0 sm:$0xff] }
 0x5c7   : > { %v2797_v36 = vadd.f32 %v13646_v5, %v2710_v44  ;;  %v2798_v35 = vadd.f32 %v13646_v5, %v2711_v11 }
 0x5c8   : > { %15804 = vst [vmem:[#allocation72_spill] sm:$0xff] %v13630_v19  ;;  %v7132_v15 = vpop.f32.mrf.mxu2 }
 0x5c9   : > { %v7133_v29 = vadd.f32 %v7132_v15, %v6964_v58 }
 0x5ca   : > { %v6968_v52 = vpop.f32.mrf.mxu1  ;;  %7007 = vmatmul.bf16.gmra.mxu1 %v15806_v31 }
 0x5cb   : > { %v6969_v17 = vadd.f32 %v6968_v52, %v15805_v21  ;;  %v13652_v52 = vadd.f32 %v7301_v24, %v7133_v29  ;;  %v2880_v21 = vmax.f32 %v2797_v36, 0.0  ;;  %v2881_v24 = vmax.f32 %v2798_v35, 0.0 }
 0x5cc   : > { %v7303_v46 = vpop.f32.mrf.mxu3 }
 0x5cd   : > { %v7450_v58 = vpop.f32.mrf.mxu0  ;;  %v3182_v57 = vrot.slane %v2880_v21, 2  ;;  %7494 = vmatmul.bf16.gmra.mxu0 %v15806_v31  ;;  %v3184_v36 = vrot.slane %v2880_v21, 6  ;;  %v3185_v48 = vrot.slane %v2881_v24, 2  ;;  %v3186_v35 = vrot.slane %v2881_v24, 4  ;;  %v15811_v31 = vld [vmem:[#allocation28_spill] sm:$0xff] }
 0x5ce   : > { %v13655_v15 = vadd.f32 %v7450_v58, %v13569_v26  ;;  %v3183_v26 = vrot.slane %v2880_v21, 4 }
 0x5d0   : > { %15807 = vst [vmem:[#allocation73_spill] sm:$0xff] %v13655_v15  ;;  %v7134_v44 = vpop.f32.mrf.mxu2  ;;  %v13665_v15 = vld.sshfl [vmem:[#allocation1] sm:$0xff pattern:$0x73625140] }
 0x5d1   : > { %7345 = vmatmul.bf16.gmra.mxu3 %v15808_v8  ;;  %v7135_v14 = vadd.f32 %v7134_v44, %v6966_v39  ;;  %v2799_v8 = vadd.f32 %v13646_v5, %v2712_v59  ;;  %3826 = vst [vmem:[#allocation1] ss:$4 sm:$0xff] %v2880_v21  ;;  %v13673_v44 = vld.sshfl [vmem:[#allocation1 + $0x20] sm:$0xff pattern:$0x73625140] }
 0x5d2   : > { %v6970_v19 = vpop.f32.mrf.mxu1  ;;  %3827 = vst [vmem:[#allocation1 + $0x1] ss:$4 sm:$0xff] %v3182_v57 }
 0x5d3   : > { %v6971_v43 = vadd.f32 %v6970_v19, %v15809_v28  ;;  %v13663_v58 = vadd.f32 %v7303_v46, %v7135_v14  ;;  %3828 = vst [vmem:[#allocation1 + $0x2] ss:$4 sm:$0xff] %v3183_v26  ;;  %v3187_v19 = vrot.slane %v2881_v24, 6  ;;  %v2882_v50 = vmax.f32 %v2799_v8, 0.0 }
 0x5d4   : > { %v7306_v29 = vpop.f32.mrf.mxu3  ;;  %7176 = vmatmul.bf16.gmra.mxu2 %v12645_v25  ;;  %3829 = vst [vmem:[#allocation1 + $0x3] ss:$4 sm:$0xff] %v3184_v36 }
 0x5d5   : > { %v7452_v11 = vpop.f32.mrf.mxu0  ;;  %3830 = vst [vmem:[#allocation1 + $0x20] ss:$4 sm:$0xff] %v2881_v24  ;;  %v3189_v36 = vrot.slane %v2882_v50, 4 }
 0x5d6   : > { %v13670_v28 = vadd.f32 %v7452_v11, %v13576_v20  ;;  %v2713_v20 = vmul.f32 %v13635_v1, %v12859_v61  ;;  %3831 = vst [vmem:[#allocation1 + $0x21] ss:$4 sm:$0xff] %v3185_v48  ;;  %v3188_v11 = vrot.slane %v2882_v50, 2  ;;  %v3190_v61 = vrot.slane %v2882_v50, 6 }
 0x5d7   : > { %3832 = vst [vmem:[#allocation1 + $0x22] ss:$4 sm:$0xff] %v3186_v35  ;;  %v15814_v35 = vld [vmem:[#allocation89_spill] sm:$0xff] }
 0x5d8   : > { %15810 = vst [vmem:[#allocation75_spill] sm:$0xff] %v13670_v28  ;;  %v7137_v14 = vpop.f32.mrf.mxu2  ;;  %v2800_v8 = vadd.f32 %v13646_v5, %v2713_v20 }
 0x5d9   : > { %v7138_v59 = vadd.f32 %v7137_v14, %v6969_v17  ;;  %3833 = vst [vmem:[#allocation1 + $0x23] ss:$4 sm:$0xff] %v3187_v19  ;;  %v2714_v17 = vmul.f32 %v13635_v1, %v12915_v56  ;;  %v15813_v14 = vld [vmem:[#allocation96_spill] sm:$0xff] }
 0x5da   : > { %v6973_v39 = vpop.f32.mrf.mxu1  ;;  %7012 = vmatmul.bf16.gmra.mxu1 %v12672_v49 }
 0x5db   : > { %v6974_v46 = vadd.f32 %v6973_v39, %v15811_v31  ;;  %v13678_v57 = vadd.f32 %v7306_v29, %v7138_v59  ;;  %v13687_v48 = vld.sshfl [vmem:[#allocation1] sm:$0xff pattern:$0x73625140]  ;;  %v2801_v59 = vadd.f32 %v13646_v5, %v2714_v17 }
 0x5dc   : > { %v7308_v21 = vpop.f32.mrf.mxu3  ;;  %3836 = vst [vmem:[#allocation1] ss:$4 sm:$0xff] %v2882_v50  ;;  %v15816_v17 = vld [vmem:[#allocation91_spill] sm:$0xff] }
 0x5dd   : > { %v7455_v26 = vpop.f32.mrf.mxu0  ;;  %3837 = vst [vmem:[#allocation1 + $0x1] ss:$4 sm:$0xff] %v3188_v11  ;;  %7499 = vmatmul.bf16.gmra.mxu0 %v12672_v49  ;;  %v2884_v50 = vmax.f32 %v2801_v59, 0.0 }
 0x5de   : > { %v13681_v39 = vadd.f32 %v7455_v26, %v13583_v6  ;;  %v2883_v6 = vmax.f32 %v2800_v8, 0.0  ;;  %3838 = vst [vmem:[#allocation1 + $0x2] ss:$4 sm:$0xff] %v3189_v36  ;;  %v2715_v36 = vmul.f32 %v13635_v1, %v12956_v42 }
 0x5df   : > { %3839 = vst [vmem:[#allocation1 + $0x3] ss:$4 sm:$0xff] %v3190_v61  ;;  %v3195_v61 = vrot.slane %v2884_v50, 4  ;;  %v3196_v59 = vrot.slane %v2884_v50, 6 }
 0x5e0   : > { %15812 = vst [vmem:[#allocation23_spill] sm:$0xff] %v13681_v39  ;;  %v7139_v29 = vpop.f32.mrf.mxu2  ;;  %v3193_v8 = vrot.slane %v2883_v6, 6  ;;  %v13699_v39 = vld.sshfl [vmem:[#allocation1 + $0x20] sm:$0xff pattern:$0x73625140] }
 0x5e1   : > { %7350 = vmatmul.bf16.gmra.mxu3 %v15813_v14  ;;  %v7140_v19 = vadd.f32 %v7139_v29, %v6971_v43  ;;  %v3192_v43 = vrot.slane %v2883_v6, 4  ;;  %3840 = vst [vmem:[#allocation1 + $0x20] ss:$4 sm:$0xff] %v2883_v6 }
 0x5e2   : > { %v6975_v24 = vpop.f32.mrf.mxu1  ;;  %3843 = vst [vmem:[#allocation1 + $0x23] ss:$4 sm:$0xff] %v3193_v8 }
 0x5e3   : > { %v6976_v31 = vadd.f32 %v6975_v24, %v15814_v35  ;;  %v13692_v56 = vadd.f32 %v7308_v21, %v7140_v19  ;;  %v3191_v24 = vrot.slane %v2883_v6, 2  ;;  %v3194_v21 = vrot.slane %v2884_v50, 2  ;;  %3842 = vst [vmem:[#allocation1 + $0x22] ss:$4 sm:$0xff] %v3192_v43 }
 0x5e4   : > { %v7311_v26 = vpop.f32.mrf.mxu3  ;;  %7181 = vmatmul.bf16.gmra.mxu2 %v12711_v60  ;;  %v2802_v6 = vadd.f32 %v13646_v5, %v2715_v36  ;;  %v2716_v43 = vmul.f32 %v13635_v1, %v12999_v45 }
 0x5e5   : > { %v7457_v20 = vpop.f32.mrf.mxu0  ;;  %3841 = vst [vmem:[#allocation1 + $0x21] ss:$4 sm:$0xff] %v3191_v24 }
 0x5e6   : > { %v13696_v14 = vadd.f32 %v7457_v20, %v13592_v41 }
 0x5e8   : > { %15815 = vst [vmem:[#allocation22_spill] sm:$0xff] %v13696_v14  ;;  %v7142_v29 = vpop.f32.mrf.mxu2  ;;  %v15830_v14 = vld [vmem:[#allocation31_spill] sm:$0xff] }
 0x5e9   : > { %v7143_v49 = vadd.f32 %v7142_v29, %v6974_v46 }
 0x5ea   : > { %v6978_v11 = vpop.f32.mrf.mxu1  ;;  %7017 = vmatmul.bf16.gmra.mxu1 %v12733_v12 }
 0x5eb   : > { %v6979_v35 = vadd.f32 %v6978_v11, %v15816_v17  ;;  %v13704_v19 = vadd.f32 %v7311_v26, %v7143_v49  ;;  %v13706_v11 = vld.sshfl [vmem:[#allocation1] sm:$0xff pattern:$0x73625140]  ;;  %v2885_v17 = vmax.f32 %v2802_v6, 0.0 }
 0x5ec   : > { %v7313_v41 = vpop.f32.mrf.mxu3  ;;  %3846 = vst [vmem:[#allocation1] ss:$4 sm:$0xff] %v2884_v50  ;;  %v15818_v26 = vld [vmem:[#allocation92_spill] sm:$0xff] }
 0x5ed   : > { %v7460_v20 = vpop.f32.mrf.mxu0  ;;  %3847 = vst [vmem:[#allocation1 + $0x1] ss:$4 sm:$0xff] %v3194_v21  ;;  %7504 = vmatmul.bf16.gmra.mxu0 %v12733_v12  ;;  %v2803_v21 = vadd.f32 %v13646_v5, %v2716_v43  ;;  %v3197_v45 = vrot.slane %v2885_v17, 2  ;;  %v15821_v43 = vld [vmem:[#allocation102_spill] sm:$0xff] }
 0x5ee   : > { %v13709_v46 = vadd.f32 %v7460_v20, %v13596_v2  ;;  %3848 = vst [vmem:[#allocation1 + $0x2] ss:$4 sm:$0xff] %v3195_v61  ;;  %v9355_v61 = vld [vmem:[%s15498_s2 + $0x210] sm:$0xff]  ;;  %v3199_v20 = vrot.slane %v2885_v17, 6 }
 0x5ef   : > { %3849 = vst [vmem:[#allocation1 + $0x3] ss:$4 sm:$0xff] %v3196_v59  ;;  %7769 = vmatpush.bf16.msra.mxu2 %v9355_v61 }
 0x5f0   : > { %15817 = vst [vmem:[#allocation83_spill] sm:$0xff] %v13709_v46  ;;  %v7144_v24 = vpop.f32.mrf.mxu2 }
 0x5f1   : > { %7355 = vmatmul.bf16.gmra.mxu3 %v12761_v7  ;;  %v7145_v8 = vadd.f32 %v7144_v24, %v6976_v31  ;;  %v3198_v31 = vrot.slane %v2885_v17, 4  ;;  %v2886_v24 = vmax.f32 %v2803_v21, 0.0  ;;  %v2718_v21 = vmul.f32 %v13635_v1, %v13084_v55  ;;  %v15828_v7 = vld [vmem:[#allocation40_spill] sm:$0xff] }
 0x5f2   : > { %v6980_v42 = vpop.f32.mrf.mxu1 }
 0x5f3   : > { %v6981_v29 = vadd.f32 %v6980_v42, %v15818_v26  ;;  %v13717_v2 = vadd.f32 %v7313_v41, %v7145_v8  ;;  %v15820_v41 = vld [vmem:[#allocation34_spill] sm:$0xff]  ;;  %v13728_v42 = vld.sshfl [vmem:[#allocation1 + $0x20] sm:$0xff pattern:$0x73625140] }
 0x5f4   : > { %v7316_v49 = vpop.f32.mrf.mxu3  ;;  %7186 = vmatmul.bf16.gmra.mxu2 %v12787_v27  ;;  %3850 = vst [vmem:[#allocation1 + $0x20] ss:$4 sm:$0xff] %v2885_v17  ;;  %v2717_v17 = vmul.f32 %v13635_v1, %v13037_v51  ;;  %v2805_v51 = vadd.f32 %v13646_v5, %v2718_v21 }
 0x5f5   : > { %v7462_v50 = vpop.f32.mrf.mxu0  ;;  %3851 = vst [vmem:[#allocation1 + $0x21] ss:$4 sm:$0xff] %v3197_v45 }
 0x5f6   : > { %v13722_v36 = vadd.f32 %v7462_v50, %v13604_v3  ;;  %v9347_v3 = vld [vmem:[%s15498_s2 + $0x1d0] sm:$0xff]  ;;  %3852 = vst [vmem:[#allocation1 + $0x22] ss:$4 sm:$0xff] %v3198_v31  ;;  %v15824_v31 = vld [vmem:[#allocation95_spill] sm:$0xff]  ;;  %v13763_v21 = vmax.f32 %v2805_v51, 0.0 }
 0x5f7   : > { %7600 = vmatpush.bf16.msra.mxu1 %v9347_v3  ;;  %3853 = vst [vmem:[#allocation1 + $0x23] ss:$4 sm:$0xff] %v3199_v20 }
 0x5f8   : > { %15819 = vst [vmem:[#allocation74_spill] sm:$0xff] %v13722_v36  ;;  %v7147_v12 = vpop.f32.mrf.mxu2  ;;  %v3206_v51 = vrot.slane %v13763_v21, 2 }
 0x5f9   : > { %v7148_v26 = vadd.f32 %v7147_v12, %v6979_v35  ;;  %v15823_v12 = vld [vmem:[#allocation103_spill] sm:$0xff] }
 0x5fa   : > { %v6983_v59 = vpop.f32.mrf.mxu1  ;;  %7022 = vmatmul.bf16.gmra.mxu1 %v15821_v43 }
 0x5fb   : > { %v6984_v6 = vadd.f32 %v6983_v59, %v15820_v41  ;;  %v13734_v50 = vadd.f32 %v7316_v49, %v7148_v26  ;;  %v3233_v59 = vadd.s32 8, %v10695_v4  ;;  %v3854_v41 = vld.sshfl [vmem:[#allocation1] sm:$0xff pattern:$0x73625140] }
 0x5fc   : > { %v7318_v8 = vpop.f32.mrf.mxu3  ;;  %3856 = vst [vmem:[#allocation1] ss:$4 sm:$0xff] %v2886_v24 }
 0x5fd   : > { %v7465_v61 = vpop.f32.mrf.mxu0  ;;  %vm3253_vm15 = vcmp.ge.s32.totalorder %v3233_v59, 1  ;;  %vm3263_vm0 = vcmp.le.s32.totalorder %v3233_v59, 64  ;;  %7509 = vmatmul.bf16.gmra.mxu0 %v15821_v43  ;;  %v3201_v43 = vrot.slane %v2886_v24, 4  ;;  %v3202_v59 = vrot.slane %v2886_v24, 6 }
 0x5fe   : > { %v13738_v35 = vadd.f32 %v7465_v61, %v13618_v10  ;;  %v2804_v10 = vadd.f32 %v13646_v5, %v2717_v17  ;;  %vm13753_vm1 = vmand %vm3253_vm15, %vm3263_vm0  ;;  %v3855_v36 = vld.sshfl [vmem:[#allocation1 + $0x20] sm:$0xff pattern:$0x73625140] }
 0x5ff   : > { %3859 = vst [vmem:[#allocation1 + $0x21] ss:$4 sm:$0xff] %v3201_v43  ;;  %vm3463_vm3 = vmand %vm13753_vm1, %vm3382_vm2 }
 0x600   : > { %15822 = vst [vmem:[#allocation77_spill] sm:$0xff] %v13738_v35  ;;  %v7149_v49 = vpop.f32.mrf.mxu2  ;;  %v2887_v17 = vmax.f32 %v2804_v10, 0.0 }
 0x601   : > { %7360 = vmatmul.bf16.gmra.mxu3 %v15823_v12  ;;  %v7150_v20 = vadd.f32 %v7149_v49, %v6981_v29  ;;  %3860 = vst [vmem:[#allocation1 + $0x22] ss:$4 sm:$0xff] %v3202_v59 }
 0x602   : > { %v6985_v45 = vpop.f32.mrf.mxu1  ;;  %3861 = vst [vmem:[#allocation1 + $0x23] ss:$4 sm:$0xff] %v2887_v17 }
 0x603   : > { %v13746_v26 = vadd.f32 %v6985_v45, %v15824_v31  ;;  %v13751_v61 = vadd.f32 %v7318_v8, %v7150_v20  ;;  %v4068_v45 = vsel %vm13753_vm1, %v3854_v41, 0.0  ;;  %v3200_v31 = vrot.slane %v2886_v24, 2 }
 0x604   : > { %v7321_v3 = vpop.f32.mrf.mxu3  ;;  %7191 = vmatmul.bf16.gmra.mxu2 %v12854_v53  ;;  %v13765_v49 = vpack.c.bf16 %v4068_v45, %v4068_v45  ;;  %v2719_v20 = vmul.f32 %v13635_v1, %v13127_v13  ;;  %v3203_v53 = vrot.slane %v2887_v17, 2  ;;  %v4069_v24 = vsel %vm13753_vm1, %v3855_v36, 0.0 }
 0x605   : > { %v7467_v12 = vpop.f32.mrf.mxu0  ;;  %3858 = vst [vmem:[#allocation1 + $0x20] ss:$4 sm:$0xff] %v3200_v31  ;;  %v13778_v13 = vpack.c.bf16 %v4069_v24, %v4069_v24  ;;  %v3857_v31 = vld.sshfl [vmem:[#allocation1] sm:$0xff pattern:$0x73625140] }
 0x606   : > { %v13761_v29 = vadd.f32 %v7467_v12, %v13626_v22  ;;  %v9365_v22 = vld [vmem:[%s15766_s8 + $0x20] sm:$0xff]  ;;  %v3204_v12 = vrot.slane %v2887_v17, 4  ;;  %v2806_v45 = vadd.f32 %v13646_v5, %v2719_v20  ;;  %v5184_v43 = vshrl.u32 %v13765_v49, 16  ;;  %3863 = vst [vmem:[#allocation1] ss:$4 sm:$0xff] %v3203_v53 }
 0x607   : > { %8232 = vmatpush.bf16.msra.mxu3 %v9365_v22  ;;  %v5194_v59 = vshrl.u32 %v13778_v13, 16  ;;  %v5233_v22 = vrot.slane %v13778_v13, 5  ;;  %v2720_v20 = vmul.f32 %v13635_v1, %v13171_v63  ;;  %3866 = vst [vmem:[#allocation1 + $0x3] ss:$4 sm:$0xff] %v13763_v21 }
 0x608   : > { %15827 = vst [vmem:[#allocation25_spill] sm:$0xff] %v13761_v29  ;;  %v7152_v35 = vpop.f32.mrf.mxu2  ;;  %v5186_v24 = vrot.slane %v5184_v43, 4  ;;  %v3207_v29 = vrot.slane %v13763_v21, 4 }
 0x609   : > { %v7153_v27 = vadd.f32 %v7152_v35, %v6984_v6  ;;  %v5180_v35 = vshll.u32 %v13765_v49, 16  ;;  %3864 = vst [vmem:[#allocation1 + $0x1] ss:$4 sm:$0xff] %v3204_v12  ;;  %v15832_v12 = vrot.slane %v13765_v49, 5 }
 0x60a   : > { %v6988_v8 = vpop.f32.mrf.mxu1  ;;  %7027 = vmatmul.bf16.gmra.mxu1 %v12885_v32 }
 0x60b   : > { %v13770_v41 = vadd.f32 %v6988_v8, %v15828_v7  ;;  %v3205_v7 = vrot.slane %v2887_v17, 6  ;;  %v13781_v6 = vadd.f32 %v7321_v3, %v7153_v27  ;;  %v4070_v27 = vsel %vm3463_vm3, %v3857_v31, 0.0 }
 0x60c   : > { %v7323_v10 = vpop.f32.mrf.mxu3  ;;  %v5190_v3 = vshll.u32 %v13778_v13, 16  ;;  %v4160_v17 = vpack.c.bf16 %v4070_v27, %v4070_v27  ;;  %v3208_v31 = vrot.slane %v13763_v21, 6  ;;  %v5232_v43 = vrot.slane %v15832_v12, 4  ;;  %v3862_v0 = vld.sshfl [vmem:[#allocation1 + $0x20] sm:$0xff pattern:$0x73625140] }
 0x60d   : > { %v7470_v36 = vpop.f32.mrf.mxu0  ;;  %3865 = vst [vmem:[#allocation1 + $0x2] ss:$4 sm:$0xff] %v3205_v7  ;;  %7514 = vmatmul.bf16.gmra.mxu0 %v12885_v32  ;;  %v2721_v32 = vmul.f32 %v13635_v1, %v13202_v18 }
 0x60e   : > { %v13791_v8 = vadd.f32 %v7470_v36, %v13652_v52  ;;  %v13799_v52 = vrot.slane %v5180_v35, 5  ;;  %v5192_v53 = vrot.slane %v5190_v3, 5  ;;  %v5196_v36 = vrot.slane %v5194_v59, 4  ;;  %3867 = vst [vmem:[#allocation1 + $0x20] ss:$4 sm:$0xff] %v3206_v51 }
 0x60f   : > { %v5236_v7 = vrot.slane %v4160_v17, 5  ;;  %v2889_v59 = vmax.f32 %v2806_v45, 0.0  ;;  %v5234_v63 = vsel %vm10773_vm14, %v5232_v43, %v5233_v22  ;;  %v3234_v43 = vadd.s32 9, %v10695_v4  ;;  %3868 = vst [vmem:[#allocation1 + $0x21] ss:$4 sm:$0xff] %v3207_v29 }
 0x610   : > { %15829 = vst [vmem:[#allocation78_spill] sm:$0xff] %v13791_v8  ;;  %v7154_v27 = vpop.f32.mrf.mxu2  ;;  %v15831_v8 = vld [vmem:[#allocation97_spill] sm:$0xff]  ;;  %v5187_v3 = vor.u32 %v5186_v24, %v13799_v52  ;;  %v5778_v12 = vunpack.c.l.b16 %v5234_v63 }
 0x611   : > { %7365 = vmatmul.bf16.gmra.mxu3 %v15830_v14  ;;  %v7155_v35 = vadd.f32 %v7154_v27, %v13746_v26  ;;  %v5235_v14 = vrot.slane %v5233_v22, 4  ;;  %v2807_v27 = vadd.f32 %v13646_v5, %v2720_v20  ;;  %v15833_v22 = vld [vmem:[#allocation107_spill] sm:$0xff]  ;;  %3869 = vst [vmem:[#allocation1 + $0x22] ss:$4 sm:$0xff] %v3208_v31  ;;  %vm3254_vm4 = vcmp.ge.s32.totalorder %v3234_v43, 1 }
 0x612   : > { %v6990_v46 = vpop.f32.mrf.mxu1  ;;  %v5188_v26 = vrot.slane %v5187_v3, 4  ;;  %v3210_v3 = vrot.slane %v2889_v59, 4  ;;  %vm3264_vm5 = vcmp.le.s32.totalorder %v3234_v43, 64  ;;  %3870 = vst [vmem:[#allocation1 + $0x23] ss:$4 sm:$0xff] %v2889_v59  ;;  %v3211_v51 = vrot.slane %v2889_v59, 6 }
 0x613   : > { %v13805_v60 = vadd.f32 %v6990_v46, %v15831_v8  ;;  %v5197_v46 = vor.u32 %v5196_v36, %v5192_v53  ;;  %v5200_v8 = vshll.u32 %v4160_v17, 16  ;;  %v13815_v25 = vadd.f32 %v7323_v10, %v7155_v35  ;;  %vm13839_vm6 = vmand %vm3254_vm4, %vm3264_vm5 }
 0x614   : > { %v7326_v28 = vpop.f32.mrf.mxu3  ;;  %v5237_v21 = vsel %vm10773_vm14, %v5235_v14, %v5236_v7  ;;  %7196 = vmatmul.bf16.gmra.mxu2 %v15833_v22  ;;  %v5193_v14 = vsel %vm10749_vm11, %v5188_v26, %v5192_v53  ;;  %v3209_v35 = vrot.slane %v2889_v59, 2  ;;  %v2890_v29 = vmax.f32 %v2807_v27, 0.0  ;;  %vm3365_vm8 = vmand %vm13839_vm6, %vm3275_vm7  ;;  %v3871_v59 = vld.sshfl [vmem:[#allocation1] sm:$0xff pattern:$0x73625140] }
 0x615   : > { %v7472_v47 = vpop.f32.mrf.mxu0  ;;  %v5779_v24 = vunpack.c.l.b16 %v5237_v21  ;;  %v5198_v45 = vrot.slane %v5197_v46, 4  ;;  %v5202_v30 = vrot.slane %v5200_v8, 5  ;;  %v5762_v36 = vunpack.c.l.b16 %v5193_v14  ;;  %v15838_v46 = vld [vmem:[#allocation39_spill] sm:$0xff]  ;;  %3874 = vst [vmem:[#allocation1 + $0x1] ss:$4 sm:$0xff] %v3210_v3  ;;  %vm3472_vm9 = vmand %vm13839_vm6, %vm3382_vm2 }
 0x616   : > { %v13824_v10 = vadd.f32 %v7472_v47, %v13663_v58  ;;  %v15835_v58 = vld [vmem:[#allocation99_spill] sm:$0xff]  ;;  %v2808_v31 = vadd.f32 %v13646_v5, %v2721_v32  ;;  %v4071_v26 = vsel %vm3365_vm8, %v3862_v0, 0.0  ;;  %v4072_v27 = vsel %vm13839_vm6, %v3871_v59, 0.0  ;;  %3873 = vst [vmem:[#allocation1] ss:$4 sm:$0xff] %v3209_v35  ;;  %vm3356_vm2 = vmand %vm13753_vm1, %vm3275_vm7 }
 0x617   : > { %v13828_v17 = vpack.c.b16 %v5779_v24, %v5778_v12  ;;  %v5203_v20 = vsel %vm10749_vm11, %v5198_v45, %v5202_v30  ;;  %v3212_v24 = vrot.slane %v2890_v29, 2  ;;  %v4161_v32 = vpack.c.bf16 %v4071_v26, %v4071_v26  ;;  %3875 = vst [vmem:[#allocation1 + $0x2] ss:$4 sm:$0xff] %v3211_v51  ;;  %v15842_v26 = vld [vmem:[#allocation101_spill] sm:$0xff] }
 0x618   : > { %15834 = vst [vmem:[#allocation81_spill] sm:$0xff] %v13824_v10  ;;  %v5763_v7 = vunpack.c.l.b16 %v5203_v20  ;;  %v7157_v47 = vpop.f32.mrf.mxu2  ;;  %v4162_v14 = vpack.c.bf16 %v4072_v27, %v4072_v27  ;;  %v3213_v20 = vrot.slane %v2890_v29, 4 }
 0x619   : > { %v7158_v53 = vadd.f32 %v7157_v47, %v13770_v41  ;;  %v2722_v41 = vmul.f32 %v13635_v1, %v13235_v62  ;;  %3876 = vst [vmem:[#allocation1 + $0x3] ss:$4 sm:$0xff] %v2890_v29  ;;  %v5239_v62 = vshrl.u32 %v4161_v32, 16 }
 0x61a   : > { %v6993_v18 = vpop.f32.mrf.mxu1  ;;  %v13837_v30 = vpack.c.b16 %v5763_v7, %v5762_v36  ;;  %7032 = vmatmul.bf16.gmra.mxu1 %v15838_v46  ;;  %v3214_v36 = vrot.slane %v2890_v29, 6  ;;  %v5252_v0 = vshrl.u32 %v4162_v14, 16  ;;  %v13858_v7 = vmax.f32 %v2808_v31, 0.0 }
 0x61b   : > { %v13834_v63 = vadd.f32 %v6993_v18, %v15835_v58  ;;  %v13851_v12 = vadd.f32 %v7326_v28, %v7158_v53  ;;  %v5242_v28 = vshll.u32 %v4161_v32, 16  ;;  %v5248_v18 = vshll.u32 %v4162_v14, 16  ;;  %v15841_v58 = vld [vmem:[#allocation38_spill] sm:$0xff]  ;;  %v3872_v53 = vld.sshfl [vmem:[#allocation1 + $0x20] sm:$0xff pattern:$0x73625140] }
 0x61c   : > { %v7328_v8 = vpop.f32.mrf.mxu3  ;;  %v2809_v35 = vadd.f32 %v13646_v5, %v2722_v41  ;;  %v5333_v3 = vrot.slane %v4162_v14, 5  ;;  %v5789_v51 = vunpack.c.l.b16 %v4162_v14  ;;  %v4073_v29 = vsel %vm13839_vm6, %v3872_v53, 0.0  ;;  %3877 = vst [vmem:[#allocation1 + $0x20] ss:$4 sm:$0xff] %v3212_v24 }
 0x61d   : > { %v7475_v45 = vpop.f32.mrf.mxu0  ;;  %3878 = vst [vmem:[#allocation1 + $0x21] ss:$4 sm:$0xff] %v3213_v20  ;;  %v5241_v41 = vrot.slane %v5239_v62, 4  ;;  %7519 = vmatmul.bf16.gmra.mxu0 %v15838_v46  ;;  %v8950_v14 = vrot.slane %v4161_v32, 9  ;;  %v15843_v20 = vld [vmem:[#allocation121_spill] sm:$0xff] }
 0x61e   : > { %v13856_v43 = vadd.f32 %v7475_v45, %v13678_v57  ;;  %v5788_v57 = vunpack.c.l.b16 %v4161_v32  ;;  %v13868_v45 = vpack.c.bf16 %v4073_v29, %v4073_v29  ;;  %3879 = vst [vmem:[#allocation1 + $0x22] ss:$4 sm:$0xff] %v3214_v36  ;;  %v5335_v53 = vrot.slane %v5333_v3, 4 }
 0x61f   : > { %3880 = vst [vmem:[#allocation1 + $0x23] ss:$4 sm:$0xff] %v13858_v7  ;;  %v2723_v62 = vmul.f32 %v13635_v1, %v15843_v20  ;;  %v5334_v46 = vsel %vm10773_vm14, %v8950_v14, %v5333_v3  ;;  %v3216_v3 = vrot.slane %v13858_v7, 4  ;;  %v2892_v14 = vmax.f32 %v2809_v35, 0.0 }
 0x620   : > { %15840 = vst [vmem:[#allocation90_spill] sm:$0xff] %v13856_v43  ;;  %v7159_v59 = vpop.f32.mrf.mxu2  ;;  %v5244_v43 = vrot.slane %v5242_v28, 5  ;;  %v13871_v10 = vpack.c.b16 %v5789_v51, %v5788_v57  ;;  %v15419_v36 = vrot.slane %v13868_v45, 5  ;;  %v3215_v57 = vrot.slane %v13858_v7, 2 }
 0x621   : > { %7370 = vmatmul.bf16.gmra.mxu3 %v15841_v58  ;;  %v7160_v31 = vadd.f32 %v7159_v59, %v13805_v60  ;;  %v5258_v60 = vshll.u32 %v13868_v45, 16 }
 0x622   : > { %v6995_v47 = vpop.f32.mrf.mxu1  ;;  %v5245_v24 = vor.u32 %v5244_v43, %v5241_v41  ;;  %v5337_v29 = vsel %vm10773_vm14, %v5335_v53, %v15419_v36  ;;  %v2810_v53 = vadd.f32 %v13646_v5, %v2723_v62  ;;  %v15852_v62 = vld [vmem:[#allocation42_spill] sm:$0xff] }
 0x623   : > { %v13863_v27 = vadd.f32 %v6995_v47, %v15842_v26  ;;  %v5250_v47 = vrot.slane %v5248_v18, 5  ;;  %v5254_v26 = vrot.slane %v5252_v0, 4  ;;  %v13873_v22 = vadd.f32 %v7328_v8, %v7160_v31  ;;  %v15844_v18 = vld [vmem:[#allocation110_spill] sm:$0xff] }
 0x624   : > { %v7331_v58 = vpop.f32.mrf.mxu3  ;;  %7201 = vmatmul.bf16.gmra.mxu2 %v15844_v18  ;;  %v5246_v32 = vrot.slane %v5245_v24, 4  ;;  %v13886_v43 = vrot.slane %v5258_v60, 5  ;;  %v5820_v0 = vunpack.c.l.b16 %v5334_v46  ;;  %v3217_v31 = vrot.slane %v13858_v7, 6  ;;  %v15845_v60 = vld [vmem:[#allocation104_spill] sm:$0xff] }
 0x625   : > { %v7477_v28 = vpop.f32.mrf.mxu0  ;;  %v5255_v59 = vor.u32 %v5254_v26, %v5250_v47  ;;  %v5821_v26 = vunpack.c.l.b16 %v5337_v29  ;;  %v3218_v29 = vrot.slane %v2892_v14, 2 }
 0x626   : > { %v13884_v8 = vadd.f32 %v7477_v28, %v13692_v56  ;;  %v5251_v56 = vsel %vm10749_vm11, %v5246_v32, %v5250_v47  ;;  %v15849_v47 = vld [vmem:[#allocation43_spill] sm:$0xff] }
 0x627   : > { %v5256_v51 = vrot.slane %v5255_v59, 4  ;;  %v13903_v59 = vunpack.c.l.b16 %v5251_v56  ;;  %v13909_v36 = vpack.c.b16 %v5821_v26, %v5820_v0  ;;  %v3881_v32 = vld.sshfl [vmem:[#allocation1] sm:$0xff pattern:$0x73625140]  ;;  %v3219_v56 = vrot.slane %v2892_v14, 4 }
 0x628   : > { %v7162_v24 = vpop.f32.mrf.mxu2  ;;  %3883 = vst [vmem:[#allocation1] ss:$4 sm:$0xff] %v3215_v57  ;;  %v3220_v0 = vrot.slane %v2892_v14, 6  ;;  %v13918_v26 = vmax.f32 %v2810_v53, 0.0 }
 0x629   : > { %v5261_v28 = vsel %vm10749_vm11, %v5256_v51, %v13886_v43  ;;  %15846 = vst [vmem:[#allocation24_spill] sm:$0xff] %v13903_v59  ;;  %v7163_v7 = vadd.f32 %v7162_v24, %v13834_v63  ;;  %v4074_v51 = vsel %vm13839_vm6, %v3881_v32, 0.0 }
 0x62a   : > { %v6998_v41 = vpop.f32.mrf.mxu1  ;;  %v13907_v46 = vunpack.c.l.b16 %v5261_v28  ;;  %15848 = vst [vmem:[#allocation93_spill] sm:$0xff] %v13909_v36  ;;  %7037 = vmatmul.bf16.gmra.mxu1 %v15849_v47  ;;  %v4164_v24 = vpack.c.bf16 %v4074_v51, %v4074_v51  ;;  %v5262_v28 = vshrl.u32 %v13868_v45, 16 }
 0x62b   : > { %v13898_v20 = vadd.f32 %v6998_v41, %v15845_v60  ;;  %v13912_v41 = vadd.f32 %v7331_v58, %v7163_v7  ;;  %3884 = vst [vmem:[#allocation1 + $0x1] ss:$4 sm:$0xff] %v3216_v3  ;;  %v3882_v58 = vld.sshfl [vmem:[#allocation1 + $0x20] sm:$0xff pattern:$0x73625140] }
 0x62c   : > { %15847 = vst [vmem:[#allocation84_spill] sm:$0xff] %v13907_v46  ;;  %v7333_v35 = vpop.f32.mrf.mxu3  ;;  %v15851_v7 = vld [vmem:[#allocation124_spill] sm:$0xff]  ;;  %v4075_v3 = vsel %vm13839_vm6, %v3882_v58, 0.0  ;;  %v5268_v53 = vshll.u32 %v4164_v24, 16  ;;  %v5272_v51 = vshrl.u32 %v4164_v24, 16 }
 0x62d   : > { %v7480_v63 = vpop.f32.mrf.mxu0  ;;  %3885 = vst [vmem:[#allocation1 + $0x2] ss:$4 sm:$0xff] %v3217_v31  ;;  %v2724_v57 = vmul.f32 %v13635_v1, %v15851_v7  ;;  %v5790_v31 = vunpack.c.l.b16 %v13868_v45  ;;  %v13933_v59 = vpack.c.bf16 %v4075_v3, %v4075_v3  ;;  %v5264_v7 = vrot.slane %v5262_v28, 4  ;;  %7524 = vmatmul.bf16.gmra.mxu0 %v15849_v47 }
 0x62e   : > { %v13921_v60 = vadd.f32 %v7480_v63, %v13704_v19  ;;  %3886 = vst [vmem:[#allocation1 + $0x3] ss:$4 sm:$0xff] %v2892_v14  ;;  %v15853_v19 = vld [vmem:[#allocation32_spill] sm:$0xff]  ;;  %v5791_v14 = vunpack.c.l.b16 %v4164_v24  ;;  %v5270_v46 = vrot.slane %v5268_v53, 5 }
 0x62f   : > { %3887 = vst [vmem:[#allocation1 + $0x20] ss:$4 sm:$0xff] %v3218_v29  ;;  %v2811_v28 = vadd.f32 %v13646_v5, %v2724_v57  ;;  %v3221_v57 = vrot.slane %v13918_v26, 2 }
 0x630   : > { %15850 = vst [vmem:[#allocation86_spill] sm:$0xff] %v13921_v60  ;;  %v7164_v36 = vpop.f32.mrf.mxu2  ;;  %v13937_v29 = vpack.c.b16 %v5791_v14, %v5790_v31  ;;  %v5339_v60 = vrot.slane %v4164_v24, 5  ;;  %v15855_v14 = vld [vmem:[#allocation113_spill] sm:$0xff] }
 0x631   : > { %7375 = vmatmul.bf16.gmra.mxu3 %v15852_v62  ;;  %3888 = vst [vmem:[#allocation1 + $0x21] ss:$4 sm:$0xff] %v3219_v56  ;;  %v7165_v1 = vadd.f32 %v7164_v36, %v13863_v27  ;;  %v5274_v62 = vrot.slane %v5272_v51, 4  ;;  %v5265_v27 = vor.u32 %v5264_v7, %v13886_v43  ;;  %v9354_v43 = vld [vmem:[%s15498_s2 + $0x208] sm:$0xff] }
 0x632   : > { %v7000_v32 = vpop.f32.mrf.mxu1  ;;  %3889 = vst [vmem:[#allocation1 + $0x22] ss:$4 sm:$0xff] %v3220_v0  ;;  %v15422_v0 = vrot.slane %v13933_v59, 5  ;;  %v5341_v31 = vrot.slane %v5339_v60, 4  ;;  %7770 = vmatpush.bf16.msra.mxu2 %v9354_v43  ;;  %v9346_v43 = vld [vmem:[%s15498_s2 + $0x1c8] sm:$0xff] }
 0x633   : > { %v13930_v63 = vadd.f32 %v7000_v32, %v15853_v19  ;;  %3890 = vst [vmem:[#allocation1 + $0x23] ss:$4 sm:$0xff] %v13918_v26  ;;  %v5278_v32 = vshll.u32 %v13933_v59, 16  ;;  %v15854_v19 = vrot.slane %v13868_v45, 5  ;;  %v13943_v56 = vadd.f32 %v7333_v35, %v7165_v1  ;;  %7601 = vmatpush.bf16.msra.mxu1 %v9346_v43 }
 0x634   : > { %v7336_v58 = vpop.f32.mrf.mxu3  ;;  %v5275_v36 = vor.u32 %v5274_v62, %v5270_v46  ;;  %7206 = vmatmul.bf16.gmra.mxu2 %v15855_v14  ;;  %v5266_v35 = vrot.slane %v5265_v27, 4  ;;  %v5343_v5 = vsel %vm10773_vm14, %v5341_v31, %v15422_v0  ;;  %v2894_v31 = vmax.f32 %v2811_v28, 0.0  ;;  %v15863_v0 = vld [vmem:[#allocation114_spill] sm:$0xff] }
 0x635   : > { %v5338_v3 = vrot.slane %v15854_v19, 4  ;;  %v7482_v47 = vpop.f32.mrf.mxu0  ;;  %v13948_v53 = vrot.slane %v5278_v32, 5  ;;  %v5823_v7 = vunpack.c.l.b16 %v5343_v5  ;;  %v3222_v32 = vrot.slane %v13918_v26, 4 }
 0x636   : > { %v13954_v45 = vadd.f32 %v7482_v47, %v13717_v2  ;;  %v5276_v62 = vrot.slane %v5275_v36, 4  ;;  %v5271_v2 = vsel %vm10749_vm11, %v5266_v35, %v5270_v46 }
 0x637   : > { %v5340_v51 = vsel %vm10773_vm14, %v5338_v3, %v5339_v60  ;;  %v15857_v3 = vld [vmem:[#allocation106_spill] sm:$0xff]  ;;  %v13973_v36 = vunpack.c.l.b16 %v5271_v2 }
 0x638   : > { %15856 = vst [vmem:[#allocation28_spill] sm:$0xff] %v13954_v45  ;;  %v5822_v24 = vunpack.c.l.b16 %v5340_v51  ;;  %v5281_v1 = vsel %vm10749_vm11, %v5276_v62, %v13948_v53  ;;  %v7167_v19 = vpop.f32.mrf.mxu2  ;;  %v3223_v51 = vrot.slane %v13918_v26, 6  ;;  %v15861_v62 = vld [vmem:[#allocation46_spill] sm:$0xff] }
 0x639   : > { %15858 = vst [vmem:[#allocation89_spill] sm:$0xff] %v13973_v36  ;;  %v13975_v47 = vunpack.c.l.b16 %v5281_v1  ;;  %v7168_v46 = vadd.f32 %v7167_v19, %v13898_v20  ;;  %v3224_v1 = vrot.slane %v2894_v31, 2  ;;  %v5282_v19 = vshrl.u32 %v13933_v59, 16 }
 0x63a   : > { %v7003_v60 = vpop.f32.mrf.mxu1  ;;  %v13982_v35 = vpack.c.b16 %v5823_v7, %v5822_v24  ;;  %7042 = vmatmul.bf16.gmra.mxu1 %v15861_v62  ;;  %v3892_v7 = vld.sshfl [vmem:[#allocation1 + $0x20] sm:$0xff pattern:$0x73625140] }
 0x63b   : > { %v13971_v27 = vadd.f32 %v7003_v60, %v15857_v3  ;;  %15859 = vst [vmem:[#allocation91_spill] sm:$0xff] %v13975_v47  ;;  %v3891_v60 = vld.sshfl [vmem:[#allocation1] sm:$0xff pattern:$0x73625140]  ;;  %v13987_v3 = vadd.f32 %v7336_v58, %v7168_v46  ;;  %v4077_v58 = vsel %vm13839_vm6, %v3892_v7, 0.0 }
 0x63c   : > { %15860 = vst [vmem:[#allocation92_spill] sm:$0xff] %v13982_v35  ;;  %v7338_v5 = vpop.f32.mrf.mxu3  ;;  %v4076_v20 = vsel %vm13839_vm6, %v3891_v60, 0.0  ;;  %v15864_v60 = vld [vmem:[#allocation108_spill] sm:$0xff] }
 0x63d   : > { %3893 = vst [vmem:[#allocation1] ss:$4 sm:$0xff] %v3221_v57  ;;  %v7485_v26 = vpop.f32.mrf.mxu0  ;;  %v4166_v28 = vpack.c.bf16 %v4076_v20, %v4076_v20  ;;  %7529 = vmatmul.bf16.gmra.mxu0 %v15861_v62 }
 0x63e   : > { %3894 = vst [vmem:[#allocation1 + $0x1] ss:$4 sm:$0xff] %v3222_v32  ;;  %v13992_v24 = vadd.f32 %v7485_v26, %v13734_v50  ;;  %v5792_v50 = vunpack.c.l.b16 %v13933_v59  ;;  %v5284_v26 = vrot.slane %v5282_v19, 4 }
 0x63f   : > { %3895 = vst [vmem:[#allocation1 + $0x2] ss:$4 sm:$0xff] %v3223_v51  ;;  %v5288_v46 = vshll.u32 %v4166_v28, 16  ;;  %v5292_v57 = vshrl.u32 %v4166_v28, 16  ;;  %v5793_v51 = vunpack.c.l.b16 %v4166_v28 }
 0x640   : > { %15862 = vst [vmem:[#allocation34_spill] sm:$0xff] %v13992_v24  ;;  %v7169_v43 = vpop.f32.mrf.mxu2 }
 0x641   : > { %3896 = vst [vmem:[#allocation1 + $0x3] ss:$4 sm:$0xff] %v2894_v31  ;;  %7380 = vmatmul.bf16.gmra.mxu3 %v15863_v0  ;;  %v14002_v31 = vpack.c.bf16 %v4077_v58, %v4077_v58  ;;  %v7170_v20 = vadd.f32 %v7169_v43, %v13930_v63  ;;  %v5290_v35 = vrot.slane %v5288_v46, 5  ;;  %v5294_v36 = vrot.slane %v5292_v57, 4  ;;  %v15866_v43 = vld [vmem:[#allocation116_spill] sm:$0xff] }
 0x642   : > { %v7005_v2 = vpop.f32.mrf.mxu1  ;;  %3897 = vst [vmem:[#allocation1 + $0x20] ss:$4 sm:$0xff] %v3224_v1  ;;  %v14006_v1 = vpack.c.b16 %v5793_v51, %v5792_v50  ;;  %v5345_v0 = vrot.slane %v4166_v28, 5  ;;  %v5285_v58 = vor.u32 %v5284_v26, %v13948_v53 }
 0x643   : > { %v13999_v32 = vadd.f32 %v7005_v2, %v15864_v60  ;;  %v5298_v7 = vshll.u32 %v14002_v31, 16  ;;  %v15865_v2 = vrot.slane %v13933_v59, 5  ;;  %v14011_v24 = vadd.f32 %v7338_v5, %v7170_v20 }
 0x644   : > { %v7341_v47 = vpop.f32.mrf.mxu3  ;;  %v5295_v45 = vor.u32 %v5294_v36, %v5290_v35  ;;  %v5348_v63 = vrot.slane %v14002_v31, 5  ;;  %v5347_v57 = vrot.slane %v5345_v0, 4  ;;  %7211 = vmatmul.bf16.gmra.mxu2 %v15866_v43  ;;  %v5286_v59 = vrot.slane %v5285_v58, 4 }
 0x645   : > { %v5344_v60 = vrot.slane %v15865_v2, 4  ;;  %v7487_v19 = vpop.f32.mrf.mxu0  ;;  %v5300_v46 = vrot.slane %v5298_v7, 5  ;;  %v15868_v7 = vld [vmem:[#allocation109_spill] sm:$0xff] }
 0x646   : > { %v14019_v50 = vadd.f32 %v7487_v19, %v13751_v61  ;;  %v5296_v28 = vrot.slane %v5295_v45, 4  ;;  %v5349_v53 = vsel %vm10773_vm14, %v5347_v57, %v5348_v63  ;;  %v5291_v51 = vsel %vm10749_vm11, %v5286_v59, %v5290_v35  ;;  %v9364_v19 = vld [vmem:[%s15766_s8 + $0x18] sm:$0xff]  ;;  %v15872_v57 = vld [vmem:[#allocation117_spill] sm:$0xff] }
 0x647   : > { %v5346_v62 = vsel %vm10773_vm14, %v5344_v60, %v5345_v0  ;;  %v5825_v26 = vunpack.c.l.b16 %v5349_v53  ;;  %v14028_v61 = vunpack.c.l.b16 %v5291_v51  ;;  %8233 = vmatpush.bf16.msra.mxu3 %v9364_v19 }
 0x648   : > { %15867 = vst [vmem:[#allocation102_spill] sm:$0xff] %v14019_v50  ;;  %v5824_v5 = vunpack.c.l.b16 %v5346_v62  ;;  %v5301_v20 = vsel %vm10749_vm11, %v5296_v28, %v5300_v46  ;;  %v7172_v0 = vpop.f32.mrf.mxu2  ;;  %v3898_v60 = vld.sshfl [vmem:[#allocation1] sm:$0xff pattern:$0x73625140] }
 0x649   : > { %15869 = vst [vmem:[#allocation95_spill] sm:$0xff] %v14028_v61  ;;  %v14030_v58 = vunpack.c.l.b16 %v5301_v20  ;;  %v7173_v45 = vadd.f32 %v7172_v0, %v13971_v27  ;;  %v4078_v35 = vsel %vm13839_vm6, %v3898_v60, 0.0  ;;  %v3899_v51 = vld.sshfl [vmem:[#allocation1 + $0x20] sm:$0xff pattern:$0x73625140] }
 0x64a   : > { %v7008_v36 = vpop.f32.mrf.mxu1  ;;  %v14038_v62 = vpack.c.b16 %v5825_v26, %v5824_v5  ;;  %7047 = vmatmul.bf16.gmra.mxu1 %v15872_v57  ;;  %v14041_v28 = vpack.c.bf16 %v4078_v35, %v4078_v35  ;;  %v5302_v5 = vshrl.u32 %v14002_v31, 16 }
 0x64b   : > { %v7009_v2 = vadd.f32 %v7008_v36, %v15868_v7  ;;  %15870 = vst [vmem:[#allocation40_spill] sm:$0xff] %v14030_v58  ;;  %v14045_v36 = vadd.f32 %v7341_v47, %v7173_v45  ;;  %v4079_v7 = vsel %vm3472_vm9, %v3899_v51, 0.0 }
 0x64c   : > { %15871 = vst [vmem:[#allocation97_spill] sm:$0xff] %v14038_v62  ;;  %v7343_v59 = vpop.f32.mrf.mxu3  ;;  %v5308_v20 = vshll.u32 %v14041_v28, 16  ;;  %v5312_v26 = vshrl.u32 %v14041_v28, 16  ;;  %v4169_v60 = vpack.c.bf16 %v4079_v7, %v4079_v7  ;;  %v5304_v47 = vrot.slane %v5302_v5, 4  ;;  %v15875_v62 = vld [vmem:[#allocation111_spill] sm:$0xff] }
 0x64d   : > { %v7490_v27 = vpop.f32.mrf.mxu0  ;;  %v5351_v4 = vrot.slane %v14041_v28, 5  ;;  %7534 = vmatmul.bf16.gmra.mxu0 %v15872_v57 }
 0x64e   : > { %v14055_v0 = vadd.f32 %v7490_v27, %v13781_v6  ;;  %v5310_v45 = vrot.slane %v5308_v20, 5  ;;  %v5314_v19 = vrot.slane %v5312_v26, 4  ;;  %v5305_v58 = vor.u32 %v5304_v47, %v5300_v46 }
 0x64f   : > { %v5318_v14 = vshll.u32 %v4169_v60, 16  ;;  %v5350_v6 = vrot.slane %v5348_v63, 4  ;;  %v5353_v5 = vrot.slane %v5351_v4, 4  ;;  %v5354_v20 = vrot.slane %v4169_v60, 5 }
 0x650   : > { %15873 = vst [vmem:[#allocation99_spill] sm:$0xff] %v14055_v0  ;;  %v7174_v53 = vpop.f32.mrf.mxu2  ;;  %v5315_v43 = vor.u32 %v5314_v19, %v5310_v45  ;;  %v5306_v51 = vrot.slane %v5305_v58, 4 }
 0x651   : > { %7385 = vmatmul.bf16.gmra.mxu3 %v15874_v33  ;;  %v7175_v50 = vadd.f32 %v7174_v53, %v13999_v32  ;;  %v5320_v33 = vrot.slane %v5318_v14, 5  ;;  %v5352_v0 = vsel %vm10773_vm14, %v5350_v6, %v5351_v4  ;;  %v5355_v63 = vsel %vm10773_vm14, %v5353_v5, %v5354_v20  ;;  %v15876_v53 = vld [vmem:[#allocation120_spill] sm:$0xff]  ;;  %v15883_v20 = vld [vmem:[#allocation125_spill] sm:$0xff] }
 0x652   : > { %v7010_v35 = vpop.f32.mrf.mxu1  ;;  %v5316_v7 = vrot.slane %v5315_v43, 4  ;;  %v5311_v32 = vsel %vm10749_vm11, %v5306_v51, %v5310_v45  ;;  %v5826_v46 = vunpack.c.l.b16 %v5352_v0  ;;  %v15880_v45 = vld [vmem:[#allocation112_spill] sm:$0xff] }
 0x653   : > { %v7011_v61 = vadd.f32 %v7010_v35, %v15875_v62  ;;  %v14062_v26 = vadd.f32 %v7343_v59, %v7175_v50  ;;  %v14076_v14 = vunpack.c.l.b16 %v5311_v32  ;;  %v5827_v50 = vunpack.c.l.b16 %v5355_v63 }
 0x654   : > { %v7346_v27 = vpop.f32.mrf.mxu3  ;;  %7216 = vmatmul.bf16.gmra.mxu2 %v15876_v53  ;;  %v5321_v43 = vsel %vm10749_vm11, %v5316_v7, %v5320_v33 }
 0x655   : > { %v7492_v62 = vpop.f32.mrf.mxu0  ;;  %15877 = vst [vmem:[#allocation39_spill] sm:$0xff] %v14076_v14  ;;  %v14078_v57 = vunpack.c.l.b16 %v5321_v43  ;;  %v14080_v60 = vpack.c.b16 %v5827_v50, %v5826_v46  ;;  %v15885_v50 = vld [vmem:[#allocation126_spill] sm:$0xff] }
 0x656   : > { %v14072_v58 = vadd.f32 %v7492_v62, %v13815_v25  ;;  %v15881_v25 = vld [vmem:[#allocation122_spill] sm:$0xff]  ;;  %v15884_v62 = vld [vmem:[#allocation45_spill] sm:$0xff] }
 0x657   : > { %15878 = vst [vmem:[#allocation26_spill] sm:$0xff] %v14078_v57 }
 0x658   : > { %15879 = vst [vmem:[#allocation101_spill] sm:$0xff] %v14080_v60  ;;  %v7177_v47 = vpop.f32.mrf.mxu2 }
 0x659   : > { %v7178_v35 = vadd.f32 %v7177_v47, %v7009_v2  ;;  %v15887_v47 = vld [vmem:[#allocation115_spill] sm:$0xff] }
 0x65a   : > { %v7013_v59 = vpop.f32.mrf.mxu1  ;;  %7052 = vmatmul.bf16.gmra.mxu1 %v15881_v25 }
 0x65b   : > { %v7014_v19 = vadd.f32 %v7013_v59, %v15880_v45  ;;  %v14086_v6 = vadd.f32 %v7346_v27, %v7178_v35 }
 0x65c   : > { %v7348_v4 = vpop.f32.mrf.mxu3 }
 0x65d   : > { %v7495_v33 = vpop.f32.mrf.mxu0  ;;  %7539 = vmatmul.bf16.gmra.mxu0 %v15881_v25 }
 0x65e   : > { %v14089_v51 = vadd.f32 %v7495_v33, %v13851_v12  ;;  %v15888_v33 = vld [vmem:[#allocation41_spill] sm:$0xff] }
 0x660   : > { %15882 = vst [vmem:[#allocation121_spill] sm:$0xff] %v14089_v51  ;;  %v7179_v7 = vpop.f32.mrf.mxu2 }
 0x661   : > { %7390 = vmatmul.bf16.gmra.mxu3 %v15883_v20  ;;  %v7180_v63 = vadd.f32 %v7179_v7, %v7011_v61  ;;  %v15898_v20 = vld [vmem:[#allocation35_spill] sm:$0xff] }
 0x662   : > { %v7015_v5 = vpop.f32.mrf.mxu1 }
 0x663   : > { %v7016_v32 = vadd.f32 %v7015_v5, %v15884_v62  ;;  %v14094_v2 = vadd.f32 %v7348_v4, %v7180_v63  ;;  %v15890_v62 = vld [vmem:[#allocation129_spill] sm:$0xff] }
 0x664   : > { %v7351_v46 = vpop.f32.mrf.mxu3  ;;  %7221 = vmatmul.bf16.gmra.mxu2 %v15885_v50 }
 0x665   : > { %v7497_v43 = vpop.f32.mrf.mxu0 }
 0x666   : > { %v14098_v27 = vadd.f32 %v7497_v43, %v13873_v22  ;;  %v15891_v22 = vld [vmem:[#allocation55_spill] sm:$0xff] }
 0x668   : > { %15886 = vst [vmem:[#allocation110_spill] sm:$0xff] %v14098_v27  ;;  %v7182_v59 = vpop.f32.mrf.mxu2 }
 0x669   : > { %v7183_v35 = vadd.f32 %v7182_v59, %v7014_v19 }
 0x66a   : > { %v7018_v12 = vpop.f32.mrf.mxu1  ;;  %7057 = vmatmul.bf16.gmra.mxu1 %v15888_v33 }
 0x66b   : > { %v7019_v45 = vadd.f32 %v7018_v12, %v15887_v47  ;;  %v14102_v61 = vadd.f32 %v7351_v46, %v7183_v35  ;;  %v4062_v46 = vsel %vm3356_vm2, %v13665_v15, 0.0  ;;  %v4063_v47 = vsel %vm13753_vm1, %v13673_v44, 0.0  ;;  %v15892_v35 = vld [vmem:[#allocation130_spill] sm:$0xff]  ;;  %v9345_v44 = vld [vmem:[%s15498_s2 + $0x1c0] sm:$0xff] }
 0x66c   : > { %v7353_v5 = vpop.f32.mrf.mxu3  ;;  %7602 = vmatpush.bf16.msra.mxu1 %v9345_v44 }
 0x66d   : > { %v7500_v7 = vpop.f32.mrf.mxu0  ;;  %7544 = vmatmul.bf16.gmra.mxu0 %v15888_v33 }
 0x66e   : > { %v14105_v25 = vadd.f32 %v7500_v7, %v13912_v41  ;;  %v4152_v7 = vpack.c.bf16 %v4062_v46, %v4062_v46  ;;  %v4064_v46 = vsel %vm13753_vm1, %v13687_v48, 0.0 }
 0x670   : > { %15889 = vst [vmem:[#allocation104_spill] sm:$0xff] %v14105_v25  ;;  %v7184_v63 = vpop.f32.mrf.mxu2  ;;  %v5124_v0 = vshll.u32 %v4152_v7, 16 }
 0x671   : > { %7395 = vmatmul.bf16.gmra.mxu3 %v15890_v62  ;;  %v7185_v19 = vadd.f32 %v7184_v63, %v7016_v32  ;;  %v9353_v32 = vld [vmem:[%s15498_s2 + $0x200] sm:$0xff] }
 0x672   : > { %v7020_v4 = vpop.f32.mrf.mxu1  ;;  %7771 = vmatpush.bf16.msra.mxu2 %v9353_v32  ;;  %v5126_v57 = vrot.slane %v5124_v0, 5 }
 0x673   : > { %v7021_v43 = vadd.f32 %v7020_v4, %v15891_v22  ;;  %v14115_v59 = vadd.f32 %v7353_v5, %v7185_v19  ;;  %v4153_v4 = vpack.c.bf16 %v4063_v47, %v4063_v47  ;;  %v15894_v5 = vld [vmem:[#allocation119_spill] sm:$0xff]  ;;  %v15895_v19 = vld [vmem:[#allocation44_spill] sm:$0xff] }
 0x674   : > { %v7356_v12 = vpop.f32.mrf.mxu3  ;;  %7226 = vmatmul.bf16.gmra.mxu2 %v15892_v35 }
 0x675   : > { %v7502_v41 = vpop.f32.mrf.mxu0  ;;  %v5130_v60 = vshll.u32 %v4153_v4, 16  ;;  %v5134_v47 = vshrl.u32 %v4153_v4, 16 }
 0x676   : > { %v14122_v21 = vadd.f32 %v7502_v41, %v13943_v56  ;;  %v5121_v41 = vshrl.u32 %v4152_v7, 16 }
 0x677   : > { %v5132_v35 = vrot.slane %v5130_v60, 5  ;;  %v5136_v25 = vrot.slane %v5134_v47, 4  ;;  %v5741_v60 = vunpack.c.l.b16 %v4153_v4 }
 0x678   : > { %15893 = vst [vmem:[#allocation43_spill] sm:$0xff] %v14122_v21  ;;  %v7187_v15 = vpop.f32.mrf.mxu2  ;;  %v5123_v14 = vrot.slane %v5121_v41, 4  ;;  %v15897_v21 = vld [vmem:[#allocation133_spill] sm:$0xff] }
 0x679   : > { %v7188_v22 = vadd.f32 %v7187_v15, %v7019_v45  ;;  %v14140_v15 = vpack.c.bf16 %v4064_v46, %v4064_v46  ;;  %v5137_v46 = vor.u32 %v5136_v25, %v5132_v35 }
 0x67a   : > { %v7023_v33 = vpop.f32.mrf.mxu1  ;;  %7062 = vmatmul.bf16.gmra.mxu1 %v15895_v19 }
 0x67b   : > { %v7024_v63 = vadd.f32 %v7023_v33, %v15894_v5  ;;  %v14135_v32 = vadd.f32 %v7356_v12, %v7188_v22  ;;  %v5215_v5 = vrot.slane %v4153_v4, 5  ;;  %v8949_v22 = vrot.slane %v4152_v7, 9 }
 0x67c   : > { %v7358_v56 = vpop.f32.mrf.mxu3  ;;  %v5140_v0 = vshll.u32 %v14140_v15, 16 }
 0x67d   : > { %v7505_v33 = vpop.f32.mrf.mxu0  ;;  %v5217_v50 = vrot.slane %v5215_v5, 4  ;;  %7549 = vmatmul.bf16.gmra.mxu0 %v15895_v19 }
 0x67e   : > { %v14138_v45 = vadd.f32 %v7505_v33, %v13987_v3  ;;  %v5218_v3 = vrot.slane %v14140_v15, 5  ;;  %v5127_v33 = vor.u32 %v5126_v57, %v5123_v14  ;;  %v5216_v14 = vsel %vm10773_vm14, %v8949_v22, %v5215_v5 }
 0x67f   : > { %v5142_v4 = vrot.slane %v5140_v0, 5 }
 0x680   : > { %15896 = vst [vmem:[#allocation124_spill] sm:$0xff] %v14138_v45  ;;  %v7189_v48 = vpop.f32.mrf.mxu2  ;;  %v15899_v45 = vld [vmem:[#allocation134_spill] sm:$0xff]  ;;  %v5219_v57 = vsel %vm10773_vm14, %v5217_v50, %v5218_v3  ;;  %v5128_v25 = vrot.slane %v5127_v33, 4 }
 0x681   : > { %7400 = vmatmul.bf16.gmra.mxu3 %v15897_v21  ;;  %v7190_v44 = vadd.f32 %v7189_v48, %v7021_v43  ;;  %v5740_v21 = vunpack.c.l.b16 %v4152_v7  ;;  %v5138_v7 = vrot.slane %v5137_v46, 4 }
 0x682   : > { %v7025_v62 = vpop.f32.mrf.mxu1  ;;  %v5133_v50 = vsel %vm10749_vm11, %v5128_v25, %v5132_v35 }
 0x683   : > { %v7026_v27 = vadd.f32 %v7025_v62, %v15898_v20  ;;  %v14147_v41 = vadd.f32 %v7358_v56, %v7190_v44  ;;  %v4065_v62 = vsel %vm13753_vm1, %v13699_v39, 0.0  ;;  %v15901_v56 = vld [vmem:[#allocation123_spill] sm:$0xff]  ;;  %v5748_v44 = vpack.c.b16 %v5741_v60, %v5740_v21  ;;  %v9363_v39 = vld [vmem:[%s15766_s8 + $0x10] sm:$0xff] }
 0x684   : > { %v7361_v12 = vpop.f32.mrf.mxu3  ;;  %7231 = vmatmul.bf16.gmra.mxu2 %v15899_v45  ;;  %v5773_v45 = vunpack.c.l.b16 %v5219_v57  ;;  %v5143_v22 = vsel %vm10749_vm11, %v5138_v7, %v5142_v4  ;;  %v4066_v21 = vsel %vm13753_vm1, %v13706_v11, 0.0  ;;  %8234 = vmatpush.bf16.msra.mxu3 %v9363_v39  ;;  %v5756_v35 = vunpack.c.l.b16 %v5133_v50 }
 0x685   : > { %v7507_v47 = vpop.f32.mrf.mxu0  ;;  %v5757_v57 = vunpack.c.l.b16 %v5143_v22  ;;  %v14179_v25 = vpack.c.bf16 %v4066_v21, %v4066_v21  ;;  %v5742_v22 = vunpack.c.l.b16 %v14140_v15 }
 0x686   : > { %v14151_v20 = vadd.f32 %v7507_v47, %v14011_v24  ;;  %v4155_v24 = vpack.c.bf16 %v4065_v62, %v4065_v62 }
 0x687   : > { %v5224_v50 = vrot.slane %v14179_v25, 5 }
 0x688   : > { %15900 = vst [vmem:[#allocation32_spill] sm:$0xff] %v14151_v20  ;;  %v7192_v19 = vpop.f32.mrf.mxu2  ;;  %v5772_v20 = vunpack.c.l.b16 %v5216_v14  ;;  %v5150_v0 = vshll.u32 %v4155_v24, 16  ;;  %v5154_v60 = vshrl.u32 %v4155_v24, 16  ;;  %v5743_v21 = vunpack.c.l.b16 %v4155_v24 }
 0x689   : > { %v7193_v47 = vadd.f32 %v7192_v19, %v7024_v63  ;;  %v5144_v63 = vshrl.u32 %v14140_v15, 16 }
 0x68a   : > { %v7028_v43 = vpop.f32.mrf.mxu1  ;;  %7067 = vmatmul.bf16.gmra.mxu1 %v5748_v44  ;;  %v14174_v62 = vpack.c.b16 %v5773_v45, %v5772_v20  ;;  %v5156_v39 = vrot.slane %v5154_v60, 4  ;;  %v14183_v20 = vpack.c.b16 %v5757_v57, %v5756_v35  ;;  %v15905_v60 = vld [vmem:[#allocation128_spill] sm:$0xff] }
 0x68b   : > { %v7029_v48 = vadd.f32 %v7028_v43, %v15901_v56  ;;  %v14172_v33 = vadd.f32 %v7361_v12, %v7193_v47  ;;  %v5221_v43 = vrot.slane %v4155_v24, 5  ;;  %v5146_v11 = vrot.slane %v5144_v63, 4  ;;  %v15904_v12 = vld [vmem:[#allocation127_spill] sm:$0xff] }
 0x68c   : > { %v7363_v5 = vpop.f32.mrf.mxu3  ;;  %15902 = vst [vmem:[#allocation106_spill] sm:$0xff] %v14174_v62  ;;  %v5152_v47 = vrot.slane %v5150_v0, 5 }
 0x68d   : > { %v7510_v46 = vpop.f32.mrf.mxu0  ;;  %7554 = vmatmul.bf16.gmra.mxu0 %v5748_v44  ;;  %v5749_v44 = vpack.c.b16 %v5743_v21, %v5742_v22 }
 0x68e   : > { %v14177_v14 = vadd.f32 %v7510_v46, %v14045_v36  ;;  %v5220_v36 = vrot.slane %v5218_v3, 4  ;;  %v5223_v46 = vrot.slane %v5221_v43, 4  ;;  %v5157_v63 = vor.u32 %v5156_v39, %v5152_v47 }
 0x68f   : > { %v4067_v3 = vsel %vm13753_vm1, %v13728_v42, 0.0 }
 0x690   : > { %15903 = vst [vmem:[#allocation46_spill] sm:$0xff] %v14177_v14  ;;  %v7194_v19 = vpop.f32.mrf.mxu2  ;;  %v5147_v14 = vor.u32 %v5146_v11, %v5142_v4  ;;  %v5222_v15 = vsel %vm10773_vm14, %v5220_v36, %v5221_v43  ;;  %v5158_v57 = vrot.slane %v5157_v63, 4 }
 0x691   : > { %7405 = vmatmul.bf16.gmra.mxu3 %v14174_v62  ;;  %v7195_v51 = vadd.f32 %v7194_v19, %v7026_v27 }
 0x692   : > { %v7030_v7 = vpop.f32.mrf.mxu1  ;;  %v5148_v24 = vrot.slane %v5147_v14, 4 }
 0x693   : > { %v7031_v56 = vadd.f32 %v7030_v7, %v15904_v12  ;;  %v14187_v62 = vadd.f32 %v7363_v5, %v7195_v51  ;;  %v5160_v7 = vshll.u32 %v14179_v25, 16  ;;  %v5225_v51 = vsel %vm10773_vm14, %v5223_v46, %v5224_v50 }
 0x694   : > { %v7366_v45 = vpop.f32.mrf.mxu3  ;;  %7236 = vmatmul.bf16.gmra.mxu2 %v14183_v20  ;;  %v5774_v12 = vunpack.c.l.b16 %v5222_v15  ;;  %v5775_v39 = vunpack.c.l.b16 %v5225_v51  ;;  %v5153_v55 = vsel %vm10749_vm11, %v5148_v24, %v5152_v47  ;;  %v5164_v46 = vshrl.u32 %v14179_v25, 16  ;;  %v15907_v15 = vld [vmem:[#allocation131_spill] sm:$0xff] }
 0x695   : > { %v7512_v0 = vpop.f32.mrf.mxu0  ;;  %v5162_v11 = vrot.slane %v5160_v7, 5  ;;  %v5758_v47 = vunpack.c.l.b16 %v5153_v55 }
 0x696   : > { %v14192_v27 = vadd.f32 %v7512_v0, %v14062_v26  ;;  %v4157_v26 = vpack.c.bf16 %v4067_v3, %v4067_v3  ;;  %v14211_v63 = vpack.c.b16 %v5775_v39, %v5774_v12  ;;  %v5744_v39 = vunpack.c.l.b16 %v14179_v25  ;;  %v15909_v25 = vld [vmem:[#allocation132_spill] sm:$0xff] }
 0x697   : > { %v5163_v14 = vsel %vm10749_vm11, %v5158_v57, %v5162_v11 }
 0x698   : > { %v7197_v5 = vpop.f32.mrf.mxu2  ;;  %v5170_v22 = vshll.u32 %v4157_v26, 16  ;;  %v5174_v21 = vshrl.u32 %v4157_v26, 16  ;;  %v5227_v7 = vrot.slane %v4157_v26, 5 }
 0x699   : > { %v7198_v19 = vadd.f32 %v7197_v5, %v7029_v48 }
 0x69a   : > { %v7033_v4 = vpop.f32.mrf.mxu1  ;;  %7072 = vmatmul.bf16.gmra.mxu1 %v5749_v44  ;;  %v5172_v24 = vrot.slane %v5170_v22, 5  ;;  %v5176_v5 = vrot.slane %v5174_v21, 4  ;;  %v5229_v12 = vrot.slane %v5227_v7, 4 }
 0x69b   : > { %v7034_v35 = vadd.f32 %v7033_v4, %v15905_v60  ;;  %v14206_v43 = vadd.f32 %v7366_v45, %v7198_v19  ;;  %v5759_v45 = vunpack.c.l.b16 %v5163_v14  ;;  %v5166_v4 = vrot.slane %v5164_v46, 4 }
 0x69c   : > { %v14202_v42 = vpop.f32.mrf.mxu3  ;;  %v5226_v19 = vrot.slane %v5224_v50, 4  ;;  %v5177_v55 = vor.u32 %v5176_v5, %v5172_v24  ;;  %v15908_v50 = vrot.slane %v13765_v49, 5 }
 0x69d   : > { %15906 = vst [vmem:[#allocation108_spill] sm:$0xff] %v14202_v42  ;;  %v7515_v36 = vpop.f32.mrf.mxu0  ;;  %7559 = vmatmul.bf16.gmra.mxu0 %v5749_v44  ;;  %v5167_v42 = vor.u32 %v5166_v4, %v5162_v11 }
 0x69e   : > { %v14214_v48 = vadd.f32 %v7515_v36, %v14086_v6  ;;  %v14220_v6 = vpack.c.b16 %v5759_v45, %v5758_v47  ;;  %v5745_v36 = vunpack.c.l.b16 %v4157_v26  ;;  %v5231_v44 = vsel %vm10773_vm14, %v5229_v12, %v15908_v50 }
 0x69f   : > { %v5178_v47 = vrot.slane %v5177_v55, 4 }
 0x6a0   : > { %v7199_v3 = vpop.f32.mrf.mxu2  ;;  %v5750_v11 = vpack.c.b16 %v5745_v36, %v5744_v39  ;;  %v15910_v36 = vld [vmem:[#allocation135_spill] sm:$0xff] }
 0x6a1   : > { %7410 = vmatmul.bf16.gmra.mxu3 %v14211_v63  ;;  %v14218_v60 = vadd.f32 %v7199_v3, %v7031_v56  ;;  %v5228_v56 = vsel %vm10773_vm14, %v5226_v19, %v5227_v7  ;;  %v5183_v37 = vsel %vm10749_vm11, %v5178_v47, %v13799_v52  ;;  %v5746_v52 = vunpack.c.l.b16 %v13765_v49 }
 0x6a2   : > { %v7035_v0 = vpop.f32.mrf.mxu1  ;;  %v5776_v3 = vunpack.c.l.b16 %v5228_v56  ;;  %v5761_v39 = vunpack.c.l.b16 %v5183_v37  ;;  %v5747_v56 = vunpack.c.l.b16 %v13778_v13 }
 0x6a3   : > { %v7036_v51 = vadd.f32 %v7035_v0, %v15907_v15  ;;  %v5168_v0 = vrot.slane %v5167_v42, 4  ;;  %v5777_v15 = vunpack.c.l.b16 %v5231_v44 }
 0x6a4   : > { %v7371_v57 = vpop.f32.mrf.mxu3  ;;  %7241 = vmatmul.bf16.gmra.mxu2 %v14220_v6 }
 0x6a5   : > { %v7517_v14 = vpop.f32.mrf.mxu0  ;;  %v5173_v7 = vsel %vm10749_vm11, %v5168_v0, %v5172_v24  ;;  %v14243_v19 = vpack.c.b16 %v5777_v15, %v5776_v3  ;;  %v15912_v3 = vld [vmem:[#allocation50_spill] sm:$0xff] }
 0x6a6   : > { %v14225_v46 = vadd.f32 %v7517_v14, %v14094_v2  ;;  %v5760_v12 = vunpack.c.l.b16 %v5173_v7 }
 0x6a8   : > { %v7202_v21 = vpop.f32.mrf.mxu2  ;;  %v14252_v23 = vpack.c.b16 %v5761_v39, %v5760_v12 }
 0x6a9   : > { %v7203_v45 = vadd.f32 %v7202_v21, %v7034_v35  ;;  %v15911_v21 = vld [vmem:[#allocation47_spill] sm:$0xff] }
 0x6aa   : > { %v7038_v22 = vpop.f32.mrf.mxu1  ;;  %7077 = vmatmul.bf16.gmra.mxu1 %v5750_v11 }
 0x6ab   : > { %v7039_v26 = vadd.f32 %v7038_v22, %v15909_v25  ;;  %v14236_v4 = vadd.f32 %v7371_v57, %v7203_v45 }
 0x6ac   : > { %v14234_v2 = vpop.f32.mrf.mxu3 }
 0x6ad   : > { %v7520_v5 = vpop.f32.mrf.mxu0  ;;  %7564 = vmatmul.bf16.gmra.mxu0 %v5750_v11 }
 0x6ae   : > { %v14246_v42 = vadd.f32 %v7520_v5, %v14102_v61 }
 0x6b0   : > { %v7204_v57 = vpop.f32.mrf.mxu2 }
 0x6b1   : > { %7415 = vmatmul.bf16.gmra.mxu3 %v14243_v19  ;;  %v14250_v14 = vadd.f32 %v7204_v57, %v7036_v51  ;;  %v5751_v51 = vpack.c.b16 %v5747_v56, %v5746_v52 }
 0x6b2   : > { %v7040_v35 = vpop.f32.mrf.mxu1 }
 0x6b3   : > { %v7041_v55 = vadd.f32 %v7040_v35, %v15910_v36  ;;  %v9362_v36 = vld [vmem:[%s15766_s8 + $0x8] sm:$0xff] }
 0x6b4   : > { %v7376_v24 = vpop.f32.mrf.mxu3  ;;  %7246 = vmatmul.bf16.gmra.mxu2 %v14252_v23  ;;  %8235 = vmatpush.bf16.msra.mxu3 %v9362_v36 }
 0x6b5   : > { %v7522_v61 = vpop.f32.mrf.mxu0 }
 0x6b6   : > { %v14258_v50 = vadd.f32 %v7522_v61, %v14115_v59 }
 0x6b8   : > { %v7207_v22 = vpop.f32.mrf.mxu2 }
 0x6b9   : > { %v7208_v0 = vadd.f32 %v7207_v22, %v7039_v26  ;;  %v15915_v22 = vld [vmem:[#allocation49_spill] sm:$0xff] }
 0x6ba   : > { %v7043_v44 = vpop.f32.mrf.mxu1  ;;  %7082 = vmatmul.bf16.gmra.mxu1 %v5751_v51 }
 0x6bb   : > { %v7044_v25 = vadd.f32 %v7043_v44, %v15911_v21  ;;  %v14263_v47 = vadd.f32 %v7376_v24, %v7208_v0 }
 0x6bc   : > { %v14261_v11 = vpop.f32.mrf.mxu3 }
 0x6bd   : > { %v7525_v49 = vpop.f32.mrf.mxu0  ;;  %7569 = vmatmul.bf16.gmra.mxu0 %v5751_v51 }
 0x6be   : > { %v14266_v13 = vadd.f32 %v7525_v49, %v14135_v32  ;;  %v15913_v32 = vld [vmem:[#allocation48_spill] sm:$0xff] }
 0x6bf   : > { %v15916_v49 = vld [vmem:[#allocation60_spill] sm:$0xff] }
 0x6c0   : > { %v7209_v59 = vpop.f32.mrf.mxu2 }
 0x6c1   : > { %7420 = vmatmul.bf16.gmra.mxu3 %v13828_v17  ;;  %v14270_v7 = vadd.f32 %v7209_v59, %v7041_v55  ;;  %v15914_v55 = vld [vmem:[#allocation61_spill] sm:$0xff] }
 0x6c2   : > { %v7045_v45 = vpop.f32.mrf.mxu1 }
 0x6c3   : > { %v7046_v15 = vadd.f32 %v7045_v45, %v15912_v3 }
 0x6c4   : > { %v7381_v37 = vpop.f32.mrf.mxu3  ;;  %7251 = vmatmul.bf16.gmra.mxu2 %v13837_v30 }
 0x6c5   : > { %v7527_v26 = vpop.f32.mrf.mxu0 }
 0x6c6   : > { %v14274_v5 = vadd.f32 %v7527_v26, %v14147_v41 }
 0x6c8   : > { %v7212_v12 = vpop.f32.mrf.mxu2 }
 0x6c9   : > { %v7213_v57 = vadd.f32 %v7212_v12, %v7044_v25  ;;  %v15918_v12 = vld [vmem:[#allocation63_spill] sm:$0xff] }
 0x6ca   : > { %v7048_v35 = vpop.f32.mrf.mxu1  ;;  %7603 = vmatmul.bf16.vlgmr.msra.gmra.mxu1 %v15914_v55 }
 0x6cb   : > { %v7049_v39 = vadd.f32 %v7048_v35, %v15913_v32  ;;  %v14283_v52 = vadd.f32 %v7381_v37, %v7213_v57  ;;  %v15917_v37 = vld [vmem:[#allocation51_spill] sm:$0xff] }
 0x6cc   : > { %v14280_v24 = vpop.f32.mrf.mxu3 }
 0x6cd   : > { %v7530_v56 = vpop.f32.mrf.mxu0  ;;  %7574 = vmatmul.bf16.gmra.mxu0 %v13871_v10  ;;  %v15919_v10 = vld [vmem:[#allocation52_spill] sm:$0xff] }
 0x6ce   : > { %v14286_v41 = vadd.f32 %v7530_v56, %v14172_v33 }
 0x6d0   : > { %v7214_v44 = vpop.f32.mrf.mxu2 }
 0x6d1   : > { %v14289_v25 = vadd.f32 %v7214_v44, %v7046_v15 }
 0x6d2   : > { %v7050_v61 = vpop.f32.mrf.mxu1 }
 0x6d3   : > { %v7051_v21 = vadd.f32 %v7050_v61, %v15915_v22 }
 0x6d4   : > { %v7386_v51 = vpop.f32.mrf.mxu3  ;;  %7772 = vmatmul.bf16.vlgmr.msra.gmra.mxu2 %v15916_v49 }
 0x6d5   : > { %v7532_v0 = vpop.f32.mrf.mxu0 }
 0x6d6   : > { %v14294_v45 = vadd.f32 %v7532_v0, %v14187_v62  ;;  %v15920_v62 = vld [vmem:[#allocation62_spill] sm:$0xff] }
 0x6d8   : > { %v7217_v3 = vpop.f32.mrf.mxu2 }
 0x6d9   : > { %v7218_v26 = vadd.f32 %v7217_v3, %v7049_v39  ;;  %v15921_v39 = vld [vmem:[#allocation53_spill] sm:$0xff] }
 0x6da   : > { %v7053_v59 = vpop.f32.mrf.mxu1  ;;  %7608 = vmatmul.bf16.gmra.mxu1 %v15918_v12 }
 0x6db   : > { %v7054_v33 = vadd.f32 %v7053_v59, %v15917_v37  ;;  %v14300_v15 = vadd.f32 %v7386_v51, %v7218_v26  ;;  %v15923_v51 = vld [vmem:[#allocation65_spill] sm:$0xff] }
 0x6dc   : > { %v14297_v35 = vpop.f32.mrf.mxu3 }
 0x6dd   : > { %7579 = vmatmul.bf16.gmra.mxu0 %v13937_v29 }
 0x6e0   : > { %v7219_v57 = vpop.f32.mrf.mxu2 }
 0x6e1   : > { %v14303_v55 = vadd.f32 %v7219_v57, %v7051_v21  ;;  %v15924_v21 = vld [vmem:[#allocation54_spill] sm:$0xff] }
 0x6e2   : > { %v7055_v32 = vpop.f32.mrf.mxu1 }
 0x6e3   : > { %v7056_v36 = vadd.f32 %v7055_v32, %v15919_v10  ;;  %v15925_v32 = vld [vmem:[#allocation64_spill] sm:$0xff] }
 0x6e4   : > { %v7391_v56 = vpop.f32.mrf.mxu3  ;;  %7777 = vmatmul.bf16.gmra.mxu2 %v15920_v62 }
 0x6e8   : > { %v7222_v44 = vpop.f32.mrf.mxu2 }
 0x6e9   : > { %v7223_v0 = vadd.f32 %v7222_v44, %v7054_v33  ;;  %v15926_v33 = vld [vmem:[#allocation56_spill] sm:$0xff] }
 0x6ea   : > { %v7058_v61 = vpop.f32.mrf.mxu1  ;;  %7613 = vmatmul.bf16.gmra.mxu1 %v15923_v51 }
 0x6eb   : > { %v7059_v22 = vadd.f32 %v7058_v61, %v15921_v39  ;;  %v14311_v59 = vadd.f32 %v7391_v56, %v7223_v0  ;;  %v15927_v56 = vld [vmem:[#allocation67_spill] sm:$0xff]  ;;  %v5794_v0 = vunpack.c.l.b16 %v14002_v31 }
 0x6ec   : > { %v14308_v49 = vpop.f32.mrf.mxu3  ;;  %v9361_v31 = vld [vmem:[%s15766_s8] sm:$0xff] }
 0x6ed   : > { %15922 = vst [vmem:[#allocation109_spill] sm:$0xff] %v14308_v49  ;;  %7584 = vmatmul.bf16.gmra.mxu0 %v14006_v1  ;;  %v15928_v1 = vld [vmem:[#allocation57_spill] sm:$0xff]  ;;  %8236 = vmatpush.bf16.msra.mxu3 %v9361_v31 }
 0x6ee   : > { %v15936_v31 = vld [vmem:[#allocation17_spill] sm:$0xff] }
 0x6f0   : > { %v7224_v37 = vpop.f32.mrf.mxu2 }
 0x6f1   : > { %v14314_v12 = vadd.f32 %v7224_v37, %v7056_v36  ;;  %v5795_v36 = vunpack.c.l.b16 %v14041_v28 }
 0x6f2   : > { %v7060_v3 = vpop.f32.mrf.mxu1 }
 0x6f3   : > { %v7061_v26 = vadd.f32 %v7060_v3, %v15924_v21  ;;  %v5799_v21 = vpack.c.b16 %v5795_v36, %v5794_v0  ;;  %v15932_v36 = vld [vmem:[#allocation59_spill] sm:$0xff] }
 0x6f4   : > { %v7396_v29 = vpop.f32.mrf.mxu3  ;;  %7782 = vmatmul.bf16.gmra.mxu2 %v15925_v32 }
 0x6f8   : > { %v7227_v10 = vpop.f32.mrf.mxu2 }
 0x6f9   : > { %v7228_v61 = vadd.f32 %v7227_v10, %v7059_v22  ;;  %v15929_v22 = vld [vmem:[#allocation66_spill] sm:$0xff] }
 0x6fa   : > { %v7063_v57 = vpop.f32.mrf.mxu1  ;;  %7618 = vmatmul.bf16.gmra.mxu1 %v15927_v56 }
 0x6fb   : > { %v7064_v62 = vadd.f32 %v7063_v57, %v15926_v33  ;;  %v14322_v39 = vadd.f32 %v7396_v29, %v7228_v61  ;;  %v15930_v33 = vld [vmem:[#allocation58_spill] sm:$0xff] }
 0x6fc   : > { %v14319_v44 = vpop.f32.mrf.mxu3 }
 0x6fd   : > { %7589 = vmatmul.bf16.gmra.mxu0 %v5799_v21 }
 0x700   : > { %v7229_v3 = vpop.f32.mrf.mxu2 }
 0x701   : > { %v14327_v32 = vadd.f32 %v7229_v3, %v7061_v26 }
 0x702   : > { %v7065_v51 = vpop.f32.mrf.mxu1 }
 0x703   : > { %v7066_v37 = vadd.f32 %v7065_v51, %v15928_v1 }
 0x704   : > { %v7401_v49 = vpop.f32.mrf.mxu3  ;;  %7787 = vmatmul.bf16.gmra.mxu2 %v15929_v22  ;;  %v15933_v22 = vld [vmem:[#allocation36_spill] sm:$0xff] }
 0x708   : > { %v7232_v10 = vpop.f32.mrf.mxu2 }
 0x709   : > { %v7233_v61 = vadd.f32 %v7232_v10, %v7064_v62 }
 0x70a   : > { %v7068_v57 = vpop.f32.mrf.mxu1  ;;  %7623 = vmatmul.bf16.gmra.mxu1 %v15771_v54 }
 0x70b   : > { %v7069_v29 = vadd.f32 %v7068_v57, %v15930_v33  ;;  %v14337_v26 = vadd.f32 %v7401_v49, %v7233_v61 }
 0x70c   : > { %v14334_v28 = vpop.f32.mrf.mxu3 }
 0x70d   : > { %15931 = vst [vmem:[#allocation117_spill] sm:$0xff] %v14334_v28  ;;  %v15938_v28 = vld [vmem:[#allocation18_spill] sm:$0xff] }
 0x710   : > { %v7234_v0 = vpop.f32.mrf.mxu2 }
 0x711   : > { %v14340_v3 = vadd.f32 %v7234_v0, %v7066_v37 }
 0x712   : > { %v7070_v56 = vpop.f32.mrf.mxu1 }
 0x713   : > { %v7071_v51 = vadd.f32 %v7070_v56, %v15932_v36 }
 0x714   : > { %v7406_v1 = vpop.f32.mrf.mxu3  ;;  %7792 = vmatmul.bf16.gmra.mxu2 %v15769_v38 }
 0x718   : > { %v7237_v21 = vpop.f32.mrf.mxu2 }
 0x719   : > { %v7238_v10 = vadd.f32 %v7237_v21, %v7069_v29 }
 0x71a   : > { %v7073_v62 = vpop.f32.mrf.mxu1  ;;  %7628 = vmatmul.bf16.gmra.mxu1 %v15774_v34 }
 0x71b   : > { %v7074_v57 = vadd.f32 %v7073_v62, %v15933_v22  ;;  %v14347_v54 = vadd.f32 %v7406_v1, %v7238_v10  ;;  %v15941_v10 = vld [vmem:[#allocation136_spill] sm:$0xff] }
 0x71c   : > { %v14344_v33 = vpop.f32.mrf.mxu3 }
 0x71d   : > { %15934 = vst [vmem:[#allocation111_spill] sm:$0xff] %v14344_v33  ;;  %v15943_v33 = vld [vmem:[#allocation19_spill] sm:$0xff] }
 0x71e   : > { %15935 = vst [vmem:[#allocation120_spill] sm:$0xff] %v14347_v54  ;;  %v15964_v54 = vld [vmem:[#allocation88_spill] sm:$0xff] }
 0x720   : > { %v7239_v61 = vpop.f32.mrf.mxu2 }
 0x721   : > { %v14350_v37 = vadd.f32 %v7239_v61, %v7071_v51 }
 0x722   : > { %v7075_v49 = vpop.f32.mrf.mxu1 }
 0x723   : > { %v7076_v56 = vadd.f32 %v7075_v49, %v15936_v31  ;;  %15937 = vst [vmem:[#allocation112_spill] sm:$0xff] %v14350_v37 }
 0x724   : > { %v7411_v0 = vpop.f32.mrf.mxu3  ;;  %7797 = vmatmul.bf16.gmra.mxu2 %v15773_v40 }
 0x728   : > { %v7242_v36 = vpop.f32.mrf.mxu2 }
 0x729   : > { %v7243_v29 = vadd.f32 %v7242_v36, %v7074_v57 }
 0x72a   : > { %v7078_v38 = vpop.f32.mrf.mxu1  ;;  %7633 = vmatmul.bf16.gmra.mxu1 %v15777_v16 }
 0x72b   : > { %v7079_v62 = vadd.f32 %v7078_v38, %v15938_v28  ;;  %v14355_v21 = vadd.f32 %v7411_v0, %v7243_v29  ;;  %v15944_v38 = vld [vmem:[#allocation79_spill] sm:$0xff] }
 0x72c   : > { %v14357_v34 = vpop.f32.mrf.mxu3 }
 0x72d   : > { %15939 = vst [vmem:[#allocation122_spill] sm:$0xff] %v14355_v21 }
 0x72e   : > { %15940 = vst [vmem:[#allocation45_spill] sm:$0xff] %v14357_v34  ;;  %v15947_v34 = vld [vmem:[#allocation68_spill] sm:$0xff] }
 0x730   : > { %v7244_v22 = vpop.f32.mrf.mxu2 }
 0x731   : > { %v14360_v51 = vadd.f32 %v7244_v22, %v7076_v56  ;;  %v15949_v22 = vld [vmem:[#allocation76_spill] sm:$0xff] }
 0x732   : > { %v7080_v1 = vpop.f32.mrf.mxu1 }
 0x733   : > { %v7081_v49 = vadd.f32 %v7080_v1, %v15941_v10  ;;  %15942 = vst [vmem:[#allocation115_spill] sm:$0xff] %v14360_v51 }
 0x734   : > { %7802 = vmatmul.bf16.gmra.mxu2 %v15776_v9  ;;  %v7416_v40 = vpop.f32.mrf.mxu3 }
 0x738   : > { %v7247_v31 = vpop.f32.mrf.mxu2 }
 0x739   : > { %v7248_v57 = vadd.f32 %v7247_v31, %v7079_v62 }
 0x73a   : > { %v7083_v61 = vpop.f32.mrf.mxu1  ;;  %7638 = vmatmul.bf16.gmra.mxu1 %v15944_v38 }
 0x73b   : > { %v7084_v28 = vadd.f32 %v7083_v61, %v15943_v33  ;;  %v14365_v16 = vadd.f32 %v7416_v40, %v7248_v57  ;;  %v15950_v33 = vld [vmem:[#allocation82_spill] sm:$0xff]  ;;  %v15953_v57 = vld [vmem:[#allocation80_spill] sm:$0xff] }
 0x73c   : > { %v14367_v36 = vpop.f32.mrf.mxu3 }
 0x73d   : > { %15945 = vst [vmem:[#allocation41_spill] sm:$0xff] %v14365_v16 }
 0x73e   : > { %15946 = vst [vmem:[#allocation55_spill] sm:$0xff] %v14367_v36 }
 0x740   : > { %v7249_v29 = vpop.f32.mrf.mxu2 }
 0x741   : > { %v14370_v56 = vadd.f32 %v7249_v29, %v7081_v49  ;;  %v15954_v49 = vld [vmem:[#allocation69_spill] sm:$0xff]  ;;  %v15955_v29 = vld [vmem:[#allocation87_spill] sm:$0xff] }
 0x742   : > { %v7085_v0 = vpop.f32.mrf.mxu1 }
 0x743   : > { %v7086_v1 = vadd.f32 %v7085_v0, %v15947_v34  ;;  %15948 = vst [vmem:[#allocation119_spill] sm:$0xff] %v14370_v56  ;;  %v15962_v56 = vld [vmem:[#allocation27_spill] sm:$0xff] }
 0x744   : > { %7807 = vmatmul.bf16.gmra.mxu2 %v15949_v22  ;;  %v7421_v21 = vpop.f32.mrf.mxu3 }
 0x748   : > { %v7252_v10 = vpop.f32.mrf.mxu2 }
 0x749   : > { %v7253_v51 = vadd.f32 %v7252_v10, %v7084_v28  ;;  %v14384_v28 = vld [vmem:[%s15956_s28] ss:$0 sm:$0xff] }
 0x74a   : > { %v7604_v9 = vpop.f32.mrf.mxu1  ;;  %7643 = vmatmul.bf16.gmra.mxu1 %v15950_v33 }
 0x74b   : > { %v14374_v62 = vadd.f32 %v7421_v21, %v7253_v51  ;;  %v7605_v0 = vadd.f32 %v7604_v9, %v15954_v49  ;;  %v15958_v21 = vld [vmem:[#allocation20_spill] sm:$0xff] }
 0x74d   : > { %15951 = vst [vmem:[#allocation44_spill] sm:$0xff] %v14374_v62 }
 0x750   : > { %v7254_v61 = vpop.f32.mrf.mxu2 }
 0x751   : > { %v14376_v31 = vadd.f32 %v7254_v61, %v7086_v1  ;;  %v14391_v1 = vld [vmem:[%s15959_s11] ss:$0 sm:$0xff] }
 0x752   : > { %v7606_v40 = vpop.f32.mrf.mxu1 }
 0x753   : > { %15952 = vst [vmem:[#allocation35_spill] sm:$0xff] %v14376_v31  ;;  %v7607_v51 = vadd.f32 %v7606_v40, %v15958_v21  ;;  %v15961_v31 = vld [vmem:[#allocation70_spill] sm:$0xff] }
 0x754   : > { %7812 = vmatmul.bf16.gmra.mxu2 %v15953_v57 }
 0x758   : > { %v7773_v34 = vpop.f32.mrf.mxu2 }
 0x759   : > { %v7774_v22 = vadd.f32 %v7773_v34, %v7605_v0  ;;  %v15960_v0 = vld [vmem:[#allocation85_spill] sm:$0xff] }
 0x75a   : > { %v7609_v38 = vpop.f32.mrf.mxu1  ;;  %7648 = vmatmul.bf16.gmra.mxu1 %v15955_v29 }
 0x75b   : > { %v7937_v10 = vmul.f32 %v14384_v28, %v7774_v22  ;;  %v7610_v62 = vadd.f32 %v7609_v38, %v15961_v31 }
 0x75d   : > { %v8005_v57 = vadd.f32 %v14391_v1, %v7937_v10 }
 0x75f   : > { %v8069_v29 = vmax.f32 %v8005_v57, 0.0 }
 0x760   : > { %v7775_v61 = vpop.f32.mrf.mxu2 }
 0x761   : > { %v7776_v9 = vadd.f32 %v7775_v61, %v7607_v51  ;;  %v15963_v51 = vld [vmem:[#allocation71_spill] sm:$0xff] }
 0x762   : > { %v7611_v33 = vpop.f32.mrf.mxu1 }
 0x763   : > { %v7938_v34 = vmul.f32 %v14384_v28, %v7776_v9  ;;  %v7612_v61 = vadd.f32 %v7611_v33, %v15963_v51 }
 0x764   : > { %7817 = vmatmul.bf16.gmra.mxu2 %v15960_v0 }
 0x765   : > { %v8006_v49 = vadd.f32 %v14391_v1, %v7938_v34 }
 0x767   : > { %v8070_v40 = vmax.f32 %v8006_v49, 0.0 }
 0x768   : > { %v7778_v22 = vpop.f32.mrf.mxu2 }
 0x769   : > { %v8133_v36 = vpack.c.bf16 %v8070_v40, %v8069_v29  ;;  %v7779_v16 = vadd.f32 %v7778_v22, %v7610_v62  ;;  %v15966_v40 = vld [vmem:[#allocation30_spill] sm:$0xff] }
 0x76a   : > { %v7614_v21 = vpop.f32.mrf.mxu1  ;;  %7653 = vmatmul.bf16.gmra.mxu1 %v15962_v56 }
 0x76b   : > { %8237 = vmatmul.bf16.vlgmr.msra.gmra.mxu3 %v8133_v36  ;;  %v7939_v10 = vmul.f32 %v14384_v28, %v7779_v16  ;;  %v15965_v36 = vld [vmem:[#allocation21_spill] sm:$0xff] }
 0x76c   : > { %v7615_v29 = vadd.f32 %v7614_v21, %v15965_v36  ;;  %v15969_v36 = vld [vmem:[#allocation73_spill] sm:$0xff] }
 0x76d   : > { %v8007_v0 = vadd.f32 %v14391_v1, %v7939_v10 }
 0x76f   : > { %v8071_v31 = vmax.f32 %v8007_v0, 0.0 }
 0x770   : > { %v7780_v37 = vpop.f32.mrf.mxu2 }
 0x771   : > { %v7781_v34 = vadd.f32 %v7780_v37, %v7612_v61  ;;  %v15967_v37 = vld [vmem:[#allocation72_spill] sm:$0xff] }
 0x772   : > { %v7616_v9 = vpop.f32.mrf.mxu1 }
 0x773   : > { %v7940_v57 = vmul.f32 %v14384_v28, %v7781_v34  ;;  %v7617_v22 = vadd.f32 %v7616_v9, %v15967_v37 }
 0x774   : > { %7822 = vmatmul.bf16.gmra.mxu2 %v15964_v54 }
 0x775   : > { %v8008_v49 = vadd.f32 %v14391_v1, %v7940_v57 }
 0x777   : > { %v8072_v56 = vmax.f32 %v8008_v49, 0.0  ;;  %v15968_v49 = vld [vmem:[#allocation29_spill] sm:$0xff] }
 0x778   : > { %v7783_v62 = vpop.f32.mrf.mxu2 }
 0x779   : > { %v8134_v33 = vpack.c.bf16 %v8072_v56, %v8071_v31  ;;  %v7784_v16 = vadd.f32 %v7783_v62, %v7615_v29 }
 0x77a   : > { %v7619_v38 = vpop.f32.mrf.mxu1  ;;  %7658 = vmatmul.bf16.gmra.mxu1 %v15966_v40 }
 0x77b   : > { %8242 = vmatmul.bf16.gmra.mxu3 %v8134_v33  ;;  %v7941_v51 = vmul.f32 %v14384_v28, %v7784_v16  ;;  %v7620_v29 = vadd.f32 %v7619_v38, %v15969_v36  ;;  %v15970_v33 = vld [vmem:[#allocation33_spill] sm:$0xff]  ;;  %v15971_v16 = vld [vmem:[#allocation75_spill] sm:$0xff] }
 0x77c   : > { %v15973_v36 = vld [vmem:[#allocation23_spill] sm:$0xff] }
 0x77d   : > { %v8009_v54 = vadd.f32 %v14391_v1, %v7941_v51 }
 0x77f   : > { %v8073_v21 = vmax.f32 %v8009_v54, 0.0 }
 0x780   : > { %v7785_v10 = vpop.f32.mrf.mxu2 }
 0x781   : > { %v7786_v34 = vadd.f32 %v7785_v10, %v7617_v22 }
 0x782   : > { %v7621_v61 = vpop.f32.mrf.mxu1 }
 0x783   : > { %v7942_v0 = vmul.f32 %v14384_v28, %v7786_v34  ;;  %v7622_v37 = vadd.f32 %v7621_v61, %v15971_v16 }
 0x784   : > { %7827 = vmatmul.bf16.gmra.mxu2 %v15968_v49  ;;  %v15972_v49 = vld [vmem:[#allocation94_spill] sm:$0xff] }
 0x785   : > { %v8010_v57 = vadd.f32 %v14391_v1, %v7942_v0 }
 0x787   : > { %v8074_v56 = vmax.f32 %v8010_v57, 0.0 }
 0x788   : > { %v7788_v62 = vpop.f32.mrf.mxu2 }
 0x789   : > { %v8135_v9 = vpack.c.bf16 %v8074_v56, %v8073_v21  ;;  %v7789_v40 = vadd.f32 %v7788_v62, %v7620_v29 }
 0x78a   : > { %v7624_v31 = vpop.f32.mrf.mxu1  ;;  %7663 = vmatmul.bf16.gmra.mxu1 %v15970_v33 }
 0x78b   : > { %8247 = vmatmul.bf16.gmra.mxu3 %v8135_v9  ;;  %v7943_v22 = vmul.f32 %v14384_v28, %v7789_v40  ;;  %v7625_v29 = vadd.f32 %v7624_v31, %v15973_v36  ;;  %v15974_v9 = vld [vmem:[#allocation37_spill] sm:$0xff]  ;;  %v15975_v40 = vld [vmem:[#allocation22_spill] sm:$0xff]  ;;  %v15977_v36 = vld [vmem:[#allocation83_spill] sm:$0xff] }
 0x78d   : > { %v8011_v0 = vadd.f32 %v14391_v1, %v7943_v22 }
 0x78f   : > { %v8075_v38 = vmax.f32 %v8011_v0, 0.0 }
 0x790   : > { %v7790_v10 = vpop.f32.mrf.mxu2 }
 0x791   : > { %v7791_v34 = vadd.f32 %v7790_v10, %v7622_v37 }
 0x792   : > { %v7626_v51 = vpop.f32.mrf.mxu1 }
 0x793   : > { %v7944_v54 = vmul.f32 %v14384_v28, %v7791_v34  ;;  %v7627_v16 = vadd.f32 %v7626_v51, %v15975_v40 }
 0x794   : > { %7832 = vmatmul.bf16.gmra.mxu2 %v15972_v49  ;;  %v15976_v49 = vld [vmem:[#allocation96_spill] sm:$0xff] }
 0x795   : > { %v8012_v57 = vadd.f32 %v14391_v1, %v7944_v54 }
 0x797   : > { %v8076_v56 = vmax.f32 %v8012_v57, 0.0 }
 0x798   : > { %v7793_v62 = vpop.f32.mrf.mxu2 }
 0x799   : > { %v8136_v61 = vpack.c.bf16 %v8076_v56, %v8075_v38  ;;  %v7794_v33 = vadd.f32 %v7793_v62, %v7625_v29 }
 0x79a   : > { %v7629_v21 = vpop.f32.mrf.mxu1  ;;  %7668 = vmatmul.bf16.gmra.mxu1 %v15974_v9 }
 0x79b   : > { %8252 = vmatmul.bf16.gmra.mxu3 %v8136_v61  ;;  %v7945_v37 = vmul.f32 %v14384_v28, %v7794_v33  ;;  %v7630_v29 = vadd.f32 %v7629_v21, %v15977_v36  ;;  %v15978_v61 = vld [vmem:[#allocation100_spill] sm:$0xff]  ;;  %v15979_v33 = vld [vmem:[#allocation74_spill] sm:$0xff]  ;;  %v15981_v36 = vld [vmem:[#allocation77_spill] sm:$0xff] }
 0x79d   : > { %v8013_v54 = vadd.f32 %v14391_v1, %v7945_v37 }
 0x79f   : > { %v8077_v31 = vmax.f32 %v8013_v54, 0.0 }
 0x7a0   : > { %v7795_v10 = vpop.f32.mrf.mxu2 }
 0x7a1   : > { %v7796_v34 = vadd.f32 %v7795_v10, %v7627_v16 }
 0x7a2   : > { %v7631_v22 = vpop.f32.mrf.mxu1 }
 0x7a3   : > { %v7946_v0 = vmul.f32 %v14384_v28, %v7796_v34  ;;  %v7632_v40 = vadd.f32 %v7631_v22, %v15979_v33 }
 0x7a4   : > { %7837 = vmatmul.bf16.gmra.mxu2 %v15976_v49  ;;  %v15980_v49 = vld [vmem:[#allocation98_spill] sm:$0xff] }
 0x7a5   : > { %v8014_v57 = vadd.f32 %v14391_v1, %v7946_v0 }
 0x7a7   : > { %v8078_v56 = vmax.f32 %v8014_v57, 0.0 }
 0x7a8   : > { %v7798_v62 = vpop.f32.mrf.mxu2 }
 0x7a9   : > { %v8137_v51 = vpack.c.bf16 %v8078_v56, %v8077_v31  ;;  %v7799_v9 = vadd.f32 %v7798_v62, %v7630_v29 }
 0x7aa   : > { %v7634_v38 = vpop.f32.mrf.mxu1  ;;  %7673 = vmatmul.bf16.gmra.mxu1 %v15978_v61 }
 0x7ab   : > { %8257 = vmatmul.bf16.gmra.mxu3 %v8137_v51  ;;  %v7947_v16 = vmul.f32 %v14384_v28, %v7799_v9  ;;  %v7635_v29 = vadd.f32 %v7634_v38, %v15981_v36  ;;  %v15982_v51 = vld [vmem:[#allocation105_spill] sm:$0xff]  ;;  %v15985_v36 = vld [vmem:[#allocation78_spill] sm:$0xff] }
 0x7ac   : > { %v15983_v9 = vld [vmem:[#allocation25_spill] sm:$0xff] }
 0x7ad   : > { %v8015_v0 = vadd.f32 %v14391_v1, %v7947_v16 }
 0x7af   : > { %v8079_v21 = vmax.f32 %v8015_v0, 0.0 }
 0x7b0   : > { %v7800_v10 = vpop.f32.mrf.mxu2 }
 0x7b1   : > { %v7801_v34 = vadd.f32 %v7800_v10, %v7632_v40 }
 0x7b2   : > { %v7636_v37 = vpop.f32.mrf.mxu1 }
 0x7b3   : > { %v7948_v54 = vmul.f32 %v14384_v28, %v7801_v34  ;;  %v7637_v33 = vadd.f32 %v7636_v37, %v15983_v9 }
 0x7b4   : > { %7842 = vmatmul.bf16.gmra.mxu2 %v15980_v49  ;;  %v15984_v49 = vld [vmem:[#allocation103_spill] sm:$0xff] }
 0x7b5   : > { %v8016_v57 = vadd.f32 %v14391_v1, %v7948_v54 }
 0x7b7   : > { %v8080_v56 = vmax.f32 %v8016_v57, 0.0 }
 0x7b8   : > { %v7803_v62 = vpop.f32.mrf.mxu2 }
 0x7b9   : > { %v8138_v22 = vpack.c.bf16 %v8080_v56, %v8079_v21  ;;  %v7804_v61 = vadd.f32 %v7803_v62, %v7635_v29 }
 0x7ba   : > { %v7639_v31 = vpop.f32.mrf.mxu1  ;;  %7678 = vmatmul.bf16.gmra.mxu1 %v15982_v51 }
 0x7bb   : > { %8262 = vmatmul.bf16.gmra.mxu3 %v8138_v22  ;;  %v7949_v40 = vmul.f32 %v14384_v28, %v7804_v61  ;;  %v7640_v29 = vadd.f32 %v7639_v31, %v15985_v36  ;;  %v15986_v22 = vld [vmem:[#allocation107_spill] sm:$0xff]  ;;  %v15987_v61 = vld [vmem:[#allocation81_spill] sm:$0xff]  ;;  %v15989_v36 = vld [vmem:[#allocation90_spill] sm:$0xff] }
 0x7bd   : > { %v8017_v54 = vadd.f32 %v14391_v1, %v7949_v40 }
 0x7bf   : > { %v8081_v38 = vmax.f32 %v8017_v54, 0.0 }
 0x7c0   : > { %v7805_v10 = vpop.f32.mrf.mxu2 }
 0x7c1   : > { %v7806_v34 = vadd.f32 %v7805_v10, %v7637_v33 }
 0x7c2   : > { %v7641_v16 = vpop.f32.mrf.mxu1 }
 0x7c3   : > { %v7950_v0 = vmul.f32 %v14384_v28, %v7806_v34  ;;  %v7642_v9 = vadd.f32 %v7641_v16, %v15987_v61 }
 0x7c4   : > { %7847 = vmatmul.bf16.gmra.mxu2 %v15984_v49  ;;  %v15988_v49 = vld [vmem:[#allocation31_spill] sm:$0xff] }
 0x7c5   : > { %v8018_v57 = vadd.f32 %v14391_v1, %v7950_v0 }
 0x7c7   : > { %v8082_v56 = vmax.f32 %v8018_v57, 0.0 }
 0x7c8   : > { %v7808_v62 = vpop.f32.mrf.mxu2 }
 0x7c9   : > { %v8139_v37 = vpack.c.bf16 %v8082_v56, %v8081_v38  ;;  %v7809_v51 = vadd.f32 %v7808_v62, %v7640_v29 }
 0x7ca   : > { %v7644_v21 = vpop.f32.mrf.mxu1  ;;  %7683 = vmatmul.bf16.gmra.mxu1 %v15986_v22 }
 0x7cb   : > { %8267 = vmatmul.bf16.gmra.mxu3 %v8139_v37  ;;  %v7951_v33 = vmul.f32 %v14384_v28, %v7809_v51  ;;  %v7645_v29 = vadd.f32 %v7644_v21, %v15989_v36  ;;  %v14461_v21 = vpop.f32.mrf.mxu3 }
 0x7cd   : > { %v8019_v0 = vadd.f32 %v14391_v1, %v7951_v33 }
 0x7cf   : > { %v8083_v31 = vmax.f32 %v8019_v0, 0.0 }
 0x7d0   : > { %v7810_v10 = vpop.f32.mrf.mxu2 }
 0x7d1   : > { %v7811_v34 = vadd.f32 %v7810_v10, %v7642_v9 }
 0x7d2   : > { %v7646_v40 = vpop.f32.mrf.mxu1 }
 0x7d3   : > { %v7952_v54 = vmul.f32 %v14384_v28, %v7811_v34  ;;  %v7647_v22 = vadd.f32 %v7646_v40, %v13884_v8  ;;  %v15992_v40 = vld [vmem:[#allocation86_spill] sm:$0xff] }
 0x7d4   : > { %7852 = vmatmul.bf16.gmra.mxu2 %v15988_v49 }
 0x7d5   : > { %v8020_v57 = vadd.f32 %v14391_v1, %v7952_v54  ;;  %v15990_v54 = vld [vmem:[#allocation38_spill] sm:$0xff] }
 0x7d7   : > { %v8084_v56 = vmax.f32 %v8020_v57, 0.0 }
 0x7d8   : > { %v7813_v62 = vpop.f32.mrf.mxu2 }
 0x7d9   : > { %v8140_v16 = vpack.c.bf16 %v8084_v56, %v8083_v31  ;;  %v7814_v37 = vadd.f32 %v7813_v62, %v7645_v29  ;;  %v15993_v62 = vld [vmem:[#allocation113_spill] sm:$0xff] }
 0x7da   : > { %v7649_v38 = vpop.f32.mrf.mxu1  ;;  %7688 = vmatmul.bf16.gmra.mxu1 %v15844_v18 }
 0x7db   : > { %8272 = vmatmul.bf16.gmra.mxu3 %v8140_v16  ;;  %v7953_v51 = vmul.f32 %v14384_v28, %v7814_v37  ;;  %v7650_v31 = vadd.f32 %v7649_v38, %v15992_v40  ;;  %v15994_v16 = vld [vmem:[#allocation28_spill] sm:$0xff] }
 0x7dd   : > { %v8021_v10 = vadd.f32 %v14391_v1, %v7953_v51 }
 0x7df   : > { %v8085_v18 = vmax.f32 %v8021_v10, 0.0 }
 0x7e0   : > { %v7815_v9 = vpop.f32.mrf.mxu2 }
 0x7e1   : > { %v7816_v33 = vadd.f32 %v7815_v9, %v7647_v22 }
 0x7e2   : > { %v7651_v61 = vpop.f32.mrf.mxu1 }
 0x7e3   : > { %v7954_v34 = vmul.f32 %v14384_v28, %v7816_v33  ;;  %v7652_v37 = vadd.f32 %v7651_v61, %v15994_v16  ;;  %v14470_v33 = vld [vmem:[%s15995_s9] ss:$0 sm:$0xff] }
 0x7e4   : > { %7857 = vmatmul.bf16.gmra.mxu2 %v15990_v54  ;;  %v14479_v61 = vld [vmem:[%s15996_s27] ss:$0 sm:$0xff]  ;;  %s16060_s27 = sand.u32 1, %s9854_s18  }
 0x7e5   : > { %v8022_v0 = vadd.f32 %v14391_v1, %v7954_v34  ;;  %s15065_s30 = scalar_lea.vmem [#allocation4], %s16060_s27 }
 0x7e7   : > { %v8086_v49 = vmax.f32 %v8022_v0, 0.0 }
 0x7e8   : > { %v7818_v8 = vpop.f32.mrf.mxu2 }
 0x7e9   : > { %v8141_v56 = vpack.c.bf16 %v8086_v49, %v8085_v18  ;;  %v7819_v36 = vadd.f32 %v7818_v8, %v7650_v31  ;;  %v15998_v18 = vld [vmem:[#allocation42_spill] sm:$0xff] }
 0x7ea   : > { %v7654_v57 = vpop.f32.mrf.mxu1  ;;  %7693 = vmatmul.bf16.gmra.mxu1 %v15993_v62 }
 0x7eb   : > { %8277 = vmatmul.bf16.gmra.mxu3 %v8141_v56  ;;  %v7955_v22 = vmul.f32 %v14384_v28, %v7819_v36  ;;  %v15999_v36 = vld [vmem:[#allocation34_spill] sm:$0xff] }
 0x7ed   : > { %v8023_v38 = vadd.f32 %v14391_v1, %v7955_v22 }
 0x7ee   : > { %v8238_v29 = vpop.f32.mrf.mxu3 }
 0x7ef   : > { %v8402_v0 = vmul.f32 %v14470_v33, %v8238_v29  ;;  %v8087_v8 = vmax.f32 %v8023_v38, 0.0  ;;  %v7655_v29 = vadd.f32 %v7654_v57, %v15999_v36  ;;  %v16002_v57 = vld [vmem:[#allocation102_spill] sm:$0xff] }
 0x7f0   : > { %v7820_v9 = vpop.f32.mrf.mxu2 }
 0x7f1   : > { %v7821_v10 = vadd.f32 %v7820_v9, %v7652_v37  ;;  %v14488_v16 = vadd.f32 %v14479_v61, %v8402_v0  ;;  %v16001_v9 = vld [vmem:[#allocation116_spill] sm:$0xff] }
 0x7f2   : > { %v7656_v51 = vpop.f32.mrf.mxu1 }
 0x7f3   : > { %v7956_v34 = vmul.f32 %v14384_v28, %v7821_v10 }
 0x7f4   : > { %7862 = vmatmul.bf16.gmra.mxu2 %v15998_v18 }
 0x7f5   : > { %v8024_v54 = vadd.f32 %v14391_v1, %v7956_v34 }
 0x7f6   : > { %v8240_v49 = vpop.f32.mrf.mxu3 }
 0x7f7   : > { %v8403_v40 = vmul.f32 %v14470_v33, %v8240_v49  ;;  %v8088_v56 = vmax.f32 %v8024_v54, 0.0  ;;  %v7657_v54 = vadd.f32 %v7656_v51, %v16002_v57 }
 0x7f8   : > { %v7823_v62 = vpop.f32.mrf.mxu2 }
 0x7f9   : > { %v14491_v37 = vadd.f32 %v14479_v61, %v8403_v40  ;;  %v8142_v22 = vpack.c.bf16 %v8088_v56, %v8087_v8  ;;  %v7824_v38 = vadd.f32 %v7823_v62, %v7655_v29  ;;  %v16003_v29 = vld [vmem:[#allocation114_spill] sm:$0xff] }
 0x7fa   : > { %v7659_v31 = vpop.f32.mrf.mxu1  ;;  %7698 = vmatmul.bf16.gmra.mxu1 %v16001_v9 }
 0x7fb   : > { %16000 = vst [vmem:[#allocation123_spill] sm:$0xff] %v14491_v37  ;;  %v9372_v10 = vpack.c.bf16 %v14491_v37, %v14488_v16  ;;  %8282 = vmatmul.bf16.gmra.mxu3 %v8142_v22  ;;  %v7957_v0 = vmul.f32 %v14384_v28, %v7824_v38  ;;  %v16004_v37 = vld [vmem:[#allocation99_spill] sm:$0xff] }
 0x7fd   : > { %9373 = vst [vmem:[%s14496_s21] sm:$0xff] %v9372_v10   ;;  %v8025_v8 = vadd.f32 %v14391_v1, %v7957_v0 }
 0x7fe   : > { %v8243_v34 = vpop.f32.mrf.mxu3 }
 0x7ff   : > { %v8404_v36 = vmul.f32 %v14470_v33, %v8243_v34  ;;  %v8089_v9 = vmax.f32 %v8025_v8, 0.0 }
 0x800   : > { %v7825_v49 = vpop.f32.mrf.mxu2 }
 0x801   : > { %v7826_v40 = vadd.f32 %v7825_v49, %v7657_v54  ;;  %v7660_v54 = vadd.f32 %v7659_v31, %v16004_v37  ;;  %v14509_v0 = vadd.f32 %v14479_v61, %v8404_v36 }
 0x802   : > { %v7661_v18 = vpop.f32.mrf.mxu1 }
 0x803   : > { %v7958_v56 = vmul.f32 %v14384_v28, %v7826_v40 }
 0x804   : > { %7867 = vmatmul.bf16.gmra.mxu2 %v16003_v29 }
 0x805   : > { %v8026_v62 = vadd.f32 %v14391_v1, %v7958_v56 }
 0x806   : > { %v8245_v22 = vpop.f32.mrf.mxu3 }
 0x807   : > { %v8405_v51 = vmul.f32 %v14470_v33, %v8245_v22  ;;  %v8090_v38 = vmax.f32 %v8026_v62, 0.0  ;;  %v7662_v62 = vadd.f32 %v7661_v18, %v14072_v58 }
 0x808   : > { %v7828_v57 = vpop.f32.mrf.mxu2 }
 0x809   : > { %v14512_v49 = vadd.f32 %v14479_v61, %v8405_v51  ;;  %v8143_v34 = vpack.c.bf16 %v8090_v38, %v8089_v9  ;;  %v7829_v8 = vadd.f32 %v7828_v57, %v7660_v54  ;;  %v16006_v38 = vld [vmem:[#allocation118_spill] sm:$0xff] }
 0x80a   : > { %v7664_v10 = vpop.f32.mrf.mxu1  ;;  %7703 = vmatmul.bf16.gmra.mxu1 %v15876_v53 }
 0x80b   : > { %16005 = vst [vmem:[#allocation127_spill] sm:$0xff] %v14512_v49  ;;  %v9377_v40 = vpack.c.bf16 %v14512_v49, %v14509_v0  ;;  %8287 = vmatmul.bf16.gmra.mxu3 %v8143_v34  ;;  %v7959_v31 = vmul.f32 %v14384_v28, %v7829_v8  ;;  %v16007_v8 = vld [vmem:[#allocation121_spill] sm:$0xff] }
 0x80d   : > { %9529 = vst [vmem:[%s14496_s21 + $0x8] sm:$0xff] %v9377_v40   ;;  %v8027_v22 = vadd.f32 %v14391_v1, %v7959_v31 }
 0x80e   : > { %v8248_v56 = vpop.f32.mrf.mxu3 }
 0x80f   : > { %v8406_v53 = vmul.f32 %v14470_v33, %v8248_v56  ;;  %v8091_v54 = vmax.f32 %v8027_v22, 0.0 }
 0x810   : > { %v7830_v36 = vpop.f32.mrf.mxu2 }
 0x811   : > { %v7831_v29 = vadd.f32 %v7830_v36, %v7662_v62  ;;  %v7665_v62 = vadd.f32 %v7664_v10, %v16007_v8  ;;  %v14528_v31 = vadd.f32 %v14479_v61, %v8406_v53 }
 0x812   : > { %v7666_v37 = vpop.f32.mrf.mxu1 }
 0x813   : > { %v7960_v9 = vmul.f32 %v14384_v28, %v7831_v29  ;;  %16008 = vst [vmem:[#allocation128_spill] sm:$0xff] %v14528_v31  ;;  %v16010_v29 = vld [vmem:[#allocation126_spill] sm:$0xff] }
 0x814   : > { %7872 = vmatmul.bf16.gmra.mxu2 %v16006_v38 }
 0x815   : > { %v8028_v51 = vadd.f32 %v14391_v1, %v7960_v9 }
 0x816   : > { %v8250_v57 = vpop.f32.mrf.mxu3 }
 0x817   : > { %v8407_v58 = vmul.f32 %v14470_v33, %v8250_v57  ;;  %v8092_v34 = vmax.f32 %v8028_v51, 0.0  ;;  %v16011_v51 = vld [vmem:[#allocation110_spill] sm:$0xff] }
 0x818   : > { %v7833_v40 = vpop.f32.mrf.mxu2  ;;  %v7667_v57 = vadd.f32 %v7666_v37, %v16011_v51  ;;  %v16013_v51 = vld [vmem:[#allocation104_spill] sm:$0xff] }
 0x819   : > { %v14531_v36 = vadd.f32 %v14479_v61, %v8407_v58  ;;  %v8144_v56 = vpack.c.bf16 %v8092_v34, %v8091_v54  ;;  %v7834_v22 = vadd.f32 %v7833_v40, %v7665_v62 }
 0x81a   : > { %v7669_v18 = vpop.f32.mrf.mxu1  ;;  %7708 = vmatmul.bf16.gmra.mxu1 %v16010_v29 }
 0x81b   : > { %16009 = vst [vmem:[#allocation131_spill] sm:$0xff] %v14531_v36  ;;  %v9382_v9 = vpack.c.bf16 %v14531_v36, %v14528_v31  ;;  %8292 = vmatmul.bf16.gmra.mxu3 %v8144_v56  ;;  %v7961_v10 = vmul.f32 %v14384_v28, %v7834_v22  ;;  %v16012_v36 = vld [vmem:[#allocation125_spill] sm:$0xff] }
 0x81d   : > { %9530 = vst [vmem:[%s14496_s21 + $0x10] sm:$0xff] %v9382_v9   ;;  %v8029_v58 = vadd.f32 %v14391_v1, %v7961_v10 }
 0x81e   : > { %v8253_v38 = vpop.f32.mrf.mxu3 }
 0x81f   : > { %v8408_v34 = vmul.f32 %v14470_v33, %v8253_v38  ;;  %v8093_v62 = vmax.f32 %v8029_v58, 0.0 }
 0x820   : > { %v7835_v53 = vpop.f32.mrf.mxu2 }
 0x821   : > { %v7836_v49 = vadd.f32 %v7835_v53, %v7667_v57  ;;  %v7670_v57 = vadd.f32 %v7669_v18, %v16013_v51  ;;  %v14547_v10 = vadd.f32 %v14479_v61, %v8408_v34  ;;  %v16016_v53 = vld [vmem:[#allocation130_spill] sm:$0xff] }
 0x822   : > { %v7671_v8 = vpop.f32.mrf.mxu1 }
 0x823   : > { %v7962_v54 = vmul.f32 %v14384_v28, %v7836_v49  ;;  %16014 = vst [vmem:[#allocation132_spill] sm:$0xff] %v14547_v10 }
 0x824   : > { %7877 = vmatmul.bf16.gmra.mxu2 %v16012_v36 }
 0x825   : > { %v8030_v29 = vadd.f32 %v14391_v1, %v7962_v54 }
 0x826   : > { %v8255_v40 = vpop.f32.mrf.mxu3 }
 0x827   : > { %v8409_v37 = vmul.f32 %v14470_v33, %v8255_v40  ;;  %v8094_v9 = vmax.f32 %v8030_v29, 0.0  ;;  %v16017_v29 = vld [vmem:[#allocation43_spill] sm:$0xff] }
 0x828   : > { %v7838_v22 = vpop.f32.mrf.mxu2  ;;  %v7672_v40 = vadd.f32 %v7671_v8, %v16017_v29  ;;  %v16019_v29 = vld [vmem:[#allocation124_spill] sm:$0xff] }
 0x829   : > { %v14550_v49 = vadd.f32 %v14479_v61, %v8409_v37  ;;  %v8145_v38 = vpack.c.bf16 %v8094_v9, %v8093_v62  ;;  %v7839_v58 = vadd.f32 %v7838_v22, %v7670_v57 }
 0x82a   : > { %v7674_v56 = vpop.f32.mrf.mxu1  ;;  %7713 = vmatmul.bf16.gmra.mxu1 %v16016_v53 }
 0x82b   : > { %16015 = vst [vmem:[#allocation135_spill] sm:$0xff] %v14550_v49  ;;  %v9387_v36 = vpack.c.bf16 %v14550_v49, %v14547_v10  ;;  %8297 = vmatmul.bf16.gmra.mxu3 %v8145_v38  ;;  %v7963_v18 = vmul.f32 %v14384_v28, %v7839_v58  ;;  %v16018_v49 = vld [vmem:[#allocation129_spill] sm:$0xff] }
 0x82d   : > { %9531 = vst [vmem:[%s14496_s21 + $0x18] sm:$0xff] %v9387_v36   ;;  %v8031_v37 = vadd.f32 %v14391_v1, %v7963_v18 }
 0x82e   : > { %v8258_v54 = vpop.f32.mrf.mxu3 }
 0x82f   : > { %v8410_v9 = vmul.f32 %v14470_v33, %v8258_v54  ;;  %v8095_v57 = vmax.f32 %v8031_v37, 0.0 }
 0x830   : > { %v7840_v34 = vpop.f32.mrf.mxu2 }
 0x831   : > { %v7841_v31 = vadd.f32 %v7840_v34, %v7672_v40  ;;  %v7675_v40 = vadd.f32 %v7674_v56, %v16019_v29  ;;  %v14566_v18 = vadd.f32 %v14479_v61, %v8410_v9  ;;  %v16021_v34 = vld [vmem:[#allocation134_spill] sm:$0xff] }
 0x832   : > { %v7676_v51 = vpop.f32.mrf.mxu1 }
 0x833   : > { %v7964_v62 = vmul.f32 %v14384_v28, %v7841_v31 }
 0x834   : > { %7882 = vmatmul.bf16.gmra.mxu2 %v16018_v49 }
 0x835   : > { %v8032_v53 = vadd.f32 %v14391_v1, %v7964_v62 }
 0x836   : > { %v8260_v22 = vpop.f32.mrf.mxu3 }
 0x837   : > { %v8411_v8 = vmul.f32 %v14470_v33, %v8260_v22  ;;  %v8096_v36 = vmax.f32 %v8032_v53, 0.0  ;;  %v16022_v53 = vld [vmem:[#allocation32_spill] sm:$0xff] }
 0x838   : > { %v7843_v58 = vpop.f32.mrf.mxu2  ;;  %v7677_v22 = vadd.f32 %v7676_v51, %v16022_v53  ;;  %v16024_v53 = vld [vmem:[#allocation46_spill] sm:$0xff] }
 0x839   : > { %v14569_v31 = vadd.f32 %v14479_v61, %v8411_v8  ;;  %v8146_v54 = vpack.c.bf16 %v8096_v36, %v8095_v57  ;;  %v7844_v37 = vadd.f32 %v7843_v58, %v7675_v40 }
 0x83a   : > { %v7679_v38 = vpop.f32.mrf.mxu1  ;;  %7718 = vmatmul.bf16.gmra.mxu1 %v16021_v34 }
 0x83b   : > { %16020 = vst [vmem:[#allocation47_spill] sm:$0xff] %v14569_v31  ;;  %v9392_v49 = vpack.c.bf16 %v14569_v31, %v14566_v18  ;;  %8302 = vmatmul.bf16.gmra.mxu3 %v8146_v54  ;;  %v7965_v56 = vmul.f32 %v14384_v28, %v7844_v37  ;;  %v16023_v31 = vld [vmem:[#allocation133_spill] sm:$0xff] }
 0x83d   : > { %9532 = vst [vmem:[%s14496_s21 + $0x20] sm:$0xff] %v9392_v49   ;;  %v8033_v8 = vadd.f32 %v14391_v1, %v7965_v56 }
 0x83e   : > { %v8263_v62 = vpop.f32.mrf.mxu3 }
 0x83f   : > { %v8412_v36 = vmul.f32 %v14470_v33, %v8263_v62  ;;  %v8097_v40 = vmax.f32 %v8033_v8, 0.0 }
 0x840   : > { %v7845_v9 = vpop.f32.mrf.mxu2 }
 0x841   : > { %v7846_v10 = vadd.f32 %v7845_v9, %v7677_v22  ;;  %v7680_v22 = vadd.f32 %v7679_v38, %v16024_v53  ;;  %v14585_v56 = vadd.f32 %v14479_v61, %v8412_v36  ;;  %v16025_v53 = vld [vmem:[#allocation106_spill] sm:$0xff] }
 0x842   : > { %v7681_v29 = vpop.f32.mrf.mxu1 }
 0x843   : > { %v7966_v57 = vmul.f32 %v14384_v28, %v7846_v10 }
 0x844   : > { %7887 = vmatmul.bf16.gmra.mxu2 %v16023_v31 }
 0x845   : > { %v8034_v34 = vadd.f32 %v14391_v1, %v7966_v57  ;;  %v7682_v57 = vadd.f32 %v7681_v29, %v14192_v27 }
 0x846   : > { %v8265_v58 = vpop.f32.mrf.mxu3 }
 0x847   : > { %v8413_v51 = vmul.f32 %v14470_v33, %v8265_v58  ;;  %v8098_v49 = vmax.f32 %v8034_v34, 0.0 }
 0x848   : > { %v7848_v37 = vpop.f32.mrf.mxu2 }
 0x849   : > { %v14588_v10 = vadd.f32 %v14479_v61, %v8413_v51  ;;  %v8147_v62 = vpack.c.bf16 %v8098_v49, %v8097_v40  ;;  %v7849_v9 = vadd.f32 %v7848_v37, %v7680_v22 }
 0x84a   : > { %v7684_v54 = vpop.f32.mrf.mxu1  ;;  %7723 = vmatmul.bf16.gmra.mxu1 %v14183_v20 }
 0x84b   : > { %v9397_v31 = vpack.c.bf16 %v14588_v10, %v14585_v56  ;;  %8307 = vmatmul.bf16.gmra.mxu3 %v8147_v62  ;;  %v7967_v38 = vmul.f32 %v14384_v28, %v7849_v9  ;;  %v7685_v9 = vadd.f32 %v7684_v54, %v14214_v48 }
 0x84d   : > { %9533 = vst [vmem:[%s14496_s21 + $0x28] sm:$0xff] %v9397_v31   ;;  %v8035_v51 = vadd.f32 %v14391_v1, %v7967_v38 }
 0x84e   : > { %v8268_v8 = vpop.f32.mrf.mxu3 }
 0x84f   : > { %v8414_v20 = vmul.f32 %v14470_v33, %v8268_v8  ;;  %v8099_v22 = vmax.f32 %v8035_v51, 0.0 }
 0x850   : > { %v7850_v36 = vpop.f32.mrf.mxu2 }
 0x851   : > { %v7851_v58 = vadd.f32 %v7850_v36, %v7682_v57  ;;  %v14604_v57 = vadd.f32 %v14479_v61, %v8414_v20 }
 0x852   : > { %v7686_v34 = vpop.f32.mrf.mxu1 }
 0x853   : > { %v7968_v40 = vmul.f32 %v14384_v28, %v7851_v58 }
 0x854   : > { %7892 = vmatmul.bf16.gmra.mxu2 %v16025_v53 }
 0x855   : > { %v8036_v49 = vadd.f32 %v14391_v1, %v7968_v40  ;;  %v7687_v40 = vadd.f32 %v7686_v34, %v14225_v46 }
 0x856   : > { %v8270_v37 = vpop.f32.mrf.mxu3 }
 0x857   : > { %v8415_v27 = vmul.f32 %v14470_v33, %v8270_v37  ;;  %v8100_v62 = vmax.f32 %v8036_v49, 0.0 }
 0x858   : > { %v7853_v31 = vpop.f32.mrf.mxu2 }
 0x859   : > { %v14607_v38 = vadd.f32 %v14479_v61, %v8415_v27  ;;  %v8148_v8 = vpack.c.bf16 %v8100_v62, %v8099_v22  ;;  %v7854_v58 = vadd.f32 %v7853_v31, %v7685_v9  ;;  %v14617_v22 = vpop.f32.mrf.mxu0 }
 0x85a   : > { %v7689_v29 = vpop.f32.mrf.mxu1  ;;  %7728 = vmatmul.bf16.gmra.mxu1 %v14220_v6 }
 0x85b   : > { %v9402_v36 = vpack.c.bf16 %v14607_v38, %v14604_v57  ;;  %8312 = vmatmul.bf16.gmra.mxu3 %v8148_v8  ;;  %v7969_v48 = vmul.f32 %v14384_v28, %v7854_v58 }
 0x85d   : > { %9534 = vst [vmem:[%s14496_s21 + $0x30] sm:$0xff] %v9402_v36   ;;  %v8037_v53 = vadd.f32 %v14391_v1, %v7969_v48  ;;  %v7690_v36 = vadd.f32 %v7689_v29, %v14246_v42 }
 0x85e   : > { %v8273_v51 = vpop.f32.mrf.mxu3 }
 0x85f   : > { %v8416_v6 = vmul.f32 %v14470_v33, %v8273_v51  ;;  %v8101_v46 = vmax.f32 %v8037_v53, 0.0 }
 0x860   : > { %v7855_v20 = vpop.f32.mrf.mxu2 }
 0x861   : > { %v7856_v49 = vadd.f32 %v7855_v20, %v7687_v40  ;;  %v14625_v58 = vadd.f32 %v14479_v61, %v8416_v6  ;;  %v14634_v20 = vpop.f32.mrf.mxu0 }
 0x862   : > { %v7691_v54 = vpop.f32.mrf.mxu1 }
 0x863   : > { %v7970_v37 = vmul.f32 %v14384_v28, %v7856_v49  ;;  %v7692_v42 = vadd.f32 %v7691_v54, %v14258_v50 }
 0x864   : > { %7897 = vmatmul.bf16.gmra.mxu2 %v14211_v63 }
 0x865   : > { %v8038_v27 = vadd.f32 %v14391_v1, %v7970_v37 }
 0x866   : > { %v8275_v62 = vpop.f32.mrf.mxu3 }
 0x867   : > { %v8417_v34 = vmul.f32 %v14470_v33, %v8275_v62  ;;  %v8102_v9 = vmax.f32 %v8038_v27, 0.0 }
 0x868   : > { %v7858_v8 = vpop.f32.mrf.mxu2 }
 0x869   : > { %v14628_v40 = vadd.f32 %v14479_v61, %v8417_v34  ;;  %v8149_v51 = vpack.c.bf16 %v8102_v9, %v8101_v46  ;;  %v7859_v48 = vadd.f32 %v7858_v8, %v7690_v36  ;;  %v14644_v36 = vpop.f32.mrf.mxu0 }
 0x86a   : > { %v7694_v31 = vpop.f32.mrf.mxu1  ;;  %7733 = vmatmul.bf16.gmra.mxu1 %v14252_v23 }
 0x86b   : > { %v9407_v63 = vpack.c.bf16 %v14628_v40, %v14625_v58  ;;  %8317 = vmatmul.bf16.gmra.mxu3 %v8149_v51  ;;  %v7971_v29 = vmul.f32 %v14384_v28, %v7859_v48 }
 0x86d   : > { %9535 = vst [vmem:[%s14496_s21 + $0x38] sm:$0xff] %v9407_v63   ;;  %v8039_v27 = vadd.f32 %v14391_v1, %v7971_v29  ;;  %v7695_v63 = vadd.f32 %v7694_v31, %v14266_v13 }
 0x86e   : > { %v8278_v49 = vpop.f32.mrf.mxu3 }
 0x86f   : > { %v8418_v62 = vmul.f32 %v14470_v33, %v8278_v49  ;;  %v8103_v9 = vmax.f32 %v8039_v27, 0.0 }
 0x870   : > { %v7860_v37 = vpop.f32.mrf.mxu2 }
 0x871   : > { %v7861_v6 = vadd.f32 %v7860_v37, %v7692_v42  ;;  %v14648_v48 = vadd.f32 %v14479_v61, %v8418_v62  ;;  %v14659_v62 = vpop.f32.mrf.mxu0 }
 0x872   : > { %v7696_v53 = vpop.f32.mrf.mxu1 }
 0x873   : > { %v7972_v23 = vmul.f32 %v14384_v28, %v7861_v6  ;;  %v7697_v6 = vadd.f32 %v7696_v53, %v14274_v5 }
 0x874   : > { %7902 = vmatmul.bf16.gmra.mxu2 %v14243_v19 }
 0x875   : > { %v8040_v46 = vadd.f32 %v14391_v1, %v7972_v23 }
 0x876   : > { %v8280_v34 = vpop.f32.mrf.mxu3 }
 0x877   : > { %v8419_v50 = vmul.f32 %v14470_v33, %v8280_v34  ;;  %v8104_v8 = vmax.f32 %v8040_v46, 0.0 }
 0x878   : > { %v7863_v51 = vpop.f32.mrf.mxu2 }
 0x879   : > { %v14651_v49 = vadd.f32 %v14479_v61, %v8419_v50  ;;  %v8150_v42 = vpack.c.bf16 %v8104_v8, %v8103_v9  ;;  %v7864_v29 = vadd.f32 %v7863_v51, %v7695_v63 }
 0x87a   : > { %v7699_v54 = vpop.f32.mrf.mxu1  ;;  %7738 = vmatmul.bf16.gmra.mxu1 %v13837_v30 }
 0x87b   : > { %v9412_v19 = vpack.c.bf16 %v14651_v49, %v14648_v48  ;;  %8322 = vmatmul.bf16.gmra.mxu3 %v8150_v42  ;;  %v7973_v13 = vmul.f32 %v14384_v28, %v7864_v29  ;;  %v7700_v42 = vadd.f32 %v7699_v54, %v14286_v41 }
 0x87d   : > { %9536 = vst [vmem:[%s14496_s21 + $0x40] sm:$0xff] %v9412_v19   ;;  %v8041_v46 = vadd.f32 %v14391_v1, %v7973_v13  ;;  %v16027_v13 = vld [vmem:[#allocation24_spill] sm:$0xff] }
 0x87e   : > { %v8283_v37 = vpop.f32.mrf.mxu3 }
 0x87f   : > { %v8420_v34 = vmul.f32 %v14470_v33, %v8283_v37  ;;  %v8105_v5 = vmax.f32 %v8041_v46, 0.0  ;;  %v14679_v46 = vpop.f32.mrf.mxu0 }
 0x880   : > { %v7865_v27 = vpop.f32.mrf.mxu2 }
 0x881   : > { %v7866_v23 = vadd.f32 %v7865_v27, %v7697_v6  ;;  %v14669_v19 = vadd.f32 %v14479_v61, %v8420_v34  ;;  %v16026_v6 = vld [vmem:[#allocation84_spill] sm:$0xff] }
 0x882   : > { %v7701_v31 = vpop.f32.mrf.mxu1 }
 0x883   : > { %v7974_v30 = vmul.f32 %v14384_v28, %v7866_v23  ;;  %v7702_v54 = vadd.f32 %v7701_v31, %v14294_v45  ;;  %v7536_v45 = vadd.f32 %v14617_v22, %v14206_v43  ;;  %v16033_v43 = vld [vmem:[#allocation108_spill] sm:$0xff] }
 0x884   : > { %7907 = vmatmul.bf16.gmra.mxu2 %v13828_v17  ;;  %v16028_v17 = vpack.c.b16 %v16026_v6, %v16027_v13  ;;  %v7369_v22 = vadd.f32 %v16033_v43, %v14218_v60 }
 0x885   : > { %v8042_v9 = vadd.f32 %v14391_v1, %v7974_v30 }
 0x886   : > { %v8285_v50 = vpop.f32.mrf.mxu3 }
 0x887   : > { %v8421_v53 = vmul.f32 %v14470_v33, %v8285_v50  ;;  %v8106_v51 = vmax.f32 %v8042_v9, 0.0 }
 0x888   : > { %v7868_v63 = vpop.f32.mrf.mxu2 }
 0x889   : > { %v14672_v29 = vadd.f32 %v14479_v61, %v8421_v53  ;;  %v8151_v37 = vpack.c.bf16 %v8106_v51, %v8105_v5  ;;  %v7869_v23 = vadd.f32 %v7868_v63, %v7700_v42  ;;  %v16029_v42 = vld [vmem:[#allocation93_spill] sm:$0xff] }
 0x88a   : > { %v7704_v8 = vpop.f32.mrf.mxu1  ;;  %7743 = vmatmul.bf16.gmra.mxu1 %v16028_v17 }
 0x88b   : > { %v9417_v27 = vpack.c.bf16 %v14672_v29, %v14669_v19  ;;  %8327 = vmatmul.bf16.gmra.mxu3 %v8151_v37  ;;  %v7975_v30 = vmul.f32 %v14384_v28, %v7869_v23  ;;  %v14689_v37 = vpop.f32.mrf.mxu0 }
 0x88d   : > { %9537 = vst [vmem:[%s14496_s21 + $0x48] sm:$0xff] %v9417_v27   ;;  %v8043_v5 = vadd.f32 %v14391_v1, %v7975_v30 }
 0x88e   : > { %v8288_v41 = vpop.f32.mrf.mxu3 }
 0x88f   : > { %v8422_v51 = vmul.f32 %v14470_v33, %v8288_v41  ;;  %v8107_v31 = vmax.f32 %v8043_v5, 0.0 }
 0x890   : > { %v7870_v9 = vpop.f32.mrf.mxu2 }
 0x891   : > { %v7871_v50 = vadd.f32 %v7870_v9, %v7702_v54  ;;  %v7705_v54 = vadd.f32 %v7704_v8, %v7536_v45  ;;  %v14695_v41 = vadd.f32 %v14479_v61, %v8422_v51  ;;  %v7538_v8 = vadd.f32 %v14634_v20, %v7369_v22 }
 0x892   : > { %v7706_v34 = vpop.f32.mrf.mxu1 }
 0x893   : > { %v7976_v53 = vmul.f32 %v14384_v28, %v7871_v50  ;;  %v16030_v50 = vld [vmem:[#allocation91_spill] sm:$0xff] }
 0x894   : > { %7912 = vmatmul.bf16.gmra.mxu2 %v16029_v42 }
 0x895   : > { %v8044_v63 = vadd.f32 %v14391_v1, %v7976_v53  ;;  %v16031_v53 = vld [vmem:[#allocation89_spill] sm:$0xff] }
 0x896   : > { %v8290_v6 = vpop.f32.mrf.mxu3  ;;  %v16032_v42 = vpack.c.b16 %v16030_v50, %v16031_v53 }
 0x897   : > { %v8423_v13 = vmul.f32 %v14470_v33, %v8290_v6  ;;  %v8108_v27 = vmax.f32 %v8044_v63, 0.0  ;;  %v7707_v6 = vadd.f32 %v7706_v34, %v7538_v8  ;;  %v7541_v34 = vadd.f32 %v14644_v36, %v14236_v4 }
 0x898   : > { %v7873_v23 = vpop.f32.mrf.mxu2  ;;  %v7374_v36 = vadd.f32 %v14234_v2, %v14250_v14 }
 0x899   : > { %v14698_v30 = vadd.f32 %v14479_v61, %v8423_v13  ;;  %v8152_v9 = vpack.c.bf16 %v8108_v27, %v8107_v31  ;;  %v7874_v63 = vadd.f32 %v7873_v23, %v7705_v54  ;;  %v14710_v13 = vpop.f32.mrf.mxu0  ;;  %v16034_v54 = vld [vmem:[#allocation92_spill] sm:$0xff] }
 0x89a   : > { %v7709_v17 = vpop.f32.mrf.mxu1  ;;  %7748 = vmatmul.bf16.gmra.mxu1 %v16032_v42 }
 0x89b   : > { %v9422_v5 = vpack.c.bf16 %v14698_v30, %v14695_v41  ;;  %8332 = vmatmul.bf16.gmra.mxu3 %v8152_v9  ;;  %v7977_v45 = vmul.f32 %v14384_v28, %v7874_v63  ;;  %v7710_v8 = vadd.f32 %v7709_v17, %v7541_v34 }
 0x89d   : > { %9538 = vst [vmem:[%s14496_s21 + $0x50] sm:$0xff] %v9422_v5   ;;  %v8045_v53 = vadd.f32 %v14391_v1, %v7977_v45 }
 0x89e   : > { %v8293_v51 = vpop.f32.mrf.mxu3 }
 0x89f   : > { %v8424_v42 = vmul.f32 %v14470_v33, %v8293_v51  ;;  %v8109_v9 = vmax.f32 %v8045_v53, 0.0 }
 0x8a0   : > { %v7875_v27 = vpop.f32.mrf.mxu2 }
 0x8a1   : > { %v7876_v50 = vadd.f32 %v7875_v27, %v7707_v6  ;;  %v14721_v6 = vadd.f32 %v14479_v61, %v8424_v42  ;;  %v14726_v27 = vpop.f32.mrf.mxu0  ;;  %v7543_v42 = vadd.f32 %v14659_v62, %v7374_v36 }
 0x8a2   : > { %v7711_v31 = vpop.f32.mrf.mxu1 }
 0x8a3   : > { %v7978_v60 = vmul.f32 %v14384_v28, %v7876_v50  ;;  %v16035_v50 = vld [vmem:[#allocation40_spill] sm:$0xff] }
 0x8a4   : > { %7917 = vmatmul.bf16.gmra.mxu2 %v16034_v54  ;;  %v7712_v54 = vadd.f32 %v7711_v31, %v7543_v42  ;;  %v7546_v31 = vadd.f32 %v14679_v46, %v14263_v47  ;;  %v7379_v47 = vadd.f32 %v14261_v11, %v14270_v7 }
 0x8a5   : > { %v8046_v23 = vadd.f32 %v14391_v1, %v7978_v60  ;;  %v16036_v60 = vld [vmem:[#allocation95_spill] sm:$0xff] }
 0x8a6   : > { %v8295_v20 = vpop.f32.mrf.mxu3  ;;  %v16037_v4 = vpack.c.b16 %v16035_v50, %v16036_v60 }
 0x8a7   : > { %v8110_v43 = vmax.f32 %v8046_v23, 0.0  ;;  %v8425_v22 = vmul.f32 %v14470_v33, %v8295_v20 }
 0x8a8   : > { %v7878_v63 = vpop.f32.mrf.mxu2 }
 0x8a9   : > { %v14724_v51 = vadd.f32 %v14479_v61, %v8425_v22  ;;  %v8153_v45 = vpack.c.bf16 %v8110_v43, %v8109_v9  ;;  %v7879_v17 = vadd.f32 %v7878_v63, %v7710_v8  ;;  %v14740_v2 = vpop.f32.mrf.mxu0  ;;  %v16038_v8 = vld [vmem:[#allocation97_spill] sm:$0xff] }
 0x8aa   : > { %v7714_v5 = vpop.f32.mrf.mxu1  ;;  %7753 = vmatmul.bf16.gmra.mxu1 %v16037_v4 }
 0x8ab   : > { %v9427_v53 = vpack.c.bf16 %v14724_v51, %v14721_v6  ;;  %8337 = vmatmul.bf16.gmra.mxu3 %v8153_v45  ;;  %v7979_v20 = vmul.f32 %v14384_v28, %v7879_v17 }
 0x8ad   : > { %9539 = vst [vmem:[%s14496_s21 + $0x58] sm:$0xff] %v9427_v53   ;;  %v8047_v22 = vadd.f32 %v14391_v1, %v7979_v20 }
 0x8ae   : > { %v8298_v23 = vpop.f32.mrf.mxu3 }
 0x8af   : > { %v8426_v14 = vmul.f32 %v14470_v33, %v8298_v23  ;;  %v8111_v45 = vmax.f32 %v8047_v22, 0.0  ;;  %v16039_v23 = vld [vmem:[#allocation26_spill] sm:$0xff] }
 0x8b0   : > { %v7880_v9 = vpop.f32.mrf.mxu2 }
 0x8b1   : > { %v7881_v43 = vadd.f32 %v7880_v9, %v7712_v54  ;;  %v14749_v17 = vadd.f32 %v14479_v61, %v8426_v14  ;;  %v16040_v54 = vld [vmem:[#allocation39_spill] sm:$0xff] }
 0x8b2   : > { %v7716_v34 = vpop.f32.mrf.mxu1  ;;  %v16041_v20 = vpack.c.b16 %v16039_v23, %v16040_v54  ;;  %v14766_v14 = vld [vmem:[%s15957_s15] ss:$0 sm:$0xff] }
 0x8b3   : > { %v7980_v50 = vmul.f32 %v14384_v28, %v7881_v43  ;;  %v7715_v28 = vadd.f32 %v7714_v5, %v7546_v31  ;;  %v7548_v5 = vadd.f32 %v14689_v37, %v7379_v47  ;;  %v7557_v43 = vpop.f32.mrf.mxu0 }
 0x8b4   : > { %7922 = vmatmul.bf16.gmra.mxu2 %v16038_v8 }
 0x8b5   : > { %v8048_v63 = vadd.f32 %v14391_v1, %v7980_v50  ;;  %v7717_v50 = vadd.f32 %v7716_v34, %v7548_v5 }
 0x8b6   : > { %v8300_v62 = vpop.f32.mrf.mxu3 }
 0x8b7   : > { %v8112_v60 = vmax.f32 %v8048_v63, 0.0  ;;  %v8427_v4 = vmul.f32 %v14470_v33, %v8300_v62  ;;  %v14772_v62 = vld [vmem:[%s15959_s11] ss:$0 sm:$0xff] }
 0x8b8   : > { %v7883_v53 = vpop.f32.mrf.mxu2 }
 0x8b9   : > { %v14752_v42 = vadd.f32 %v14479_v61, %v8427_v4  ;;  %v8154_v1 = vpack.c.bf16 %v8112_v60, %v8111_v45  ;;  %v7884_v9 = vadd.f32 %v7883_v53, %v7715_v28  ;;  %v16042_v60 = vld [vmem:[#allocation101_spill] sm:$0xff]  ;;  %v7551_v53 = vadd.f32 %v14710_v13, %v14283_v52 }
 0x8ba   : > { %v7719_v36 = vpop.f32.mrf.mxu1  ;;  %7758 = vmatmul.bf16.gmra.mxu1 %v16041_v20 }
 0x8bb   : > { %v9432_v46 = vpack.c.bf16 %v14752_v42, %v14749_v17  ;;  %8342 = vmatmul.bf16.gmra.mxu3 %v8154_v1  ;;  %v7981_v63 = vmul.f32 %v14766_v14, %v7884_v9  ;;  %v7560_v20 = vpop.f32.mrf.mxu0 }
 0x8bd   : > { %9540 = vst [vmem:[%s14496_s21 + $0x60] sm:$0xff] %v9432_v46   ;;  %v8049_v37 = vadd.f32 %v14772_v62, %v7981_v63  ;;  %v7720_v46 = vadd.f32 %v7719_v36, %v7551_v53 }
 0x8be   : > { %v8303_v22 = vpop.f32.mrf.mxu3 }
 0x8bf   : > { %v8428_v34 = vmul.f32 %v14470_v33, %v8303_v22  ;;  %v8113_v28 = vmax.f32 %v8049_v37, 0.0 }
 0x8c0   : > { %v7885_v11 = vpop.f32.mrf.mxu2 }
 0x8c1   : > { %v7886_v7 = vadd.f32 %v7885_v11, %v7717_v50  ;;  %v14783_v9 = vadd.f32 %v14479_v61, %v8428_v34  ;;  %v7384_v50 = vadd.f32 %v14280_v24, %v14289_v25 }
 0x8c2   : > { %v7721_v8 = vpop.f32.mrf.mxu1 }
 0x8c3   : > { %v7982_v31 = vmul.f32 %v14766_v14, %v7886_v7  ;;  %v7553_v63 = vadd.f32 %v14726_v27, %v7384_v50  ;;  %v7556_v27 = vadd.f32 %v14740_v2, %v14300_v15 }
 0x8c4   : > { %7927 = vmatmul.bf16.gmra.mxu2 %v16042_v60 }
 0x8c5   : > { %v8050_v45 = vadd.f32 %v14772_v62, %v7982_v31  ;;  %v7722_v36 = vadd.f32 %v7721_v8, %v7553_v63 }
 0x8c6   : > { %v8305_v4 = vpop.f32.mrf.mxu3 }
 0x8c7   : > { %v8114_v1 = vmax.f32 %v8050_v45, 0.0  ;;  %v8429_v23 = vmul.f32 %v14470_v33, %v8305_v4  ;;  %v7562_v45 = vpop.f32.mrf.mxu0 }
 0x8c8   : > { %v7888_v47 = vpop.f32.mrf.mxu2 }
 0x8c9   : > { %v14786_v5 = vadd.f32 %v14479_v61, %v8429_v23  ;;  %v8155_v22 = vpack.c.bf16 %v8114_v1, %v8113_v28  ;;  %v7889_v13 = vadd.f32 %v7888_v47, %v7720_v46 }
 0x8ca   : > { %v7724_v54 = vpop.f32.mrf.mxu1 }
 0x8cb   : > { %v9437_v52 = vpack.c.bf16 %v14786_v5, %v14783_v9  ;;  %8347 = vmatmul.bf16.gmra.mxu3 %v8155_v22  ;;  %v7983_v7 = vmul.f32 %v14766_v14, %v7889_v13  ;;  %v7725_v46 = vadd.f32 %v7724_v54, %v7556_v27  ;;  %v7389_v13 = vadd.f32 %v14297_v35, %v14303_v55 }
 0x8cd   : > { %9541 = vst [vmem:[%s14496_s21 + $0x68] sm:$0xff] %v9437_v52   ;;  %v8051_v60 = vadd.f32 %v14772_v62, %v7983_v7 }
 0x8ce   : > { %v8308_v11 = vpop.f32.mrf.mxu3 }
 0x8cf   : > { %v8430_v25 = vmul.f32 %v14470_v33, %v8308_v11  ;;  %v8115_v8 = vmax.f32 %v8051_v60, 0.0  ;;  %v7565_v63 = vpop.f32.mrf.mxu0  ;;  %v7558_v11 = vadd.f32 %v7557_v43, %v7389_v13  ;;  %v7561_v43 = vadd.f32 %v7560_v20, %v14311_v59 }
 0x8d0   : > { %v7890_v31 = vpop.f32.mrf.mxu2 }
 0x8d1   : > { %v7891_v34 = vadd.f32 %v7890_v31, %v7722_v36  ;;  %v14803_v22 = vadd.f32 %v14479_v61, %v8430_v25 }
 0x8d2   : > { %v7726_v37 = vpop.f32.mrf.mxu1 }
 0x8d3   : > { %v7984_v24 = vmul.f32 %v14766_v14, %v7891_v34  ;;  %v7727_v54 = vadd.f32 %v7726_v37, %v7558_v11 }
 0x8d5   : > { %v8052_v4 = vadd.f32 %v14772_v62, %v7984_v24 }
 0x8d6   : > { %v8310_v53 = vpop.f32.mrf.mxu3 }
 0x8d7   : > { %v8116_v28 = vmax.f32 %v8052_v4, 0.0  ;;  %v8431_v1 = vmul.f32 %v14470_v33, %v8310_v53  ;;  %v7567_v4 = vpop.f32.mrf.mxu0 }
 0x8d8   : > { %v7893_v47 = vpop.f32.mrf.mxu2 }
 0x8d9   : > { %v14806_v50 = vadd.f32 %v14479_v61, %v8431_v1  ;;  %v8156_v52 = vpack.c.bf16 %v8116_v28, %v8115_v8  ;;  %v7894_v2 = vadd.f32 %v7893_v47, %v7725_v46 }
 0x8da   : > { %v7729_v23 = vpop.f32.mrf.mxu1 }
 0x8db   : > { %v9442_v15 = vpack.c.bf16 %v14806_v50, %v14803_v22  ;;  %8352 = vmatmul.bf16.gmra.mxu3 %v8156_v52  ;;  %v7985_v7 = vmul.f32 %v14766_v14, %v7894_v2  ;;  %v7730_v47 = vadd.f32 %v7729_v23, %v7561_v43 }
 0x8dd   : > { %9542 = vst [vmem:[%s14496_s21 + $0x70] sm:$0xff] %v9442_v15   ;;  %v8053_v24 = vadd.f32 %v14772_v62, %v7985_v7  ;;  %v16043_v15 = vld [vmem:[#allocation109_spill] sm:$0xff] }
 0x8de   : > { %v8313_v36 = vpop.f32.mrf.mxu3  ;;  %v7394_v2 = vadd.f32 %v16043_v15, %v14314_v12 }
 0x8df   : > { %v8432_v35 = vmul.f32 %v14470_v33, %v8313_v36  ;;  %v8117_v27 = vmax.f32 %v8053_v24, 0.0 }
 0x8e0   : > { %v7895_v34 = vpop.f32.mrf.mxu2  ;;  %v7563_v11 = vadd.f32 %v7562_v45, %v7394_v2  ;;  %v7566_v45 = vadd.f32 %v7565_v63, %v14322_v39 }
 0x8e1   : > { %v7896_v60 = vadd.f32 %v7895_v34, %v7727_v54  ;;  %v14821_v46 = vadd.f32 %v14479_v61, %v8432_v35  ;;  %v7570_v34 = vpop.f32.mrf.mxu0 }
 0x8e2   : > { %v7731_v31 = vpop.f32.mrf.mxu1 }
 0x8e3   : > { %v7986_v25 = vmul.f32 %v14766_v14, %v7896_v60  ;;  %v7732_v54 = vadd.f32 %v7731_v31, %v7563_v11 }
 0x8e5   : > { %v8054_v55 = vadd.f32 %v14772_v62, %v7986_v25 }
 0x8e6   : > { %v8315_v53 = vpop.f32.mrf.mxu3 }
 0x8e7   : > { %v8118_v37 = vmax.f32 %v8054_v55, 0.0  ;;  %v8433_v8 = vmul.f32 %v14470_v33, %v8315_v53 }
 0x8e8   : > { %v7898_v1 = vpop.f32.mrf.mxu2 }
 0x8e9   : > { %v14824_v52 = vadd.f32 %v14479_v61, %v8433_v8  ;;  %v8157_v13 = vpack.c.bf16 %v8118_v37, %v8117_v27  ;;  %v7899_v20 = vadd.f32 %v7898_v1, %v7730_v47  ;;  %v7572_v2 = vpop.f32.mrf.mxu0 }
 0x8ea   : > { %v7734_v28 = vpop.f32.mrf.mxu1 }
 0x8eb   : > { %v9447_v59 = vpack.c.bf16 %v14824_v52, %v14821_v46  ;;  %8357 = vmatmul.bf16.gmra.mxu3 %v8157_v13  ;;  %v7987_v23 = vmul.f32 %v14766_v14, %v7899_v20  ;;  %v7735_v1 = vadd.f32 %v7734_v28, %v7566_v45 }
 0x8ed   : > { %9543 = vst [vmem:[%s14496_s21 + $0x78] sm:$0xff] %v9447_v59   ;;  %v8055_v25 = vadd.f32 %v14772_v62, %v7987_v23  ;;  %v7399_v59 = vadd.f32 %v14319_v44, %v14327_v32 }
 0x8ee   : > { %v8318_v36 = vpop.f32.mrf.mxu3 }
 0x8ef   : > { %v8434_v12 = vmul.f32 %v14470_v33, %v8318_v36  ;;  %v8119_v43 = vmax.f32 %v8055_v25, 0.0  ;;  %v7568_v20 = vadd.f32 %v7567_v4, %v7399_v59  ;;  %v7571_v4 = vadd.f32 %v7570_v34, %v14337_v26 }
 0x8f0   : > { %v7900_v60 = vpop.f32.mrf.mxu2 }
 0x8f1   : > { %v7901_v24 = vadd.f32 %v7900_v60, %v7732_v54  ;;  %v14839_v47 = vadd.f32 %v14479_v61, %v8434_v12 }
 0x8f2   : > { %v7736_v7 = vpop.f32.mrf.mxu1 }
 0x8f3   : > { %v7988_v35 = vmul.f32 %v14766_v14, %v7901_v24  ;;  %v7737_v28 = vadd.f32 %v7736_v7, %v7568_v20 }
 0x8f5   : > { %v8056_v55 = vadd.f32 %v14772_v62, %v7988_v35  ;;  %v7575_v35 = vpop.f32.mrf.mxu0 }
 0x8f6   : > { %v8320_v53 = vpop.f32.mrf.mxu3 }
 0x8f7   : > { %v8120_v31 = vmax.f32 %v8056_v55, 0.0  ;;  %v8435_v27 = vmul.f32 %v14470_v33, %v8320_v53 }
 0x8f8   : > { %v7903_v8 = vpop.f32.mrf.mxu2 }
 0x8f9   : > { %v14842_v13 = vadd.f32 %v14479_v61, %v8435_v27  ;;  %v8158_v15 = vpack.c.bf16 %v8120_v31, %v8119_v43  ;;  %v7904_v63 = vadd.f32 %v7903_v8, %v7735_v1 }
 0x8fa   : > { %v7739_v37 = vpop.f32.mrf.mxu1 }
 0x8fb   : > { %v9452_v39 = vpack.c.bf16 %v14842_v13, %v14839_v47  ;;  %8362 = vmatmul.bf16.gmra.mxu3 %v8158_v15  ;;  %v7989_v36 = vmul.f32 %v14766_v14, %v7904_v63  ;;  %v7740_v31 = vadd.f32 %v7739_v37, %v7571_v4  ;;  %v16044_v15 = vld [vmem:[#allocation117_spill] sm:$0xff] }
 0x8fc   : > { %v7404_v59 = vadd.f32 %v16044_v15, %v14340_v3  ;;  %v16046_v15 = vld [vmem:[#allocation112_spill] sm:$0xff] }
 0x8fd   : > { %9544 = vst [vmem:[%s14496_s21 + $0x80] sm:$0xff] %v9452_v39   ;;  %v8057_v24 = vadd.f32 %v14772_v62, %v7989_v36  ;;  %v7577_v63 = vpop.f32.mrf.mxu0 }
 0x8fe   : > { %v8323_v11 = vpop.f32.mrf.mxu3  ;;  %v7573_v39 = vadd.f32 %v7572_v2, %v7404_v59  ;;  %v16047_v59 = vld [vmem:[#allocation111_spill] sm:$0xff] }
 0x8ff   : > { %v8436_v44 = vmul.f32 %v14470_v33, %v8323_v11  ;;  %v8121_v55 = vmax.f32 %v8057_v24, 0.0 }
 0x900   : > { %v7905_v23 = vpop.f32.mrf.mxu2 }
 0x901   : > { %v7906_v60 = vadd.f32 %v7905_v23, %v7737_v28  ;;  %v14857_v27 = vadd.f32 %v14479_v61, %v8436_v44  ;;  %v16045_v44 = vld [vmem:[#allocation120_spill] sm:$0xff] }
 0x902   : > { %v7741_v54 = vpop.f32.mrf.mxu1  ;;  %v7576_v2 = vadd.f32 %v7575_v35, %v16045_v44 }
 0x903   : > { %v7990_v25 = vmul.f32 %v14766_v14, %v7906_v60  ;;  %v7742_v37 = vadd.f32 %v7741_v54, %v7573_v39  ;;  %v14876_v54 = vld [vmem:[%s15995_s9] ss:$0 sm:$0xff] }
 0x905   : > { %v8058_v32 = vadd.f32 %v14772_v62, %v7990_v25 }
 0x906   : > { %v8325_v12 = vpop.f32.mrf.mxu3 }
 0x907   : > { %v8122_v7 = vmax.f32 %v8058_v32, 0.0  ;;  %v8437_v53 = vmul.f32 %v14470_v33, %v8325_v12 }
 0x908   : > { %v7908_v43 = vpop.f32.mrf.mxu2 }
 0x909   : > { %v14860_v8 = vadd.f32 %v14479_v61, %v8437_v53  ;;  %v8159_v1 = vpack.c.bf16 %v8122_v7, %v8121_v55  ;;  %v7909_v34 = vadd.f32 %v7908_v43, %v7740_v31  ;;  %v7580_v55 = vpop.f32.mrf.mxu0 }
 0x90a   : > { %v7744_v45 = vpop.f32.mrf.mxu1 }
 0x90b   : > { %v9457_v26 = vpack.c.bf16 %v14860_v8, %v14857_v27  ;;  %8367 = vmatmul.bf16.gmra.mxu3 %v8159_v1  ;;  %v7991_v11 = vmul.f32 %v14766_v14, %v7909_v34  ;;  %v7745_v53 = vadd.f32 %v7744_v45, %v7576_v2 }
 0x90d   : > { %9545 = vst [vmem:[%s14496_s21 + $0x88] sm:$0xff] %v9457_v26   ;;  %v8059_v23 = vadd.f32 %v14772_v62, %v7991_v11  ;;  %v7409_v26 = vadd.f32 %v16047_v59, %v16046_v15 }
 0x90e   : > { %v8328_v20 = vpop.f32.mrf.mxu3 }
 0x90f   : > { %v8438_v3 = vmul.f32 %v14470_v33, %v8328_v20  ;;  %v8123_v32 = vmax.f32 %v8059_v23, 0.0  ;;  %v14882_v33 = vld [vmem:[%s15997_s3] ss:$0 sm:$0xff]  ;;  %v7578_v39 = vadd.f32 %v7577_v63, %v7409_v26 }
 0x910   : > { %v7910_v28 = vpop.f32.mrf.mxu2  ;;  %v16049_v26 = vld [vmem:[#allocation115_spill] sm:$0xff] }
 0x911   : > { %v7911_v61 = vadd.f32 %v7910_v28, %v7742_v37  ;;  %v14885_v35 = vadd.f32 %v14882_v33, %v8438_v3  ;;  %v7582_v23 = vpop.f32.mrf.mxu0 }
 0x912   : > { %v7746_v36 = vpop.f32.mrf.mxu1 }
 0x913   : > { %v7992_v60 = vmul.f32 %v14766_v14, %v7911_v61  ;;  %v7747_v37 = vadd.f32 %v7746_v36, %v7578_v39 }
 0x915   : > { %v8060_v24 = vadd.f32 %v14772_v62, %v7992_v60 }
 0x916   : > { %v8330_v25 = vpop.f32.mrf.mxu3 }
 0x917   : > { %v8124_v12 = vmax.f32 %v8060_v24, 0.0  ;;  %v8439_v4 = vmul.f32 %v14876_v54, %v8330_v25 }
 0x918   : > { %v7913_v7 = vpop.f32.mrf.mxu2 }
 0x919   : > { %v14888_v43 = vadd.f32 %v14882_v33, %v8439_v4  ;;  %v8160_v31 = vpack.c.bf16 %v8124_v12, %v8123_v32  ;;  %v7914_v45 = vadd.f32 %v7913_v7, %v7745_v53  ;;  %v16048_v32 = vld [vmem:[#allocation122_spill] sm:$0xff] }
 0x91a   : > { %v7749_v1 = vpop.f32.mrf.mxu1  ;;  %v7581_v63 = vadd.f32 %v7580_v55, %v16048_v32 }
 0x91b   : > { %v9462_v34 = vpack.c.bf16 %v14888_v43, %v14885_v35  ;;  %8372 = vmatmul.bf16.gmra.mxu3 %v8160_v31  ;;  %v7993_v11 = vmul.f32 %v14766_v14, %v7914_v45 }
 0x91c   : > { %v7750_v53 = vadd.f32 %v7749_v1, %v7581_v63 }
 0x91d   : > { %9546 = vst [vmem:[%s14496_s21 + $0x90] sm:$0xff] %v9462_v34   ;;  %v8061_v60 = vadd.f32 %v14772_v62, %v7993_v11  ;;  %v16050_v34 = vld [vmem:[#allocation45_spill] sm:$0xff] }
 0x91e   : > { %v8333_v20 = vpop.f32.mrf.mxu3  ;;  %v7414_v45 = vadd.f32 %v16050_v34, %v16049_v26 }
 0x91f   : > { %v8440_v25 = vmul.f32 %v14876_v54, %v8333_v20  ;;  %v8125_v12 = vmax.f32 %v8061_v60, 0.0  ;;  %v7585_v20 = vpop.f32.mrf.mxu0 }
 0x920   : > { %v7915_v28 = vpop.f32.mrf.mxu2 }
 0x921   : > { %v7916_v61 = vadd.f32 %v7915_v28, %v7747_v37  ;;  %v14903_v31 = vadd.f32 %v14882_v33, %v8440_v25  ;;  %v7583_v37 = vadd.f32 %v7582_v23, %v7414_v45 }
 0x922   : > { %v7751_v24 = vpop.f32.mrf.mxu1 }
 0x923   : > { %v7994_v3 = vmul.f32 %v14766_v14, %v7916_v61  ;;  %v7752_v28 = vadd.f32 %v7751_v24, %v7583_v37  ;;  %v16053_v37 = vld [vmem:[#allocation55_spill] sm:$0xff] }
 0x925   : > { %v8062_v44 = vadd.f32 %v14772_v62, %v7994_v3 }
 0x926   : > { %v8335_v2 = vpop.f32.mrf.mxu3 }
 0x927   : > { %v8126_v36 = vmax.f32 %v8062_v44, 0.0  ;;  %v8441_v4 = vmul.f32 %v14876_v54, %v8335_v2  ;;  %v7587_v63 = vpop.f32.mrf.mxu0 }
 0x928   : > { %v7918_v7 = vpop.f32.mrf.mxu2 }
 0x929   : > { %v14906_v15 = vadd.f32 %v14882_v33, %v8441_v4  ;;  %v8161_v59 = vpack.c.bf16 %v8126_v36, %v8125_v12  ;;  %v7919_v55 = vadd.f32 %v7918_v7, %v7750_v53  ;;  %v16051_v36 = vld [vmem:[#allocation41_spill] sm:$0xff] }
 0x92a   : > { %v7754_v11 = vpop.f32.mrf.mxu1  ;;  %v7586_v23 = vadd.f32 %v7585_v20, %v16051_v36 }
 0x92b   : > { %v9467_v39 = vpack.c.bf16 %v14906_v15, %v14903_v31  ;;  %8377 = vmatmul.bf16.gmra.mxu3 %v8161_v59  ;;  %v7995_v61 = vmul.f32 %v14766_v14, %v7919_v55  ;;  %v16052_v55 = vld [vmem:[#allocation119_spill] sm:$0xff] }
 0x92c   : > { %v7755_v26 = vadd.f32 %v7754_v11, %v7586_v23 }
 0x92d   : > { %9547 = vst [vmem:[%s14496_s21 + $0x98] sm:$0xff] %v9467_v39   ;;  %v8063_v25 = vadd.f32 %v14772_v62, %v7995_v61 }
 0x92e   : > { %v8338_v1 = vpop.f32.mrf.mxu3 }
 0x92f   : > { %v8442_v2 = vmul.f32 %v14876_v54, %v8338_v1  ;;  %v8127_v4 = vmax.f32 %v8063_v25, 0.0  ;;  %v7419_v1 = vadd.f32 %v16053_v37, %v16052_v55  ;;  %v7590_v25 = vpop.f32.mrf.mxu0 }
 0x930   : > { %v7920_v60 = vpop.f32.mrf.mxu2 }
 0x931   : > { %v7921_v3 = vadd.f32 %v7920_v60, %v7752_v28  ;;  %v14921_v34 = vadd.f32 %v14882_v33, %v8442_v2  ;;  %v7588_v61 = vadd.f32 %v7587_v63, %v7419_v1 }
 0x932   : > { %v7756_v53 = vpop.f32.mrf.mxu1 }
 0x933   : > { %v7996_v44 = vmul.f32 %v14766_v14, %v7921_v3  ;;  %v7757_v3 = vadd.f32 %v7756_v53, %v7588_v61  ;;  %v16055_v61 = vld [vmem:[#allocation35_spill] sm:$0xff] }
 0x935   : > { %v8064_v32 = vadd.f32 %v14772_v62, %v7996_v44 }
 0x936   : > { %v8340_v12 = vpop.f32.mrf.mxu3 }
 0x937   : > { %v8128_v7 = vmax.f32 %v8064_v32, 0.0  ;;  %v8443_v24 = vmul.f32 %v14876_v54, %v8340_v12 }
 0x938   : > { %v7923_v59 = vpop.f32.mrf.mxu2 }
 0x939   : > { %v14924_v45 = vadd.f32 %v14882_v33, %v8443_v24  ;;  %v8162_v39 = vpack.c.bf16 %v8128_v7, %v8127_v4  ;;  %v7924_v28 = vadd.f32 %v7923_v59, %v7755_v26  ;;  %v16054_v24 = vld [vmem:[#allocation44_spill] sm:$0xff] }
 0x93a   : > { %v7759_v32 = vpop.f32.mrf.mxu1  ;;  %v7591_v63 = vadd.f32 %v7590_v25, %v16054_v24 }
 0x93b   : > { %v9472_v20 = vpack.c.bf16 %v14924_v45, %v14921_v34  ;;  %8382 = vmatmul.bf16.gmra.mxu3 %v8162_v39  ;;  %v7997_v11 = vmul.f32 %v14766_v14, %v7924_v28  ;;  %v7592_v28 = vpop.f32.mrf.mxu0 }
 0x93c   : > { %v7760_v55 = vadd.f32 %v7759_v32, %v7591_v63 }
 0x93d   : > { %9548 = vst [vmem:[%s14496_s21 + $0xa0] sm:$0xff] %v9472_v20   ;;  %v8065_v12 = vadd.f32 %v14772_v62, %v7997_v11 }
 0x93e   : > { %v8343_v60 = vpop.f32.mrf.mxu3 }
 0x93f   : > { %v8444_v23 = vmul.f32 %v14876_v54, %v8343_v60  ;;  %v8129_v59 = vmax.f32 %v8065_v12, 0.0  ;;  %v7424_v60 = vadd.f32 %v14461_v21, %v16055_v61 }
 0x940   : > { %v7925_v44 = vpop.f32.mrf.mxu2 }
 0x941   : > { %v7926_v2 = vadd.f32 %v7925_v44, %v7757_v3  ;;  %v14939_v37 = vadd.f32 %v14882_v33, %v8444_v23  ;;  %v7593_v44 = vadd.f32 %v7592_v28, %v7424_v60 }
 0x942   : > { %v7761_v25 = vpop.f32.mrf.mxu1 }
 0x943   : > { %v7998_v36 = vmul.f32 %v14766_v14, %v7926_v2  ;;  %v7762_v32 = vadd.f32 %v7761_v25, %v7593_v44 }
 0x945   : > { %v8066_v4 = vadd.f32 %v14772_v62, %v7998_v36 }
 0x946   : > { %v8345_v7 = vpop.f32.mrf.mxu3 }
 0x947   : > { %v8130_v53 = vmax.f32 %v8066_v4, 0.0  ;;  %v8445_v26 = vmul.f32 %v14876_v54, %v8345_v7 }
 0x948   : > { %v7928_v39 = vpop.f32.mrf.mxu2 }
 0x949   : > { %v14942_v1 = vadd.f32 %v14882_v33, %v8445_v26  ;;  %v8163_v20 = vpack.c.bf16 %v8130_v53, %v8129_v59  ;;  %v7929_v11 = vadd.f32 %v7928_v39, %v7760_v55 }
 0x94b   : > { %v9477_v3 = vpack.c.bf16 %v14942_v1, %v14939_v37  ;;  %8387 = vmatmul.bf16.gmra.mxu3 %v8163_v20  ;;  %v7999_v12 = vmul.f32 %v14766_v14, %v7929_v11 }
 0x94d   : > { %9549 = vst [vmem:[%s14496_s21 + $0xa8] sm:$0xff] %v9477_v3   ;;  %v8067_v4 = vadd.f32 %v14772_v62, %v7999_v12 }
 0x94e   : > { %v8348_v2 = vpop.f32.mrf.mxu3 }
 0x94f   : > { %v8446_v21 = vmul.f32 %v14876_v54, %v8348_v2  ;;  %v8131_v59 = vmax.f32 %v8067_v4, 0.0 }
 0x950   : > { %v7930_v36 = vpop.f32.mrf.mxu2 }
 0x951   : > { %v7931_v23 = vadd.f32 %v7930_v36, %v7762_v32  ;;  %v14956_v39 = vadd.f32 %v14882_v33, %v8446_v21 }
 0x953   : > { %v8000_v7 = vmul.f32 %v14766_v14, %v7931_v23 }
 0x955   : > { %v8068_v24 = vadd.f32 %v14772_v62, %v8000_v7 }
 0x956   : > { %v8350_v63 = vpop.f32.mrf.mxu3 }
 0x957   : > { %v8132_v53 = vmax.f32 %v8068_v24, 0.0  ;;  %v8447_v26 = vmul.f32 %v14876_v54, %v8350_v63 }
 0x959   : > { %v14959_v55 = vadd.f32 %v14882_v33, %v8447_v26  ;;  %v8164_v20 = vpack.c.bf16 %v8132_v53, %v8131_v59 }
 0x95b   : > { %v9482_v14 = vpack.c.bf16 %v14959_v55, %v14956_v39  ;;  %8392 = vmatmul.bf16.gmra.mxu3 %v8164_v20 }
 0x95d   : > { %9550 = vst [vmem:[%s14496_s21 + $0xb0] sm:$0xff] %v9482_v14  }
 0x95e   : > { %v8353_v62 = vpop.f32.mrf.mxu3 }
 0x95f   : > { %v8448_v28 = vmul.f32 %v14876_v54, %v8353_v62 }
 0x961   : > { %v14967_v3 = vadd.f32 %v14882_v33, %v8448_v28 }
 0x966   : > { %v8355_v61 = vpop.f32.mrf.mxu3 }
 0x967   : > { %v8449_v60 = vmul.f32 %v14876_v54, %v8355_v61 }
 0x969   : > { %v14970_v11 = vadd.f32 %v14882_v33, %v8449_v60 }
 0x96b   : > { %v9487_v25 = vpack.c.bf16 %v14970_v11, %v14967_v3 }
 0x96d   : > { %9551 = vst [vmem:[%s14496_s21 + $0xb8] sm:$0xff] %v9487_v25  }
 0x96e   : > { %v8358_v44 = vpop.f32.mrf.mxu3 }
 0x96f   : > { %v8450_v2 = vmul.f32 %v14876_v54, %v8358_v44 }
 0x971   : > { %v14978_v36 = vadd.f32 %v14882_v33, %v8450_v2 }
 0x976   : > { %v8360_v32 = vpop.f32.mrf.mxu3 }
 0x977   : > { %v8451_v12 = vmul.f32 %v14876_v54, %v8360_v32 }
 0x979   : > { %v14981_v23 = vadd.f32 %v14882_v33, %v8451_v12 }
 0x97b   : > { %v9492_v4 = vpack.c.bf16 %v14981_v23, %v14978_v36 }
 0x97d   : > { %9552 = vst [vmem:[%s14496_s21 + $0xc0] sm:$0xff] %v9492_v4  }
 0x97e   : > { %v8363_v7 = vpop.f32.mrf.mxu3 }
 0x97f   : > { %v8452_v21 = vmul.f32 %v14876_v54, %v8363_v7 }
 0x981   : > { %v14989_v59 = vadd.f32 %v14882_v33, %v8452_v21 }
 0x986   : > { %v8365_v24 = vpop.f32.mrf.mxu3 }
 0x987   : > { %v8453_v63 = vmul.f32 %v14876_v54, %v8365_v24 }
 0x989   : > { %v14992_v53 = vadd.f32 %v14882_v33, %v8453_v63 }
 0x98b   : > { %v9497_v26 = vpack.c.bf16 %v14992_v53, %v14989_v59 }
 0x98d   : > { %9553 = vst [vmem:[%s14496_s21 + $0xc8] sm:$0xff] %v9497_v26  }
 0x98e   : > { %v8368_v20 = vpop.f32.mrf.mxu3 }
 0x98f   : > { %v8454_v14 = vmul.f32 %v14876_v54, %v8368_v20 }
 0x991   : > { %v15000_v61 = vadd.f32 %v14882_v33, %v8454_v14 }
 0x996   : > { %v8370_v62 = vpop.f32.mrf.mxu3 }
 0x997   : > { %v8455_v28 = vmul.f32 %v14876_v54, %v8370_v62 }
 0x999   : > { %v15003_v60 = vadd.f32 %v14882_v33, %v8455_v28 }
 0x99b   : > { %v9502_v25 = vpack.c.bf16 %v15003_v60, %v15000_v61 }
 0x99d   : > { %9554 = vst [vmem:[%s14496_s21 + $0xd0] sm:$0xff] %v9502_v25  }
 0x99e   : > { %v8373_v44 = vpop.f32.mrf.mxu3 }
 0x99f   : > { %v8456_v2 = vmul.f32 %v14876_v54, %v8373_v44 }
 0x9a1   : > { %v15011_v4 = vadd.f32 %v14882_v33, %v8456_v2 }
 0x9a6   : > { %v8375_v32 = vpop.f32.mrf.mxu3 }
 0x9a7   : > { %v8457_v12 = vmul.f32 %v14876_v54, %v8375_v32 }
 0x9a9   : > { %v15014_v7 = vadd.f32 %v14882_v33, %v8457_v12 }
 0x9ab   : > { %v9507_v21 = vpack.c.bf16 %v15014_v7, %v15011_v4 }
 0x9ad   : > { %9555 = vst [vmem:[%s14496_s21 + $0xd8] sm:$0xff] %v9507_v21  }
 0x9ae   : > { %v8378_v24 = vpop.f32.mrf.mxu3 }
 0x9af   : > { %v8458_v63 = vmul.f32 %v14876_v54, %v8378_v24 }
 0x9b1   : > { %v15022_v14 = vadd.f32 %v14882_v33, %v8458_v63 }
 0x9b6   : > { %v8380_v26 = vpop.f32.mrf.mxu3 }
 0x9b7   : > { %v8459_v20 = vmul.f32 %v14876_v54, %v8380_v26 }
 0x9b9   : > { %v15025_v62 = vadd.f32 %v14882_v33, %v8459_v20 }
 0x9bb   : > { %v9512_v28 = vpack.c.bf16 %v15025_v62, %v15022_v14 }
 0x9bd   : > { %9556 = vst [vmem:[%s14496_s21 + $0xe0] sm:$0xff] %v9512_v28  }
 0x9be   : > { %v8383_v25 = vpop.f32.mrf.mxu3 }
 0x9bf   : > { %v8460_v44 = vmul.f32 %v14876_v54, %v8383_v25 }
 0x9c1   : > { %v15033_v12 = vadd.f32 %v14882_v33, %v8460_v44 }
 0x9c3   : > { %16056 = vst [vmem:[#allocation50_spill] sm:$0xff] %v15033_v12 }
 0x9c6   : > { %v8385_v2 = vpop.f32.mrf.mxu3 }
 0x9c7   : > { %v8461_v32 = vmul.f32 %v14876_v54, %v8385_v2 }
 0x9c9   : > { %v15036_v21 = vadd.f32 %v14882_v33, %v8461_v32 }
 0x9cb   : > { %16057 = vst [vmem:[#allocation48_spill] sm:$0xff] %v15036_v21  ;;  %v9517_v24 = vpack.c.bf16 %v15036_v21, %v15033_v12 }
 0x9cd   : > { %9557 = vst [vmem:[%s14496_s21 + $0xe8] sm:$0xff] %v9517_v24  }
 0x9ce   : > { %v8388_v63 = vpop.f32.mrf.mxu3 }
 0x9cf   : > { %v8462_v26 = vmul.f32 %v14876_v54, %v8388_v63 }
 0x9d1   : > { %v15044_v25 = vadd.f32 %v14882_v33, %v8462_v26 }
 0x9d6   : > { %v8390_v20 = vpop.f32.mrf.mxu3 }
 0x9d7   : > { %v8463_v28 = vmul.f32 %v14876_v54, %v8390_v20 }
 0x9d9   : > { %v15047_v44 = vadd.f32 %v14882_v33, %v8463_v28 }
 0x9db   : > { %v9522_v2 = vpack.c.bf16 %v15047_v44, %v15044_v25 }
 0x9dd   : > { %9558 = vst [vmem:[%s14496_s21 + $0xf0] sm:$0xff] %v9522_v2  }
 0x9de   : > { %v8393_v32 = vpop.f32.mrf.mxu3 }
 0x9df   : > { %v8464_v24 = vmul.f32 %v14876_v54, %v8393_v32 }
 0x9e1   : > { %v15055_v63 = vadd.f32 %v14882_v33, %v8464_v24 }
 0x9e3   : > { %16058 = vst [vmem:[#allocation61_spill] sm:$0xff] %v15055_v63 }
 0x9e6   : > { %v8395_v21 = vpop.f32.mrf.mxu3 }
 0x9e7   : > { %v8465_v12 = vmul.f32 %v14876_v54, %v8395_v21 }
 0x9e9   : > { %v15058_v20 = vadd.f32 %v14882_v33, %v8465_v12  ;;  %8665 = sbr.rel (%p9271_p5) target bundleno = 2544 (0x9f0), region = 64 }
 0x9eb   : > { %16059 = vst [vmem:[#allocation49_spill] sm:$0xff] %v15058_v20  ;;  %v9527_v26 = vpack.c.bf16 %v15058_v20, %v15055_v63 }
 0x9ed   : > { %9559 = vst [vmem:[%s14496_s21 + $0xf8] sm:$0xff] %v9527_v26  }
 0x9ee   : > { %v9900_v28 = vmov 0.0  }
 0x9ef   : > { %8666 = vst [vmem:[%s15065_s30] sm:$0x1] %v9900_v28 }
 0x9f0 PF: > { %v16061_v54 = vld [vmem:[#allocation123_spill] sm:$0xff]  ;;  %s16063_s6 = sld [smem:[#allocation9_spill]]  ;;  %v16064_v32 = vld [vmem:[#allocation128_spill] sm:$0xff]  ;;  %s9274_s13 = sshll.u32 %s10110_s26, 6 }
 0x9f1   : > { %v8668_v33 = vadd.f32 %v16061_v54, %v14488_v16  ;;  %v16062_v21 = vld [vmem:[#allocation127_spill] sm:$0xff]  ;;  %s9275_s23 = sshll.u32 %s9882_s25, 9  ;;  %v16067_v28 = vld [vmem:[#allocation132_spill] sm:$0xff]  ;;  %s16068_s2 = sld [smem:[#allocation147_spill]] }
 0x9f2   : > { %v16065_v26 = vld [vmem:[#allocation131_spill] sm:$0xff]  ;;  %s8757_s27 = sadd.s32 %s9275_s23, %s9274_s13  ;;  %s8760_s4 = sshll.u32 %s14496_s21, 4  ;;  %s8761_s4 = int_to_ptr.vmem [resolvable:$true] %s8760_s4 }
 0x9f3   : > { %v8669_v12 = vadd.f32 %v8668_v33, %v14509_v0  ;;  %s9276_s7 = sshll.u32 %s8757_s27, 2  ;;  %v16069_v16 = vld [vmem:[#allocation135_spill] sm:$0xff] }
 0x9f5   : > { %v8670_v2 = vadd.f32 %v8669_v12, %v16062_v21 }
 0x9f6   : > { %s16070_s26 = sand.u32 1, %s16063_s6  }
 0x9f7   : > { %v8671_v24 = vadd.f32 %v8670_v2, %v16064_v32  ;;  %s8759_s3 = scalar_lea.hbm %s16068_s2, %s9276_s7  ;;  %s8740_s8 = scalar_lea.sflag [#allocation3], %s16070_s26 }
 0x9f8   : > { %s8762_s5 = sshll.u32 %s8759_s3, 4  ;;  %s9752_s1 = scalar_lea.hbm %s16068_s2, 4096  ;;  %s8763_s5 = int_to_ptr.hbm [resolvable:$true] %s8762_s5 }
 0x9f9   : > { %v8672_v20 = vadd.f32 %v8671_v24, %v16065_v26  ;;  %s9746_s9 = sshra.s32 %s8763_s5, 4  ;;  %s9747_s9 = int_to_ptr.hbm [resolvable:$true] %s9746_s9 }
 0x9fa   : > { %s9748_s13 = scalar_lea.hbm %s9747_s9, 256  ;;  %p9753_p11 = scmp.lt.s32.totalorder %s9747_s9, %s16068_s2 }
 0x9fb   : > { %v8673_v63 = vadd.f32 %v8672_v20, %v16067_v28  ;;  %p9749_p7 = scmp.ne.s32.totalorder %s9747_s9, %s9748_s13  ;;  %p9754_p13 = scmp.lt.s32.totalorder %s9752_s1, %s9748_s13 }
 0x9fd   : > { %v8674_v0 = vadd.f32 %v8673_v63, %v16069_v16  ;;  %p9750_p9 = pnand %p9749_p7, %p10057_p6  ;;  %p9755_p1 = por %p9754_p13, %p9753_p11 }
 0x9ff   : > { %v8675_v54 = vadd.f32 %v8674_v0, %v14566_v18  ;;  %p9751_p10 = pneg %p9750_p9 }
 0xa01   : > { %p9756_p2 = pnand %p9755_p1, %p9751_p10 }
 0xa03   : > { %9759 = shalt.err (!%p9756_p2)
}
 0xa04   : > { %s9901_s21 = smov 64   ;;  %s9902_s6 = smov 4   ;;  %v16071_v18 = vld [vmem:[#allocation47_spill] sm:$0xff] }
 0xa05   : > { %9585 = dma.vmem_to_hbm [thread:$0]  (%p10057_p6), %s8761_s4, 4096, %s8763_s5, %s8740_s8, %s9901_s21, %s9901_s21, %s9902_s6   ;;  %v8676_v63 = vadd.f32 %v8675_v54, %v16071_v18  ;;  %v16074_v54 = vld [vmem:[#allocation61_spill] sm:$0xff] }
 0xa06   : > { %v16075_v18 = vld [vmem:[#allocation49_spill] sm:$0xff]  ;;  %s9277_s4 = sshll.u32 %s9882_s25, 1  ;;  %s16076_s28 = sld [smem:[#allocation148_spill]] }
 0xa07   : > { %v8677_v20 = vadd.f32 %v8676_v63, %v14585_v56  ;;  %s8775_s5 = sadd.s32 %s9878_s24, %s9277_s4  ;;  %s8778_s26 = sshll.u32 %s15065_s30, 4  ;;  %s8779_s26 = int_to_ptr.vmem [resolvable:$true] %s8778_s26 }
 0xa08   : > { %s16078_s0 = sand.u32 1, %s9854_s18  }
 0xa09   : > { %v8678_v33 = vadd.f32 %v8677_v20, %v14588_v10  ;;  %v8667_v20 = vld [vmem:[%s15065_s30] sm:$0x1]  ;;  %s8745_s25 = scalar_lea.sflag [#allocation5], %s16078_s0 }
 0xa0b   : > { %v8679_v12 = vadd.f32 %v8678_v33, %v14604_v57 }
 0xa0c   : > { %s16077_s13 = smov %s16076_s28  ;;  %s8776_s27 = scalar_lea.hbm %s16076_s28, %s8775_s5 }
 0xa0d   : > { %v8680_v21 = vadd.f32 %v8679_v12, %v14607_v38  ;;  %s8780_s23 = sshll.u32 %s8776_s27, 4  ;;  %s9780_s21 = scalar_lea.hbm %s16077_s13, 4  ;;  %s8781_s23 = int_to_ptr.hbm [resolvable:$true] %s8780_s23 }
 0xa0e   : > { %s9774_s1 = sshra.s32 %s8781_s23, 4  ;;  %s9775_s1 = int_to_ptr.hbm [resolvable:$true] %s9774_s1 }
 0xa0f   : > { %v8681_v2 = vadd.f32 %v8680_v21, %v14625_v58  ;;  %s9776_s24 = scalar_lea.hbm %s9775_s1, 1  ;;  %p9781_p5 = scmp.lt.s32.totalorder %s9775_s1, %s16077_s13 }
 0xa10   : > { %p9777_p6 = scmp.ne.s32.totalorder %s9775_s1, %s9776_s24  ;;  %p9782_p7 = scmp.lt.s32.totalorder %s9780_s21, %s9776_s24 }
 0xa11   : > { %v8682_v32 = vadd.f32 %v8681_v2, %v14628_v40 }
 0xa12   : > { %p9778_p4 = pnand %p9777_p6, %p10079_p12  ;;  %p9783_p9 = por %p9782_p7, %p9781_p5 }
 0xa13   : > { %v8683_v24 = vadd.f32 %v8682_v32, %v14648_v48 }
 0xa14   : > { %p9779_p3 = pneg %p9778_p4 }
 0xa15   : > { %v8684_v26 = vadd.f32 %v8683_v24, %v14651_v49 }
 0xa16   : > { %p9784_p10 = pnand %p9783_p9, %p9779_p3 }
 0xa17   : > { %v8685_v28 = vadd.f32 %v8684_v26, %v14669_v19 }
 0xa19   : > { %v8686_v16 = vadd.f32 %v8685_v28, %v14672_v29 }
 0xa1b   : > { %v8687_v56 = vadd.f32 %v8686_v16, %v14695_v41 }
 0xa1d   : > { %v8688_v10 = vadd.f32 %v8687_v56, %v14698_v30 }
 0xa1f   : > { %v8689_v57 = vadd.f32 %v8688_v10, %v14721_v6 }
 0xa21   : > { %v8690_v38 = vadd.f32 %v8689_v57, %v14724_v51 }
 0xa23   : > { %v8691_v58 = vadd.f32 %v8690_v38, %v14749_v17 }
 0xa25   : > { %v8692_v40 = vadd.f32 %v8691_v58, %v14752_v42 }
 0xa27   : > { %v8693_v48 = vadd.f32 %v8692_v40, %v14783_v9 }
 0xa29   : > { %v8694_v49 = vadd.f32 %v8693_v48, %v14786_v5 }
 0xa2b   : > { %v8695_v19 = vadd.f32 %v8694_v49, %v14803_v22 }
 0xa2d   : > { %v8696_v29 = vadd.f32 %v8695_v19, %v14806_v50 }
 0xa2f   : > { %v8697_v41 = vadd.f32 %v8696_v29, %v14821_v46 }
 0xa31   : > { %v8698_v30 = vadd.f32 %v8697_v41, %v14824_v52 }
 0xa33   : > { %v8699_v6 = vadd.f32 %v8698_v30, %v14839_v47 }
 0xa35   : > { %v8700_v51 = vadd.f32 %v8699_v6, %v14842_v13 }
 0xa37   : > { %v8701_v17 = vadd.f32 %v8700_v51, %v14857_v27 }
 0xa39   : > { %v8702_v42 = vadd.f32 %v8701_v17, %v14860_v8 }
 0xa3b   : > { %v8703_v9 = vadd.f32 %v8702_v42, %v14885_v35 }
 0xa3d   : > { %v8704_v5 = vadd.f32 %v8703_v9, %v14888_v43 }
 0xa3f   : > { %v8705_v22 = vadd.f32 %v8704_v5, %v14903_v31 }
 0xa41   : > { %v8706_v50 = vadd.f32 %v8705_v22, %v14906_v15 }
 0xa43   : > { %v8707_v46 = vadd.f32 %v8706_v50, %v14921_v34 }
 0xa45   : > { %v8708_v52 = vadd.f32 %v8707_v46, %v14924_v45 }
 0xa47   : > { %v8709_v47 = vadd.f32 %v8708_v52, %v14939_v37 }
 0xa49   : > { %v8710_v13 = vadd.f32 %v8709_v47, %v14942_v1 }
 0xa4b   : > { %v8711_v27 = vadd.f32 %v8710_v13, %v14956_v39 }
 0xa4d   : > { %v8712_v8 = vadd.f32 %v8711_v27, %v14959_v55 }
 0xa4f   : > { %v8713_v35 = vadd.f32 %v8712_v8, %v14967_v3 }
 0xa51   : > { %v8714_v43 = vadd.f32 %v8713_v35, %v14970_v11 }
 0xa53   : > { %v8715_v31 = vadd.f32 %v8714_v43, %v14978_v36  ;;  %v16072_v36 = vld [vmem:[#allocation50_spill] sm:$0xff] }
 0xa55   : > { %v8716_v15 = vadd.f32 %v8715_v31, %v14981_v23 }
 0xa57   : > { %v8717_v34 = vadd.f32 %v8716_v15, %v14989_v59  ;;  %v16073_v59 = vld [vmem:[#allocation48_spill] sm:$0xff] }
 0xa59   : > { %v8718_v45 = vadd.f32 %v8717_v34, %v14992_v53 }
 0xa5b   : > { %v8719_v37 = vadd.f32 %v8718_v45, %v15000_v61 }
 0xa5d   : > { %v8720_v1 = vadd.f32 %v8719_v37, %v15003_v60 }
 0xa5f   : > { %v8721_v39 = vadd.f32 %v8720_v1, %v15011_v4 }
 0xa61   : > { %v8722_v55 = vadd.f32 %v8721_v39, %v15014_v7 }
 0xa63   : > { %v8723_v3 = vadd.f32 %v8722_v55, %v15022_v14 }
 0xa65   : > { %v8724_v11 = vadd.f32 %v8723_v3, %v15025_v62 }
 0xa67   : > { %v8725_v23 = vadd.f32 %v8724_v11, %v16072_v36 }
 0xa69   : > { %v8726_v0 = vadd.f32 %v8725_v23, %v16073_v59 }
 0xa6b   : > { %v8727_v53 = vadd.f32 %v8726_v0, %v15044_v25 }
 0xa6d   : > { %v8728_v61 = vadd.f32 %v8727_v53, %v15047_v44 }
 0xa6f   : > { %v8729_v60 = vadd.f32 %v8728_v61, %v16074_v54 }
 0xa71   : > { %v8730_v4 = vadd.f32 %v8729_v60, %v16075_v18 }
 0xa73   : > { %v8731_v7 = vrot.slane %v8730_v4, 4 }
 0xa75   : > { %v8732_v14 = vadd.f32 %v8731_v7, %v8730_v4 }
 0xa77   : > { %v8733_v62 = vrot.slane %v8732_v14, 2 }
 0xa79   : > { %v8734_v63 = vadd.f32 %v8733_v62, %v8732_v14 }
 0xa7b   : > { %v8735_v25 = vrot.slane %v8734_v63, 1 }
 0xa7d   : > { %v8736_v44 = vadd.f32 %v8735_v25, %v8734_v63 }
 0xa7f   : > { %v8737_v33 = vadd.f32 %v8736_v44, %v8667_v20 }
 0xa81   : > { %8738 = vst [vmem:[%s15065_s30] sm:$0x1] %v8737_v33 }
 0xa82   : > { %9787 = shalt.err (!%p9784_p10)
}
 0xa83   : > { %9586 = dma.vmem_to_hbm [thread:$0]  (%p10079_p12), %s8779_s26, 16, %s8781_s23, %s8745_s25  }
 0xa84 PF: > { %s16079_s30 = sld [smem:[#allocation8_spill]]  ;;  %p9596_p11 = scmp.ge.s32.totalorder %s9898_s29, 2 }
 0xa86   : > { %p9590_p13 = pnand %p9596_p11, %p10064_p8 }
 0xa88   : > { %p9591_p1 = pneg %p9590_p13 }
 0xa8a   : > { %s8792_s5 = sand.u32 1, %s16079_s30  }
 0xa8b   : > { %s8793_s8 = scalar_lea.sflag [#allocation3], %s8792_s5 }
 0xa8c   : > { %9841 = dma.done.wait (%p9591_p1), %s8793_s8, 4096  }
 0xa8d   : > { %9843 = vsyncadd (%p9591_p1), %s8793_s8, 4294963200  ;;  %s8802_s9 = sand.u32 1, %s9850_s17   ;;  %p9593_p2 = pnand %p9596_p11, %p10093_p0 }
 0xa8e   : > { %s8803_s10 = scalar_lea.sflag [#allocation5], %s8802_s9 }
 0xa8f   : > { %p9594_p6 = pneg %p9593_p2 }
 0xa91   : > { %9845 = dma.done.wait (%p9594_p6), %s8803_s10, 16  }
 0xa92   : > { %9847 = vsyncadd (%p9594_p6), %s8803_s10, 4294967280  ;;  %s28_s29 = sadd.s32 1, %s9898_s29   ;;  %s16081_s20 = sld [smem:[#allocation9_spill]] }
 0xa93   : > { %p15179_p12 = scmp.ge.s32.totalorder %s28_s29, 18   ;;  %s16082_s23 = sld [smem:[#allocation10_spill]] }
 0xa94   : > { %s16083_s24 = sld [smem:[#allocation11_spill]]  ;;  %s16089_s17 = smov %s9854_s18 }
 0xa95   : > { %s16084_s25 = sld [smem:[#allocation12_spill]]  ;;  %s16090_s18 = smov %s9858_s19 }
 0xa96   : > { %s16085_s26 = sld [smem:[#allocation13_spill]]  ;;  %s16091_s19 = smov %s10089_s12 }
 0xa97   : > { %s16086_s27 = sld [smem:[#allocation14_spill]]  ;;  %s16092_s21 = smov %s9870_s22 }
 0xa98   : > { %s16087_s14 = sld [smem:[#allocation16_spill]]  ;;  %s16093_s22 = smov %s10086_s16 }
 0xa9a   :  { %27 = sbr.rel (!%p15179_p12) target bundleno = 23 (0x17), region = 131 }
 0xa9e   : > { %s16094_s28 = smov %s16087_s14 }
 0xa9f   :  { %8808 = vsyncpa [#allocation3], 1 }
 0xaa0   :  { %8810 = vsyncpa [#allocation3 + $0x1], 1 }
 0xaa1   :  { %8811 = vsyncpa [#allocation5], 1 }
 0xaa2   :  { %8813 = vsyncpa [#allocation5 + $0x1], 1 }

</bundles_post_ra>
